<compile_context>
chip_gen: v6e
topology: v6e:2x2x1
jax: 0.10.0
libtpu: 0.0.40
codegen_flags: <defaults>
</compile_context>

<pallas_src>
import functools

import jax
import jax.numpy as jnp
import numpy as np
from jax.experimental import pallas as pl
from jax.experimental.pallas import tpu as pltpu

# --- module hyper-parameters (small synthetic config) -----------------------
HIDDEN = 32
NUM_HEADS = 4
EXPAND_K = 1.0
EXPAND_V = 2.0
GATE_LOGIT_NORMALIZER = 16
NORM_EPS = 1e-5
CHUNK = 128           # sequence chunk processed per grid step (capped at L)


# ---------------------------------------------------------------------------
# Pallas kernel: one (head-group, chunk) step of chunked simple-GLA, fused
# with the RMSNorm + swish output gate.  h_ref carries the per-head (Dk, Dv)
# recurrent state across the sequential chunk axis.
#
#   q_ref    (HPG, C, Dk)     bf16, RAW
#   k_ref    (HPG, C, Dk)     bf16, RAW
#   v_ref    (HPG, C, Dv)     bf16, RAW
#   b_ref    (HPG, C)         f32  within-chunk inclusive cumsum of gate logs
#   gate_ref (C, HPG*Dv)      bf16 lane-packed swish output-gate input
#   w_ref    (1, HPG*Dv)      f32  RMSNorm weight tiled per head
#   o_ref    (C, HPG*Dv)      bf16 lane-packed output
#   h_ref    (HPG, Dk, Dv)    f32  recurrent state scratch
# ---------------------------------------------------------------------------
def _simple_gla_kernel(q_ref, k_ref, v_ref, b_ref, gate_ref, w_ref,
                       o_ref, h_ref, *, scale, eps):
    c = pl.program_id(1)

    @pl.when(c == 0)
    def _():
        h_ref[...] = jnp.zeros_like(h_ref)

    q = q_ref[...]                                  # (HPG, C, Dk) bf16
    k = k_ref[...]                                  # (HPG, C, Dk) bf16
    v = v_ref[...]                                  # (HPG, C, Dv) bf16
    b = b_ref[...]                                  # (HPG, C) f32, b_t <= 0
    h_state = h_ref[...]                            # (HPG, Dk, Dv) f32

    hpg, C, _ = q.shape
    Dv = v.shape[-1]
    b_last = b[:, C - 1:C]                          # (HPG, 1), per-head scalar

    # ---- inter-chunk contribution: scale * exp(b_t) * q_t @ h_prev ---------
    # (state read path is bf16 for the MXU; the state itself stays f32.
    #  TODO(synk): for very long sequences consider an f32 q@h path.)
    o = jnp.einsum('hck,hkd->hcd', q, h_state.astype(jnp.bfloat16),
                   preferred_element_type=jnp.float32)
    o = o * (scale * jnp.exp(b))[:, :, None]        # exp(b_t) <= 1

    # ---- intra-chunk causal attention with bounded f32 decay matrix --------
    s = jnp.einsum('hck,hsk->hcs', q, k, preferred_element_type=jnp.float32)
    row = jax.lax.broadcasted_iota(jnp.int32, (C, C), 0)
    col = jax.lax.broadcasted_iota(jnp.int32, (C, C), 1)
    causal = row >= col
    dif = b[:, :, None] - b[:, None, :]             # b_t - b_s
    decay = jnp.exp(jnp.where(causal[None], dif, -1e30))   # <=1 causal, 0 off
    attn = s * decay * scale
    o = o + jnp.einsum('hcs,hsd->hcd', attn.astype(jnp.bfloat16), v,
                       preferred_element_type=jnp.float32)

    # ---- state update: h <- exp(b_last)*h + sum_t exp(b_last - b_t) k_t v_t^T
    kdec = (k.astype(jnp.float32)
            * jnp.exp(b_last - b)[:, :, None]).astype(jnp.bfloat16)   # <= 1
    kv = jnp.einsum('hck,hcd->hkd', kdec, v, preferred_element_type=jnp.float32)
    h_ref[...] = jnp.exp(b_last)[:, :, None] * h_state + kv

    # ---- per-head RMSNorm (reduce over Dv) ----------------------------------
    var = jnp.mean(o * o, axis=-1, keepdims=True)
    o = o * jax.lax.rsqrt(var + eps)                # (HPG, C, Dv) f32

    # ---- pack heads onto the lane axis via tiny one-hot placement matmuls ---
    # (MXU is idle here; avoids an XLU lane-shuffle chain before the store.)
    d_idx = jax.lax.broadcasted_iota(jnp.int32, (Dv, hpg * Dv), 0)
    e_idx = jax.lax.broadcasted_iota(jnp.int32, (Dv, hpg * Dv), 1)
    o_pk = None
    for h in range(hpg):
        place = (e_idx == d_idx + h * Dv).astype(jnp.float32)   # (Dv, HPG*Dv)
        term = jnp.dot(o[h], place, preferred_element_type=jnp.float32)
        o_pk = term if o_pk is None else o_pk + term            # (C, HPG*Dv)

    # ---- lane-dense RMSNorm weight + swish output gate, bf16 store ----------
    gate = gate_ref[...].astype(jnp.float32)        # (C, HPG*Dv)
    o_pk = o_pk * w_ref[...] * gate * jax.nn.sigmoid(gate)
    o_ref[...] = o_pk.astype(o_ref.dtype)


def chunk_simple_gla_fused(q, k, v, gk, gate_packed, rms_w, *, scale, eps,
                           chunk=CHUNK):
    """q,k: (BH,L,Dk)  v: (BH,L,Dv)  gk: (BH,L)  gate_packed: (L,BH*Dv)
    rms_w: (Dv,).  Returns the gated/normalized attention output packed as
    (L, BH*Dv) bf16 (lane index = bh*Dv + d, bh = b*H + h)."""
    BH, L, Dk = q.shape
    Dv = v.shape[-1]
    C = min(chunk, L)
    assert L % C == 0
    NC = L // C
    # heads per lane group so the output / gate blocks are >=128 lanes wide
    HPG = min(BH, max(1, 128 // Dv))
    assert BH % HPG == 0
    G = BH // HPG     # "parallel"; feeds v7x's 2nd TC once BH*Dv > 128

    # Only gate math left in the wrapper: per-chunk inclusive cumulative decay.
    b = jnp.cumsum(gk.reshape(BH, NC, C), axis=-1).reshape(BH, L)
    b = b.astype(jnp.float32)

    q_bf = q.astype(jnp.bfloat16)
    k_bf = k.astype(jnp.bfloat16)
    v_bf = v.astype(jnp.bfloat16)
    gate_bf = gate_packed.astype(jnp.bfloat16)                    # (L, BH*Dv)
    w_tiled = jnp.tile(rms_w.reshape(1, Dv).astype(jnp.float32), (1, BH))

    # advisory cost estimate
    flops = (2 * BH * L * (C * (Dk + Dv) + 2 * Dk * Dv)      # scores/attn/state
             + 2 * BH * L * Dv * (HPG * Dv))                 # head packing
    transcendentals = BH * L * (C + Dv + 4)                  # decays + sigmoid
    bytes_accessed = (BH * L * (2 * Dk + 2 * Dv) * 2         # bf16 q,k,v,gate
                      + BH * L * 4 + BH * Dv * 4             # b, rms weight
                      + L * BH * Dv * 2)                     # bf16 output

    kernel = functools.partial(_simple_gla_kernel, scale=scale, eps=eps)
    return pl.pallas_call(
        kernel,
        out_shape=jax.ShapeDtypeStruct((L, BH * Dv), jnp.bfloat16),
        grid_spec=pltpu.PrefetchScalarGridSpec(
            num_scalar_prefetch=0,
            grid=(G, NC),
            in_specs=[
                pl.BlockSpec((HPG, C, Dk), lambda g, c: (g, c, 0)),   # q raw
                pl.BlockSpec((HPG, C, Dk), lambda g, c: (g, c, 0)),   # k raw
                pl.BlockSpec((HPG, C, Dv), lambda g, c: (g, c, 0)),   # v raw
                pl.BlockSpec((HPG, C),     lambda g, c: (g, c)),      # cum gate
                pl.BlockSpec((C, HPG * Dv), lambda g, c: (c, g)),     # gate pk
                pl.BlockSpec((1, HPG * Dv), lambda g, c: (0, g)),     # rms w
            ],
            out_specs=pl.BlockSpec((C, HPG * Dv), lambda g, c: (c, g)),
            scratch_shapes=[pltpu.VMEM((HPG, Dk, Dv), jnp.float32)],
        ),
        compiler_params=pltpu.CompilerParams(
            dimension_semantics=("parallel", "arbitrary")),
        cost_estimate=pl.CostEstimate(flops=flops,
                                      transcendentals=transcendentals,
                                      bytes_accessed=bytes_accessed),
    )(q_bf, k_bf, v_bf, b, gate_bf, w_tiled)


# ---------------------------------------------------------------------------
# JAX glue: parameter init + module forward
# ---------------------------------------------------------------------------
def init_params(key):
    gain = 2.0 ** -2.5
    key_dim = int(HIDDEN * EXPAND_K)
    value_dim = int(HIDDEN * EXPAND_V)

    def xavier(k, fan_in, fan_out):
        bound = gain * (6.0 / (fan_in + fan_out)) ** 0.5
        return jax.random.uniform(k, (fan_in, fan_out), jnp.float32, -bound, bound)

    ks = jax.random.split(key, 6)
    return {
        "wq": xavier(ks[0], HIDDEN, key_dim),
        "wk": xavier(ks[1], HIDDEN, key_dim),
        "wv": xavier(ks[2], HIDDEN, value_dim),
        "wg": xavier(ks[3], HIDDEN, value_dim),
        "wgk": xavier(ks[4], HIDDEN, NUM_HEADS),
        "bgk": jnp.zeros((NUM_HEADS,), jnp.float32),
        "wo": xavier(ks[5], value_dim, HIDDEN),
        "rms_w": jnp.ones((value_dim // NUM_HEADS,), jnp.float32),
    }


def _project(params, x):
    q = x @ params["wq"]
    k = x @ params["wk"]
    v = x @ params["wv"]
    g = x @ params["wg"]
    gk = x @ params["wgk"] + params["bgk"]                       # (B, L, H)
    gk = jax.nn.log_sigmoid(gk) / GATE_LOGIT_NORMALIZER
    return q, k, v, g, gk


def simple_gla_forward(params, x):
    B, L, _ = x.shape
    H = NUM_HEADS
    Dk = params["wq"].shape[1] // H
    Dv = params["wv"].shape[1] // H
    scale = Dk ** -0.5

    q, k, v, g, gk = _project(params, x)

    def to_bh(t, d):
        return t.reshape(B, L, H, d).transpose(0, 2, 1, 3).reshape(B * H, L, d)

    q_bh = to_bh(q, Dk)
    k_bh = to_bh(k, Dk)
    v_bh = to_bh(v, Dv)
    gk_bh = gk.transpose(0, 2, 1).reshape(B * H, L)
    # output gate, already lane-packed to match the kernel's packed output:
    # lane index = b*H*Dv + h*Dv + d
    g_pk = g.transpose(1, 0, 2).reshape(L, B * H * Dv)

    o = chunk_simple_gla_fused(q_bh, k_bh, v_bh, gk_bh, g_pk,
                               params["rms_w"], scale=scale, eps=NORM_EPS)

    # (L, B*H*Dv) bf16, head-major lanes; fold the (L,B) transpose into the
    # output projection (single dot_general, no extra relayout pass).
    o3 = o.reshape(L, B, H * Dv).astype(jnp.float32)
    return jnp.einsum('lbv,vh->blh', o3, params["wo"])


def simple_gla_forward_ref(params, x):
    """Pure-JAX step-by-step recurrence reference (no Pallas)."""
    B, L, _ = x.shape
    H = NUM_HEADS
    Dk = params["wq"].shape[1] // H
    Dv = params["wv"].shape[1] // H
    scale = Dk ** -0.5

    q, k, v, g, gk = _project(params, x)
    q4 = q.reshape(B, L, H, Dk).transpose(0, 2, 1, 3)
    k4 = k.reshape(B, L, H, Dk).transpose(0, 2, 1, 3)
    v4 = v.reshape(B, L, H, Dv).transpose(0, 2, 1, 3)
    gk3 = gk.transpose(0, 2, 1)                                  # (B, H, L)

    def step(h, inp):
        qt, kt, vt, gt = inp
        h = jnp.exp(gt)[..., None, None] * h + kt[..., :, None] * vt[..., None, :]
        ot = jnp.einsum("bhk,bhkv->bhv", qt, h,
                        precision=jax.lax.Precision.HIGHEST) * scale
        return h, ot

    h0 = jnp.zeros((B, H, Dk, Dv), jnp.float32)
    xs = (q4.transpose(2, 0, 1, 3), k4.transpose(2, 0, 1, 3),
          v4.transpose(2, 0, 1, 3), gk3.transpose(2, 0, 1))
    _, o = jax.lax.scan(step, h0, xs)                            # (L, B, H, Dv)
    o = o.transpose(1, 0, 2, 3)                                  # (B, L, H, Dv)

    g4 = g.reshape(B, L, H, Dv)
    var = jnp.mean(o * o, axis=-1, keepdims=True)
    o = o * jax.lax.rsqrt(var + NORM_EPS) * params["rms_w"]
    o = o * g4 * jax.nn.sigmoid(g4)
    o = o.reshape(B, L, H * Dv)
    return o @ params["wo"]


if __name__ == "__main__":
    key = jax.random.PRNGKey(0)
    pkey, xkey = jax.random.split(key)
    params = init_params(pkey)

    fwd = jax.jit(simple_gla_forward)
    ref = jax.jit(simple_gla_forward_ref)

    # Case 1: L = 128 = CHUNK -> a single grid step, no state carry needed.
    B, L = 2, 128
    x1 = jax.random.normal(xkey, (B, L, HIDDEN), jnp.float32)
    out1 = jax.block_until_ready(fwd(params, x1))
    ref1 = jax.block_until_ready(ref(params, x1))
    assert out1.shape == (B, L, HIDDEN)
    np.testing.assert_allclose(np.asarray(out1), np.asarray(ref1),
                               rtol=3e-2, atol=5e-3)

    # Case 2: L = 256, CHUNK = 128 -> two chunk steps, exercises the f32
    # cross-chunk state carry.
    x2 = jax.random.normal(jax.random.PRNGKey(1), (B, 256, HIDDEN), jnp.float32)
    out2 = jax.block_until_ready(fwd(params, x2))
    ref2 = jax.block_until_ready(ref(params, x2))
    assert out2.shape == (B, 256, HIDDEN)
    np.testing.assert_allclose(np.asarray(out2), np.asarray(ref2),
                               rtol=3e-2, atol=5e-3)

    print("KERNEL_OK")
</pallas_src>

<mosaic_0001>
module attributes {stable_mosaic.version = 11 : i64} {
  func.func @_simple_gla_kernel(%arg0: i32, %arg1: i32, %arg2: memref<8x128x8xbf16, #tpu.memory_space<vmem>>, %arg3: memref<8x128x8xbf16, #tpu.memory_space<vmem>>, %arg4: memref<8x128x16xbf16, #tpu.memory_space<vmem>>, %arg5: memref<8x128xf32, #tpu.memory_space<vmem>>, %arg6: memref<128x128xbf16, #tpu.memory_space<vmem>>, %arg7: memref<1x128xf32, #tpu.memory_space<vmem>>, %arg8: memref<128x128xbf16, #tpu.memory_space<vmem>>, %arg9: memref<8x8x16xf32, #tpu.memory_space<vmem>>) attributes {dimension_semantics = [#tpu.dimension_semantics<parallel>, #tpu.dimension_semantics<arbitrary>], iteration_bounds = array<i64: 1, 1>, scalar_prefetch = 0 : i64, scratch_operands = 1 : i64, tpu.core_type = #tpu.core_type<tc>, window_params = [{transform_indices = @transform_0, window_bounds = array<i64: 8, 128, 8>}, {transform_indices = @transform_1, window_bounds = array<i64: 8, 128, 8>}, {transform_indices = @transform_2, window_bounds = array<i64: 8, 128, 16>}, {transform_indices = @transform_3, window_bounds = array<i64: 8, 128>}, {transform_indices = @transform_4, window_bounds = array<i64: 128, 128>}, {transform_indices = @transform_5, window_bounds = array<i64: 1, 128>}, {transform_indices = @transform_6, window_bounds = array<i64: 128, 128>}]} {
    %c0_i32 = arith.constant 0 : i32
    %0 = arith.cmpi eq, %arg1, %c0_i32 : i32
    %1 = arith.extui %0 : i1 to i32
    %c0_i32_0 = arith.constant 0 : i32
    %2 = arith.cmpi ne, %1, %c0_i32_0 : i32
    scf.if %2 {
      %cst_42 = arith.constant 0.000000e+00 : f32
      %150 = vector.broadcast %cst_42 : f32 to vector<8x8x16xf32>
      %c0_43 = arith.constant 0 : index
      %c0_44 = arith.constant 0 : index
      %c0_45 = arith.constant 0 : index
      %151 = vector.load %arg9[%c0_43, %c0_44, %c0_45] : memref<8x8x16xf32, #tpu.memory_space<vmem>>, vector<8x8x16xf32>
      tpu.vector_store %arg9[%c0_43, %c0_44, %c0_45], %150 {strides = array<i32>} : memref<8x8x16xf32, #tpu.memory_space<vmem>>, vector<8x8x16xf32>,
    } else {
    }
    %c0 = arith.constant 0 : index
    %c0_1 = arith.constant 0 : index
    %c0_2 = arith.constant 0 : index
    %3 = vector.load %arg2[%c0, %c0_1, %c0_2] : memref<8x128x8xbf16, #tpu.memory_space<vmem>>, vector<8x128x8xbf16>
    %c0_3 = arith.constant 0 : index
    %c0_4 = arith.constant 0 : index
    %c0_5 = arith.constant 0 : index
    %4 = vector.load %arg3[%c0_3, %c0_4, %c0_5] : memref<8x128x8xbf16, #tpu.memory_space<vmem>>, vector<8x128x8xbf16>
    %c0_6 = arith.constant 0 : index
    %c0_7 = arith.constant 0 : index
    %c0_8 = arith.constant 0 : index
    %5 = vector.load %arg4[%c0_6, %c0_7, %c0_8] : memref<8x128x16xbf16, #tpu.memory_space<vmem>>, vector<8x128x16xbf16>
    %c0_9 = arith.constant 0 : index
    %c0_10 = arith.constant 0 : index
    %6 = vector.load %arg5[%c0_9, %c0_10] : memref<8x128xf32, #tpu.memory_space<vmem>>, vector<8x128xf32>
    %c0_11 = arith.constant 0 : index
    %c0_12 = arith.constant 0 : index
    %c0_13 = arith.constant 0 : index
    %7 = vector.load %arg9[%c0_11, %c0_12, %c0_13] : memref<8x8x16xf32, #tpu.memory_space<vmem>>, vector<8x8x16xf32>
    %8 = vector.extract_strided_slice %6 {offsets = [0, 127], sizes = [8, 1], strides = [1, 1]} : vector<8x128xf32> to vector<8x1xf32>
    %9 = arith.truncf %7 : vector<8x8x16xf32> to vector<8x8x16xbf16>
    "tpu.trace_start"() <{level = 10 : i32, message = "hck,hkd->hcd"}> : () -> ()
    %cst = arith.constant dense<0.000000e+00> : vector<8x128x16xf32>
    %10 = tpu.matmul %3, %9, %cst {dimension_numbers = #tpu.dot_dimension_numbers<[2], [1], [1], [2], [0, 0, 0, 1, 1, 2], [0], [0]>} : vector<8x128x8xbf16>, vector<8x8x16xbf16>, vector<8x128x16xf32> -> vector<8x128x16xf32>
    "tpu.trace_stop"() : () -> ()
    %11 = math.exp %6 : vector<8x128xf32>
    %cst_14 = arith.constant 0.353553385 : f32
    %12 = vector.broadcast %cst_14 : f32 to vector<8x128xf32>
    %13 = arith.mulf %12, %11 : vector<8x128xf32>
    %14 = vector.shape_cast %13 : vector<8x128xf32> to vector<8x128x1xf32>
    %15 = vector.broadcast %14 : vector<8x128x1xf32> to vector<8x128x16xf32>
    %16 = arith.mulf %10, %15 : vector<8x128x16xf32>
    "tpu.trace_start"() <{level = 10 : i32, message = "hck,hsk->hcs"}> : () -> ()
    %cst_15 = arith.constant dense<0.000000e+00> : vector<8x128x128xf32>
    %17 = tpu.matmul %3, %4, %cst_15 {dimension_numbers = #tpu.dot_dimension_numbers<[2], [2], [1], [1], [0, 0, 0, 1, 1, 1], [0], [0]>} : vector<8x128x8xbf16>, vector<8x128x8xbf16>, vector<8x128x128xf32> -> vector<8x128x128xf32>
    "tpu.trace_stop"() : () -> ()
    %18 = tpu.iota {dimensions = array<i32: 0>} : vector<128x128xi32>
    %19 = tpu.iota {dimensions = array<i32: 1>} : vector<128x128xi32>
    %20 = arith.cmpi sge, %18, %19 : vector<128x128xi32>
    %21 = vector.shape_cast %6 : vector<8x128xf32> to vector<8x128x1xf32>
    %22 = vector.shape_cast %6 : vector<8x128xf32> to vector<8x1x128xf32>
    %23 = vector.broadcast %21 : vector<8x128x1xf32> to vector<8x128x128xf32>
    %24 = vector.broadcast %22 : vector<8x1x128xf32> to vector<8x128x128xf32>
    %25 = arith.subf %23, %24 : vector<8x128x128xf32>
    %26 = vector.shape_cast %20 : vector<128x128xi1> to vector<1x128x128xi1>
    %cst_16 = arith.constant -1.000000e+30 : f32
    %27 = vector.shape_cast %26 : vector<1x128x128xi1> to vector<1x128x128xi1>
    %28 = vector.broadcast %27 : vector<1x128x128xi1> to vector<8x128x128xi1>
    %29 = vector.broadcast %cst_16 : f32 to vector<8x128x128xf32>
    %30 = arith.select %28, %25, %29 : vector<8x128x128xi1>, vector<8x128x128xf32>
    %31 = math.exp %30 : vector<8x128x128xf32>
    %32 = arith.mulf %17, %31 : vector<8x128x128xf32>
    %cst_17 = arith.constant 0.353553385 : f32
    %33 = vector.broadcast %cst_17 : f32 to vector<8x128x128xf32>
    %34 = arith.mulf %32, %33 : vector<8x128x128xf32>
    %35 = arith.truncf %34 : vector<8x128x128xf32> to vector<8x128x128xbf16>
    "tpu.trace_start"() <{level = 10 : i32, message = "hcs,hsd->hcd"}> : () -> ()
    %cst_18 = arith.constant dense<0.000000e+00> : vector<8x128x16xf32>
    %36 = tpu.matmul %35, %5, %cst_18 {dimension_numbers = #tpu.dot_dimension_numbers<[2], [1], [1], [2], [0, 0, 0, 1, 1, 2], [0], [0]>} : vector<8x128x128xbf16>, vector<8x128x16xbf16>, vector<8x128x16xf32> -> vector<8x128x16xf32>
    "tpu.trace_stop"() : () -> ()
    %37 = arith.addf %16, %36 : vector<8x128x16xf32>
    %38 = arith.extf %4 : vector<8x128x8xbf16> to vector<8x128x8xf32>
    %39 = vector.broadcast %8 : vector<8x1xf32> to vector<8x128xf32>
    %40 = arith.subf %39, %6 : vector<8x128xf32>
    %41 = math.exp %40 : vector<8x128xf32>
    %42 = vector.shape_cast %41 : vector<8x128xf32> to vector<8x128x1xf32>
    %43 = vector.broadcast %42 : vector<8x128x1xf32> to vector<8x128x8xf32>
    %44 = arith.mulf %38, %43 : vector<8x128x8xf32>
    %45 = arith.truncf %44 : vector<8x128x8xf32> to vector<8x128x8xbf16>
    "tpu.trace_start"() <{level = 10 : i32, message = "hck,hcd->hkd"}> : () -> ()
    %cst_19 = arith.constant dense<0.000000e+00> : vector<8x8x16xf32>
    %46 = tpu.matmul %45, %5, %cst_19 {dimension_numbers = #tpu.dot_dimension_numbers<[1], [1], [2], [2], [0, 0, 0, 2, 1, 2], [0], [0]>} : vector<8x128x8xbf16>, vector<8x128x16xbf16>, vector<8x8x16xf32> -> vector<8x8x16xf32>
    "tpu.trace_stop"() : () -> ()
    %47 = math.exp %8 : vector<8x1xf32>
    %48 = vector.shape_cast %47 : vector<8x1xf32> to vector<8x1x1xf32>
    %49 = vector.broadcast %48 : vector<8x1x1xf32> to vector<8x8x16xf32>
    %50 = arith.mulf %49, %7 : vector<8x8x16xf32>
    %51 = arith.addf %50, %46 : vector<8x8x16xf32>
    %c0_20 = arith.constant 0 : index
    %c0_21 = arith.constant 0 : index
    %c0_22 = arith.constant 0 : index
    %52 = vector.load %arg9[%c0_20, %c0_21, %c0_22] : memref<8x8x16xf32, #tpu.memory_space<vmem>>, vector<8x8x16xf32>
    tpu.vector_store %arg9[%c0_20, %c0_21, %c0_22], %51 {strides = array<i32>} : memref<8x8x16xf32, #tpu.memory_space<vmem>>, vector<8x8x16xf32>,
    %53 = arith.mulf %37, %37 : vector<8x128x16xf32>
    %cst_23 = arith.constant dense<0.000000e+00> : vector<8x128xf32>
    %54 = vector.multi_reduction <add>, %53, %cst_23 [2] : vector<8x128x16xf32> to vector<8x128xf32>
    %55 = vector.shape_cast %54 : vector<8x128xf32> to vector<8x128x1xf32>
    %cst_24 = arith.constant 1.600000e+01 : f32
    %56 = vector.broadcast %cst_24 : f32 to vector<8x128x1xf32>
    %57 = arith.divf %55, %56 : vector<8x128x1xf32>
    %cst_25 = arith.constant 9.99999974E-6 : f32
    %58 = vector.broadcast %cst_25 : f32 to vector<8x128x1xf32>
    %59 = arith.addf %57, %58 : vector<8x128x1xf32>
    %60 = math.rsqrt %59 : vector<8x128x1xf32>
    %61 = vector.broadcast %60 : vector<8x128x1xf32> to vector<8x128x16xf32>
    %62 = arith.mulf %37, %61 : vector<8x128x16xf32>
    %63 = tpu.iota {dimensions = array<i32: 0>} : vector<16x128xi32>
    %64 = tpu.iota {dimensions = array<i32: 1>} : vector<16x128xi32>
    %c0_i32_26 = arith.constant 0 : i32
    %65 = vector.broadcast %c0_i32_26 : i32 to vector<16x128xi32>
    %66 = arith.addi %63, %65 : vector<16x128xi32>
    %67 = arith.cmpi eq, %64, %66 : vector<16x128xi32>
    %68 = arith.extui %67 : vector<16x128xi1> to vector<16x128xi32>
    %69 = arith.sitofp %68 : vector<16x128xi32> to vector<16x128xf32>
    %70 = vector.extract_strided_slice %62 {offsets = [0, 0, 0], sizes = [1, 128, 16], strides = [1, 1, 1]} : vector<8x128x16xf32> to vector<1x128x16xf32>
    %71 = vector.shape_cast %70 : vector<1x128x16xf32> to vector<128x16xf32>
    %cst_27 = arith.constant dense<0.000000e+00> : vector<128x128xf32>
    %72 = tpu.matmul %71, %69, %cst_27 {dimension_numbers = #tpu.dot_dimension_numbers<[1], [0], [0], [1], [0, 0, 1, 1], [], []>} : vector<128x16xf32>, vector<16x128xf32>, vector<128x128xf32> -> vector<128x128xf32>
    %c16_i32 = arith.constant 16 : i32
    %73 = vector.broadcast %c16_i32 : i32 to vector<16x128xi32>
    %74 = arith.addi %63, %73 : vector<16x128xi32>
    %75 = arith.cmpi eq, %64, %74 : vector<16x128xi32>
    %76 = arith.extui %75 : vector<16x128xi1> to vector<16x128xi32>
    %77 = arith.sitofp %76 : vector<16x128xi32> to vector<16x128xf32>
    %78 = vector.extract_strided_slice %62 {offsets = [1, 0, 0], sizes = [1, 128, 16], strides = [1, 1, 1]} : vector<8x128x16xf32> to vector<1x128x16xf32>
    %79 = vector.shape_cast %78 : vector<1x128x16xf32> to vector<128x16xf32>
    %cst_28 = arith.constant dense<0.000000e+00> : vector<128x128xf32>
    %80 = tpu.matmul %79, %77, %cst_28 {dimension_numbers = #tpu.dot_dimension_numbers<[1], [0], [0], [1], [0, 0, 1, 1], [], []>} : vector<128x16xf32>, vector<16x128xf32>, vector<128x128xf32> -> vector<128x128xf32>
    %81 = arith.addf %72, %80 : vector<128x128xf32>
    %c32_i32 = arith.constant 32 : i32
    %82 = vector.broadcast %c32_i32 : i32 to vector<16x128xi32>
    %83 = arith.addi %63, %82 : vector<16x128xi32>
    %84 = arith.cmpi eq, %64, %83 : vector<16x128xi32>
    %85 = arith.extui %84 : vector<16x128xi1> to vector<16x128xi32>
    %86 = arith.sitofp %85 : vector<16x128xi32> to vector<16x128xf32>
    %87 = vector.extract_strided_slice %62 {offsets = [2, 0, 0], sizes = [1, 128, 16], strides = [1, 1, 1]} : vector<8x128x16xf32> to vector<1x128x16xf32>
    %88 = vector.shape_cast %87 : vector<1x128x16xf32> to vector<128x16xf32>
    %cst_29 = arith.constant dense<0.000000e+00> : vector<128x128xf32>
    %89 = tpu.matmul %88, %86, %cst_29 {dimension_numbers = #tpu.dot_dimension_numbers<[1], [0], [0], [1], [0, 0, 1, 1], [], []>} : vector<128x16xf32>, vector<16x128xf32>, vector<128x128xf32> -> vector<128x128xf32>
    %90 = arith.addf %81, %89 : vector<128x128xf32>
    %c48_i32 = arith.constant 48 : i32
    %91 = vector.broadcast %c48_i32 : i32 to vector<16x128xi32>
    %92 = arith.addi %63, %91 : vector<16x128xi32>
    %93 = arith.cmpi eq, %64, %92 : vector<16x128xi32>
    %94 = arith.extui %93 : vector<16x128xi1> to vector<16x128xi32>
    %95 = arith.sitofp %94 : vector<16x128xi32> to vector<16x128xf32>
    %96 = vector.extract_strided_slice %62 {offsets = [3, 0, 0], sizes = [1, 128, 16], strides = [1, 1, 1]} : vector<8x128x16xf32> to vector<1x128x16xf32>
    %97 = vector.shape_cast %96 : vector<1x128x16xf32> to vector<128x16xf32>
    %cst_30 = arith.constant dense<0.000000e+00> : vector<128x128xf32>
    %98 = tpu.matmul %97, %95, %cst_30 {dimension_numbers = #tpu.dot_dimension_numbers<[1], [0], [0], [1], [0, 0, 1, 1], [], []>} : vector<128x16xf32>, vector<16x128xf32>, vector<128x128xf32> -> vector<128x128xf32>
    %99 = arith.addf %90, %98 : vector<128x128xf32>
    %c64_i32 = arith.constant 64 : i32
    %100 = vector.broadcast %c64_i32 : i32 to vector<16x128xi32>
    %101 = arith.addi %63, %100 : vector<16x128xi32>
    %102 = arith.cmpi eq, %64, %101 : vector<16x128xi32>
    %103 = arith.extui %102 : vector<16x128xi1> to vector<16x128xi32>
    %104 = arith.sitofp %103 : vector<16x128xi32> to vector<16x128xf32>
    %105 = vector.extract_strided_slice %62 {offsets = [4, 0, 0], sizes = [1, 128, 16], strides = [1, 1, 1]} : vector<8x128x16xf32> to vector<1x128x16xf32>
    %106 = vector.shape_cast %105 : vector<1x128x16xf32> to vector<128x16xf32>
    %cst_31 = arith.constant dense<0.000000e+00> : vector<128x128xf32>
    %107 = tpu.matmul %106, %104, %cst_31 {dimension_numbers = #tpu.dot_dimension_numbers<[1], [0], [0], [1], [0, 0, 1, 1], [], []>} : vector<128x16xf32>, vector<16x128xf32>, vector<128x128xf32> -> vector<128x128xf32>
    %108 = arith.addf %99, %107 : vector<128x128xf32>
    %c80_i32 = arith.constant 80 : i32
    %109 = vector.broadcast %c80_i32 : i32 to vector<16x128xi32>
    %110 = arith.addi %63, %109 : vector<16x128xi32>
    %111 = arith.cmpi eq, %64, %110 : vector<16x128xi32>
    %112 = arith.extui %111 : vector<16x128xi1> to vector<16x128xi32>
    %113 = arith.sitofp %112 : vector<16x128xi32> to vector<16x128xf32>
    %114 = vector.extract_strided_slice %62 {offsets = [5, 0, 0], sizes = [1, 128, 16], strides = [1, 1, 1]} : vector<8x128x16xf32> to vector<1x128x16xf32>
    %115 = vector.shape_cast %114 : vector<1x128x16xf32> to vector<128x16xf32>
    %cst_32 = arith.constant dense<0.000000e+00> : vector<128x128xf32>
    %116 = tpu.matmul %115, %113, %cst_32 {dimension_numbers = #tpu.dot_dimension_numbers<[1], [0], [0], [1], [0, 0, 1, 1], [], []>} : vector<128x16xf32>, vector<16x128xf32>, vector<128x128xf32> -> vector<128x128xf32>
    %117 = arith.addf %108, %116 : vector<128x128xf32>
    %c96_i32 = arith.constant 96 : i32
    %118 = vector.broadcast %c96_i32 : i32 to vector<16x128xi32>
    %119 = arith.addi %63, %118 : vector<16x128xi32>
    %120 = arith.cmpi eq, %64, %119 : vector<16x128xi32>
    %121 = arith.extui %120 : vector<16x128xi1> to vector<16x128xi32>
    %122 = arith.sitofp %121 : vector<16x128xi32> to vector<16x128xf32>
    %123 = vector.extract_strided_slice %62 {offsets = [6, 0, 0], sizes = [1, 128, 16], strides = [1, 1, 1]} : vector<8x128x16xf32> to vector<1x128x16xf32>
    %124 = vector.shape_cast %123 : vector<1x128x16xf32> to vector<128x16xf32>
    %cst_33 = arith.constant dense<0.000000e+00> : vector<128x128xf32>
    %125 = tpu.matmul %124, %122, %cst_33 {dimension_numbers = #tpu.dot_dimension_numbers<[1], [0], [0], [1], [0, 0, 1, 1], [], []>} : vector<128x16xf32>, vector<16x128xf32>, vector<128x128xf32> -> vector<128x128xf32>
    %126 = arith.addf %117, %125 : vector<128x128xf32>
    %c112_i32 = arith.constant 112 : i32
    %127 = vector.broadcast %c112_i32 : i32 to vector<16x128xi32>
    %128 = arith.addi %63, %127 : vector<16x128xi32>
    %129 = arith.cmpi eq, %64, %128 : vector<16x128xi32>
    %130 = arith.extui %129 : vector<16x128xi1> to vector<16x128xi32>
    %131 = arith.sitofp %130 : vector<16x128xi32> to vector<16x128xf32>
    %132 = vector.extract_strided_slice %62 {offsets = [7, 0, 0], sizes = [1, 128, 16], strides = [1, 1, 1]} : vector<8x128x16xf32> to vector<1x128x16xf32>
    %133 = vector.shape_cast %132 : vector<1x128x16xf32> to vector<128x16xf32>
    %cst_34 = arith.constant dense<0.000000e+00> : vector<128x128xf32>
    %134 = tpu.matmul %133, %131, %cst_34 {dimension_numbers = #tpu.dot_dimension_numbers<[1], [0], [0], [1], [0, 0, 1, 1], [], []>} : vector<128x16xf32>, vector<16x128xf32>, vector<128x128xf32> -> vector<128x128xf32>
    %135 = arith.addf %126, %134 : vector<128x128xf32>
    %c0_35 = arith.constant 0 : index
    %c0_36 = arith.constant 0 : index
    %136 = vector.load %arg6[%c0_35, %c0_36] : memref<128x128xbf16, #tpu.memory_space<vmem>>, vector<128x128xbf16>
    %137 = arith.extf %136 : vector<128x128xbf16> to vector<128x128xf32>
    %c0_37 = arith.constant 0 : index
    %c0_38 = arith.constant 0 : index
    %138 = vector.load %arg7[%c0_37, %c0_38] : memref<1x128xf32, #tpu.memory_space<vmem>>, vector<1x128xf32>
    %139 = vector.broadcast %138 : vector<1x128xf32> to vector<128x128xf32>
    %140 = arith.mulf %135, %139 : vector<128x128xf32>
    %141 = arith.mulf %140, %137 : vector<128x128xf32>
    %142 = arith.negf %137 : vector<128x128xf32>
    %143 = math.exp %142 : vector<128x128xf32>
    %cst_39 = arith.constant 1.000000e+00 : f32
    %144 = vector.broadcast %cst_39 : f32 to vector<128x128xf32>
    %145 = arith.addf %144, %143 : vector<128x128xf32>
    %146 = arith.divf %144, %145 : vector<128x128xf32>
    %147 = arith.mulf %141, %146 : vector<128x128xf32>
    %148 = arith.truncf %147 : vector<128x128xf32> to vector<128x128xbf16>
    %c0_40 = arith.constant 0 : index
    %c0_41 = arith.constant 0 : index
    %149 = vector.load %arg8[%c0_40, %c0_41] : memref<128x128xbf16, #tpu.memory_space<vmem>>, vector<128x128xbf16>
    tpu.vector_store %arg8[%c0_40, %c0_41], %148 {strides = array<i32>} : memref<128x128xbf16, #tpu.memory_space<vmem>>, vector<128x128xbf16>,
    return
  }
  func.func @transform_0(%arg0: i32, %arg1: i32) -> (i32, i32, i32) {
    %c0_i32 = arith.constant 0 : i32
    %c0_i32_0 = arith.constant 0 : i32
    return %arg0, %arg1, %c0_i32 : i32, i32, i32
  }
  func.func @transform_1(%arg0: i32, %arg1: i32) -> (i32, i32, i32) {
    %c0_i32 = arith.constant 0 : i32
    %c0_i32_0 = arith.constant 0 : i32
    return %arg0, %arg1, %c0_i32 : i32, i32, i32
  }
  func.func @transform_2(%arg0: i32, %arg1: i32) -> (i32, i32, i32) {
    %c0_i32 = arith.constant 0 : i32
    %c0_i32_0 = arith.constant 0 : i32
    return %arg0, %arg1, %c0_i32 : i32, i32, i32
  }
  func.func @transform_3(%arg0: i32, %arg1: i32) -> (i32, i32) {
    %c0_i32 = arith.constant 0 : i32
    return %arg0, %arg1 : i32, i32
  }
  func.func @transform_4(%arg0: i32, %arg1: i32) -> (i32, i32) {
    %c0_i32 = arith.constant 0 : i32
    return %arg1, %arg0 : i32, i32
  }
  func.func @transform_5(%arg0: i32, %arg1: i32) -> (i32, i32) {
    %c0_i32 = arith.constant 0 : i32
    %c0_i32_0 = arith.constant 0 : i32
    return %c0_i32, %arg0 : i32, i32
  }
  func.func @transform_6(%arg0: i32, %arg1: i32) -> (i32, i32) {
    %c0_i32 = arith.constant 0 : i32
    return %arg1, %arg0 : i32, i32
  }
}

</mosaic_0001>

<bundles_post_ra>
// kernel: simple_gla_forward.1
= control target key start
LH: loop header
LB: loop body
LE: loop exit
PB: predicated region body
PF: predicated region fallthrough
CT: control target
= control target key end

     0   :  { %vm20111_vm0 = vcmask 130048   ;;  %vm478_vm1 = vcmask 64512   ;;  %v20087_v0 = vmov 0.0   ;;  %vm503_vm2 = vcmask 1043456   ;;  %s20080_s0 = inlined_call_operand.vmem [shape: bf16[8,128,8], index: 0, kind: input, shape index: {}]   ;;  %s20081_s3 = inlined_call_operand.vmem [shape: f32[8,128], index: 3, kind: input, shape index: {}]   ;;  %s20082_s1 = inlined_call_operand.vmem [shape: bf16[8,128,8], index: 1, kind: input, shape index: {}]   ;;  %s20083_s2 = inlined_call_operand.vmem [shape: bf16[8,128,16], index: 2, kind: input, shape index: {}]   ;;  %s20084_s4 = inlined_call_operand.vmem [shape: bf16[128,128], index: 4, kind: input, shape index: {}]   ;;  %s20085_s5 = inlined_call_operand.vmem [shape: f32[1,128], index: 5, kind: input, shape index: {}]   ;;  %s20086_s6 = inlined_call_operand.vmem [shape: bf16[128,128], index: 6, kind: output, shape index: {}]  }
   0x1   :  { %29 = vst.msk [vmem:[#allocation2] sm:$0xff] %vm20111_vm0, %v20087_v0  ;;  %30 = vst.msk [vmem:[#allocation2 + $0x8] sm:$0xff] %vm20111_vm0, %v20087_v0  ;;  %v14317_v1 = vld [vmem:[%s20080_s0] sm:$0xff]   ;;  %v14334_v9 = vld [vmem:[%s20080_s0 + $0x8] sm:$0xff]   ;;  %v20089_v14 = vlaneseq }
   0x2   :  { %31 = vst.msk [vmem:[#allocation2 + $0x10] sm:$0xff] %vm20111_vm0, %v20087_v0  ;;  %32 = vst.msk [vmem:[#allocation2 + $0x18] sm:$0xff] %vm20111_vm0, %v20087_v0  ;;  %v14322_v2 = vld [vmem:[%s20080_s0 + $0x40] sm:$0xff]   ;;  %12118 = vmatprep.mubr.msk.bf16.mxu0 %vm478_vm1, %v14317_v1  ;;  %v14339_v10 = vld [vmem:[%s20080_s0 + $0x48] sm:$0xff]  }
   0x3   :  { %33 = vst.msk [vmem:[#allocation2 + $0x20] sm:$0xff] %vm20111_vm0, %v20087_v0  ;;  %34 = vst.msk [vmem:[#allocation2 + $0x28] sm:$0xff] %vm20111_vm0, %v20087_v0  ;;  %12136 = vmatprep.mubr.msk.bf16.mxu1 %vm478_vm1, %v14322_v2  ;;  %v421_v3 = vld [vmem:[%s20081_s3] sm:$0xff]  ;;  %v14344_v11 = vld [vmem:[%s20080_s0 + $0x10] sm:$0xff]   ;;  %v14360_v16 = vshrl.u32 %v20089_v14, 7 }
   0x4   :  { %35 = vst.msk [vmem:[#allocation2 + $0x30] sm:$0xff] %vm20111_vm0, %v20087_v0  ;;  %36 = vst.msk [vmem:[#allocation2 + $0x38] sm:$0xff] %vm20111_vm0, %v20087_v0  ;;  %v1752_v4 = vmul.f32 1.442695, %v421_v3  ;;  %v14353_v15 = vld [vmem:[%s20080_s0 + $0x50] sm:$0xff]   ;;  %v14369_v17 = vld [vmem:[%s20080_s0 + $0x18] sm:$0xff]  }
   0x5   :  { %20251 = vst [vmem:[#allocation3_spill] sm:$0xff] %v14360_v16  ;;  %v14374_v18 = vld [vmem:[%s20080_s0 + $0x58] sm:$0xff]   ;;  %v14379_v21 = vld [vmem:[%s20080_s0 + $0x20] sm:$0xff]   ;;  %v14382_v24 = vsub.s32 0, %v14360_v16  ;;  %v14411_v31 = vld [vmem:[%s20080_s0 + $0x28] sm:$0xff]   ;;  %v14485_v49 = vsub.s32 1, %v14360_v16 }
   0x6   :  { %13492 = vpow2.f32 %v1752_v4  ;;  %v14387_v25 = vld [vmem:[%s20080_s0 + $0x60] sm:$0xff]   ;;  %v14416_v32 = vld [vmem:[%s20080_s0 + $0x68] sm:$0xff]   ;;  %v14421_v33 = vld [vmem:[%s20080_s0 + $0x30] sm:$0xff]  }
   0x7   :  { %20252 = vst [vmem:[#allocation4_spill] sm:$0xff] %v14382_v24  ;;  %v14426_v34 = vld [vmem:[%s20080_s0 + $0x70] sm:$0xff]   ;;  %v14439_v35 = vld [vmem:[%s20080_s0 + $0x38] sm:$0xff]   ;;  %v14449_v37 = vld [vmem:[%s20080_s0 + $0x80] sm:$0xff]  }
   0x8   :  { %v422_v5 = vld [vmem:[#allocation2] sm:$0xff]  ;;  %v423_v6 = vld [vmem:[#allocation2 + $0x8] sm:$0xff]  ;;  %v14444_v36 = vld [vmem:[%s20080_s0 + $0x78] sm:$0xff]   ;;  %20254 = vst [vmem:[#allocation6_spill] sm:$0xff] %v14485_v49 }
   0x9   :  { %v430_v7 = vpack.c.bf16 %v422_v5, %v422_v5  ;;  %v431_v8 = vpack.c.bf16 %v423_v6, %v423_v6  ;;  %v424_v19 = vld [vmem:[#allocation2 + $0x10] sm:$0xff]  ;;  %v425_v20 = vld [vmem:[#allocation2 + $0x18] sm:$0xff]  ;;  %v14454_v39 = vld [vmem:[%s20080_s0 + $0xc0] sm:$0xff]  }
   0xa   :  { %v432_v22 = vpack.c.bf16 %v424_v19, %v424_v19  ;;  %v433_v23 = vpack.c.bf16 %v425_v20, %v425_v20  ;;  %v426_v38 = vld [vmem:[#allocation2 + $0x20] sm:$0xff]  ;;  %v13253_v41 = vld [vmem:[%s20080_s0 + $0x88] sm:$0xff]   ;;  %v13255_v43 = vld [vmem:[%s20080_s0 + $0x90] sm:$0xff]  }
   0xb   :  { %13156 = vmatprep.subr.msk.bf16.mxu0 %vm503_vm2, %v430_v7  ;;  %13157 = vmatprep.subr.msk.bf16.mxu1 %vm503_vm2, %v431_v8  ;;  %v505_v12 = vsel %vm503_vm2, %v430_v7, 0  ;;  %v669_v13 = vsel %vm503_vm2, %v431_v8, 0  ;;  %v434_v40 = vpack.c.bf16 %v426_v38, %v426_v38  ;;  %v13254_v42 = vld [vmem:[%s20080_s0 + $0xc8] sm:$0xff]   ;;  %v13256_v46 = vld [vmem:[%s20080_s0 + $0xd0] sm:$0xff]   ;;  %v13257_v50 = vld [vmem:[%s20080_s0 + $0x98] sm:$0xff]  }
   0xc   :  { %12117 = vmatpush3.bf16.msra.mxu0 %v505_v12  ;;  %12135 = vmatpush3.bf16.msra.mxu1 %v669_v13  ;;  %v833_v27 = vsel %vm503_vm2, %v432_v22, 0  ;;  %v997_v28 = vsel %vm503_vm2, %v433_v23, 0  ;;  %v427_v44 = vld [vmem:[#allocation2 + $0x28] sm:$0xff]  ;;  %v13258_v51 = vld [vmem:[%s20080_s0 + $0xd8] sm:$0xff]   ;;  %v13259_v52 = vld [vmem:[%s20080_s0 + $0xa0] sm:$0xff]  }
   0xd   :  { %13158 = vmatprep.subr.msk.bf16.mxu0 %vm503_vm2, %v432_v22  ;;  %13159 = vmatprep.subr.msk.bf16.mxu1 %vm503_vm2, %v433_v23  ;;  %v435_v45 = vpack.c.bf16 %v427_v44, %v427_v44  ;;  %v1161_v47 = vsel %vm503_vm2, %v434_v40, 0  ;;  %v13260_v53 = vld [vmem:[%s20080_s0 + $0xe0] sm:$0xff]   ;;  %v428_v54 = vld [vmem:[#allocation2 + $0x30] sm:$0xff]  ;;  %v13261_v57 = vld [vmem:[%s20080_s0 + $0xa8] sm:$0xff]   ;;  %v14564_v23 = vsub.s32 2, %v14360_v16 }
   0xe   :  { %v436_v55 = vpack.c.bf16 %v428_v54, %v428_v54  ;;  %v13262_v58 = vld [vmem:[%s20080_s0 + $0xe8] sm:$0xff]   ;;  %v13263_v59 = vld [vmem:[%s20080_s0 + $0xb0] sm:$0xff]   ;;  %v429_v61 = vld [vmem:[#allocation2 + $0x38] sm:$0xff] }
   0xf   :  { %12119 = vmatmul.mubr.msk.bf16.vlgmr.msra.gmra.mxu0 %vm478_vm1, %v14334_v9  ;;  %12137 = vmatmul.mubr.msk.bf16.vlgmr.msra.gmra.mxu1 %vm478_vm1, %v14339_v10  ;;  %v1325_v48 = vsel %vm503_vm2, %v435_v45, 0  ;;  %v13264_v60 = vld [vmem:[%s20080_s0 + $0xf0] sm:$0xff]   ;;  %v437_v62 = vpack.c.bf16 %v429_v61, %v429_v61  ;;  %v13265_v63 = vld [vmem:[%s20080_s0 + $0xb8] sm:$0xff]   ;;  %v13267_v4 = vld [vmem:[%s20080_s0 + $0x100] sm:$0xff]   ;;  %20255 = vst [vmem:[#allocation7_spill] sm:$0xff] %v14564_v23 }
  0x10   :  { %12122 = vmatprep.mubr.msk.bf16.mxu0 %vm478_vm1, %v14344_v11  ;;  %12140 = vmatprep.mubr.msk.bf16.mxu1 %vm478_vm1, %v14353_v15  ;;  %v13266_v3 = vld [vmem:[%s20080_s0 + $0xf8] sm:$0xff]   ;;  %v13273_v5 = vld [vmem:[%s20080_s0 + $0x140] sm:$0xff]   ;;  %v13268_v6 = vld [vmem:[%s20080_s0 + $0x108] sm:$0xff]   ;;  %v1489_v20 = vsel %vm503_vm2, %v436_v55, 0 }
  0x11   :  { %12153 = vmatpush3.bf16.msra.mxu0 %v833_v27  ;;  %12171 = vmatpush3.bf16.msra.mxu1 %v997_v28  ;;  %v13269_v7 = vld [vmem:[%s20080_s0 + $0x110] sm:$0xff]   ;;  %v13275_v8 = vld [vmem:[%s20080_s0 + $0x148] sm:$0xff]   ;;  %v179_v13 = vld [vmem:[%s20082_s1 + $0x38] sm:$0xff]   ;;  %v1653_v22 = vsel %vm503_vm2, %v437_v62, 0 }
  0x12   :  { %13160 = vmatprep.subr.msk.bf16.mxu0 %vm503_vm2, %v434_v40  ;;  %13161 = vmatprep.subr.msk.bf16.mxu1 %vm503_vm2, %v435_v45  ;;  %v13277_v12 = vld [vmem:[%s20080_s0 + $0x150] sm:$0xff]   ;;  %v195_v19 = vld [vmem:[%s20082_s1 + $0x78] sm:$0xff]   ;;  %v13279_v38 = vld [vmem:[%s20080_s0 + $0x160] sm:$0xff]  }
  0x13   :  { %v14389_v26 = vpop.eup %13492  ;;  %v13270_v27 = vld [vmem:[%s20080_s0 + $0x118] sm:$0xff]   ;;  %v13281_v44 = vld [vmem:[%s20080_s0 + $0x170] sm:$0xff]   ;;  %v215_v0 = vld [vmem:[%s20082_s1 + $0xc8] sm:$0xff]  }
  0x14   :  { %20253 = vst [vmem:[#allocation5_spill] sm:$0xff] %v14389_v26  ;;  %v14396_v29 = vmul.f32 0.35355338, %v14389_v26  ;;  %v13278_v28 = vld [vmem:[%s20080_s0 + $0x158] sm:$0xff]   ;;  %v193_v54 = vld [vmem:[%s20082_s1 + $0x70] sm:$0xff]  }
  0x15   :  { %v13276_v45 = vld [vmem:[%s20080_s0 + $0x138] sm:$0xff]  }
  0x16   :  { %v1758_v30 = vrot.slane %v14396_v29, %v14382_v24  ;;  %v1825_v56 = vrot.slane %v14396_v29, %v14485_v49  ;;  %v1892_v40 = vrot.slane %v14396_v29, %v14564_v23  ;;  %v13300_v61 = vld [vmem:[%s20080_s0 + $0x1d8] sm:$0xff]  }
  0x17   :  { %12123 = vmatmul.mubr.msk.bf16.gmra.mxu0 %vm478_vm1, %v14369_v17  ;;  %12141 = vmatmul.mubr.msk.bf16.gmra.mxu1 %vm478_vm1, %v14374_v18 }
  0x18   :  { %12126 = vmatprep.mubr.msk.bf16.mxu0 %vm478_vm1, %v14379_v21  ;;  %12144 = vmatprep.mubr.msk.bf16.mxu1 %vm478_vm1, %v14387_v25 }
  0x19   :  { %1768 = vbcast.lane.b32.xlu1 %v1758_v30, 272  ;;  %1760 = vbcast.lane.b32.xlu0 %v1758_v30, 256 }
  0x1d   :  { %1772 = vbcast.lane.b32.xlu1 %v1758_v30, 280  ;;  %1764 = vbcast.lane.b32.xlu0 %v1758_v30, 264 }
  0x1f   :  { %12127 = vmatmul.mubr.msk.bf16.gmra.mxu0 %vm478_vm1, %v14411_v31  ;;  %12145 = vmatmul.mubr.msk.bf16.gmra.mxu1 %vm478_vm1, %v14416_v32 }
  0x20   :  { %12130 = vmatprep.mubr.msk.bf16.mxu0 %vm478_vm1, %v14421_v33  ;;  %12148 = vmatprep.mubr.msk.bf16.mxu1 %vm478_vm1, %v14426_v34 }
  0x21   :  { %1780 = vbcast.lane.b32.xlu1 %v1758_v30, 296  ;;  %1776 = vbcast.lane.b32.xlu0 %v1758_v30, 288 }
  0x25   :  { %1788 = vbcast.lane.b32.xlu1 %v1758_v30, 312  ;;  %1784 = vbcast.lane.b32.xlu0 %v1758_v30, 304 }
  0x27   :  { %12131 = vmatmul.mubr.msk.bf16.gmra.mxu0 %vm478_vm1, %v14439_v35  ;;  %12149 = vmatmul.mubr.msk.bf16.gmra.mxu1 %vm478_vm1, %v14444_v36 }
  0x28   :  { %12154 = vmatprep.mubr.msk.bf16.mxu0 %vm478_vm1, %v14449_v37  ;;  %12172 = vmatprep.mubr.msk.bf16.mxu1 %vm478_vm1, %v14454_v39 }
  0x29   :  { %1796 = vbcast.lane.b32.xlu1 %v1758_v30, 328  ;;  %1792 = vbcast.lane.b32.xlu0 %v1758_v30, 320 }
  0x2d   :  { %1804 = vbcast.lane.b32.xlu1 %v1758_v30, 344  ;;  %1800 = vbcast.lane.b32.xlu0 %v1758_v30, 336 }
  0x2f   :  { %12155 = vmatmul.mubr.msk.bf16.vlgmr.msra.gmra.mxu0 %vm478_vm1, %v13253_v41  ;;  %12173 = vmatmul.mubr.msk.bf16.vlgmr.msra.gmra.mxu1 %vm478_vm1, %v13254_v42  ;;  %v13272_v41 = vld [vmem:[%s20080_s0 + $0x128] sm:$0xff]  }
  0x30   :  { %12158 = vmatprep.mubr.msk.bf16.mxu0 %vm478_vm1, %v13255_v43  ;;  %12176 = vmatprep.mubr.msk.bf16.mxu1 %vm478_vm1, %v13256_v46  ;;  %v13280_v42 = vld [vmem:[%s20080_s0 + $0x168] sm:$0xff]   ;;  %v13274_v43 = vld [vmem:[%s20080_s0 + $0x130] sm:$0xff]   ;;  %v13282_v46 = vld [vmem:[%s20080_s0 + $0x178] sm:$0xff]  }
  0x31   :  { %12189 = vmatpush3.bf16.msra.mxu0 %v1161_v47  ;;  %12207 = vmatpush3.bf16.msra.mxu1 %v1325_v48  ;;  %v13283_v47 = vld [vmem:[%s20080_s0 + $0x180] sm:$0xff]  }
  0x32   :  { %1812 = vbcast.lane.b32.xlu1 %v1758_v30, 360  ;;  %1808 = vbcast.lane.b32.xlu0 %v1758_v30, 352  ;;  %v13295_v48 = vld [vmem:[%s20080_s0 + $0x1c0] sm:$0xff]  }
  0x33   :  { %13162 = vmatprep.subr.msk.bf16.mxu0 %vm503_vm2, %v436_v55  ;;  %13163 = vmatprep.subr.msk.bf16.mxu1 %vm503_vm2, %v437_v62  ;;  %v2481_v55 = vsel %vm478_vm1, %v179_v13, 0  ;;  %v13289_v62 = vld [vmem:[%s20080_s0 + $0x1a0] sm:$0xff]  }
  0x36   :  { %1820 = vbcast.lane.b32.xlu1 %v1758_v30, 376  ;;  %1816 = vbcast.lane.b32.xlu0 %v1758_v30, 368  ;;  %v13271_v30 = vld [vmem:[%s20080_s0 + $0x120] sm:$0xff]  }
  0x37   :  { %12159 = vmatmul.mubr.msk.bf16.gmra.mxu0 %vm478_vm1, %v13257_v50  ;;  %12177 = vmatmul.mubr.msk.bf16.gmra.mxu1 %vm478_vm1, %v13258_v51  ;;  %v177_v50 = vld [vmem:[%s20082_s1 + $0x30] sm:$0xff]   ;;  %v13284_v51 = vld [vmem:[%s20080_s0 + $0x188] sm:$0xff]  }
  0x38   :  { %12162 = vmatprep.mubr.msk.bf16.mxu0 %vm478_vm1, %v13259_v52  ;;  %12180 = vmatprep.mubr.msk.bf16.mxu1 %vm478_vm1, %v13260_v53  ;;  %v13296_v52 = vld [vmem:[%s20080_s0 + $0x1c8] sm:$0xff]   ;;  %v13286_v53 = vld [vmem:[%s20080_s0 + $0x190] sm:$0xff]  }
  0x3a   :  { %1831 = vbcast.lane.b32.xlu1 %v1825_v56, 264  ;;  %1827 = vbcast.lane.b32.xlu0 %v1825_v56, 256 }
  0x3e   :  { %1839 = vbcast.lane.b32.xlu1 %v1825_v56, 280  ;;  %1835 = vbcast.lane.b32.xlu0 %v1825_v56, 272 }
  0x3f   :  { %12163 = vmatmul.mubr.msk.bf16.gmra.mxu0 %vm478_vm1, %v13261_v57  ;;  %12181 = vmatmul.mubr.msk.bf16.gmra.mxu1 %vm478_vm1, %v13262_v58  ;;  %v13299_v57 = vld [vmem:[%s20080_s0 + $0x1d0] sm:$0xff]   ;;  %v14643_v58 = vsub.s32 3, %v14360_v16 }
  0x40   :  { %12166 = vmatprep.mubr.msk.bf16.mxu0 %vm478_vm1, %v13263_v59  ;;  %12184 = vmatprep.mubr.msk.bf16.mxu1 %vm478_vm1, %v13264_v60  ;;  %v175_v59 = vld [vmem:[%s20082_s1 + $0x28] sm:$0xff]   ;;  %v13287_v60 = vld [vmem:[%s20080_s0 + $0x198] sm:$0xff]  }
  0x41   :  { %20256 = vst [vmem:[#allocation8_spill] sm:$0xff] %v14643_v58 }
  0x42   :  { %1847 = vbcast.lane.b32.xlu1 %v1825_v56, 296  ;;  %1843 = vbcast.lane.b32.xlu0 %v1825_v56, 288 }
  0x46   :  { %1855 = vbcast.lane.b32.xlu1 %v1825_v56, 312  ;;  %1851 = vbcast.lane.b32.xlu0 %v1825_v56, 304 }
  0x47   :  { %12167 = vmatmul.mubr.msk.bf16.gmra.mxu0 %vm478_vm1, %v13265_v63  ;;  %12185 = vmatmul.mubr.msk.bf16.gmra.mxu1 %vm478_vm1, %v13266_v3  ;;  %v191_v63 = vld [vmem:[%s20082_s1 + $0x68] sm:$0xff]   ;;  %v2478_v3 = vsel %vm478_vm1, %v177_v50, 0 }
  0x48   :  { %12190 = vmatprep.mubr.msk.bf16.mxu0 %vm478_vm1, %v13267_v4  ;;  %12208 = vmatprep.mubr.msk.bf16.mxu1 %vm478_vm1, %v13273_v5  ;;  %v14665_v4 = vrot.slane %v14396_v29, %v14643_v58  ;;  %v2639_v5 = vsel %vm478_vm1, %v193_v54, 0 }
  0x4a   :  { %1863 = vbcast.lane.b32.xlu1 %v1825_v56, 328  ;;  %1859 = vbcast.lane.b32.xlu0 %v1825_v56, 320 }
  0x4e   :  { %1871 = vbcast.lane.b32.xlu1 %v1825_v56, 344  ;;  %1867 = vbcast.lane.b32.xlu0 %v1825_v56, 336 }
  0x4f   :  { %12191 = vmatmul.mubr.msk.bf16.vlgmr.msra.gmra.mxu0 %vm478_vm1, %v13268_v6  ;;  %12209 = vmatmul.mubr.msk.bf16.vlgmr.msra.gmra.mxu1 %vm478_vm1, %v13275_v8  ;;  %v13303_v6 = vld [vmem:[%s20080_s0 + $0x1e0] sm:$0xff]   ;;  %v13290_v8 = vld [vmem:[%s20080_s0 + $0x1a8] sm:$0xff]  }
  0x50   :  { %12194 = vmatprep.mubr.msk.bf16.mxu0 %vm478_vm1, %v13269_v7  ;;  %12212 = vmatprep.mubr.msk.bf16.mxu1 %vm478_vm1, %v13277_v12  ;;  %v173_v7 = vld [vmem:[%s20082_s1 + $0x20] sm:$0xff]   ;;  %v13304_v12 = vld [vmem:[%s20080_s0 + $0x1e8] sm:$0xff]  }
  0x51   :  { %12225 = vmatpush3.bf16.msra.mxu0 %v1489_v20  ;;  %12243 = vmatpush3.bf16.msra.mxu1 %v1653_v22  ;;  %v2475_v20 = vsel %vm478_vm1, %v175_v59, 0  ;;  %v2636_v22 = vsel %vm478_vm1, %v191_v63, 0 }
  0x52   :  { %1879 = vbcast.lane.b32.xlu1 %v1825_v56, 360  ;;  %1875 = vbcast.lane.b32.xlu0 %v1825_v56, 352 }
  0x53   :  { %13164 = vmatprep.subr.msk.bf16.mxu0 %vm478_vm1, %v179_v13  ;;  %13172 = vmatprep.subr.msk.bf16.mxu1 %vm478_vm1, %v195_v19  ;;  %v13292_v13 = vld [vmem:[%s20080_s0 + $0x1b0] sm:$0xff]  }
  0x56   :  { %1887 = vbcast.lane.b32.xlu1 %v1825_v56, 376  ;;  %1883 = vbcast.lane.b32.xlu0 %v1825_v56, 368  ;;  %v2642_v56 = vsel %vm478_vm1, %v195_v19, 0  ;;  %v189_v19 = vld [vmem:[%s20082_s1 + $0x60] sm:$0xff]  }
  0x57   :  { %12195 = vmatmul.mubr.msk.bf16.gmra.mxu0 %vm478_vm1, %v13270_v27  ;;  %12213 = vmatmul.mubr.msk.bf16.gmra.mxu1 %vm478_vm1, %v13278_v28  ;;  %v13307_v27 = vld [vmem:[%s20080_s0 + $0x1f0] sm:$0xff]   ;;  %v171_v28 = vld [vmem:[%s20082_s1 + $0x18] sm:$0xff]  }
  0x58   :  { %12198 = vmatprep.mubr.msk.bf16.mxu0 %vm478_vm1, %v13271_v30  ;;  %12216 = vmatprep.mubr.msk.bf16.mxu1 %vm478_vm1, %v13279_v38  ;;  %v13293_v30 = vld [vmem:[%s20080_s0 + $0x1b8] sm:$0xff]  }
  0x59   :  { %v13308_v38 = vld [vmem:[%s20080_s0 + $0x1f8] sm:$0xff]  }
  0x5a   :  { %1898 = vbcast.lane.b32.xlu1 %v1892_v40, 264  ;;  %1894 = vbcast.lane.b32.xlu0 %v1892_v40, 256 }
  0x5e   :  { %1906 = vbcast.lane.b32.xlu1 %v1892_v40, 280  ;;  %1902 = vbcast.lane.b32.xlu0 %v1892_v40, 272 }
  0x5f   :  { %12199 = vmatmul.mubr.msk.bf16.gmra.mxu0 %vm478_vm1, %v13272_v41  ;;  %12217 = vmatmul.mubr.msk.bf16.gmra.mxu1 %vm478_vm1, %v13280_v42  ;;  %v2472_v41 = vsel %vm478_vm1, %v173_v7, 0  ;;  %v2633_v42 = vsel %vm478_vm1, %v189_v19, 0 }
  0x60   :  { %12202 = vmatprep.mubr.msk.bf16.mxu0 %vm478_vm1, %v13274_v43  ;;  %12220 = vmatprep.mubr.msk.bf16.mxu1 %vm478_vm1, %v13281_v44  ;;  %v169_v43 = vld [vmem:[%s20082_s1 + $0x10] sm:$0xff]  }
  0x62   :  { %1914 = vbcast.lane.b32.xlu1 %v1892_v40, 296  ;;  %1910 = vbcast.lane.b32.xlu0 %v1892_v40, 288 }
  0x66   :  { %1922 = vbcast.lane.b32.xlu1 %v1892_v40, 312  ;;  %1918 = vbcast.lane.b32.xlu0 %v1892_v40, 304 }
  0x67   :  { %12203 = vmatmul.mubr.msk.bf16.gmra.mxu0 %vm478_vm1, %v13276_v45  ;;  %12221 = vmatmul.mubr.msk.bf16.gmra.mxu1 %vm478_vm1, %v13282_v46  ;;  %v2469_v46 = vsel %vm478_vm1, %v171_v28, 0 }
  0x68   :  { %12226 = vmatprep.mubr.msk.bf16.mxu0 %vm478_vm1, %v13283_v47  ;;  %12244 = vmatprep.mubr.msk.bf16.mxu1 %vm478_vm1, %v13295_v48 }
  0x6a   :  { %1930 = vbcast.lane.b32.xlu1 %v1892_v40, 328  ;;  %1926 = vbcast.lane.b32.xlu0 %v1892_v40, 320 }
  0x6e   :  { %1938 = vbcast.lane.b32.xlu1 %v1892_v40, 344  ;;  %1934 = vbcast.lane.b32.xlu0 %v1892_v40, 336 }
  0x6f   :  { %12227 = vmatmul.mubr.msk.bf16.vlgmr.msra.gmra.mxu0 %vm478_vm1, %v13284_v51  ;;  %12245 = vmatmul.mubr.msk.bf16.vlgmr.msra.gmra.mxu1 %vm478_vm1, %v13296_v52  ;;  %v167_v51 = vld [vmem:[%s20082_s1 + $0x8] sm:$0xff]  }
  0x70   :  { %12261 = vmatpush3.bf16.xpose.msra.mxu0 %v2481_v55  ;;  %12230 = vmatprep.mubr.msk.bf16.mxu0 %vm478_vm1, %v13286_v53  ;;  %v2466_v55 = vsel %vm478_vm1, %v169_v43, 0 }
  0x71   :  { %13165 = vmatprep.subr.msk.bf16.mxu0 %vm478_vm1, %v177_v50  ;;  %12293 = vmatpush3.bf16.xpose.msra.mxu1 %v2642_v56 }
  0x72   :  { %1946 = vbcast.lane.b32.xlu1 %v1892_v40, 360  ;;  %1942 = vbcast.lane.b32.xlu0 %v1892_v40, 352 }
  0x73   :  { %12248 = vmatprep.mubr.msk.bf16.mxu1 %vm478_vm1, %v13299_v57  ;;  %13173 = vmatprep.subr.msk.bf16.mxu1 %vm478_vm1, %v193_v54  ;;  %v183_v54 = vld [vmem:[%s20082_s1 + $0x48] sm:$0xff]  }
  0x76   :  { %1954 = vbcast.lane.b32.xlu1 %v1892_v40, 376  ;;  %1950 = vbcast.lane.b32.xlu0 %v1892_v40, 368  ;;  %v187_v40 = vld [vmem:[%s20082_s1 + $0x58] sm:$0xff]  }
  0x77   :  { %12231 = vmatmul.mubr.msk.bf16.gmra.mxu0 %vm478_vm1, %v13287_v60  ;;  %12249 = vmatmul.mubr.msk.bf16.gmra.mxu1 %vm478_vm1, %v13300_v61  ;;  %v2630_v47 = vsel %vm478_vm1, %v187_v40, 0  ;;  %v165_v61 = vld [vmem:[%s20082_s1] sm:$0xff]  }
  0x78   :  { %12263 = vmatpush3.bf16.xpose.msra.mxu0 %v2478_v3  ;;  %12234 = vmatprep.mubr.msk.bf16.mxu0 %vm478_vm1, %v13289_v62  ;;  %v181_v3 = vld [vmem:[%s20082_s1 + $0x40] sm:$0xff]  }
  0x79   :  { %13166 = vmatprep.subr.msk.bf16.mxu0 %vm478_vm1, %v175_v59  ;;  %12295 = vmatpush3.bf16.xpose.msra.mxu1 %v2639_v5  ;;  %v2624_v5 = vsel %vm478_vm1, %v183_v54, 0 }
  0x7a   :  { %1965 = vbcast.lane.b32.xlu1 %v14665_v4, 264  ;;  %1961 = vbcast.lane.b32.xlu0 %v14665_v4, 256 }
  0x7b   :  { %12252 = vmatprep.mubr.msk.bf16.mxu1 %vm478_vm1, %v13303_v6  ;;  %13174 = vmatprep.subr.msk.bf16.mxu1 %vm478_vm1, %v191_v63 }
  0x7e   :  { %1973 = vbcast.lane.b32.xlu1 %v14665_v4, 280  ;;  %1969 = vbcast.lane.b32.xlu0 %v14665_v4, 272 }
  0x7f   :  { %12235 = vmatmul.mubr.msk.bf16.gmra.mxu0 %vm478_vm1, %v13290_v8  ;;  %12253 = vmatmul.mubr.msk.bf16.gmra.mxu1 %vm478_vm1, %v13304_v12  ;;  %v211_v8 = vld [vmem:[%s20082_s1 + $0xb8] sm:$0xff]  }
  0x80   :  { %12265 = vmatpush3.bf16.xpose.msra.mxu0 %v2475_v20  ;;  %12238 = vmatprep.mubr.msk.bf16.mxu0 %vm478_vm1, %v13292_v13  ;;  %v2460_v20 = vsel %vm478_vm1, %v165_v61, 0 }
  0x81   :  { %13167 = vmatprep.subr.msk.bf16.mxu0 %vm478_vm1, %v173_v7  ;;  %12297 = vmatpush3.bf16.xpose.msra.mxu1 %v2636_v22  ;;  %v2621_v22 = vsel %vm478_vm1, %v181_v3, 0 }
  0x82   :  { %1981 = vbcast.lane.b32.xlu1 %v14665_v4, 296  ;;  %1977 = vbcast.lane.b32.xlu0 %v14665_v4, 288 }
  0x83   :  { %12256 = vmatprep.mubr.msk.bf16.mxu1 %vm478_vm1, %v13307_v27  ;;  %13175 = vmatprep.subr.msk.bf16.mxu1 %vm478_vm1, %v189_v19  ;;  %v227_v19 = vld [vmem:[%s20082_s1 + $0xf8] sm:$0xff]  }
  0x86   :  { %1989 = vbcast.lane.b32.xlu1 %v14665_v4, 312  ;;  %1985 = vbcast.lane.b32.xlu0 %v14665_v4, 304 }
  0x87   :  { %12239 = vmatmul.mubr.msk.bf16.gmra.mxu0 %vm478_vm1, %v13293_v30  ;;  %12257 = vmatmul.mubr.msk.bf16.gmra.mxu1 %vm478_vm1, %v13308_v38  ;;  %v209_v30 = vld [vmem:[%s20082_s1 + $0xb0] sm:$0xff]  }
  0x88   :  { %12267 = vmatpush3.bf16.xpose.msra.mxu0 %v2472_v41  ;;  %12276 = vmatprep.mubr.msk.bf16.mxu0 %vm478_vm1, %v14317_v1  ;;  %v185_v1 = vld [vmem:[%s20082_s1 + $0x50] sm:$0xff]   ;;  %v2803_v41 = vsel %vm478_vm1, %v211_v8, 0 }
  0x89   :  { %13168 = vmatprep.subr.msk.bf16.mxu0 %vm478_vm1, %v171_v28  ;;  %12299 = vmatpush3.bf16.xpose.msra.mxu1 %v2633_v42  ;;  %v2627_v57 = vsel %vm478_vm1, %v185_v1, 0  ;;  %v225_v42 = vld [vmem:[%s20082_s1 + $0xf0] sm:$0xff]  }
  0x8a   :  { %1997 = vbcast.lane.b32.xlu1 %v14665_v4, 328  ;;  %1993 = vbcast.lane.b32.xlu0 %v14665_v4, 320 }
  0x8b   :  { %13176 = vmatprep.subr.msk.bf16.mxu1 %vm478_vm1, %v187_v40  ;;  %12308 = vmatprep.mubr.msk.bf16.mxu1 %vm478_vm1, %v14322_v2  ;;  %v14738_v44 = vpop.permute.xlu1 %1768  ;;  %v14740_v45 = vpop.permute.xlu0 %1760  ;;  %v14757_v2 = vsub.s32 4, %v14360_v16 }
  0x8c   :  { %20257 = vst [vmem:[#allocation9_spill] sm:$0xff] %v14740_v45 }
  0x8d   :  { %20260 = vst [vmem:[#allocation12_spill] sm:$0xff] %v14757_v2  ;;  %v14775_v56 = vrot.slane %v14396_v29, %v14757_v2 }
  0x8e   :  { %2005 = vbcast.lane.b32.xlu1 %v14665_v4, 344  ;;  %2001 = vbcast.lane.b32.xlu0 %v14665_v4, 336 }
  0x8f   :  { %v14749_v48 = vpop.permute.xlu1 %1772  ;;  %v14751_v50 = vpop.permute.xlu0 %1764 }
  0x90   :  { %20258 = vst [vmem:[#allocation10_spill] sm:$0xff] %v14749_v48  ;;  %20259 = vst [vmem:[#allocation11_spill] sm:$0xff] %v14751_v50  ;;  %12269 = vmatpush3.bf16.xpose.msra.mxu0 %v2469_v46  ;;  %v2964_v46 = vsel %vm478_vm1, %v227_v19, 0  ;;  %v213_v50 = vld [vmem:[%s20082_s1 + $0xc0] sm:$0xff]  }
  0x91   :  { %13169 = vmatprep.subr.msk.bf16.mxu0 %vm478_vm1, %v169_v43  ;;  %12301 = vmatpush3.bf16.xpose.msra.mxu1 %v2630_v47  ;;  %v207_v47 = vld [vmem:[%s20082_s1 + $0xa8] sm:$0xff]  }
  0x92   :  { %2013 = vbcast.lane.b32.xlu1 %v14665_v4, 360  ;;  %2009 = vbcast.lane.b32.xlu0 %v14665_v4, 352 }
  0x93   :  { %13177 = vmatprep.subr.msk.bf16.mxu1 %vm478_vm1, %v185_v1  ;;  %v14763_v52 = vpop.permute.xlu1 %1780  ;;  %v14765_v53 = vpop.permute.xlu0 %1776 }
  0x94   :  { %20261 = vst [vmem:[#allocation13_spill] sm:$0xff] %v14763_v52  ;;  %20262 = vst [vmem:[#allocation14_spill] sm:$0xff] %v14765_v53 }
  0x96   :  { %2021 = vbcast.lane.b32.xlu1 %v14665_v4, 376  ;;  %2017 = vbcast.lane.b32.xlu0 %v14665_v4, 368  ;;  %v2463_v4 = vsel %vm478_vm1, %v167_v51, 0 }
  0x97   :  { %v14778_v59 = vpop.permute.xlu1 %1788  ;;  %v14780_v60 = vpop.permute.xlu0 %1784 }
  0x98   :  { %20263 = vst [vmem:[#allocation15_spill] sm:$0xff] %v14778_v59  ;;  %20264 = vst [vmem:[#allocation16_spill] sm:$0xff] %v14780_v60  ;;  %12271 = vmatpush3.bf16.xpose.msra.mxu0 %v2466_v55 }
  0x99   :  { %13170 = vmatprep.subr.msk.bf16.mxu0 %vm478_vm1, %v167_v51  ;;  %12303 = vmatpush3.bf16.xpose.msra.mxu1 %v2627_v57 }
  0x9a   :  { %2032 = vbcast.lane.b32.xlu1 %v14775_v56, 264  ;;  %2028 = vbcast.lane.b32.xlu0 %v14775_v56, 256 }
  0x9b   :  { %13178 = vmatprep.subr.msk.bf16.mxu1 %vm478_vm1, %v183_v54  ;;  %v14789_v62 = vpop.permute.xlu1 %1796  ;;  %v14791_v63 = vpop.permute.xlu0 %1792  ;;  %v223_v54 = vld [vmem:[%s20082_s1 + $0xe8] sm:$0xff]  }
  0x9c   :  { %20265 = vst [vmem:[#allocation17_spill] sm:$0xff] %v14789_v62  ;;  %20266 = vst [vmem:[#allocation18_spill] sm:$0xff] %v14791_v63  ;;  %v2943_v62 = vsel %vm478_vm1, %v213_v50, 0 }
  0x9e   :  { %2040 = vbcast.lane.b32.xlu1 %v14775_v56, 280  ;;  %2036 = vbcast.lane.b32.xlu0 %v14775_v56, 272 }
  0x9f   :  { %v14800_v6 = vpop.permute.xlu1 %1804  ;;  %v14802_v7 = vpop.permute.xlu0 %1800 }
  0xa0   :  { %20267 = vst [vmem:[#allocation19_spill] sm:$0xff] %v14800_v6  ;;  %20268 = vst [vmem:[#allocation20_spill] sm:$0xff] %v14802_v7  ;;  %12273 = vmatpush3.bf16.xpose.msra.mxu0 %v2463_v4 }
  0xa1   :  { %13171 = vmatprep.subr.msk.bf16.mxu0 %vm478_vm1, %v165_v61  ;;  %12305 = vmatpush3.bf16.xpose.msra.mxu1 %v2624_v5  ;;  %v2961_v61 = vsel %vm478_vm1, %v225_v42, 0  ;;  %v2958_v5 = vsel %vm478_vm1, %v223_v54, 0 }
  0xa2   :  { %2048 = vbcast.lane.b32.xlu1 %v14775_v56, 296  ;;  %2044 = vbcast.lane.b32.xlu0 %v14775_v56, 288 }
  0xa3   :  { %13179 = vmatprep.subr.msk.bf16.mxu1 %vm478_vm1, %v181_v3  ;;  %v221_v3 = vld [vmem:[%s20082_s1 + $0xe0] sm:$0xff]  }
  0xa4   :  { %v14811_v12 = vpop.permute.xlu1 %1812  ;;  %v14813_v13 = vpop.permute.xlu0 %1808 }
  0xa5   :  { %20269 = vst [vmem:[#allocation21_spill] sm:$0xff] %v14811_v12  ;;  %20270 = vst [vmem:[#allocation22_spill] sm:$0xff] %v14813_v13  ;;  %v259_v12 = vld [vmem:[%s20082_s1 + $0x178] sm:$0xff]  }
  0xa6   :  { %2056 = vbcast.lane.b32.xlu1 %v14775_v56, 312  ;;  %2052 = vbcast.lane.b32.xlu0 %v14775_v56, 304  ;;  %v3286_v52 = vsel %vm478_vm1, %v259_v12, 0 }
  0xa8   :  { %v14822_v27 = vpop.permute.xlu1 %1820  ;;  %v14824_v28 = vpop.permute.xlu0 %1816  ;;  %12275 = vmatpush3.bf16.xpose.msra.mxu0 %v2460_v20 }
  0xa9   :  { %20271 = vst [vmem:[#allocation23_spill] sm:$0xff] %v14822_v27  ;;  %20272 = vst [vmem:[#allocation24_spill] sm:$0xff] %v14824_v28  ;;  %13180 = vmatprep.subr.msk.bf16.mxu0 %vm478_vm1, %v211_v8  ;;  %12307 = vmatpush3.bf16.xpose.msra.mxu1 %v2621_v22  ;;  %v2955_v22 = vsel %vm478_vm1, %v221_v3, 0 }
  0xaa   :  { %2064 = vbcast.lane.b32.xlu1 %v14775_v56, 328  ;;  %2060 = vbcast.lane.b32.xlu0 %v14775_v56, 320 }
  0xab   :  { %13188 = vmatprep.subr.msk.bf16.mxu1 %vm478_vm1, %v227_v19  ;;  %v219_v19 = vld [vmem:[%s20082_s1 + $0xd8] sm:$0xff]  }
  0xac   :  { %v14833_v38 = vpop.permute.xlu1 %1831  ;;  %v14835_v40 = vpop.permute.xlu0 %1827 }
  0xad   :  { %20273 = vst [vmem:[#allocation25_spill] sm:$0xff] %v14833_v38  ;;  %20274 = vst [vmem:[#allocation26_spill] sm:$0xff] %v14835_v40 }
  0xae   :  { %2072 = vbcast.lane.b32.xlu1 %v14775_v56, 344  ;;  %2068 = vbcast.lane.b32.xlu0 %v14775_v56, 336 }
  0xaf   :  { %12277 = vmatmul.mubr.msk.bf16.vlgmr.msra.gmra.mxu0 %vm478_vm1, %v14334_v9  ;;  %v14858_v9 = vsub.s32 5, %v14360_v16 }
  0xb0   :  { %v14845_v43 = vpop.permute.xlu1 %1839  ;;  %v14847_v1 = vpop.permute.xlu0 %1835  ;;  %12325 = vmatpush3.bf16.xpose.msra.mxu0 %v2803_v41  ;;  %12280 = vmatprep.mubr.msk.bf16.mxu0 %vm478_vm1, %v14344_v11  ;;  %v217_v41 = vld [vmem:[%s20082_s1 + $0xd0] sm:$0xff]  }
  0xb1   :  { %20275 = vst [vmem:[#allocation27_spill] sm:$0xff] %v14845_v43  ;;  %20276 = vst [vmem:[#allocation28_spill] sm:$0xff] %v14847_v1  ;;  %13181 = vmatprep.subr.msk.bf16.mxu0 %vm478_vm1, %v209_v30  ;;  %12309 = vmatmul.mubr.msk.bf16.vlgmr.msra.gmra.mxu1 %vm478_vm1, %v14339_v10  ;;  %v2800_v10 = vsel %vm478_vm1, %v209_v30, 0  ;;  %v14878_v55 = vrot.slane %v14396_v29, %v14858_v9 }
  0xb2   :  { %2080 = vbcast.lane.b32.xlu1 %v14775_v56, 360  ;;  %2076 = vbcast.lane.b32.xlu0 %v14775_v56, 352 }
  0xb3   :  { %12357 = vmatpush3.bf16.xpose.msra.mxu1 %v2964_v46  ;;  %12312 = vmatprep.mubr.msk.bf16.mxu1 %vm478_vm1, %v14353_v15 }
  0xb4   :  { %v14865_v11 = vpop.permute.xlu1 %1847  ;;  %v14867_v51 = vpop.permute.xlu0 %1843  ;;  %13189 = vmatprep.subr.msk.bf16.mxu1 %vm478_vm1, %v225_v42 }
  0xb5   :  { %20277 = vst [vmem:[#allocation29_spill] sm:$0xff] %v14865_v11  ;;  %20278 = vst [vmem:[#allocation30_spill] sm:$0xff] %v14867_v51 }
  0xb6   :  { %2088 = vbcast.lane.b32.xlu1 %v14775_v56, 376  ;;  %2084 = vbcast.lane.b32.xlu0 %v14775_v56, 368 }
  0xb7   :  { %12281 = vmatmul.mubr.msk.bf16.gmra.mxu0 %vm478_vm1, %v14369_v17  ;;  %v205_v17 = vld [vmem:[%s20082_s1 + $0xa0] sm:$0xff]  }
  0xb8   :  { %v14882_v15 = vpop.permute.xlu1 %1855  ;;  %v14884_v57 = vpop.permute.xlu0 %1851  ;;  %12327 = vmatpush3.bf16.xpose.msra.mxu0 %v2800_v10  ;;  %12284 = vmatprep.mubr.msk.bf16.mxu0 %vm478_vm1, %v14379_v21  ;;  %v2952_v10 = vsel %vm478_vm1, %v219_v19, 0 }
  0xb9   :  { %20279 = vst [vmem:[#allocation31_spill] sm:$0xff] %v14882_v15  ;;  %20280 = vst [vmem:[#allocation32_spill] sm:$0xff] %v14884_v57  ;;  %13182 = vmatprep.subr.msk.bf16.mxu0 %vm478_vm1, %v207_v47  ;;  %12313 = vmatmul.mubr.msk.bf16.gmra.mxu1 %vm478_vm1, %v14374_v18  ;;  %v2797_v18 = vsel %vm478_vm1, %v207_v47, 0 }
  0xba   :  { %2099 = vbcast.lane.b32.xlu1 %v14878_v55, 264  ;;  %2095 = vbcast.lane.b32.xlu0 %v14878_v55, 256 }
  0xbb   :  { %12359 = vmatpush3.bf16.xpose.msra.mxu1 %v2961_v61  ;;  %12316 = vmatprep.mubr.msk.bf16.mxu1 %vm478_vm1, %v14387_v25 }
  0xbc   :  { %v14899_v21 = vpop.permute.xlu1 %1863  ;;  %v14901_v56 = vpop.permute.xlu0 %1859  ;;  %13190 = vmatprep.subr.msk.bf16.mxu1 %vm478_vm1, %v223_v54 }
  0xbd   :  { %20281 = vst [vmem:[#allocation33_spill] sm:$0xff] %v14899_v21  ;;  %20282 = vst [vmem:[#allocation34_spill] sm:$0xff] %v14901_v56  ;;  %v241_v21 = vld [vmem:[%s20082_s1 + $0x130] sm:$0xff]  }
  0xbe   :  { %2107 = vbcast.lane.b32.xlu1 %v14878_v55, 280  ;;  %2103 = vbcast.lane.b32.xlu0 %v14878_v55, 272 }
  0xbf   :  { %12285 = vmatmul.mubr.msk.bf16.gmra.mxu0 %vm478_vm1, %v14411_v31  ;;  %v203_v31 = vld [vmem:[%s20082_s1 + $0x98] sm:$0xff]  }
  0xc0   :  { %v14912_v25 = vpop.permute.xlu1 %1871  ;;  %v14914_v4 = vpop.permute.xlu0 %1867  ;;  %12329 = vmatpush3.bf16.xpose.msra.mxu0 %v2797_v18  ;;  %12288 = vmatprep.mubr.msk.bf16.mxu0 %vm478_vm1, %v14421_v33  ;;  %v199_v18 = vld [vmem:[%s20082_s1 + $0x88] sm:$0xff]  }
  0xc1   :  { %20283 = vst [vmem:[#allocation35_spill] sm:$0xff] %v14912_v25  ;;  %20284 = vst [vmem:[#allocation36_spill] sm:$0xff] %v14914_v4  ;;  %13183 = vmatprep.subr.msk.bf16.mxu0 %vm478_vm1, %v205_v17  ;;  %12317 = vmatmul.mubr.msk.bf16.gmra.mxu1 %vm478_vm1, %v14416_v32  ;;  %v2794_v32 = vsel %vm478_vm1, %v205_v17, 0  ;;  %v14987_v17 = vsub.s32 6, %v14360_v16 }
  0xc2   :  { %2115 = vbcast.lane.b32.xlu1 %v14878_v55, 296  ;;  %2111 = vbcast.lane.b32.xlu0 %v14878_v55, 288 }
  0xc3   :  { %12361 = vmatpush3.bf16.xpose.msra.mxu1 %v2958_v5  ;;  %12320 = vmatprep.mubr.msk.bf16.mxu1 %vm478_vm1, %v14426_v34 }
  0xc4   :  { %v14929_v33 = vpop.permute.xlu1 %1879  ;;  %v14931_v8 = vpop.permute.xlu0 %1875  ;;  %13191 = vmatprep.subr.msk.bf16.mxu1 %vm478_vm1, %v221_v3 }
  0xc5   :  { %20285 = vst [vmem:[#allocation37_spill] sm:$0xff] %v14929_v33  ;;  %20286 = vst [vmem:[#allocation38_spill] sm:$0xff] %v14931_v8 }
  0xc6   :  { %2123 = vbcast.lane.b32.xlu1 %v14878_v55, 312  ;;  %2119 = vbcast.lane.b32.xlu0 %v14878_v55, 304 }
  0xc7   :  { %12289 = vmatmul.mubr.msk.bf16.gmra.mxu0 %vm478_vm1, %v14439_v35  ;;  %v201_v35 = vld [vmem:[%s20082_s1 + $0x90] sm:$0xff]  }
  0xc8   :  { %v14942_v34 = vpop.permute.xlu1 %1887  ;;  %v14944_v20 = vpop.permute.xlu0 %1883  ;;  %12331 = vmatpush3.bf16.xpose.msra.mxu0 %v2794_v32  ;;  %12340 = vmatprep.mubr.msk.bf16.mxu0 %vm478_vm1, %v14449_v37 }
  0xc9   :  { %20287 = vst [vmem:[#allocation39_spill] sm:$0xff] %v14942_v34  ;;  %20288 = vst [vmem:[#allocation40_spill] sm:$0xff] %v14944_v20  ;;  %13184 = vmatprep.subr.msk.bf16.mxu0 %vm478_vm1, %v203_v31  ;;  %12321 = vmatmul.mubr.msk.bf16.gmra.mxu1 %vm478_vm1, %v14444_v36  ;;  %v2791_v36 = vsel %vm478_vm1, %v203_v31, 0 }
  0xca   :  { %2131 = vbcast.lane.b32.xlu1 %v14878_v55, 328  ;;  %2127 = vbcast.lane.b32.xlu0 %v14878_v55, 320 }
  0xcb   :  { %12363 = vmatpush3.bf16.xpose.msra.mxu1 %v2955_v22  ;;  %12372 = vmatprep.mubr.msk.bf16.mxu1 %vm478_vm1, %v14454_v39 }
  0xcc   :  { %v14959_v30 = vpop.permute.xlu1 %1898  ;;  %v14961_v37 = vpop.permute.xlu0 %1894  ;;  %13192 = vmatprep.subr.msk.bf16.mxu1 %vm478_vm1, %v219_v19 }
  0xcd   :  { %20289 = vst [vmem:[#allocation41_spill] sm:$0xff] %v14959_v30  ;;  %20290 = vst [vmem:[#allocation42_spill] sm:$0xff] %v14961_v37 }
  0xce   :  { %2139 = vbcast.lane.b32.xlu1 %v14878_v55, 344  ;;  %2135 = vbcast.lane.b32.xlu0 %v14878_v55, 336 }
  0xcf   :  { %v14970_v42 = vpop.f32.mrf.mxu0  ;;  %v14972_v46 = vpop.f32.mrf.mxu1 }
  0xd0   :  { %20291 = vst [vmem:[#allocation43_spill] sm:$0xff] %v14970_v42  ;;  %20292 = vst [vmem:[#allocation44_spill] sm:$0xff] %v14972_v46  ;;  %v14974_v39 = vpop.permute.xlu1 %1906  ;;  %v14976_v47 = vpop.permute.xlu0 %1902  ;;  %12333 = vmatpush3.bf16.xpose.msra.mxu0 %v2791_v36  ;;  %v2788_v36 = vsel %vm478_vm1, %v201_v35, 0  ;;  %v20103_v46 = vmov 127  }
  0xd1   :  { %20293 = vst [vmem:[#allocation45_spill] sm:$0xff] %v14974_v39  ;;  %20294 = vst [vmem:[#allocation46_spill] sm:$0xff] %v14976_v47  ;;  %v14979_v54 = vpop.f32.mrf.mxu0  ;;  %v14981_v61 = vpop.f32.mrf.mxu1  ;;  %13185 = vmatprep.subr.msk.bf16.mxu0 %vm478_vm1, %v201_v35  ;;  %v2949_v35 = vsel %vm478_vm1, %v217_v41, 0  ;;  %13233 = vset.pattern.permute.xlu0 %v20103_v46  ;;  %v14127_v46 = vld [vmem:[%s20083_s2 + $0x8] sm:$0xff]  }
  0xd2   :  { %20295 = vst [vmem:[#allocation47_spill] sm:$0xff] %v14979_v54  ;;  %20296 = vst [vmem:[#allocation48_spill] sm:$0xff] %v14981_v61  ;;  %2147 = vbcast.lane.b32.xlu1 %v14878_v55, 360  ;;  %2143 = vbcast.lane.b32.xlu0 %v14878_v55, 352  ;;  %v2946_v54 = vsel %vm478_vm1, %v215_v0, 0 }
  0xd3   :  { %v14992_v3 = vpop.f32.mrf.mxu0  ;;  %v14994_v5 = vpop.f32.mrf.mxu1  ;;  %12365 = vmatpush3.bf16.xpose.msra.mxu1 %v2952_v10  ;;  %v15013_v10 = vrot.slane %v14396_v29, %v14987_v17 }
  0xd4   :  { %20297 = vst [vmem:[#allocation49_spill] sm:$0xff] %v14992_v3  ;;  %20298 = vst [vmem:[#allocation50_spill] sm:$0xff] %v14994_v5  ;;  %v14996_v31 = vpop.permute.xlu1 %1914  ;;  %v14998_v32 = vpop.permute.xlu0 %1910  ;;  %13193 = vmatprep.subr.msk.bf16.mxu1 %vm478_vm1, %v217_v41 }
  0xd5   :  { %20299 = vst [vmem:[#allocation51_spill] sm:$0xff] %v14996_v31  ;;  %20300 = vst [vmem:[#allocation52_spill] sm:$0xff] %v14998_v32  ;;  %v15001_v19 = vpop.f32.mrf.mxu0  ;;  %v15003_v22 = vpop.f32.mrf.mxu1 }
  0xd6   :  { %20301 = vst [vmem:[#allocation53_spill] sm:$0xff] %v15001_v19  ;;  %20302 = vst [vmem:[#allocation54_spill] sm:$0xff] %v15003_v22  ;;  %2155 = vbcast.lane.b32.xlu1 %v14878_v55, 376  ;;  %2151 = vbcast.lane.b32.xlu0 %v14878_v55, 368  ;;  %v197_v55 = vld [vmem:[%s20082_s1 + $0x80] sm:$0xff]   ;;  %v243_v22 = vld [vmem:[%s20082_s1 + $0x138] sm:$0xff]  }
  0xd7   :  { %v15015_v14 = vpop.f32.mrf.mxu0  ;;  %v15017_v26 = vpop.f32.mrf.mxu1  ;;  %v2782_v34 = vsel %vm478_vm1, %v197_v55, 0 }
  0xd8   :  { %20303 = vst [vmem:[#allocation55_spill] sm:$0xff] %v15015_v14  ;;  %20304 = vst [vmem:[#allocation56_spill] sm:$0xff] %v15017_v26  ;;  %v15019_v32 = vpop.permute.xlu1 %1922  ;;  %v15021_v37 = vpop.permute.xlu0 %1918  ;;  %12335 = vmatpush3.bf16.xpose.msra.mxu0 %v2788_v36 }
  0xd9   :  { %20305 = vst [vmem:[#allocation57_spill] sm:$0xff] %v15019_v32  ;;  %20306 = vst [vmem:[#allocation58_spill] sm:$0xff] %v15021_v37  ;;  %v15024_v13 = vpop.f32.mrf.mxu0  ;;  %v15026_v8 = vpop.f32.mrf.mxu1  ;;  %13186 = vmatprep.subr.msk.bf16.mxu0 %vm478_vm1, %v199_v18 }
  0xda   :  { %20307 = vst [vmem:[#allocation59_spill] sm:$0xff] %v15024_v13  ;;  %20308 = vst [vmem:[#allocation60_spill] sm:$0xff] %v15026_v8  ;;  %2166 = vbcast.lane.b32.xlu1 %v15013_v10, 264  ;;  %2162 = vbcast.lane.b32.xlu0 %v15013_v10, 256  ;;  %v2785_v8 = vsel %vm478_vm1, %v199_v18, 0 }
  0xdb   :  { %v15034_v63 = vpop.f32.mrf.mxu0  ;;  %v15036_v53 = vpop.f32.mrf.mxu1  ;;  %12367 = vmatpush3.bf16.xpose.msra.mxu1 %v2949_v35 }
  0xdc   :  { %20309 = vst [vmem:[#allocation61_spill] sm:$0xff] %v15034_v63  ;;  %20310 = vst [vmem:[#allocation62_spill] sm:$0xff] %v15036_v53  ;;  %v15038_v41 = vpop.permute.xlu1 %1930  ;;  %v15040_v36 = vpop.permute.xlu0 %1926  ;;  %13194 = vmatprep.subr.msk.bf16.mxu1 %vm478_vm1, %v215_v0 }
  0xdd   :  { %20311 = vst [vmem:[#allocation63_spill] sm:$0xff] %v15038_v41  ;;  %20312 = vst [vmem:[#allocation64_spill] sm:$0xff] %v15040_v36  ;;  %v15043_v13 = vpop.f32.mrf.mxu0  ;;  %v15045_v51 = vpop.f32.mrf.mxu1 }
  0xde   :  { %20313 = vst [vmem:[#allocation65_spill] sm:$0xff] %v15043_v13  ;;  %20314 = vst [vmem:[#allocation66_spill] sm:$0xff] %v15045_v51  ;;  %2174 = vbcast.lane.b32.xlu1 %v15013_v10, 280  ;;  %2170 = vbcast.lane.b32.xlu0 %v15013_v10, 272  ;;  %v14075_v13 = vld [vmem:[%s20080_s0 + $0xd0] sm:$0xff]   ;;  %v3122_v51 = vsel %vm478_vm1, %v241_v21, 0 }
  0xdf   :  { %v15053_v35 = vpop.f32.mrf.mxu0  ;;  %v15055_v19 = vpop.f32.mrf.mxu1 }
  0xe0   :  { %20315 = vst [vmem:[#allocation67_spill] sm:$0xff] %v15053_v35  ;;  %20316 = vst [vmem:[#allocation68_spill] sm:$0xff] %v15055_v19  ;;  %v15057_v36 = vpop.permute.xlu1 %1938  ;;  %v15059_v45 = vpop.permute.xlu0 %1934  ;;  %12337 = vmatpush3.bf16.xpose.msra.mxu0 %v2785_v8 }
  0xe1   :  { %20317 = vst [vmem:[#allocation69_spill] sm:$0xff] %v15057_v36  ;;  %20318 = vst [vmem:[#allocation70_spill] sm:$0xff] %v15059_v45  ;;  %v15062_v18 = vpop.f32.mrf.mxu0  ;;  %v15064_v38 = vpop.f32.mrf.mxu1  ;;  %13187 = vmatprep.subr.msk.bf16.mxu0 %vm478_vm1, %v197_v55 }
  0xe2   :  { %20319 = vst [vmem:[#allocation71_spill] sm:$0xff] %v15062_v18  ;;  %20320 = vst [vmem:[#allocation72_spill] sm:$0xff] %v15064_v38  ;;  %2182 = vbcast.lane.b32.xlu1 %v15013_v10, 296  ;;  %2178 = vbcast.lane.b32.xlu0 %v15013_v10, 288  ;;  %v3125_v38 = vsel %vm478_vm1, %v243_v22, 0 }
  0xe3   :  { %v15072_v41 = vpop.f32.mrf.mxu0  ;;  %v15074_v31 = vpop.f32.mrf.mxu1  ;;  %12369 = vmatpush3.bf16.xpose.msra.mxu1 %v2946_v54 }
  0xe4   :  { %20321 = vst [vmem:[#allocation73_spill] sm:$0xff] %v15072_v41  ;;  %20322 = vst [vmem:[#allocation74_spill] sm:$0xff] %v15074_v31  ;;  %v15076_v0 = vpop.permute.xlu1 %1946  ;;  %v15078_v8 = vpop.permute.xlu0 %1942  ;;  %13195 = vmatprep.subr.msk.bf16.mxu1 %vm478_vm1, %v213_v50  ;;  %v14124_v31 = vld [vmem:[%s20083_s2 + $0x20] sm:$0xff]  }
  0xe5   :  { %20323 = vst [vmem:[#allocation75_spill] sm:$0xff] %v15076_v0  ;;  %20324 = vst [vmem:[#allocation76_spill] sm:$0xff] %v15078_v8  ;;  %v15081_v18 = vpop.f32.mrf.mxu0  ;;  %v15083_v30 = vpop.f32.mrf.mxu1 }
  0xe6   :  { %20325 = vst [vmem:[#allocation77_spill] sm:$0xff] %v15081_v18  ;;  %20326 = vst [vmem:[#allocation78_spill] sm:$0xff] %v15083_v30  ;;  %2190 = vbcast.lane.b32.xlu1 %v15013_v10, 312  ;;  %2186 = vbcast.lane.b32.xlu0 %v15013_v10, 304 }
  0xe7   :  { %v15091_v54 = vpop.f32.mrf.mxu0  ;;  %v15093_v0 = vpop.f32.mrf.mxu1 }
  0xe8   :  { %20327 = vst [vmem:[#allocation79_spill] sm:$0xff] %v15091_v54  ;;  %20328 = vst [vmem:[#allocation80_spill] sm:$0xff] %v15093_v0  ;;  %v15095_v8 = vpop.permute.xlu1 %1954  ;;  %v15097_v33 = vpop.permute.xlu0 %1950  ;;  %12339 = vmatpush3.bf16.xpose.msra.mxu0 %v2782_v34 }
  0xe9   :  { %20329 = vst [vmem:[#allocation81_spill] sm:$0xff] %v15095_v8  ;;  %20330 = vst [vmem:[#allocation82_spill] sm:$0xff] %v15097_v33  ;;  %v15100_v55 = vpop.f32.mrf.mxu0  ;;  %v15102_v18 = vpop.f32.mrf.mxu1  ;;  %13196 = vmatprep.subr.msk.bf16.mxu0 %vm478_vm1, %v243_v22  ;;  %v15969_v33 = vadd.s32 8, %v14360_v16 }
  0xea   :  { %20331 = vst [vmem:[#allocation83_spill] sm:$0xff] %v15100_v55  ;;  %20332 = vst [vmem:[#allocation84_spill] sm:$0xff] %v15102_v18  ;;  %2198 = vbcast.lane.b32.xlu1 %v15013_v10, 328  ;;  %2194 = vbcast.lane.b32.xlu0 %v15013_v10, 320 }
  0xeb   :  { %v15110_v30 = vpop.f32.mrf.mxu0  ;;  %v15112_v56 = vpop.f32.mrf.mxu1  ;;  %12371 = vmatpush3.bf16.xpose.msra.mxu1 %v2943_v62  ;;  %v257_v62 = vld [vmem:[%s20082_s1 + $0x170] sm:$0xff]   ;;  %20513 = vst [vmem:[#allocation265_spill] sm:$0xff] %v15969_v33 }
  0xec   :  { %20333 = vst [vmem:[#allocation85_spill] sm:$0xff] %v15110_v30  ;;  %20334 = vst [vmem:[#allocation86_spill] sm:$0xff] %v15112_v56  ;;  %v15114_v50 = vpop.permute.xlu1 %1965  ;;  %v15116_v34 = vpop.permute.xlu0 %1961  ;;  %13204 = vmatprep.subr.msk.bf16.mxu1 %vm478_vm1, %v259_v12  ;;  %v3283_v40 = vsel %vm478_vm1, %v257_v62, 0  ;;  %v14126_v30 = vld [vmem:[%s20083_s2 + $0x10] sm:$0xff]  }
  0xed   :  { %20335 = vst [vmem:[#allocation87_spill] sm:$0xff] %v15114_v50  ;;  %20336 = vst [vmem:[#allocation88_spill] sm:$0xff] %v15116_v34  ;;  %v15119_v55 = vpop.f32.mrf.mxu0  ;;  %v15121_v18 = vpop.f32.mrf.mxu1  ;;  %v14072_v34 = vld [vmem:[%s20080_s0 + $0x88] sm:$0xff]  }
  0xee   :  { %20337 = vst [vmem:[#allocation89_spill] sm:$0xff] %v15119_v55  ;;  %20338 = vst [vmem:[#allocation90_spill] sm:$0xff] %v15121_v18  ;;  %2206 = vbcast.lane.b32.xlu1 %v15013_v10, 344  ;;  %2202 = vbcast.lane.b32.xlu0 %v15013_v10, 336  ;;  %v14073_v18 = vld [vmem:[%s20080_s0 + $0x90] sm:$0xff]  }
  0xef   :  { %v15129_v56 = vpop.f32.mrf.mxu0  ;;  %v15131_v50 = vpop.f32.mrf.mxu1  ;;  %12341 = vmatmul.mubr.msk.bf16.vlgmr.msra.gmra.mxu0 %vm478_vm1, %v14072_v34  ;;  %v239_v34 = vld [vmem:[%s20082_s1 + $0x128] sm:$0xff]  }
  0xf0   :  { %20339 = vst [vmem:[#allocation91_spill] sm:$0xff] %v15129_v56  ;;  %20340 = vst [vmem:[#allocation92_spill] sm:$0xff] %v15131_v50  ;;  %v15137_v55 = vpop.permute.xlu1 %1973  ;;  %v15139_v22 = vpop.permute.xlu0 %1969  ;;  %12389 = vmatpush3.bf16.xpose.msra.mxu0 %v3125_v38  ;;  %12344 = vmatprep.mubr.msk.bf16.mxu0 %vm478_vm1, %v14073_v18  ;;  %v15154_v38 = vsub.s32 7, %v14360_v16  ;;  %v16043_v56 = vadd.s32 32, %v14360_v16 }
  0xf1   :  { %20341 = vst [vmem:[#allocation93_spill] sm:$0xff] %v15137_v55  ;;  %20342 = vst [vmem:[#allocation94_spill] sm:$0xff] %v15139_v22  ;;  %v15145_v53 = vpop.f32.mrf.mxu0  ;;  %v15147_v15 = vpop.f32.mrf.mxu1  ;;  %13197 = vmatprep.subr.msk.bf16.mxu0 %vm478_vm1, %v241_v21  ;;  %v14076_v21 = vld [vmem:[%s20080_s0 + $0x98] sm:$0xff]  }
  0xf2   :  { %20343 = vst [vmem:[#allocation95_spill] sm:$0xff] %v15145_v53  ;;  %20344 = vst [vmem:[#allocation96_spill] sm:$0xff] %v15147_v15  ;;  %2214 = vbcast.lane.b32.xlu1 %v15013_v10, 360  ;;  %2210 = vbcast.lane.b32.xlu0 %v15013_v10, 352  ;;  %v14074_v15 = vld [vmem:[%s20080_s0 + $0xc8] sm:$0xff]  }
  0xf3   :  { %20345 = vst [vmem:[#allocation97_spill] sm:$0xff] %v15154_v38  ;;  %v15159_v18 = vpop.f32.mrf.mxu0  ;;  %v15161_v53 = vpop.f32.mrf.mxu1  ;;  %12373 = vmatmul.mubr.msk.bf16.vlgmr.msra.gmra.mxu1 %vm478_vm1, %v14074_v15  ;;  %20527 = vst [vmem:[#allocation270_spill] sm:$0xff] %v16043_v56 }
  0xf4   :  { %20346 = vst [vmem:[#allocation98_spill] sm:$0xff] %v15159_v18  ;;  %20347 = vst [vmem:[#allocation99_spill] sm:$0xff] %v15161_v53  ;;  %v15167_v12 = vpop.permute.xlu1 %1981  ;;  %v15169_v55 = vpop.permute.xlu0 %1977  ;;  %12421 = vmatpush3.bf16.xpose.msra.mxu1 %v3286_v52  ;;  %12376 = vmatprep.mubr.msk.bf16.mxu1 %vm478_vm1, %v14075_v13  ;;  %v15185_v52 = vrot.slane %v14396_v29, %v15154_v38  ;;  %v255_v13 = vld [vmem:[%s20082_s1 + $0x168] sm:$0xff]   ;;  %v14077_v29 = vld [vmem:[%s20080_s0 + $0xa0] sm:$0xff]  }
  0xf5   :  { %20348 = vst [vmem:[#allocation100_spill] sm:$0xff] %v15167_v12  ;;  %20349 = vst [vmem:[#allocation101_spill] sm:$0xff] %v15169_v55  ;;  %v15175_v11 = vpop.f32.mrf.mxu0  ;;  %v15177_v53 = vpop.f32.mrf.mxu1  ;;  %13205 = vmatprep.subr.msk.bf16.mxu1 %vm478_vm1, %v257_v62 }
  0xf6   :  { %20350 = vst [vmem:[#allocation102_spill] sm:$0xff] %v15175_v11  ;;  %20351 = vst [vmem:[#allocation103_spill] sm:$0xff] %v15177_v53  ;;  %2222 = vbcast.lane.b32.xlu1 %v15013_v10, 376  ;;  %2218 = vbcast.lane.b32.xlu0 %v15013_v10, 368 }
  0xf7   :  { %v15190_v15 = vpop.f32.mrf.mxu0  ;;  %v15192_v55 = vpop.f32.mrf.mxu1  ;;  %12345 = vmatmul.mubr.msk.bf16.gmra.mxu0 %vm478_vm1, %v14076_v21 }
  0xf8   :  { %20352 = vst [vmem:[#allocation104_spill] sm:$0xff] %v15190_v15  ;;  %20353 = vst [vmem:[#allocation105_spill] sm:$0xff] %v15192_v55  ;;  %v15198_v12 = vpop.permute.xlu1 %1989  ;;  %v15200_v10 = vpop.permute.xlu0 %1985  ;;  %12391 = vmatpush3.bf16.xpose.msra.mxu0 %v3122_v51  ;;  %12348 = vmatprep.mubr.msk.bf16.mxu0 %vm478_vm1, %v14077_v29  ;;  %v237_v51 = vld [vmem:[%s20082_s1 + $0x120] sm:$0xff]   ;;  %v14078_v29 = vld [vmem:[%s20080_s0 + $0xd8] sm:$0xff]   ;;  %v3119_v55 = vsel %vm478_vm1, %v239_v34, 0 }
  0xf9   :  { %20354 = vst [vmem:[#allocation106_spill] sm:$0xff] %v15198_v12  ;;  %20355 = vst [vmem:[#allocation107_spill] sm:$0xff] %v15200_v10  ;;  %v15206_v53 = vpop.f32.mrf.mxu0  ;;  %v15208_v11 = vpop.f32.mrf.mxu1  ;;  %13198 = vmatprep.subr.msk.bf16.mxu0 %vm478_vm1, %v239_v34  ;;  %v3280_v10 = vsel %vm478_vm1, %v255_v13, 0  ;;  %v3116_v50 = vsel %vm478_vm1, %v237_v51, 0 }
  0xfa   :  { %20356 = vst [vmem:[#allocation108_spill] sm:$0xff] %v15206_v53  ;;  %20357 = vst [vmem:[#allocation109_spill] sm:$0xff] %v15208_v11  ;;  %2233 = vbcast.lane.b32.xlu1 %v15185_v52, 264  ;;  %2229 = vbcast.lane.b32.xlu0 %v15185_v52, 256  ;;  %v14079_v53 = vld [vmem:[%s20080_s0 + $0xe0] sm:$0xff]  }
  0xfb   :  { %v15217_v21 = vpop.f32.mrf.mxu0  ;;  %v15219_v61 = vpop.f32.mrf.mxu1  ;;  %12377 = vmatmul.mubr.msk.bf16.gmra.mxu1 %vm478_vm1, %v14078_v29 }
  0xfc   :  { %20358 = vst [vmem:[#allocation110_spill] sm:$0xff] %v15217_v21  ;;  %20359 = vst [vmem:[#allocation111_spill] sm:$0xff] %v15219_v61  ;;  %v15225_v11 = vpop.permute.xlu1 %1997  ;;  %v15227_v62 = vpop.permute.xlu0 %1993  ;;  %12423 = vmatpush3.bf16.xpose.msra.mxu1 %v3283_v40  ;;  %12380 = vmatprep.mubr.msk.bf16.mxu1 %vm478_vm1, %v14079_v53  ;;  %v253_v40 = vld [vmem:[%s20082_s1 + $0x160] sm:$0xff]   ;;  %v14080_v53 = vld [vmem:[%s20080_s0 + $0xa8] sm:$0xff]  }
  0xfd   :  { %20360 = vst [vmem:[#allocation112_spill] sm:$0xff] %v15225_v11  ;;  %20361 = vst [vmem:[#allocation113_spill] sm:$0xff] %v15227_v62  ;;  %v15233_v12 = vpop.f32.mrf.mxu0  ;;  %v15235_v61 = vpop.f32.mrf.mxu1  ;;  %13206 = vmatprep.subr.msk.bf16.mxu1 %vm478_vm1, %v255_v13 }
  0xfe   :  { %20362 = vst [vmem:[#allocation114_spill] sm:$0xff] %v15233_v12  ;;  %20363 = vst [vmem:[#allocation115_spill] sm:$0xff] %v15235_v61  ;;  %2241 = vbcast.lane.b32.xlu1 %v15185_v52, 280  ;;  %2237 = vbcast.lane.b32.xlu0 %v15185_v52, 272  ;;  %v14081_v61 = vld [vmem:[%s20080_s0 + $0xb0] sm:$0xff]  }
  0xff   :  { %v15244_v29 = vpop.f32.mrf.mxu0  ;;  %v15246_v62 = vpop.f32.mrf.mxu1  ;;  %12349 = vmatmul.mubr.msk.bf16.gmra.mxu0 %vm478_vm1, %v14080_v53 }
 0x100   :  { %20364 = vst [vmem:[#allocation116_spill] sm:$0xff] %v15244_v29  ;;  %20365 = vst [vmem:[#allocation117_spill] sm:$0xff] %v15246_v62  ;;  %v15252_v34 = vpop.permute.xlu1 %2005  ;;  %v15254_v11 = vpop.permute.xlu0 %2001  ;;  %12393 = vmatpush3.bf16.xpose.msra.mxu0 %v3119_v55  ;;  %12352 = vmatprep.mubr.msk.bf16.mxu0 %vm478_vm1, %v14081_v61  ;;  %v235_v55 = vld [vmem:[%s20082_s1 + $0x118] sm:$0xff]   ;;  %v14082_v61 = vld [vmem:[%s20080_s0 + $0xe8] sm:$0xff]  }
 0x101   :  { %20366 = vst [vmem:[#allocation118_spill] sm:$0xff] %v15252_v34  ;;  %20367 = vst [vmem:[#allocation119_spill] sm:$0xff] %v15254_v11  ;;  %v15260_v12 = vpop.f32.mrf.mxu0  ;;  %v15262_v62 = vpop.f32.mrf.mxu1  ;;  %13199 = vmatprep.subr.msk.bf16.mxu0 %vm478_vm1, %v237_v51 }
 0x102   :  { %20368 = vst [vmem:[#allocation120_spill] sm:$0xff] %v15260_v12  ;;  %20369 = vst [vmem:[#allocation121_spill] sm:$0xff] %v15262_v62  ;;  %2249 = vbcast.lane.b32.xlu1 %v15185_v52, 296  ;;  %2245 = vbcast.lane.b32.xlu0 %v15185_v52, 288  ;;  %v14083_v12 = vld [vmem:[%s20080_s0 + $0xf0] sm:$0xff]  }
 0x103   :  { %v15271_v53 = vpop.f32.mrf.mxu0  ;;  %v15273_v34 = vpop.f32.mrf.mxu1  ;;  %12381 = vmatmul.mubr.msk.bf16.gmra.mxu1 %vm478_vm1, %v14082_v61 }
 0x104   :  { %20370 = vst [vmem:[#allocation122_spill] sm:$0xff] %v15271_v53  ;;  %20371 = vst [vmem:[#allocation123_spill] sm:$0xff] %v15273_v34  ;;  %v15279_v62 = vpop.permute.xlu1 %2013  ;;  %v15281_v13 = vpop.permute.xlu0 %2009  ;;  %12425 = vmatpush3.bf16.xpose.msra.mxu1 %v3280_v10  ;;  %12384 = vmatprep.mubr.msk.bf16.mxu1 %vm478_vm1, %v14083_v12  ;;  %v251_v10 = vld [vmem:[%s20082_s1 + $0x158] sm:$0xff]   ;;  %v20514_v53 = vlaneseq }
 0x105   :  { %20372 = vst [vmem:[#allocation124_spill] sm:$0xff] %v15279_v62  ;;  %20373 = vst [vmem:[#allocation125_spill] sm:$0xff] %v15281_v13  ;;  %v15287_v11 = vpop.f32.mrf.mxu0  ;;  %v15289_v34 = vpop.f32.mrf.mxu1  ;;  %13207 = vmatprep.subr.msk.bf16.mxu1 %vm478_vm1, %v253_v40  ;;  %v14084_v12 = vld [vmem:[%s20080_s0 + $0xb8] sm:$0xff]  }
 0x106   :  { %20374 = vst [vmem:[#allocation126_spill] sm:$0xff] %v15287_v11  ;;  %20375 = vst [vmem:[#allocation127_spill] sm:$0xff] %v15289_v34  ;;  %2257 = vbcast.lane.b32.xlu1 %v15185_v52, 312  ;;  %2253 = vbcast.lane.b32.xlu0 %v15185_v52, 304  ;;  %v3277_v34 = vsel %vm478_vm1, %v253_v40, 0  ;;  %v14085_v11 = vld [vmem:[%s20080_s0 + $0x100] sm:$0xff]  }
 0x107   :  { %v15298_v61 = vpop.f32.mrf.mxu0  ;;  %v15300_v13 = vpop.f32.mrf.mxu1  ;;  %12353 = vmatmul.mubr.msk.bf16.gmra.mxu0 %vm478_vm1, %v14084_v12 }
 0x108   :  { %20376 = vst [vmem:[#allocation128_spill] sm:$0xff] %v15298_v61  ;;  %20377 = vst [vmem:[#allocation129_spill] sm:$0xff] %v15300_v13  ;;  %v15306_v51 = vpop.permute.xlu1 %2021  ;;  %v15308_v62 = vpop.permute.xlu0 %2017  ;;  %12395 = vmatpush3.bf16.xpose.msra.mxu0 %v3116_v50  ;;  %12404 = vmatprep.mubr.msk.bf16.mxu0 %vm478_vm1, %v14085_v11  ;;  %v233_v50 = vld [vmem:[%s20082_s1 + $0x110] sm:$0xff]   ;;  %v14086_v11 = vld [vmem:[%s20080_s0 + $0xf8] sm:$0xff]  }
 0x109   :  { %20378 = vst [vmem:[#allocation130_spill] sm:$0xff] %v15306_v51  ;;  %20379 = vst [vmem:[#allocation131_spill] sm:$0xff] %v15308_v62  ;;  %v15315_v13 = vpop.f32.mrf.mxu0  ;;  %13200 = vmatprep.subr.msk.bf16.mxu0 %vm478_vm1, %v235_v55  ;;  %v15323_v12 = vpop.f32.mrf.mxu1  ;;  %v14087_v62 = vld [vmem:[%s20080_s0 + $0x140] sm:$0xff]  }
 0x10a   :  { %20380 = vst [vmem:[#allocation132_spill] sm:$0xff] %v15315_v13  ;;  %2265 = vbcast.lane.b32.xlu1 %v15185_v52, 328  ;;  %2261 = vbcast.lane.b32.xlu0 %v15185_v52, 320  ;;  %20381 = vst [vmem:[#allocation133_spill] sm:$0xff] %v15323_v12 }
 0x10b   :  { %v15325_v40 = vpop.f32.mrf.mxu0  ;;  %12385 = vmatmul.mubr.msk.bf16.gmra.mxu1 %vm478_vm1, %v14086_v11  ;;  %v15341_v22 = vpop.f32.mrf.mxu1  ;;  %v249_v11 = vld [vmem:[%s20082_s1 + $0x150] sm:$0xff]  }
 0x10c   :  { %20382 = vst [vmem:[#allocation134_spill] sm:$0xff] %v15325_v40  ;;  %v15331_v13 = vpop.permute.xlu1 %2032  ;;  %v15333_v51 = vpop.permute.xlu0 %2028  ;;  %12427 = vmatpush3.bf16.xpose.msra.mxu1 %v3277_v34  ;;  %12436 = vmatprep.mubr.msk.bf16.mxu1 %vm478_vm1, %v14087_v62  ;;  %20386 = vst [vmem:[#allocation138_spill] sm:$0xff] %v15341_v22  ;;  %v3113_v40 = vsel %vm478_vm1, %v235_v55, 0  ;;  %v3274_v22 = vsel %vm478_vm1, %v251_v10, 0  ;;  %v3271_v8 = vsel %vm478_vm1, %v249_v11, 0 }
 0x10d   :  { %20383 = vst [vmem:[#allocation135_spill] sm:$0xff] %v15331_v13  ;;  %20384 = vst [vmem:[#allocation136_spill] sm:$0xff] %v15333_v51  ;;  %v15339_v12 = vpop.f32.mrf.mxu0  ;;  %13208 = vmatprep.subr.msk.bf16.mxu1 %vm478_vm1, %v251_v10  ;;  %v15358_v55 = vpop.f32.mrf.mxu1  ;;  %v231_v51 = vld [vmem:[%s20082_s1 + $0x108] sm:$0xff]  }
 0x10e   :  { %20385 = vst [vmem:[#allocation137_spill] sm:$0xff] %v15339_v12  ;;  %2273 = vbcast.lane.b32.xlu1 %v15185_v52, 344  ;;  %2269 = vbcast.lane.b32.xlu0 %v15185_v52, 336  ;;  %20391 = vst [vmem:[#allocation143_spill] sm:$0xff] %v15358_v55  ;;  %v247_v10 = vld [vmem:[%s20082_s1 + $0x148] sm:$0xff]  }
 0x10f   :  { %v15350_v34 = vpop.f32.mrf.mxu0 }
 0x110   :  { %20387 = vst [vmem:[#allocation139_spill] sm:$0xff] %v15350_v34  ;;  %v15352_v13 = vpop.permute.xlu1 %2040  ;;  %v15354_v62 = vpop.permute.xlu0 %2036  ;;  %12397 = vmatpush3.bf16.xpose.msra.mxu0 %v3113_v40 }
 0x111   :  { %20388 = vst [vmem:[#allocation140_spill] sm:$0xff] %v15352_v13  ;;  %20389 = vst [vmem:[#allocation141_spill] sm:$0xff] %v15354_v62  ;;  %v15356_v12 = vpop.f32.mrf.mxu0  ;;  %13201 = vmatprep.subr.msk.bf16.mxu0 %vm478_vm1, %v233_v50  ;;  %v3110_v62 = vsel %vm478_vm1, %v233_v50, 0 }
 0x112   :  { %20390 = vst [vmem:[#allocation142_spill] sm:$0xff] %v15356_v12  ;;  %2281 = vbcast.lane.b32.xlu1 %v15185_v52, 360  ;;  %2277 = vbcast.lane.b32.xlu0 %v15185_v52, 352  ;;  %v15375_v12 = vpop.f32.mrf.mxu1 }
 0x113   :  { %v15367_v13 = vpop.f32.mrf.mxu0  ;;  %20396 = vst [vmem:[#allocation148_spill] sm:$0xff] %v15375_v12 }
 0x114   :  { %20392 = vst [vmem:[#allocation144_spill] sm:$0xff] %v15367_v13  ;;  %v15369_v34 = vpop.permute.xlu1 %2048  ;;  %v15371_v40 = vpop.permute.xlu0 %2044  ;;  %12429 = vmatpush3.bf16.xpose.msra.mxu1 %v3274_v22  ;;  %v15387_v22 = vld [vmem:[%s20081_s3] sm:$0xff] }
 0x115   :  { %20393 = vst [vmem:[#allocation145_spill] sm:$0xff] %v15369_v34  ;;  %20394 = vst [vmem:[#allocation146_spill] sm:$0xff] %v15371_v40  ;;  %v15373_v55 = vpop.f32.mrf.mxu0  ;;  %13209 = vmatprep.subr.msk.bf16.mxu1 %vm478_vm1, %v249_v11  ;;  %v15391_v34 = vrot.slane %v15387_v22, %v14382_v24  ;;  %v15401_v13 = vpop.f32.mrf.mxu1  ;;  %v245_v11 = vld [vmem:[%s20082_s1 + $0x140] sm:$0xff]  }
 0x116   :  { %20395 = vst [vmem:[#allocation147_spill] sm:$0xff] %v15373_v55  ;;  %2289 = vbcast.lane.b32.xlu1 %v15185_v52, 376  ;;  %2285 = vbcast.lane.b32.xlu0 %v15185_v52, 368  ;;  %20401 = vst [vmem:[#allocation153_spill] sm:$0xff] %v15401_v13  ;;  %v229_v52 = vld [vmem:[%s20082_s1 + $0x100] sm:$0xff]  }
 0x117   :  { %v15393_v50 = vpop.f32.mrf.mxu0 }
 0x118   :  { %20397 = vst [vmem:[#allocation149_spill] sm:$0xff] %v15393_v50  ;;  %v15395_v55 = vpop.permute.xlu1 %2056  ;;  %v15397_v12 = vpop.permute.xlu0 %2052  ;;  %12399 = vmatpush3.bf16.xpose.msra.mxu0 %v3110_v62 }
 0x119   :  { %20398 = vst [vmem:[#allocation150_spill] sm:$0xff] %v15395_v55  ;;  %20399 = vst [vmem:[#allocation151_spill] sm:$0xff] %v15397_v12  ;;  %v15399_v40 = vpop.f32.mrf.mxu0  ;;  %13202 = vmatprep.subr.msk.bf16.mxu0 %vm478_vm1, %v231_v51  ;;  %v3107_v12 = vsel %vm478_vm1, %v231_v51, 0 }
 0x11a   :  { %20400 = vst [vmem:[#allocation152_spill] sm:$0xff] %v15399_v40  ;;  %3751 = vbcast.lane.b32.xlu1 %v15391_v34, 264  ;;  %3747 = vbcast.lane.b32.xlu0 %v15391_v34, 256  ;;  %v15418_v40 = vpop.f32.mrf.mxu1 }
 0x11b   :  { %v15410_v55 = vpop.f32.mrf.mxu0  ;;  %20406 = vst [vmem:[#allocation158_spill] sm:$0xff] %v15418_v40  ;;  %v275_v40 = vld [vmem:[%s20082_s1 + $0x1b8] sm:$0xff]  }
 0x11c   :  { %20402 = vst [vmem:[#allocation154_spill] sm:$0xff] %v15410_v55  ;;  %v15412_v50 = vpop.permute.xlu1 %2064  ;;  %v15414_v62 = vpop.permute.xlu0 %2060  ;;  %12431 = vmatpush3.bf16.xpose.msra.mxu1 %v3271_v8  ;;  %v3268_v55 = vsel %vm478_vm1, %v247_v10, 0 }
 0x11d   :  { %20403 = vst [vmem:[#allocation155_spill] sm:$0xff] %v15412_v50  ;;  %20404 = vst [vmem:[#allocation156_spill] sm:$0xff] %v15414_v62  ;;  %v15416_v13 = vpop.f32.mrf.mxu0  ;;  %13210 = vmatprep.subr.msk.bf16.mxu1 %vm478_vm1, %v247_v10  ;;  %v15435_v51 = vpop.f32.mrf.mxu1  ;;  %v291_v10 = vld [vmem:[%s20082_s1 + $0x1f8] sm:$0xff]  }
 0x11e   :  { %20405 = vst [vmem:[#allocation157_spill] sm:$0xff] %v15416_v13  ;;  %3759 = vbcast.lane.b32.xlu1 %v15391_v34, 280  ;;  %3755 = vbcast.lane.b32.xlu0 %v15391_v34, 272  ;;  %20411 = vst [vmem:[#allocation163_spill] sm:$0xff] %v15435_v51 }
 0x11f   :  { %v15427_v50 = vpop.f32.mrf.mxu0 }
 0x120   :  { %20407 = vst [vmem:[#allocation159_spill] sm:$0xff] %v15427_v50  ;;  %v15429_v62 = vpop.permute.xlu1 %2072  ;;  %v15431_v8 = vpop.permute.xlu0 %2068  ;;  %12401 = vmatpush3.bf16.xpose.msra.mxu0 %v3107_v12 }
 0x121   :  { %20408 = vst [vmem:[#allocation160_spill] sm:$0xff] %v15429_v62  ;;  %20409 = vst [vmem:[#allocation161_spill] sm:$0xff] %v15431_v8  ;;  %v15433_v13 = vpop.f32.mrf.mxu0  ;;  %13203 = vmatprep.subr.msk.bf16.mxu0 %vm478_vm1, %v229_v52  ;;  %v3104_v8 = vsel %vm478_vm1, %v229_v52, 0  ;;  %v273_v52 = vld [vmem:[%s20082_s1 + $0x1b0] sm:$0xff]  }
 0x122   :  { %20410 = vst [vmem:[#allocation162_spill] sm:$0xff] %v15433_v13  ;;  %3767 = vbcast.lane.b32.xlu1 %v15391_v34, 296  ;;  %3763 = vbcast.lane.b32.xlu0 %v15391_v34, 288  ;;  %v15452_v13 = vpop.f32.mrf.mxu1 }
 0x123   :  { %v15444_v62 = vpop.f32.mrf.mxu0  ;;  %20416 = vst [vmem:[#allocation168_spill] sm:$0xff] %v15452_v13  ;;  %v3265_v13 = vsel %vm478_vm1, %v245_v11, 0 }
 0x124   :  { %20412 = vst [vmem:[#allocation164_spill] sm:$0xff] %v15444_v62  ;;  %v15446_v50 = vpop.permute.xlu1 %2080  ;;  %v15448_v12 = vpop.permute.xlu0 %2076  ;;  %12433 = vmatpush3.bf16.xpose.msra.mxu1 %v3268_v55 }
 0x125   :  { %20413 = vst [vmem:[#allocation165_spill] sm:$0xff] %v15446_v50  ;;  %20414 = vst [vmem:[#allocation166_spill] sm:$0xff] %v15448_v12  ;;  %v15450_v51 = vpop.f32.mrf.mxu0  ;;  %13211 = vmatprep.subr.msk.bf16.mxu1 %vm478_vm1, %v245_v11  ;;  %v289_v11 = vld [vmem:[%s20082_s1 + $0x1f0] sm:$0xff]  }
 0x126   :  { %20415 = vst [vmem:[#allocation167_spill] sm:$0xff] %v15450_v51  ;;  %3775 = vbcast.lane.b32.xlu1 %v15391_v34, 312  ;;  %3771 = vbcast.lane.b32.xlu0 %v15391_v34, 304  ;;  %v15467_v51 = vpop.f32.mrf.mxu1 }
 0x127   :  { %v15465_v55 = vpop.f32.mrf.mxu0  ;;  %20420 = vst [vmem:[#allocation172_spill] sm:$0xff] %v15467_v51 }
 0x128   :  { %v15461_v50 = vpop.permute.xlu1 %2088  ;;  %v15463_v12 = vpop.permute.xlu0 %2084  ;;  %12403 = vmatpush3.bf16.xpose.msra.mxu0 %v3104_v8  ;;  %20419 = vst [vmem:[#allocation171_spill] sm:$0xff] %v15465_v55  ;;  %v3447_v55 = vsel %vm478_vm1, %v275_v40, 0 }
 0x129   :  { %20417 = vst [vmem:[#allocation169_spill] sm:$0xff] %v15461_v50  ;;  %20418 = vst [vmem:[#allocation170_spill] sm:$0xff] %v15463_v12  ;;  %13212 = vmatprep.subr.msk.bf16.mxu0 %vm478_vm1, %v275_v40  ;;  %v15480_v8 = vpop.f32.mrf.mxu0  ;;  %v15482_v51 = vpop.f32.mrf.mxu1 }
 0x12a   :  { %3783 = vbcast.lane.b32.xlu1 %v15391_v34, 328  ;;  %3779 = vbcast.lane.b32.xlu0 %v15391_v34, 320  ;;  %20423 = vst [vmem:[#allocation175_spill] sm:$0xff] %v15480_v8  ;;  %20424 = vst [vmem:[#allocation176_spill] sm:$0xff] %v15482_v51 }
 0x12b   :  { %v15505_v8 = vpop.f32.mrf.mxu1 }
 0x12c   :  { %v15476_v50 = vpop.permute.xlu1 %2099  ;;  %v15478_v12 = vpop.permute.xlu0 %2095  ;;  %12435 = vmatpush3.bf16.xpose.msra.mxu1 %v3265_v13  ;;  %v14089_v13 = vld [vmem:[%s20080_s0 + $0x108] sm:$0xff]   ;;  %20428 = vst [vmem:[#allocation180_spill] sm:$0xff] %v15505_v8 }
 0x12d   :  { %20421 = vst [vmem:[#allocation173_spill] sm:$0xff] %v15476_v50  ;;  %20422 = vst [vmem:[#allocation174_spill] sm:$0xff] %v15478_v12  ;;  %13220 = vmatprep.subr.msk.bf16.mxu1 %vm478_vm1, %v291_v10  ;;  %v15491_v50 = vpop.f32.mrf.mxu0  ;;  %v14090_v12 = vld [vmem:[%s20080_s0 + $0x110] sm:$0xff]  }
 0x12e   :  { %3791 = vbcast.lane.b32.xlu1 %v15391_v34, 344  ;;  %3787 = vbcast.lane.b32.xlu0 %v15391_v34, 336  ;;  %20425 = vst [vmem:[#allocation177_spill] sm:$0xff] %v15491_v50  ;;  %v271_v50 = vld [vmem:[%s20082_s1 + $0x1a8] sm:$0xff]  }
 0x12f   :  { %12405 = vmatmul.mubr.msk.bf16.vlgmr.msra.gmra.mxu0 %vm478_vm1, %v14089_v13  ;;  %v3608_v13 = vsel %vm478_vm1, %v291_v10, 0  ;;  %v14092_v10 = vld [vmem:[%s20080_s0 + $0x150] sm:$0xff]  }
 0x130   :  { %v15497_v51 = vpop.permute.xlu1 %2107  ;;  %v15499_v40 = vpop.permute.xlu0 %2103  ;;  %12453 = vmatpush3.bf16.xpose.msra.mxu0 %v3447_v55  ;;  %12408 = vmatprep.mubr.msk.bf16.mxu0 %vm478_vm1, %v14090_v12  ;;  %v14091_v12 = vld [vmem:[%s20080_s0 + $0x148] sm:$0xff]  }
 0x131   :  { %20426 = vst [vmem:[#allocation178_spill] sm:$0xff] %v15497_v51  ;;  %20427 = vst [vmem:[#allocation179_spill] sm:$0xff] %v15499_v40  ;;  %13213 = vmatprep.subr.msk.bf16.mxu0 %vm478_vm1, %v273_v52  ;;  %v15514_v55 = vpop.f32.mrf.mxu0  ;;  %v15528_v40 = vpop.f32.mrf.mxu1 }
 0x132   :  { %3799 = vbcast.lane.b32.xlu1 %v15391_v34, 360  ;;  %3795 = vbcast.lane.b32.xlu0 %v15391_v34, 352  ;;  %20429 = vst [vmem:[#allocation181_spill] sm:$0xff] %v15514_v55  ;;  %20432 = vst [vmem:[#allocation184_spill] sm:$0xff] %v15528_v40  ;;  %v3444_v55 = vsel %vm478_vm1, %v273_v52, 0  ;;  %v14093_v52 = vld [vmem:[%s20080_s0 + $0x118] sm:$0xff]  }
 0x133   :  { %12437 = vmatmul.mubr.msk.bf16.vlgmr.msra.gmra.mxu1 %vm478_vm1, %v14091_v12  ;;  %v287_v12 = vld [vmem:[%s20082_s1 + $0x1e8] sm:$0xff]  }
 0x134   :  { %v15520_v8 = vpop.permute.xlu1 %2115  ;;  %v15522_v51 = vpop.permute.xlu0 %2111  ;;  %12485 = vmatpush3.bf16.xpose.msra.mxu1 %v3608_v13  ;;  %12440 = vmatprep.mubr.msk.bf16.mxu1 %vm478_vm1, %v14092_v10  ;;  %v15539_v13 = vrot.slane %v15387_v22, %v14485_v49 }
 0x135   :  { %20430 = vst [vmem:[#allocation182_spill] sm:$0xff] %v15520_v8  ;;  %20431 = vst [vmem:[#allocation183_spill] sm:$0xff] %v15522_v51  ;;  %13221 = vmatprep.subr.msk.bf16.mxu1 %vm478_vm1, %v289_v11  ;;  %v15541_v8 = vpop.f32.mrf.mxu0  ;;  %v15555_v51 = vpop.f32.mrf.mxu1 }
 0x136   :  { %3807 = vbcast.lane.b32.xlu1 %v15391_v34, 376  ;;  %3803 = vbcast.lane.b32.xlu0 %v15391_v34, 368  ;;  %20433 = vst [vmem:[#allocation185_spill] sm:$0xff] %v15541_v8  ;;  %v14094_v34 = vld [vmem:[%s20080_s0 + $0x120] sm:$0xff]   ;;  %20436 = vst [vmem:[#allocation188_spill] sm:$0xff] %v15555_v51 }
 0x137   :  { %12409 = vmatmul.mubr.msk.bf16.gmra.mxu0 %vm478_vm1, %v14093_v52  ;;  %v269_v8 = vld [vmem:[%s20082_s1 + $0x1a0] sm:$0xff]   ;;  %v3605_v52 = vsel %vm478_vm1, %v289_v11, 0 }
 0x138   :  { %v15547_v10 = vpop.permute.xlu1 %2123  ;;  %v15549_v40 = vpop.permute.xlu0 %2119  ;;  %12455 = vmatpush3.bf16.xpose.msra.mxu0 %v3444_v55  ;;  %12412 = vmatprep.mubr.msk.bf16.mxu0 %vm478_vm1, %v14094_v34  ;;  %v14095_v34 = vld [vmem:[%s20080_s0 + $0x158] sm:$0xff]   ;;  %v14096_v11 = vld [vmem:[%s20080_s0 + $0x160] sm:$0xff]  }
 0x139   :  { %20434 = vst [vmem:[#allocation186_spill] sm:$0xff] %v15547_v10  ;;  %20435 = vst [vmem:[#allocation187_spill] sm:$0xff] %v15549_v40  ;;  %13214 = vmatprep.subr.msk.bf16.mxu0 %vm478_vm1, %v271_v50  ;;  %v15564_v55 = vpop.f32.mrf.mxu0  ;;  %v15578_v40 = vpop.f32.mrf.mxu1 }
 0x13a   :  { %3818 = vbcast.lane.b32.xlu1 %v15539_v13, 264  ;;  %3814 = vbcast.lane.b32.xlu0 %v15539_v13, 256  ;;  %20437 = vst [vmem:[#allocation189_spill] sm:$0xff] %v15564_v55  ;;  %20440 = vst [vmem:[#allocation192_spill] sm:$0xff] %v15578_v40  ;;  %v3441_v55 = vsel %vm478_vm1, %v271_v50, 0  ;;  %v14098_v40 = vld [vmem:[%s20080_s0 + $0x130] sm:$0xff]  }
 0x13b   :  { %12441 = vmatmul.mubr.msk.bf16.gmra.mxu1 %vm478_vm1, %v14095_v34  ;;  %v285_v34 = vld [vmem:[%s20082_s1 + $0x1e0] sm:$0xff]  }
 0x13c   :  { %v15570_v51 = vpop.permute.xlu1 %2131  ;;  %v15572_v10 = vpop.permute.xlu0 %2127  ;;  %12487 = vmatpush3.bf16.xpose.msra.mxu1 %v3605_v52  ;;  %12444 = vmatprep.mubr.msk.bf16.mxu1 %vm478_vm1, %v14096_v11  ;;  %v14097_v11 = vld [vmem:[%s20080_s0 + $0x128] sm:$0xff]  }
 0x13d   :  { %20438 = vst [vmem:[#allocation190_spill] sm:$0xff] %v15570_v51  ;;  %20439 = vst [vmem:[#allocation191_spill] sm:$0xff] %v15572_v10  ;;  %13222 = vmatprep.subr.msk.bf16.mxu1 %vm478_vm1, %v287_v12  ;;  %v15587_v52 = vpop.f32.mrf.mxu0  ;;  %v15601_v10 = vpop.f32.mrf.mxu1 }
 0x13e   :  { %3826 = vbcast.lane.b32.xlu1 %v15539_v13, 280  ;;  %3822 = vbcast.lane.b32.xlu0 %v15539_v13, 272  ;;  %20441 = vst [vmem:[#allocation193_spill] sm:$0xff] %v15587_v52  ;;  %20444 = vst [vmem:[#allocation196_spill] sm:$0xff] %v15601_v10  ;;  %v3602_v52 = vsel %vm478_vm1, %v287_v12, 0  ;;  %v14100_v12 = vld [vmem:[%s20080_s0 + $0x170] sm:$0xff]  }
 0x13f   :  { %12413 = vmatmul.mubr.msk.bf16.gmra.mxu0 %vm478_vm1, %v14097_v11  ;;  %v15610_v11 = vpop.f32.mrf.mxu0 }
 0x140   :  { %v15593_v51 = vpop.permute.xlu1 %2139  ;;  %v15595_v50 = vpop.permute.xlu0 %2135  ;;  %12457 = vmatpush3.bf16.xpose.msra.mxu0 %v3441_v55  ;;  %12416 = vmatprep.mubr.msk.bf16.mxu0 %vm478_vm1, %v14098_v40  ;;  %v267_v55 = vld [vmem:[%s20082_s1 + $0x198] sm:$0xff]   ;;  %20445 = vst [vmem:[#allocation197_spill] sm:$0xff] %v15610_v11  ;;  %v14099_v40 = vld [vmem:[%s20080_s0 + $0x168] sm:$0xff]   ;;  %v3438_v11 = vsel %vm478_vm1, %v269_v8, 0 }
 0x141   :  { %20442 = vst [vmem:[#allocation194_spill] sm:$0xff] %v15593_v51  ;;  %20443 = vst [vmem:[#allocation195_spill] sm:$0xff] %v15595_v50  ;;  %13215 = vmatprep.subr.msk.bf16.mxu0 %vm478_vm1, %v269_v8  ;;  %v15624_v50 = vpop.f32.mrf.mxu1 }
 0x142   :  { %3834 = vbcast.lane.b32.xlu1 %v15539_v13, 296  ;;  %3830 = vbcast.lane.b32.xlu0 %v15539_v13, 288  ;;  %20448 = vst [vmem:[#allocation200_spill] sm:$0xff] %v15624_v50 }
 0x143   :  { %12445 = vmatmul.mubr.msk.bf16.gmra.mxu1 %vm478_vm1, %v14099_v40  ;;  %v15633_v40 = vpop.f32.mrf.mxu0  ;;  %v15647_v50 = vpop.f32.mrf.mxu1 }
 0x144   :  { %v15616_v10 = vpop.permute.xlu1 %2147  ;;  %v15618_v51 = vpop.permute.xlu0 %2143  ;;  %12489 = vmatpush3.bf16.xpose.msra.mxu1 %v3602_v52  ;;  %12448 = vmatprep.mubr.msk.bf16.mxu1 %vm478_vm1, %v14100_v12  ;;  %v283_v52 = vld [vmem:[%s20082_s1 + $0x1d8] sm:$0xff]   ;;  %20449 = vst [vmem:[#allocation201_spill] sm:$0xff] %v15633_v40  ;;  %20452 = vst [vmem:[#allocation204_spill] sm:$0xff] %v15647_v50  ;;  %v3599_v40 = vsel %vm478_vm1, %v285_v34, 0 }
 0x145   :  { %20446 = vst [vmem:[#allocation198_spill] sm:$0xff] %v15616_v10  ;;  %20447 = vst [vmem:[#allocation199_spill] sm:$0xff] %v15618_v51  ;;  %13223 = vmatprep.subr.msk.bf16.mxu1 %vm478_vm1, %v285_v34  ;;  %v14101_v12 = vld [vmem:[%s20080_s0 + $0x138] sm:$0xff]   ;;  %v14102_v51 = vld [vmem:[%s20080_s0 + $0x180] sm:$0xff]  }
 0x146   :  { %3842 = vbcast.lane.b32.xlu1 %v15539_v13, 312  ;;  %3838 = vbcast.lane.b32.xlu0 %v15539_v13, 304 }
 0x147   :  { %12417 = vmatmul.mubr.msk.bf16.gmra.mxu0 %vm478_vm1, %v14101_v12  ;;  %v15656_v12 = vpop.f32.mrf.mxu0 }
 0x148   :  { %v15639_v10 = vpop.permute.xlu1 %2155  ;;  %v15641_v8 = vpop.permute.xlu0 %2151  ;;  %12459 = vmatpush3.bf16.xpose.msra.mxu0 %v3438_v11  ;;  %12468 = vmatprep.mubr.msk.bf16.mxu0 %vm478_vm1, %v14102_v51  ;;  %v265_v11 = vld [vmem:[%s20082_s1 + $0x190] sm:$0xff]   ;;  %20453 = vst [vmem:[#allocation205_spill] sm:$0xff] %v15656_v12  ;;  %v14103_v51 = vld [vmem:[%s20080_s0 + $0x178] sm:$0xff]   ;;  %v3435_v12 = vsel %vm478_vm1, %v267_v55, 0 }
 0x149   :  { %20450 = vst [vmem:[#allocation202_spill] sm:$0xff] %v15639_v10  ;;  %20451 = vst [vmem:[#allocation203_spill] sm:$0xff] %v15641_v8  ;;  %13216 = vmatprep.subr.msk.bf16.mxu0 %vm478_vm1, %v267_v55  ;;  %v15658_v10 = vpop.f32.mrf.mxu1  ;;  %v14104_v8 = vld [vmem:[%s20080_s0 + $0x1c0] sm:$0xff]   ;;  %v3596_v55 = vsel %vm478_vm1, %v283_v52, 0 }
 0x14a   :  { %3850 = vbcast.lane.b32.xlu1 %v15539_v13, 328  ;;  %3846 = vbcast.lane.b32.xlu0 %v15539_v13, 320  ;;  %20454 = vst [vmem:[#allocation206_spill] sm:$0xff] %v15658_v10 }
 0x14b   :  { %12449 = vmatmul.mubr.msk.bf16.gmra.mxu1 %vm478_vm1, %v14103_v51  ;;  %v281_v51 = vld [vmem:[%s20082_s1 + $0x1d0] sm:$0xff]  }
 0x14c   :  { %v15664_v50 = vpop.permute.xlu1 %2166  ;;  %v15666_v34 = vpop.permute.xlu0 %2162  ;;  %12491 = vmatpush3.bf16.xpose.msra.mxu1 %v3599_v40  ;;  %12500 = vmatprep.mubr.msk.bf16.mxu1 %vm478_vm1, %v14104_v8  ;;  %v263_v8 = vld [vmem:[%s20082_s1 + $0x188] sm:$0xff]  }
 0x14d   :  { %20455 = vst [vmem:[#allocation207_spill] sm:$0xff] %v15664_v50  ;;  %20456 = vst [vmem:[#allocation208_spill] sm:$0xff] %v15666_v34  ;;  %13224 = vmatprep.subr.msk.bf16.mxu1 %vm478_vm1, %v283_v52  ;;  %v15679_v50 = vpop.f32.mrf.mxu0  ;;  %v15681_v40 = vpop.f32.mrf.mxu1  ;;  %v15708_v52 = vrot.slane %v15387_v22, %v14564_v23  ;;  %v13367_v23 = vld [vmem:[%s20083_s2 + $0x10] sm:$0xff]  }
 0x14e   :  { %3858 = vbcast.lane.b32.xlu1 %v15539_v13, 344  ;;  %3854 = vbcast.lane.b32.xlu0 %v15539_v13, 336  ;;  %20457 = vst [vmem:[#allocation209_spill] sm:$0xff] %v15679_v50  ;;  %20458 = vst [vmem:[#allocation210_spill] sm:$0xff] %v15681_v40 }
 0x14f   :  { %v15694_v50 = vpop.f32.mrf.mxu0  ;;  %v15696_v40 = vpop.f32.mrf.mxu1 }
 0x150   :  { %v15683_v34 = vpop.permute.xlu1 %2174  ;;  %v15685_v10 = vpop.permute.xlu0 %2170  ;;  %12461 = vmatpush3.bf16.xpose.msra.mxu0 %v3435_v12  ;;  %20461 = vst [vmem:[#allocation213_spill] sm:$0xff] %v15694_v50  ;;  %20462 = vst [vmem:[#allocation214_spill] sm:$0xff] %v15696_v40  ;;  %v3432_v12 = vsel %vm478_vm1, %v265_v11, 0  ;;  %v279_v50 = vld [vmem:[%s20082_s1 + $0x1c8] sm:$0xff]  }
 0x151   :  { %20459 = vst [vmem:[#allocation211_spill] sm:$0xff] %v15683_v34  ;;  %20460 = vst [vmem:[#allocation212_spill] sm:$0xff] %v15685_v10  ;;  %13217 = vmatprep.subr.msk.bf16.mxu0 %vm478_vm1, %v265_v11  ;;  %v15715_v40 = vpop.f32.mrf.mxu1 }
 0x152   :  { %3866 = vbcast.lane.b32.xlu1 %v15539_v13, 360  ;;  %3862 = vbcast.lane.b32.xlu0 %v15539_v13, 352  ;;  %20466 = vst [vmem:[#allocation218_spill] sm:$0xff] %v15715_v40 }
 0x153   :  { %v15730_v40 = vpop.f32.mrf.mxu1 }
 0x154   :  { %v15698_v34 = vpop.permute.xlu1 %2182  ;;  %v15700_v10 = vpop.permute.xlu0 %2178  ;;  %12493 = vmatpush3.bf16.xpose.msra.mxu1 %v3596_v55  ;;  %20470 = vst [vmem:[#allocation222_spill] sm:$0xff] %v15730_v40 }
 0x155   :  { %20463 = vst [vmem:[#allocation215_spill] sm:$0xff] %v15698_v34  ;;  %20464 = vst [vmem:[#allocation216_spill] sm:$0xff] %v15700_v10  ;;  %13225 = vmatprep.subr.msk.bf16.mxu1 %vm478_vm1, %v281_v51  ;;  %v15713_v34 = vpop.f32.mrf.mxu0  ;;  %v261_v10 = vld [vmem:[%s20082_s1 + $0x180] sm:$0xff]   ;;  %v15745_v40 = vpop.f32.mrf.mxu1 }
 0x156   :  { %3874 = vbcast.lane.b32.xlu1 %v15539_v13, 376  ;;  %3870 = vbcast.lane.b32.xlu0 %v15539_v13, 368  ;;  %20465 = vst [vmem:[#allocation217_spill] sm:$0xff] %v15713_v34  ;;  %v3593_v13 = vsel %vm478_vm1, %v281_v51, 0  ;;  %v277_v51 = vld [vmem:[%s20082_s1 + $0x1c0] sm:$0xff]   ;;  %20474 = vst [vmem:[#allocation226_spill] sm:$0xff] %v15745_v40 }
 0x157   :  { %v15728_v34 = vpop.f32.mrf.mxu0  ;;  %v15757_v62 = vpop.f32.mrf.mxu1 }
 0x158   :  { %v15717_v55 = vpop.permute.xlu1 %2190  ;;  %v15719_v11 = vpop.permute.xlu0 %2186  ;;  %12463 = vmatpush3.bf16.xpose.msra.mxu0 %v3432_v12  ;;  %20469 = vst [vmem:[#allocation221_spill] sm:$0xff] %v15728_v34  ;;  %v3429_v12 = vsel %vm478_vm1, %v263_v8, 0  ;;  %20478 = vst [vmem:[#allocation230_spill] sm:$0xff] %v15757_v62 }
 0x159   :  { %20467 = vst [vmem:[#allocation219_spill] sm:$0xff] %v15717_v55  ;;  %20468 = vst [vmem:[#allocation220_spill] sm:$0xff] %v15719_v11  ;;  %13218 = vmatprep.subr.msk.bf16.mxu0 %vm478_vm1, %v263_v8  ;;  %v15743_v34 = vpop.f32.mrf.mxu0  ;;  %v3590_v8 = vsel %vm478_vm1, %v279_v50, 0 }
 0x15a   :  { %3885 = vbcast.lane.b32.xlu1 %v15708_v52, 264  ;;  %3881 = vbcast.lane.b32.xlu0 %v15708_v52, 256  ;;  %20473 = vst [vmem:[#allocation225_spill] sm:$0xff] %v15743_v34 }
 0x15c   :  { %v15732_v55 = vpop.permute.xlu1 %2198  ;;  %v15734_v11 = vpop.permute.xlu0 %2194  ;;  %12495 = vmatpush3.bf16.xpose.msra.mxu1 %v3593_v13 }
 0x15d   :  { %20471 = vst [vmem:[#allocation223_spill] sm:$0xff] %v15732_v55  ;;  %20472 = vst [vmem:[#allocation224_spill] sm:$0xff] %v15734_v11  ;;  %13226 = vmatprep.subr.msk.bf16.mxu1 %vm478_vm1, %v279_v50  ;;  %v15755_v13 = vpop.f32.mrf.mxu0 }
 0x15e   :  { %3893 = vbcast.lane.b32.xlu1 %v15708_v52, 280  ;;  %3889 = vbcast.lane.b32.xlu0 %v15708_v52, 272  ;;  %20477 = vst [vmem:[#allocation229_spill] sm:$0xff] %v15755_v13  ;;  %v15772_v13 = vpop.f32.mrf.mxu1 }
 0x15f   :  { %v15770_v50 = vpop.f32.mrf.mxu0  ;;  %20482 = vst [vmem:[#allocation234_spill] sm:$0xff] %v15772_v13 }
 0x160   :  { %v15747_v55 = vpop.permute.xlu1 %2206  ;;  %v15749_v11 = vpop.permute.xlu0 %2202  ;;  %12465 = vmatpush3.bf16.xpose.msra.mxu0 %v3429_v12  ;;  %v13360_v12 = vld [vmem:[%s20083_s2 + $0x38] sm:$0xff]   ;;  %20481 = vst [vmem:[#allocation233_spill] sm:$0xff] %v15770_v50 }
 0x161   :  { %20475 = vst [vmem:[#allocation227_spill] sm:$0xff] %v15747_v55  ;;  %20476 = vst [vmem:[#allocation228_spill] sm:$0xff] %v15749_v11  ;;  %13219 = vmatprep.subr.msk.bf16.mxu0 %vm478_vm1, %v261_v10  ;;  %v3426_v55 = vsel %vm478_vm1, %v261_v10, 0  ;;  %v3587_v10 = vsel %vm478_vm1, %v277_v51, 0  ;;  %v15786_v50 = vpop.f32.mrf.mxu1  ;;  %v13364_v11 = vld [vmem:[%s20083_s2 + $0x20] sm:$0xff]  }
 0x162   :  { %3901 = vbcast.lane.b32.xlu1 %v15708_v52, 296  ;;  %3897 = vbcast.lane.b32.xlu0 %v15708_v52, 288  ;;  %20486 = vst [vmem:[#allocation238_spill] sm:$0xff] %v15786_v50 }
 0x164   :  { %v15759_v34 = vpop.permute.xlu1 %2214  ;;  %v15761_v40 = vpop.permute.xlu0 %2210  ;;  %12497 = vmatpush3.bf16.xpose.msra.mxu1 %v3590_v8  ;;  %v13371_v8 = vld [vmem:[%s20083_s2 + $0x78] sm:$0xff]  }
 0x165   :  { %20479 = vst [vmem:[#allocation231_spill] sm:$0xff] %v15759_v34  ;;  %20480 = vst [vmem:[#allocation232_spill] sm:$0xff] %v15761_v40  ;;  %13227 = vmatprep.subr.msk.bf16.mxu1 %vm478_vm1, %v277_v51  ;;  %v15784_v40 = vpop.f32.mrf.mxu0 }
 0x166   :  { %3909 = vbcast.lane.b32.xlu1 %v15708_v52, 312  ;;  %3905 = vbcast.lane.b32.xlu0 %v15708_v52, 304  ;;  %20485 = vst [vmem:[#allocation237_spill] sm:$0xff] %v15784_v40 }
 0x167   :  { %v15795_v51 = vpop.f32.mrf.mxu0 }
 0x168   :  { %v15774_v34 = vpop.permute.xlu1 %2222  ;;  %v15776_v62 = vpop.permute.xlu0 %2218  ;;  %12467 = vmatpush3.bf16.xpose.msra.mxu0 %v3426_v55  ;;  %v13361_v55 = vld [vmem:[%s20083_s2 + $0x30] sm:$0xff]   ;;  %20489 = vst [vmem:[#allocation241_spill] sm:$0xff] %v15795_v51 }
 0x169   :  { %20483 = vst [vmem:[#allocation235_spill] sm:$0xff] %v15774_v34  ;;  %20484 = vst [vmem:[#allocation236_spill] sm:$0xff] %v15776_v62  ;;  %12516 = vmatprep.subr.bf16.mxu0 %v13360_v12  ;;  %v15799_v62 = vpop.f32.mrf.mxu1  ;;  %v15816_v51 = vpop.f32.mrf.mxu0 }
 0x16a   :  { %3917 = vbcast.lane.b32.xlu1 %v15708_v52, 328  ;;  %3913 = vbcast.lane.b32.xlu0 %v15708_v52, 320  ;;  %20490 = vst [vmem:[#allocation242_spill] sm:$0xff] %v15799_v62  ;;  %v13363_v62 = vld [vmem:[%s20083_s2 + $0x28] sm:$0xff]   ;;  %20493 = vst [vmem:[#allocation245_spill] sm:$0xff] %v15816_v51 }
 0x16b   :  { %v14259_v51 = vmov 1966171168  }
 0x16c   :  { %v15788_v13 = vpop.permute.xlu1 %2233  ;;  %v15790_v34 = vpop.permute.xlu0 %2229  ;;  %12499 = vmatpush3.bf16.xpose.msra.mxu1 %v3587_v10  ;;  %v4281_v40 = vunpack.c.l.s4 %v14259_v51  ;;  %v14109_v51 = vld [vmem:[%s20080_s0 + $0x1d0] sm:$0xff]  }
 0x16d   :  { %20487 = vst [vmem:[#allocation239_spill] sm:$0xff] %v15788_v13  ;;  %20488 = vst [vmem:[#allocation240_spill] sm:$0xff] %v15790_v34  ;;  %12548 = vmatprep.subr.bf16.mxu1 %v13371_v8  ;;  %v14105_v13 = vld [vmem:[%s20080_s0 + $0x188] sm:$0xff]   ;;  %v14106_v34 = vld [vmem:[%s20080_s0 + $0x190] sm:$0xff]  }
 0x16e   :  { %3925 = vbcast.lane.b32.xlu1 %v15708_v52, 344  ;;  %3921 = vbcast.lane.b32.xlu0 %v15708_v52, 336 }
 0x16f   :  { %12469 = vmatmul.mubr.msk.bf16.vlgmr.msra.gmra.mxu0 %vm478_vm1, %v14105_v13  ;;  %v13372_v13 = vld [vmem:[%s20083_s2 + $0x70] sm:$0xff]  }
 0x170   :  { %v15805_v10 = vpop.permute.xlu1 %2241  ;;  %v15807_v50 = vpop.permute.xlu0 %2237  ;;  %12517 = vmatpush3.bf16.msra.mxu0 %v13360_v12  ;;  %12472 = vmatprep.mubr.msk.bf16.mxu0 %vm478_vm1, %v14106_v34  ;;  %v14107_v34 = vld [vmem:[%s20080_s0 + $0x1c8] sm:$0xff]  }
 0x171   :  { %20491 = vst [vmem:[#allocation243_spill] sm:$0xff] %v15805_v10  ;;  %20492 = vst [vmem:[#allocation244_spill] sm:$0xff] %v15807_v50  ;;  %12518 = vmatprep.subr.bf16.mxu0 %v13361_v55  ;;  %v15823_v12 = vpop.f32.mrf.mxu1 }
 0x172   :  { %3933 = vbcast.lane.b32.xlu1 %v15708_v52, 360  ;;  %3929 = vbcast.lane.b32.xlu0 %v15708_v52, 352  ;;  %20494 = vst [vmem:[#allocation246_spill] sm:$0xff] %v15823_v12  ;;  %v15836_v12 = vpop.f32.mrf.mxu0 }
 0x173   :  { %12501 = vmatmul.mubr.msk.bf16.vlgmr.msra.gmra.mxu1 %vm478_vm1, %v14107_v34  ;;  %v15842_v34 = vrot.slane %v15387_v22, %v14643_v58 }
 0x174   :  { %v15829_v10 = vpop.permute.xlu1 %2249  ;;  %v15831_v50 = vpop.permute.xlu0 %2245  ;;  %12519 = vmatpush3.bf16.msra.mxu0 %v13361_v55  ;;  %12549 = vmatpush3.bf16.msra.mxu1 %v13371_v8  ;;  %v14108_v8 = vld [vmem:[%s20080_s0 + $0x198] sm:$0xff]  }
 0x175   :  { %20495 = vst [vmem:[#allocation247_spill] sm:$0xff] %v15829_v10  ;;  %20496 = vst [vmem:[#allocation248_spill] sm:$0xff] %v15831_v50  ;;  %12520 = vmatprep.subr.bf16.mxu0 %v13363_v62  ;;  %12550 = vmatprep.subr.bf16.mxu1 %v13372_v13  ;;  %v15844_v55 = vpop.f32.mrf.mxu1  ;;  %v15868_v58 = vpop.f32.mrf.mxu0 }
 0x176   :  { %3941 = vbcast.lane.b32.xlu1 %v15708_v52, 376  ;;  %3937 = vbcast.lane.b32.xlu0 %v15708_v52, 368  ;;  %20497 = vst [vmem:[#allocation249_spill] sm:$0xff] %v15844_v55  ;;  %v13373_v52 = vld [vmem:[%s20083_s2 + $0x68] sm:$0xff]   ;;  %v14110_v55 = vld [vmem:[%s20080_s0 + $0x1a0] sm:$0xff]  }
 0x177   :  { %12473 = vmatmul.mubr.msk.bf16.gmra.mxu0 %vm478_vm1, %v14108_v8  ;;  %12504 = vmatprep.mubr.msk.bf16.mxu1 %vm478_vm1, %v14109_v51  ;;  %v4282_v8 = vunpack.c.0.s8 %v4281_v40  ;;  %v13366_v51 = vld [vmem:[%s20083_s2 + $0x18] sm:$0xff]   ;;  %v13374_v40 = vld [vmem:[%s20083_s2 + $0x60] sm:$0xff]  }
 0x178   :  { %v15857_v10 = vpop.permute.xlu1 %2257  ;;  %v15859_v50 = vpop.permute.xlu0 %2253  ;;  %12521 = vmatpush3.bf16.msra.mxu0 %v13363_v62  ;;  %12476 = vmatprep.mubr.msk.bf16.mxu0 %vm478_vm1, %v14110_v55 }
 0x179   :  { %20498 = vst [vmem:[#allocation250_spill] sm:$0xff] %v15857_v10  ;;  %20499 = vst [vmem:[#allocation251_spill] sm:$0xff] %v15859_v50  ;;  %12522 = vmatprep.subr.bf16.mxu0 %v13364_v11  ;;  %12551 = vmatpush3.bf16.msra.mxu1 %v13372_v13  ;;  %v15872_v62 = vpop.f32.mrf.mxu1  ;;  %v14111_v10 = vld [vmem:[%s20080_s0 + $0x1d8] sm:$0xff]   ;;  %v15890_v50 = vsub.s32 %v4282_v8, %v14360_v16 }
 0x17a   :  { %3952 = vbcast.lane.b32.xlu1 %v15842_v34, 264  ;;  %3948 = vbcast.lane.b32.xlu0 %v15842_v34, 256  ;;  %20500 = vst [vmem:[#allocation252_spill] sm:$0xff] %v15872_v62  ;;  %v14112_v62 = vld [vmem:[%s20080_s0 + $0x1e0] sm:$0xff]   ;;  %v13375_v8 = vld [vmem:[%s20083_s2 + $0x58] sm:$0xff]  }
 0x17b   :  { %12505 = vmatmul.mubr.msk.bf16.gmra.mxu1 %vm478_vm1, %v14111_v10  ;;  %12552 = vmatprep.subr.bf16.mxu1 %v13373_v52  ;;  %20503 = vst [vmem:[#allocation255_spill] sm:$0xff] %v15890_v50  ;;  %v15892_v10 = vpop.f32.mrf.mxu0 }
 0x17c   :  { %v15881_v55 = vpop.permute.xlu1 %2265  ;;  %v15883_v13 = vpop.permute.xlu0 %2261  ;;  %12523 = vmatpush3.bf16.msra.mxu0 %v13364_v11  ;;  %12508 = vmatprep.mubr.msk.bf16.mxu1 %vm478_vm1, %v14112_v62  ;;  %v14113_v62 = vld [vmem:[%s20080_s0 + $0x1a8] sm:$0xff]  }
 0x17d   :  { %20501 = vst [vmem:[#allocation253_spill] sm:$0xff] %v15881_v55  ;;  %20502 = vst [vmem:[#allocation254_spill] sm:$0xff] %v15883_v13  ;;  %12524 = vmatprep.subr.bf16.mxu0 %v13366_v51  ;;  %12553 = vmatpush3.bf16.msra.mxu1 %v13373_v52  ;;  %v15899_v11 = vpop.f32.mrf.mxu1  ;;  %v15918_v13 = vrot.slane %v15387_v22, %v15890_v50  ;;  %v13376_v22 = vld [vmem:[%s20083_s2 + $0x50] sm:$0xff]  }
 0x17e   :  { %3960 = vbcast.lane.b32.xlu1 %v15842_v34, 280  ;;  %3956 = vbcast.lane.b32.xlu0 %v15842_v34, 272  ;;  %20504 = vst [vmem:[#allocation256_spill] sm:$0xff] %v15899_v11  ;;  %v14114_v11 = vld [vmem:[%s20080_s0 + $0x1b0] sm:$0xff]  }
 0x17f   :  { %12477 = vmatmul.mubr.msk.bf16.gmra.mxu0 %vm478_vm1, %v14113_v62  ;;  %12554 = vmatprep.subr.bf16.mxu1 %v13374_v40  ;;  %v15920_v62 = vpop.f32.mrf.mxu0  ;;  %v15946_v49 = vrot.slane %v15918_v13, %v15890_v50 }
 0x180   :  { %v15908_v55 = vpop.permute.xlu1 %2273  ;;  %v15910_v52 = vpop.permute.xlu0 %2269  ;;  %12525 = vmatpush3.bf16.msra.mxu0 %v13366_v51  ;;  %12480 = vmatprep.mubr.msk.bf16.mxu0 %vm478_vm1, %v14114_v11  ;;  %v14115_v11 = vld [vmem:[%s20080_s0 + $0x1e8] sm:$0xff]  }
 0x181   :  { %20505 = vst [vmem:[#allocation257_spill] sm:$0xff] %v15908_v55  ;;  %20506 = vst [vmem:[#allocation258_spill] sm:$0xff] %v15910_v52  ;;  %12526 = vmatprep.subr.bf16.mxu0 %v13367_v23  ;;  %v13369_v55 = vld [vmem:[%s20083_s2 + $0x8] sm:$0xff]   ;;  %12555 = vmatpush3.bf16.msra.mxu1 %v13374_v40  ;;  %v15927_v51 = vpop.f32.mrf.mxu1  ;;  %v15976_v36 = vrot.slane %v15946_v49, %v14382_v24 }
 0x182   :  { %3968 = vbcast.lane.b32.xlu1 %v15842_v34, 296  ;;  %3964 = vbcast.lane.b32.xlu0 %v15842_v34, 288  ;;  %20507 = vst [vmem:[#allocation259_spill] sm:$0xff] %v15927_v51  ;;  %v14116_v51 = vld [vmem:[%s20080_s0 + $0x1f0] sm:$0xff]  }
 0x183   :  { %12509 = vmatmul.mubr.msk.bf16.gmra.mxu1 %vm478_vm1, %v14115_v11  ;;  %12556 = vmatprep.subr.bf16.mxu1 %v13375_v8  ;;  %v15948_v11 = vpop.f32.mrf.mxu0 }
 0x184   :  { %v15936_v52 = vpop.permute.xlu1 %2281  ;;  %v15938_v40 = vpop.permute.xlu0 %2277  ;;  %12527 = vmatpush3.bf16.msra.mxu0 %v13367_v23  ;;  %12512 = vmatprep.mubr.msk.bf16.mxu1 %vm478_vm1, %v14116_v51  ;;  %v14117_v51 = vld [vmem:[%s20080_s0 + $0x1b8] sm:$0xff]  }
 0x185   :  { %20508 = vst [vmem:[#allocation260_spill] sm:$0xff] %v15936_v52  ;;  %20509 = vst [vmem:[#allocation261_spill] sm:$0xff] %v15938_v40  ;;  %12528 = vmatprep.subr.bf16.mxu0 %v13369_v55  ;;  %v13370_v52 = vld [vmem:[%s20083_s2] sm:$0xff]   ;;  %12557 = vmatpush3.bf16.msra.mxu1 %v13375_v8  ;;  %v15955_v23 = vpop.f32.mrf.mxu1  ;;  %v13377_v40 = vld [vmem:[%s20083_s2 + $0x48] sm:$0xff]  }
 0x186   :  { %3976 = vbcast.lane.b32.xlu1 %v15842_v34, 312  ;;  %3972 = vbcast.lane.b32.xlu0 %v15842_v34, 304  ;;  %20510 = vst [vmem:[#allocation262_spill] sm:$0xff] %v15955_v23  ;;  %v15972_v23 = vand.u32 127, %v20514_v53  ;;  %v3711_v53 = vadd.s32 24, %v14360_v16 }
 0x187   :  { %12481 = vmatmul.mubr.msk.bf16.gmra.mxu0 %vm478_vm1, %v14117_v51  ;;  %12558 = vmatprep.subr.bf16.mxu1 %v13376_v22  ;;  %v15978_v51 = vpop.f32.mrf.mxu0  ;;  %v15980_v29 = vpop.f32.mrf.mxu1 }
 0x188   :  { %v15964_v61 = vpop.permute.xlu1 %2289  ;;  %v15966_v8 = vpop.permute.xlu0 %2285  ;;  %20515 = vst [vmem:[#allocation266_spill] sm:$0xff] %v15972_v23  ;;  %12529 = vmatpush3.bf16.msra.mxu0 %v13369_v55  ;;  %20516 = vst [vmem:[#allocation267_spill] sm:$0xff] %v15980_v29  ;;  %v15991_v55 = vadd.s32 16, %v14360_v16  ;;  %vm16002_vm3 = vcmp.ge.s32.totalorder %v15969_v33, %v15972_v23  ;;  %vm16008_vm4 = vcmp.ge.s32.totalorder %v14360_v16, %v15972_v23  ;;  %v14122_v29 = vld [vmem:[%s20083_s2 + $0x30] sm:$0xff]  }
 0x189   :  { %20511 = vst [vmem:[#allocation263_spill] sm:$0xff] %v15964_v61  ;;  %20512 = vst [vmem:[#allocation264_spill] sm:$0xff] %v15966_v8  ;;  %12530 = vmatprep.subr.bf16.mxu0 %v13370_v52  ;;  %12559 = vmatpush3.bf16.msra.mxu1 %v13376_v22  ;;  %v15985_v61 = vld [vmem:[%s20083_s2 + $0xb8] sm:$0xff]   ;;  %v13378_v22 = vld [vmem:[%s20083_s2 + $0x40] sm:$0xff]   ;;  %v16014_v37 = vpop.f32.mrf.mxu0  ;;  %v16016_v18 = vpop.f32.mrf.mxu1  ;;  %vm16026_vm5 = vcmp.ge.s32.totalorder %v3711_v53, %v15972_v23  ;;  %v3713_v53 = vadd.s32 40, %v14360_v16  ;;  %vm16069_vm8 = vcmp.ge.s32.totalorder %v16043_v56, %v15972_v23 }
 0x18a   :  { %3984 = vbcast.lane.b32.xlu1 %v15842_v34, 328  ;;  %3980 = vbcast.lane.b32.xlu0 %v15842_v34, 320  ;;  %20517 = vst [vmem:[#allocation268_spill] sm:$0xff] %v15991_v55  ;;  %v14118_v8 = vld [vmem:[%s20080_s0 + $0x1f8] sm:$0xff]   ;;  %20522 = vst [vmem:[#allocation269_spill] sm:$0xff] %v16016_v18  ;;  %vm16032_vm6 = vcmp.ge.s32.totalorder %v15991_v55, %v15972_v23 }
 0x18b   :  { %12513 = vmatmul.mubr.msk.bf16.gmra.mxu1 %vm478_vm1, %v14118_v8  ;;  %12560 = vmatprep.subr.bf16.mxu1 %v13377_v40  ;;  %v16047_v0 = vpop.f32.mrf.mxu0  ;;  %v16049_v20 = vpop.f32.mrf.mxu1  ;;  %vm16063_vm7 = vcmp.ge.s32.totalorder %v3713_v53, %v15972_v23  ;;  %v14125_v53 = vld [vmem:[%s20083_s2 + $0x18] sm:$0xff]  }
 0x18c   :  { %v3752_v45 = vpop.permute.xlu1 %3751  ;;  %v3748_v32 = vpop.permute.xlu0 %3747  ;;  %12531 = vmatpush3.bf16.msra.mxu0 %v13370_v52 }
 0x18d   :  { %v4369_v8 = vsub.f32 %v3752_v45, %v15976_v36  ;;  %v4368_v15 = vsub.f32 %v3748_v32, %v15976_v36  ;;  %12561 = vmatpush3.bf16.msra.mxu1 %v13377_v40  ;;  %12580 = vmatprep.subr.bf16.mxu0 %v15985_v61  ;;  %v16039_v40 = vld [vmem:[%s20083_s2 + $0xf8] sm:$0xff]   ;;  %v16075_v4 = vpop.f32.mrf.mxu0  ;;  %v14123_v45 = vld [vmem:[%s20083_s2 + $0x28] sm:$0xff]  }
 0x18e   :  { %3992 = vbcast.lane.b32.xlu1 %v15842_v34, 344  ;;  %3988 = vbcast.lane.b32.xlu0 %v15842_v34, 336 }
 0x18f   :  { %v4529_v33 = vsel %vm16002_vm3, %v4369_v8, -1e+30  ;;  %v4528_v52 = vsel %vm16008_vm4, %v4368_v15, -1e+30  ;;  %12562 = vmatprep.subr.bf16.mxu1 %v13378_v22 }
 0x190   :  { %v4658_v8 = vmul.f32 1.442695, %v4529_v33  ;;  %v4656_v18 = vmul.f32 1.442695, %v4528_v52  ;;  %v3760_v15 = vpop.permute.xlu1 %3759  ;;  %v3756_v39 = vpop.permute.xlu0 %3755  ;;  %v3715_v33 = vadd.s32 56, %v14360_v16 }
 0x191   :  { %v4371_v55 = vsub.f32 %v3760_v15, %v15976_v36  ;;  %v4370_v47 = vsub.f32 %v3756_v39, %v15976_v36  ;;  %12563 = vmatpush3.bf16.msra.mxu1 %v13378_v22  ;;  %v16059_v39 = vadd.s32 48, %v14360_v16 }
 0x192   :  { %13494 = vpow2.f32 %v4658_v8  ;;  %4000 = vbcast.lane.b32.xlu1 %v15842_v34, 360  ;;  %3996 = vbcast.lane.b32.xlu0 %v15842_v34, 352  ;;  %vm16082_vm9 = vcmp.ge.s32.totalorder %v3715_v33, %v15972_v23 }
 0x193   :  { %13496 = vpow2.f32 %v4656_v18  ;;  %v4531_v52 = vsel %vm16026_vm5, %v4371_v55, -1e+30  ;;  %v4530_v15 = vsel %vm16032_vm6, %v4370_v47, -1e+30  ;;  %20528 = vst [vmem:[#allocation271_spill] sm:$0xff] %v16059_v39  ;;  %12612 = vmatprep.subr.bf16.mxu1 %v16039_v40  ;;  %vm16101_vm10 = vcmp.ge.s32.totalorder %v16059_v39, %v15972_v23 }
 0x194   :  { %v4662_v22 = vmul.f32 1.442695, %v4531_v52  ;;  %v4660_v8 = vmul.f32 1.442695, %v4530_v15  ;;  %v3768_v25 = vpop.permute.xlu1 %3767  ;;  %v3764_v47 = vpop.permute.xlu0 %3763  ;;  %v3721_v39 = vadd.s32 104, %v14360_v16 }
 0x195   :  { %v4373_v55 = vsub.f32 %v3768_v25, %v15976_v36  ;;  %v4372_v19 = vsub.f32 %v3764_v47, %v15976_v36  ;;  %v16077_v52 = vpop.f32.mrf.mxu1  ;;  %v16089_v25 = vld [vmem:[%s20081_s3] sm:$0xff] }
 0x196   :  { %13498 = vpow2.f32 %v4662_v22  ;;  %4008 = vbcast.lane.b32.xlu1 %v15842_v34, 376  ;;  %4004 = vbcast.lane.b32.xlu0 %v15842_v34, 368  ;;  %v16093_v15 = vrot.slane %v16089_v25, %v14757_v2  ;;  %v3717_v2 = vadd.s32 72, %v14360_v16  ;;  %vm16165_vm15 = vcmp.ge.s32.totalorder %v3721_v39, %v15972_v23 }
 0x197   :  { %13500 = vpow2.f32 %v4660_v8  ;;  %v4533_v22 = vsel %vm16063_vm7, %v4373_v55, -1e+30  ;;  %v4532_v34 = vsel %vm16069_vm8, %v4372_v19, -1e+30  ;;  %v16107_v8 = vadd.s32 64, %v14360_v16  ;;  %v16111_v19 = vpop.f32.mrf.mxu0  ;;  %v16113_v43 = vpop.f32.mrf.mxu1 }
 0x198   :  { %v4666_v47 = vmul.f32 1.442695, %v4533_v22  ;;  %v4664_v56 = vmul.f32 1.442695, %v4532_v34  ;;  %v3776_v26 = vpop.permute.xlu1 %3775  ;;  %v3772_v57 = vpop.permute.xlu0 %3771  ;;  %v3719_v22 = vadd.s32 88, %v14360_v16  ;;  %v16119_v34 = vadd.s32 80, %v14360_v16 }
 0x199   :  { %20537 = vst [vmem:[#allocation272_spill] sm:$0xff] %v16107_v8  ;;  %v4375_v55 = vsub.f32 %v3776_v26, %v15976_v36  ;;  %v4374_v5 = vsub.f32 %v3772_v57, %v15976_v36  ;;  %vm16128_vm11 = vcmp.ge.s32.totalorder %v3717_v2, %v15972_v23  ;;  %vm16134_vm12 = vcmp.ge.s32.totalorder %v16107_v8, %v15972_v23  ;;  %v16145_v2 = vpop.f32.mrf.mxu1 }
 0x19a   :  { %13502 = vpow2.f32 %v4666_v47  ;;  %4019 = vbcast.lane.b32.xlu1 %v16093_v15, 264  ;;  %4015 = vbcast.lane.b32.xlu0 %v16093_v15, 256  ;;  %20538 = vst [vmem:[#allocation273_spill] sm:$0xff] %v16119_v34  ;;  %vm16150_vm13 = vcmp.ge.s32.totalorder %v3719_v22, %v15972_v23  ;;  %vm16156_vm14 = vcmp.ge.s32.totalorder %v16119_v34, %v15972_v23  ;;  %v14128_v22 = vld [vmem:[%s20083_s2] sm:$0xff]  }
 0x19b   :  { %13504 = vpow2.f32 %v4664_v56  ;;  %v4535_v26 = vsel %vm16082_vm9, %v4375_v55, -1e+30  ;;  %v4534_v57 = vsel %vm16101_vm10, %v4374_v5, -1e+30 }
 0x19c   :  { %v4670_v47 = vmul.f32 1.442695, %v4535_v26  ;;  %v4668_v1 = vmul.f32 1.442695, %v4534_v57  ;;  %v3784_v27 = vpop.permute.xlu1 %3783  ;;  %v3780_v5 = vpop.permute.xlu0 %3779  ;;  %v16141_v26 = vadd.s32 96, %v14360_v16 }
 0x19d   :  { %v4377_v55 = vsub.f32 %v3784_v27, %v15976_v36  ;;  %v4376_v54 = vsub.f32 %v3780_v5, %v15976_v36  ;;  %v16143_v57 = vpop.f32.mrf.mxu0 }
 0x19e   :  { %20543 = vst [vmem:[#allocation274_spill] sm:$0xff] %v16141_v26  ;;  %13506 = vpow2.f32 %v4670_v47  ;;  %4027 = vbcast.lane.b32.xlu1 %v16093_v15, 280  ;;  %4023 = vbcast.lane.b32.xlu0 %v16093_v15, 272  ;;  %vm16177_vm1 = vcmp.ge.s32.totalorder %v16141_v26, %v15972_v23 }
 0x19f   :  { %v13495_v5 = vpop.eup %13494  ;;  %13508 = vpow2.f32 %v4668_v1  ;;  %v4537_v47 = vsel %vm16128_vm11, %v4377_v55, -1e+30  ;;  %v4536_v8 = vsel %vm16134_vm12, %v4376_v54, -1e+30  ;;  %v4294_v1 = vcombine.high %v15918_v13, %v15918_v13 }
 0x1a0   :  { %v13497_v28 = vpop.eup %13496  ;;  %v4674_v41 = vmul.f32 1.442695, %v4537_v47  ;;  %v4672_v6 = vmul.f32 1.442695, %v4536_v8  ;;  %v4913_v34 = vmul.f32 %v13495_v5, %v15920_v62  ;;  %v3792_v35 = vpop.permute.xlu1 %3791 }
 0x1a1   :  { %v3788_v7 = vpop.permute.xlu0 %3787  ;;  %v4912_v55 = vmul.f32 %v13497_v28, %v15868_v58  ;;  %v4379_v63 = vsub.f32 %v3792_v35, %v15976_v36  ;;  %v16181_v8 = vpop.f32.mrf.mxu0  ;;  %v3723_v58 = vadd.s32 120, %v14360_v16  ;;  %v16197_v3 = vrot.slane %v4294_v1, %v15890_v50 }
 0x1a2   :  { %v4378_v54 = vsub.f32 %v3788_v7, %v15976_v36  ;;  %v16183_v62 = vpop.f32.mrf.mxu1  ;;  %13510 = vpow2.f32 %v4674_v41  ;;  %v5041_v5 = vmul.f32 0.35355338, %v4913_v34  ;;  %4035 = vbcast.lane.b32.xlu1 %v16093_v15, 296  ;;  %4031 = vbcast.lane.b32.xlu0 %v16093_v15, 288  ;;  %v16189_v7 = vadd.s32 112, %v14360_v16 }
 0x1a3   :  { %v13499_v28 = vpop.eup %13498  ;;  %v5040_v35 = vmul.f32 0.35355338, %v4912_v55  ;;  %13512 = vpow2.f32 %v4672_v6  ;;  %v4539_v13 = vsel %vm16150_vm13, %v4379_v63, -1e+30  ;;  %v16202_v48 = vpop.f32.mrf.mxu0  ;;  %vm16209_vm2 = vcmp.ge.s32.totalorder %v3723_v58, %v15972_v23 }
 0x1a4   :  { %20552 = vst [vmem:[#allocation275_spill] sm:$0xff] %v16189_v7  ;;  %v4538_v47 = vsel %vm16156_vm14, %v4378_v54, -1e+30  ;;  %v13501_v41 = vpop.eup %13500  ;;  %v4915_v34 = vmul.f32 %v13499_v28, %v15892_v10  ;;  %v4678_v26 = vmul.f32 1.442695, %v4539_v13  ;;  %v3800_v14 = vpop.permute.xlu1 %3799  ;;  %vm16215_vm0 = vcmp.ge.s32.totalorder %v16189_v7, %v15972_v23 }
 0x1a5   :  { %v4676_v59 = vmul.f32 1.442695, %v4538_v47  ;;  %v3796_v60 = vpop.permute.xlu0 %3795  ;;  %v4914_v16 = vmul.f32 %v13501_v41, %v15836_v12  ;;  %v4381_v6 = vsub.f32 %v3800_v14, %v15976_v36  ;;  %v5168_v63 = vpack.c.bf16 %v5041_v5, %v5040_v35  ;;  %v16204_v54 = vpop.f32.mrf.mxu1 }
 0x1a6   :  { %v4380_v55 = vsub.f32 %v3796_v60, %v15976_v36  ;;  %v5043_v42 = vmul.f32 0.35355338, %v4915_v34  ;;  %13514 = vpow2.f32 %v4678_v26  ;;  %4043 = vbcast.lane.b32.xlu1 %v16093_v15, 312  ;;  %4039 = vbcast.lane.b32.xlu0 %v16093_v15, 304  ;;  %v16226_v41 = vrot.slane %v16197_v3, %v14382_v24 }
 0x1a7   :  { %v13503_v60 = vpop.eup %13502  ;;  %v5042_v12 = vmul.f32 0.35355338, %v4914_v16  ;;  %13516 = vpow2.f32 %v4676_v59  ;;  %v4541_v26 = vsel %vm16165_vm15, %v4381_v6, -1e+30  ;;  %12532 = vmatprep.mubr.bf16.mxu0 %v5168_v63  ;;  %v16233_v63 = vpop.f32.mrf.mxu1 }
 0x1a8   :  { %v4540_v1 = vsel %vm16177_vm1, %v4380_v55, -1e+30  ;;  %v13505_v5 = vpop.eup %13504  ;;  %v4682_v58 = vmul.f32 1.442695, %v4541_v26  ;;  %v4917_v35 = vmul.f32 %v13503_v60, %v16047_v0  ;;  %v3808_v13 = vpop.permute.xlu1 %3807  ;;  %v13380_v0 = vld [vmem:[%s20083_s2 + $0xb0] sm:$0xff]  }
 0x1a9   :  { %v4680_v28 = vmul.f32 1.442695, %v4540_v1  ;;  %v3804_v47 = vpop.permute.xlu0 %3803  ;;  %v5169_v16 = vpack.c.bf16 %v5043_v42, %v5042_v12  ;;  %v4916_v59 = vmul.f32 %v13505_v5, %v15978_v51  ;;  %v4383_v34 = vsub.f32 %v3808_v13, %v15976_v36  ;;  %v16231_v55 = vpop.f32.mrf.mxu0 }
 0x1aa   :  { %v4382_v6 = vsub.f32 %v3804_v47, %v15976_v36  ;;  %13518 = vpow2.f32 %v4682_v58  ;;  %v5045_v60 = vmul.f32 0.35355338, %v4917_v35  ;;  %4051 = vbcast.lane.b32.xlu1 %v16093_v15, 328  ;;  %4047 = vbcast.lane.b32.xlu0 %v16093_v15, 320 }
 0x1ab   :  { %v13507_v42 = vpop.eup %13506  ;;  %v5044_v51 = vmul.f32 0.35355338, %v4916_v59  ;;  %13520 = vpow2.f32 %v4680_v28  ;;  %v4543_v36 = vsel %vm16209_vm2, %v4383_v34, -1e+30  ;;  %12533 = vmatmul.mubr.bf16.vlgmr.msra.gmra.mxu0 %v5169_v16  ;;  %v16249_v7 = vpop.f32.mrf.mxu0 }
 0x1ac   :  { %v4542_v12 = vsel %vm16215_vm0, %v4382_v6, -1e+30  ;;  %v13509_v26 = vpop.eup %13508  ;;  %v4919_v1 = vmul.f32 %v13507_v42, %v16014_v37  ;;  %v4686_v5 = vmul.f32 1.442695, %v4543_v36  ;;  %v3819_v35 = vpop.permute.xlu1 %3818  ;;  %12581 = vmatpush3.bf16.msra.mxu0 %v15985_v61  ;;  %v13381_v37 = vld [vmem:[%s20083_s2 + $0xa8] sm:$0xff]  }
 0x1ad   :  { %v4684_v58 = vmul.f32 1.442695, %v4542_v12  ;;  %v3815_v13 = vpop.permute.xlu0 %3814  ;;  %v4918_v47 = vmul.f32 %v13509_v26, %v15948_v11  ;;  %v4385_v28 = vsub.f32 %v3819_v35, %v16226_v41  ;;  %v5170_v34 = vpack.c.bf16 %v5045_v60, %v5044_v51  ;;  %v16251_v6 = vpop.f32.mrf.mxu1  ;;  %12582 = vmatprep.subr.bf16.mxu0 %v13380_v0 }
 0x1ae   :  { %v4384_v59 = vsub.f32 %v3815_v13, %v16226_v41  ;;  %v5047_v16 = vmul.f32 0.35355338, %v4919_v1  ;;  %13522 = vpow2.f32 %v4686_v5  ;;  %4059 = vbcast.lane.b32.xlu1 %v16093_v15, 344  ;;  %4055 = vbcast.lane.b32.xlu0 %v16093_v15, 336 }
 0x1af   :  { %v13511_v61 = vpop.eup %13510  ;;  %v5046_v11 = vmul.f32 0.35355338, %v4918_v47  ;;  %13524 = vpow2.f32 %v4684_v58  ;;  %v4545_v60 = vsel %vm16002_vm3, %v4385_v28, -1e+30  ;;  %12536 = vmatprep.mubr.bf16.mxu0 %v5170_v34  ;;  %v2568_v28 = vpop.f32.mrf.mxu0 }
 0x1b0   :  { %v4544_v42 = vsel %vm16008_vm4, %v4384_v59, -1e+30  ;;  %v13513_v51 = vpop.eup %13512  ;;  %v4690_v36 = vmul.f32 1.442695, %v4545_v60  ;;  %v4921_v26 = vmul.f32 %v13511_v61, %v16181_v8  ;;  %v3827_v1 = vpop.permute.xlu1 %3826  ;;  %12583 = vmatpush3.bf16.msra.mxu0 %v13380_v0  ;;  %v13382_v59 = vld [vmem:[%s20083_s2 + $0xa0] sm:$0xff]  }
 0x1b1   :  { %v4688_v12 = vmul.f32 1.442695, %v4544_v42  ;;  %v3823_v5 = vpop.permute.xlu0 %3822  ;;  %v5171_v35 = vpack.c.bf16 %v5047_v16, %v5046_v11  ;;  %v4920_v13 = vmul.f32 %v13513_v51, %v16111_v19  ;;  %v4387_v58 = vsub.f32 %v3827_v1, %v16226_v41  ;;  %v16266_v23 = vpop.f32.mrf.mxu1  ;;  %12584 = vmatprep.subr.bf16.mxu0 %v13381_v37 }
 0x1b2   :  { %v4386_v47 = vsub.f32 %v3823_v5, %v16226_v41  ;;  %13526 = vpow2.f32 %v4690_v36  ;;  %v5049_v8 = vmul.f32 0.35355338, %v4921_v26  ;;  %4067 = vbcast.lane.b32.xlu1 %v16093_v15, 360  ;;  %4063 = vbcast.lane.b32.xlu0 %v16093_v15, 352  ;;  %v16277_v61 = vpop.f32.mrf.mxu0 }
 0x1b3   :  { %v13515_v0 = vpop.eup %13514  ;;  %v5048_v19 = vmul.f32 0.35355338, %v4920_v13  ;;  %13528 = vpow2.f32 %v4688_v12  ;;  %v4547_v34 = vsel %vm16026_vm5, %v4387_v58, -1e+30  ;;  %12537 = vmatmul.mubr.bf16.gmra.mxu0 %v5171_v35  ;;  %v16283_v58 = vpop.f32.mrf.mxu1  ;;  %v13383_v35 = vld [vmem:[%s20083_s2 + $0x98] sm:$0xff]  }
 0x1b4   :  { %v4546_v16 = vsel %vm16032_vm6, %v4386_v47, -1e+30  ;;  %v13517_v11 = vpop.eup %13516  ;;  %v4923_v60 = vmul.f32 %v13515_v0, %v16143_v57  ;;  %v4694_v42 = vmul.f32 1.442695, %v4547_v34  ;;  %v3835_v36 = vpop.permute.xlu1 %3834  ;;  %12585 = vmatpush3.bf16.msra.mxu0 %v13381_v37 }
 0x1b5   :  { %v4692_v51 = vmul.f32 1.442695, %v4546_v16  ;;  %v3831_v26 = vpop.permute.xlu0 %3830  ;;  %v4922_v1 = vmul.f32 %v13517_v11, %v16075_v4  ;;  %v4389_v12 = vsub.f32 %v3835_v36, %v16226_v41  ;;  %v5172_v13 = vpack.c.bf16 %v5049_v8, %v5048_v19  ;;  %12586 = vmatprep.subr.bf16.mxu0 %v13382_v59  ;;  %v16298_v19 = vpop.f32.mrf.mxu0 }
 0x1b6   :  { %v4388_v5 = vsub.f32 %v3831_v26, %v16226_v41  ;;  %v5051_v57 = vmul.f32 0.35355338, %v4923_v60  ;;  %13530 = vpow2.f32 %v4694_v42  ;;  %4075 = vbcast.lane.b32.xlu1 %v16093_v15, 376  ;;  %4071 = vbcast.lane.b32.xlu0 %v16093_v15, 368  ;;  %v16292_v4 = vrot.slane %v16089_v25, %v14858_v9 }
 0x1b7   :  { %v13519_v37 = vpop.eup %13518  ;;  %v5050_v47 = vmul.f32 0.35355338, %v4922_v1  ;;  %13532 = vpow2.f32 %v4692_v51  ;;  %v4549_v8 = vsel %vm16063_vm7, %v4389_v12, -1e+30  ;;  %12540 = vmatprep.mubr.bf16.mxu0 %v5172_v13  ;;  %v16303_v12 = vpop.f32.mrf.mxu1 }
 0x1b8   :  { %v4548_v0 = vsel %vm16069_vm8, %v4388_v5, -1e+30  ;;  %v13521_v34 = vpop.eup %13520  ;;  %v4698_v16 = vmul.f32 1.442695, %v4549_v8  ;;  %v4925_v15 = vmul.f32 %v13519_v37, %v2568_v28  ;;  %v3843_v60 = vpop.permute.xlu1 %3842  ;;  %12587 = vmatpush3.bf16.msra.mxu0 %v13382_v59  ;;  %v13384_v5 = vld [vmem:[%s20083_s2 + $0x90] sm:$0xff]  }
 0x1b9   :  { %v4696_v11 = vmul.f32 1.442695, %v4548_v0  ;;  %v3839_v42 = vpop.permute.xlu0 %3838  ;;  %v5173_v36 = vpack.c.bf16 %v5051_v57, %v5050_v47  ;;  %v4924_v26 = vmul.f32 %v13521_v34, %v16231_v55  ;;  %v4391_v51 = vsub.f32 %v3843_v60, %v16226_v41  ;;  %12588 = vmatprep.subr.bf16.mxu0 %v13383_v35  ;;  %v16314_v37 = vpop.f32.mrf.mxu0 }
 0x1ba   :  { %v4390_v1 = vsub.f32 %v3839_v42, %v16226_v41  ;;  %13534 = vpow2.f32 %v4698_v16  ;;  %v5053_v13 = vmul.f32 0.35355338, %v4925_v15  ;;  %4086 = vbcast.lane.b32.xlu1 %v16292_v4, 264  ;;  %4082 = vbcast.lane.b32.xlu0 %v16292_v4, 256 }
 0x1bb   :  { %v13523_v28 = vpop.eup %13522  ;;  %v5052_v59 = vmul.f32 0.35355338, %v4924_v26  ;;  %13536 = vpow2.f32 %v4696_v11  ;;  %v4551_v55 = vsel %vm16082_vm9, %v4391_v51, -1e+30  ;;  %12541 = vmatmul.mubr.bf16.gmra.mxu0 %v5173_v36  ;;  %v16320_v51 = vpop.f32.mrf.mxu1  ;;  %v13385_v36 = vld [vmem:[%s20083_s2 + $0x88] sm:$0xff]  }
 0x1bc   :  { %v4550_v57 = vsel %vm16101_vm10, %v4390_v1, -1e+30  ;;  %v13525_v47 = vpop.eup %13524  ;;  %v4927_v8 = vmul.f32 %v13523_v28, %v16249_v7  ;;  %v4702_v0 = vmul.f32 1.442695, %v4551_v55  ;;  %v3851_v16 = vpop.permute.xlu1 %3850  ;;  %12589 = vmatpush3.bf16.msra.mxu0 %v13383_v35 }
 0x1bd   :  { %v4700_v34 = vmul.f32 1.442695, %v4550_v57  ;;  %v3847_v15 = vpop.permute.xlu0 %3846  ;;  %v4926_v60 = vmul.f32 %v13525_v47, %v16202_v48  ;;  %v4393_v11 = vsub.f32 %v3851_v16, %v16226_v41  ;;  %v5174_v26 = vpack.c.bf16 %v5053_v13, %v5052_v59  ;;  %12590 = vmatprep.subr.bf16.mxu0 %v13384_v5  ;;  %v16331_v28 = vpop.f32.mrf.mxu0 }
 0x1be   :  { %v4392_v42 = vsub.f32 %v3847_v15, %v16226_v41  ;;  %v5055_v7 = vmul.f32 0.35355338, %v4927_v8  ;;  %13538 = vpow2.f32 %v4702_v0  ;;  %4094 = vbcast.lane.b32.xlu1 %v16292_v4, 280  ;;  %4090 = vbcast.lane.b32.xlu0 %v16292_v4, 272 }
 0x1bf   :  { %v13527_v35 = vpop.eup %13526  ;;  %v5054_v48 = vmul.f32 0.35355338, %v4926_v60  ;;  %13540 = vpow2.f32 %v4700_v34  ;;  %v4553_v1 = vsel %vm16128_vm11, %v4393_v11, -1e+30  ;;  %12544 = vmatprep.mubr.bf16.mxu0 %v5174_v26  ;;  %v16337_v11 = vpop.f32.mrf.mxu1 }
 0x1c0   :  { %v4552_v13 = vsel %vm16134_vm12, %v4392_v42, -1e+30  ;;  %v13529_v59 = vpop.eup %13528  ;;  %v4706_v55 = vmul.f32 1.442695, %v4553_v1  ;;  %v4929_v47 = vmul.f32 %v13527_v35, %v16145_v2  ;;  %v3859_v8 = vpop.permute.xlu1 %3858  ;;  %12591 = vmatpush3.bf16.msra.mxu0 %v13384_v5  ;;  %v13386_v42 = vld [vmem:[%s20083_s2 + $0x80] sm:$0xff]  }
 0x1c1   :  { %v4704_v57 = vmul.f32 1.442695, %v4552_v13  ;;  %v3855_v0 = vpop.permute.xlu0 %3854  ;;  %v5175_v16 = vpack.c.bf16 %v5055_v7, %v5054_v48  ;;  %v4928_v34 = vmul.f32 %v13529_v59, %v16077_v52  ;;  %v4395_v15 = vsub.f32 %v3859_v8, %v16226_v41  ;;  %12592 = vmatprep.subr.bf16.mxu0 %v13385_v36  ;;  %v16348_v35 = vpop.f32.mrf.mxu0 }
 0x1c2   :  { %v4394_v60 = vsub.f32 %v3855_v0, %v16226_v41  ;;  %13542 = vpow2.f32 %v4706_v55  ;;  %v5057_v26 = vmul.f32 0.35355338, %v4929_v47  ;;  %4102 = vbcast.lane.b32.xlu1 %v16292_v4, 296  ;;  %4098 = vbcast.lane.b32.xlu0 %v16292_v4, 288  ;;  %v4324_v8 = vcombine.high %v15946_v49, %v15946_v49 }
 0x1c3   :  { %v13531_v2 = vpop.eup %13530  ;;  %v5056_v5 = vmul.f32 0.35355338, %v4928_v34  ;;  %13544 = vpow2.f32 %v4704_v57  ;;  %v4555_v52 = vsel %vm16150_vm13, %v4395_v15, -1e+30  ;;  %12545 = vmatmul.mubr.bf16.gmra.mxu0 %v5175_v16  ;;  %v16356_v15 = vpop.f32.mrf.mxu1 }
 0x1c4   :  { %v4554_v7 = vsel %vm16156_vm14, %v4394_v60, -1e+30  ;;  %v13533_v48 = vpop.eup %13532  ;;  %v4931_v1 = vmul.f32 %v13531_v2, %v16113_v43  ;;  %v4710_v13 = vmul.f32 1.442695, %v4555_v52  ;;  %v3867_v55 = vpop.permute.xlu1 %3866  ;;  %12593 = vmatpush3.bf16.msra.mxu0 %v13385_v36  ;;  %v16361_v43 = vld [vmem:[%s20083_s2 + $0x138] sm:$0xff]  }
 0x1c5   :  { %v4708_v59 = vmul.f32 1.442695, %v4554_v7  ;;  %v3863_v47 = vpop.permute.xlu0 %3862  ;;  %v4930_v57 = vmul.f32 %v13533_v48, %v16049_v20  ;;  %v4397_v0 = vsub.f32 %v3867_v55, %v16226_v41  ;;  %v5176_v16 = vpack.c.bf16 %v5057_v26, %v5056_v5  ;;  %12594 = vmatprep.subr.bf16.mxu0 %v13386_v42  ;;  %v16369_v2 = vpop.f32.mrf.mxu0 }
 0x1c6   :  { %v4396_v34 = vsub.f32 %v3863_v47, %v16226_v41  ;;  %v5059_v60 = vmul.f32 0.35355338, %v4931_v1  ;;  %13546 = vpow2.f32 %v4710_v13  ;;  %4110 = vbcast.lane.b32.xlu1 %v16292_v4, 312  ;;  %4106 = vbcast.lane.b32.xlu0 %v16292_v4, 304  ;;  %v16373_v55 = vrot.slane %v4324_v8, %v14382_v24 }
 0x1c7   :  { %v13535_v49 = vpop.eup %13534  ;;  %v5058_v20 = vmul.f32 0.35355338, %v4930_v57  ;;  %13548 = vpow2.f32 %v4708_v59  ;;  %v4557_v36 = vsel %vm16165_vm15, %v4397_v0, -1e+30  ;;  %12564 = vmatprep.mubr.bf16.mxu1 %v5176_v16  ;;  %v13388_v16 = vld [vmem:[%s20083_s2 + $0xf0] sm:$0xff]  }
 0x1c8   :  { %v4556_v26 = vsel %vm16177_vm1, %v4396_v34, -1e+30  ;;  %v13537_v5 = vpop.eup %13536  ;;  %v4714_v52 = vmul.f32 1.442695, %v4557_v36  ;;  %v4933_v48 = vmul.f32 %v13535_v49, %v16251_v6  ;;  %v3875_v1 = vpop.permute.xlu1 %3874  ;;  %12595 = vmatpush3.bf16.msra.mxu0 %v13386_v42 }
 0x1c9   :  { %v4712_v7 = vmul.f32 1.442695, %v4556_v26  ;;  %v3871_v13 = vpop.permute.xlu0 %3870  ;;  %v5177_v59 = vpack.c.bf16 %v5059_v60, %v5058_v20  ;;  %v4932_v47 = vmul.f32 %v13537_v5, %v16204_v54  ;;  %v4399_v57 = vsub.f32 %v3875_v1, %v16226_v41  ;;  %v16378_v34 = vpop.f32.mrf.mxu1  ;;  %12644 = vmatprep.subr.bf16.mxu0 %v16361_v43 }
 0x1ca   :  { %v4398_v0 = vsub.f32 %v3871_v13, %v16226_v41  ;;  %13550 = vpow2.f32 %v4714_v52  ;;  %v5061_v6 = vmul.f32 0.35355338, %v4933_v48  ;;  %4118 = vbcast.lane.b32.xlu1 %v16292_v4, 328  ;;  %4114 = vbcast.lane.b32.xlu0 %v16292_v4, 320  ;;  %v16390_v60 = vpop.f32.mrf.mxu0 }
 0x1cb   :  { %v13539_v42 = vpop.eup %13538  ;;  %v5060_v54 = vmul.f32 0.35355338, %v4932_v47  ;;  %13552 = vpow2.f32 %v4712_v7  ;;  %v4559_v41 = vsel %vm16209_vm2, %v4399_v57, -1e+30  ;;  %12565 = vmatmul.mubr.bf16.vlgmr.msra.gmra.mxu1 %v5177_v59  ;;  %v16397_v47 = vpop.f32.mrf.mxu1 }
 0x1cc   :  { %v4558_v8 = vsel %vm16215_vm0, %v4398_v0, -1e+30  ;;  %v13541_v49 = vpop.eup %13540  ;;  %v4935_v20 = vmul.f32 %v13539_v42, %v16233_v63  ;;  %v4718_v36 = vmul.f32 1.442695, %v4559_v41  ;;  %v3886_v5 = vpop.permute.xlu1 %3885  ;;  %12613 = vmatpush3.bf16.msra.mxu1 %v16039_v40  ;;  %v13389_v63 = vld [vmem:[%s20083_s2 + $0xe8] sm:$0xff]  }
 0x1cd   :  { %v4716_v26 = vmul.f32 1.442695, %v4558_v8  ;;  %v3882_v52 = vpop.permute.xlu0 %3881  ;;  %v4934_v7 = vmul.f32 %v13541_v49, %v16183_v62  ;;  %v4401_v48 = vsub.f32 %v3886_v5, %v16373_v55  ;;  %v5178_v13 = vpack.c.bf16 %v5061_v6, %v5060_v54  ;;  %12614 = vmatprep.subr.bf16.mxu1 %v13388_v16  ;;  %v16408_v6 = vpop.f32.mrf.mxu0 }
 0x1ce   :  { %v4400_v1 = vsub.f32 %v3882_v52, %v16373_v55  ;;  %v5063_v59 = vmul.f32 0.35355338, %v4935_v20  ;;  %13554 = vpow2.f32 %v4718_v36  ;;  %4126 = vbcast.lane.b32.xlu1 %v16292_v4, 344  ;;  %4122 = vbcast.lane.b32.xlu0 %v16292_v4, 336  ;;  %v16410_v42 = vpop.f32.mrf.mxu1 }
 0x1cf   :  { %v13543_v40 = vpop.eup %13542  ;;  %v5062_v62 = vmul.f32 0.35355338, %v4934_v7  ;;  %13556 = vpow2.f32 %v4716_v26  ;;  %v4561_v57 = vsel %vm16002_vm3, %v4401_v48, -1e+30  ;;  %12568 = vmatprep.mubr.bf16.mxu1 %v5178_v13  ;;  %v13390_v48 = vld [vmem:[%s20083_s2 + $0xe0] sm:$0xff]  }
 0x1d0   :  { %v4560_v0 = vsel %vm16008_vm4, %v4400_v1, -1e+30  ;;  %v13545_v54 = vpop.eup %13544  ;;  %v4722_v41 = vmul.f32 1.442695, %v4561_v57  ;;  %v4937_v49 = vmul.f32 %v13543_v40, %v16320_v51  ;;  %v3894_v20 = vpop.permute.xlu1 %3893  ;;  %12615 = vmatpush3.bf16.msra.mxu1 %v13388_v16 }
 0x1d1   :  { %v4720_v8 = vmul.f32 1.442695, %v4560_v0  ;;  %v3890_v36 = vpop.permute.xlu0 %3889  ;;  %v5179_v26 = vpack.c.bf16 %v5063_v59, %v5062_v62  ;;  %v4936_v5 = vmul.f32 %v13545_v54, %v16283_v58  ;;  %v4403_v52 = vsub.f32 %v3894_v20, %v16373_v55  ;;  %12616 = vmatprep.subr.bf16.mxu1 %v13389_v63  ;;  %v16425_v59 = vpop.f32.mrf.mxu0 }
 0x1d2   :  { %v4402_v7 = vsub.f32 %v3890_v36, %v16373_v55  ;;  %13558 = vpow2.f32 %v4722_v41  ;;  %v5065_v1 = vmul.f32 0.35355338, %v4937_v49  ;;  %4134 = vbcast.lane.b32.xlu1 %v16292_v4, 360  ;;  %4130 = vbcast.lane.b32.xlu0 %v16292_v4, 352  ;;  %v16427_v40 = vpop.f32.mrf.mxu1 }
 0x1d3   :  { %v13547_v51 = vpop.eup %13546  ;;  %v5064_v16 = vmul.f32 0.35355338, %v4936_v5  ;;  %13560 = vpow2.f32 %v4720_v8  ;;  %v4563_v58 = vsel %vm16026_vm5, %v4403_v52, -1e+30  ;;  %12569 = vmatmul.mubr.bf16.gmra.mxu1 %v5179_v26  ;;  %v13391_v26 = vld [vmem:[%s20083_s2 + $0xd8] sm:$0xff]  }
 0x1d4   :  { %v4562_v13 = vsel %vm16032_vm6, %v4402_v7, -1e+30  ;;  %v13549_v62 = vpop.eup %13548  ;;  %v4939_v57 = vmul.f32 %v13547_v51, %v16303_v12  ;;  %v4726_v0 = vmul.f32 1.442695, %v4563_v58  ;;  %v3902_v41 = vpop.permute.xlu1 %3901  ;;  %12617 = vmatpush3.bf16.msra.mxu1 %v13389_v63  ;;  %v16440_v12 = vrot.slane %v16089_v25, %v14987_v17 }
 0x1d5   :  { %v4724_v54 = vmul.f32 1.442695, %v4562_v13  ;;  %v3898_v49 = vpop.permute.xlu0 %3897  ;;  %v4938_v8 = vmul.f32 %v13549_v62, %v16266_v23  ;;  %v4405_v20 = vsub.f32 %v3902_v41, %v16373_v55  ;;  %v5180_v5 = vpack.c.bf16 %v5065_v1, %v5064_v16  ;;  %12618 = vmatprep.subr.bf16.mxu1 %v13390_v48  ;;  %v16446_v51 = vpop.f32.mrf.mxu0 }
 0x1d6   :  { %v4404_v36 = vsub.f32 %v3898_v49, %v16373_v55  ;;  %v5067_v52 = vmul.f32 0.35355338, %v4939_v57  ;;  %13562 = vpow2.f32 %v4726_v0  ;;  %4142 = vbcast.lane.b32.xlu1 %v16292_v4, 376  ;;  %4138 = vbcast.lane.b32.xlu0 %v16292_v4, 368  ;;  %v16448_v16 = vpop.f32.mrf.mxu1 }
 0x1d7   :  { %v13551_v23 = vpop.eup %13550  ;;  %v5066_v63 = vmul.f32 0.35355338, %v4938_v8  ;;  %13564 = vpow2.f32 %v4724_v54  ;;  %v4565_v7 = vsel %vm16063_vm7, %v4405_v20, -1e+30  ;;  %12572 = vmatprep.mubr.bf16.mxu1 %v5180_v5  ;;  %v13392_v8 = vld [vmem:[%s20083_s2 + $0xd0] sm:$0xff]   ;;  %v16463_v5 = vpop.f32.mrf.mxu0 }
 0x1d8   :  { %v4564_v1 = vsel %vm16069_vm8, %v4404_v36, -1e+30  ;;  %v13553_v58 = vpop.eup %13552  ;;  %v4730_v4 = vmul.f32 1.442695, %v4565_v7  ;;  %v4941_v25 = vmul.f32 %v13551_v23, %v16397_v47  ;;  %v3910_v62 = vpop.permute.xlu1 %3909  ;;  %12619 = vmatpush3.bf16.msra.mxu1 %v13390_v48 }
 0x1d9   :  { %v4728_v13 = vmul.f32 1.442695, %v4564_v1  ;;  %v3906_v57 = vpop.permute.xlu0 %3905  ;;  %v5181_v0 = vpack.c.bf16 %v5067_v52, %v5066_v63  ;;  %v4940_v54 = vmul.f32 %v13553_v58, %v16356_v15  ;;  %v4407_v41 = vsub.f32 %v3910_v62, %v16373_v55  ;;  %12620 = vmatprep.subr.bf16.mxu1 %v13391_v26  ;;  %v16465_v52 = vpop.f32.mrf.mxu1 }
 0x1da   :  { %v4406_v49 = vsub.f32 %v3906_v57, %v16373_v55  ;;  %13566 = vpow2.f32 %v4730_v4  ;;  %v5069_v20 = vmul.f32 0.35355338, %v4941_v25  ;;  %4153 = vbcast.lane.b32.xlu1 %v16440_v12, 264  ;;  %4149 = vbcast.lane.b32.xlu0 %v16440_v12, 256 }
 0x1db   :  { %v13555_v47 = vpop.eup %13554  ;;  %v5068_v48 = vmul.f32 0.35355338, %v4940_v54  ;;  %13568 = vpow2.f32 %v4728_v13  ;;  %v4567_v15 = vsel %vm16082_vm9, %v4407_v41, -1e+30  ;;  %12573 = vmatmul.mubr.bf16.gmra.mxu1 %v5181_v0  ;;  %v13393_v0 = vld [vmem:[%s20083_s2 + $0xc8] sm:$0xff]  }
 0x1dc   :  { %v4566_v36 = vsel %vm16101_vm10, %v4406_v49, -1e+30  ;;  %v13557_v23 = vpop.eup %13556  ;;  %v4943_v63 = vmul.f32 %v13555_v47, %v16378_v34  ;;  %v4734_v7 = vmul.f32 1.442695, %v4567_v15  ;;  %v3918_v58 = vpop.permute.xlu1 %3917  ;;  %12621 = vmatpush3.bf16.msra.mxu1 %v13391_v26 }
 0x1dd   :  { %v4732_v1 = vmul.f32 1.442695, %v4566_v36  ;;  %v3914_v4 = vpop.permute.xlu0 %3913  ;;  %v4942_v13 = vmul.f32 %v13557_v23, %v16337_v11  ;;  %v4409_v25 = vsub.f32 %v3918_v58, %v16373_v55  ;;  %v5182_v57 = vpack.c.bf16 %v5069_v20, %v5068_v48  ;;  %12622 = vmatprep.subr.bf16.mxu1 %v13392_v8  ;;  %v16480_v49 = vpop.f32.mrf.mxu0 }
 0x1de   :  { %v4408_v62 = vsub.f32 %v3914_v4, %v16373_v55  ;;  %v5071_v54 = vmul.f32 0.35355338, %v4943_v63  ;;  %13570 = vpow2.f32 %v4734_v7  ;;  %4161 = vbcast.lane.b32.xlu1 %v16440_v12, 280  ;;  %4157 = vbcast.lane.b32.xlu0 %v16440_v12, 272  ;;  %v16482_v20 = vpop.f32.mrf.mxu1 }
 0x1df   :  { %v13559_v34 = vpop.eup %13558  ;;  %v5070_v26 = vmul.f32 0.35355338, %v4942_v13  ;;  %13572 = vpow2.f32 %v4732_v1  ;;  %v4569_v11 = vsel %vm16128_vm11, %v4409_v25, -1e+30  ;;  %12576 = vmatprep.mubr.bf16.mxu1 %v5182_v57  ;;  %v13394_v13 = vld [vmem:[%s20083_s2 + $0xc0] sm:$0xff]   ;;  %v16497_v57 = vpop.f32.mrf.mxu0 }
 0x1e0   :  { %v4568_v41 = vsel %vm16134_vm12, %v4408_v62, -1e+30  ;;  %v13561_v47 = vpop.eup %13560  ;;  %v4738_v48 = vmul.f32 1.442695, %v4569_v11  ;;  %v4945_v36 = vmul.f32 %v13559_v34, %v16331_v28  ;;  %v3926_v23 = vpop.permute.xlu1 %3925  ;;  %12623 = vmatpush3.bf16.msra.mxu1 %v13392_v8 }
 0x1e1   :  { %v4736_v15 = vmul.f32 1.442695, %v4568_v41  ;;  %v3922_v63 = vpop.permute.xlu0 %3921  ;;  %v5183_v7 = vpack.c.bf16 %v5071_v54, %v5070_v26  ;;  %v4944_v1 = vmul.f32 %v13561_v47, %v16298_v19  ;;  %v4411_v58 = vsub.f32 %v3926_v23, %v16373_v55  ;;  %12624 = vmatprep.subr.bf16.mxu1 %v13393_v0  ;;  %v16499_v54 = vpop.f32.mrf.mxu1 }
 0x1e2   :  { %v4410_v4 = vsub.f32 %v3922_v63, %v16373_v55  ;;  %13574 = vpow2.f32 %v4738_v48  ;;  %v5073_v25 = vmul.f32 0.35355338, %v4945_v36  ;;  %4169 = vbcast.lane.b32.xlu1 %v16440_v12, 296  ;;  %4165 = vbcast.lane.b32.xlu0 %v16440_v12, 288 }
 0x1e3   :  { %v13563_v28 = vpop.eup %13562  ;;  %v5072_v8 = vmul.f32 0.35355338, %v4944_v1  ;;  %13576 = vpow2.f32 %v4736_v15  ;;  %v4571_v19 = vsel %vm16150_vm13, %v4411_v58, -1e+30  ;;  %12577 = vmatmul.mubr.bf16.gmra.mxu1 %v5183_v7  ;;  %v4326_v15 = vcombine.high %v16197_v3, %v16197_v3 }
 0x1e4   :  { %v4570_v62 = vsel %vm16156_vm14, %v4410_v4, -1e+30  ;;  %v13565_v34 = vpop.eup %13564  ;;  %v4947_v26 = vmul.f32 %v13563_v28, %v16314_v37  ;;  %v4742_v11 = vmul.f32 1.442695, %v4571_v19  ;;  %v3934_v47 = vpop.permute.xlu1 %3933  ;;  %12625 = vmatpush3.bf16.msra.mxu1 %v13393_v0  ;;  %v16510_v37 = vld [vmem:[%s20083_s2 + $0x178] sm:$0xff]  }
 0x1e5   :  { %v4740_v41 = vmul.f32 1.442695, %v4570_v62  ;;  %v3930_v48 = vpop.permute.xlu0 %3929  ;;  %v4946_v36 = vmul.f32 %v13565_v34, %v16277_v61  ;;  %v4413_v23 = vsub.f32 %v3934_v47, %v16373_v55  ;;  %v5184_v7 = vpack.c.bf16 %v5073_v25, %v5072_v8  ;;  %12626 = vmatprep.subr.bf16.mxu1 %v13394_v13  ;;  %v16518_v4 = vpop.f32.mrf.mxu0 }
 0x1e6   :  { %v4412_v63 = vsub.f32 %v3930_v48, %v16373_v55  ;;  %v5075_v1 = vmul.f32 0.35355338, %v4947_v26  ;;  %13578 = vpow2.f32 %v4742_v11  ;;  %4177 = vbcast.lane.b32.xlu1 %v16440_v12, 312  ;;  %4173 = vbcast.lane.b32.xlu0 %v16440_v12, 304  ;;  %v16520_v25 = vpop.f32.mrf.mxu1  ;;  %v16524_v11 = vrot.slane %v4326_v15, %v14382_v24 }
 0x1e7   :  { %v13567_v3 = vpop.eup %13566  ;;  %v5074_v0 = vmul.f32 0.35355338, %v4946_v36  ;;  %13580 = vpow2.f32 %v4740_v41  ;;  %v4573_v61 = vsel %vm16165_vm15, %v4413_v23, -1e+30  ;;  %12596 = vmatprep.mubr.bf16.mxu0 %v5184_v7  ;;  %v13397_v23 = vld [vmem:[%s20083_s2 + $0x130] sm:$0xff]  }
 0x1e8   :  { %v4572_v58 = vsel %vm16177_vm1, %v4412_v63, -1e+30  ;;  %v13569_v28 = vpop.eup %13568  ;;  %v4746_v8 = vmul.f32 1.442695, %v4573_v61  ;;  %v4949_v62 = vmul.f32 %v13567_v3, %v16408_v6  ;;  %v3942_v34 = vpop.permute.xlu1 %3941  ;;  %12627 = vmatpush3.bf16.msra.mxu1 %v13394_v13 }
 0x1e9   :  { %v4744_v19 = vmul.f32 1.442695, %v4572_v58  ;;  %v3938_v26 = vpop.permute.xlu0 %3937  ;;  %v5185_v41 = vpack.c.bf16 %v5075_v1, %v5074_v0  ;;  %v4948_v47 = vmul.f32 %v13569_v28, %v16369_v2  ;;  %v4415_v48 = vsub.f32 %v3942_v34, %v16373_v55  ;;  %12676 = vmatprep.subr.bf16.mxu1 %v16510_v37  ;;  %v16539_v63 = vpop.f32.mrf.mxu0 }
 0x1ea   :  { %v4414_v36 = vsub.f32 %v3938_v26, %v16373_v55  ;;  %13582 = vpow2.f32 %v4746_v8  ;;  %v5077_v6 = vmul.f32 0.35355338, %v4949_v62  ;;  %4185 = vbcast.lane.b32.xlu1 %v16440_v12, 328  ;;  %4181 = vbcast.lane.b32.xlu0 %v16440_v12, 320  ;;  %v16541_v7 = vpop.f32.mrf.mxu1  ;;  %v13398_v26 = vld [vmem:[%s20083_s2 + $0x128] sm:$0xff]  }
 0x1eb   :  { %v13571_v13 = vpop.eup %13570  ;;  %v5076_v15 = vmul.f32 0.35355338, %v4948_v47  ;;  %13584 = vpow2.f32 %v4744_v19  ;;  %v4575_v2 = vsel %vm16209_vm2, %v4415_v48, -1e+30  ;;  %12597 = vmatmul.mubr.bf16.vlgmr.msra.gmra.mxu0 %v5185_v41  ;;  %v2890_v48 = vpop.f32.mrf.mxu0 }
 0x1ec   :  { %v4574_v55 = vsel %vm16215_vm0, %v4414_v36, -1e+30  ;;  %v13573_v1 = vpop.eup %13572  ;;  %v4951_v3 = vmul.f32 %v13571_v13, %v16390_v60  ;;  %v4750_v0 = vmul.f32 1.442695, %v4575_v2  ;;  %v3953_v58 = vpop.permute.xlu1 %3952  ;;  %12645 = vmatpush3.bf16.msra.mxu0 %v16361_v43 }
 0x1ed   :  { %v4748_v61 = vmul.f32 1.442695, %v4574_v55  ;;  %v3949_v28 = vpop.permute.xlu0 %3948  ;;  %v4950_v8 = vmul.f32 %v13573_v1, %v16348_v35  ;;  %v4417_v19 = vsub.f32 %v3953_v58, %v16524_v11  ;;  %v5186_v34 = vpack.c.bf16 %v5077_v6, %v5076_v15  ;;  %12646 = vmatprep.subr.bf16.mxu0 %v13397_v23  ;;  %v16557_v36 = vpop.f32.mrf.mxu1 }
 0x1ee   :  { %v4416_v62 = vsub.f32 %v3949_v28, %v16524_v11  ;;  %v5079_v41 = vmul.f32 0.35355338, %v4951_v3  ;;  %13586 = vpow2.f32 %v4750_v0  ;;  %4193 = vbcast.lane.b32.xlu1 %v16440_v12, 344  ;;  %4189 = vbcast.lane.b32.xlu0 %v16440_v12, 336  ;;  %v13399_v28 = vld [vmem:[%s20083_s2 + $0x120] sm:$0xff]  }
 0x1ef   :  { %v13575_v60 = vpop.eup %13574  ;;  %v5078_v43 = vmul.f32 0.35355338, %v4950_v8  ;;  %13588 = vpow2.f32 %v4748_v61  ;;  %v4577_v35 = vsel %vm16002_vm3, %v4417_v19, -1e+30  ;;  %12600 = vmatprep.mubr.bf16.mxu0 %v5186_v34  ;;  %v16566_v8 = vpop.f32.mrf.mxu0 }
 0x1f0   :  { %v4576_v47 = vsel %vm16008_vm4, %v4416_v62, -1e+30  ;;  %v13577_v6 = vpop.eup %13576  ;;  %v4754_v13 = vmul.f32 1.442695, %v4577_v35  ;;  %v4953_v2 = vmul.f32 %v13575_v60, %v16480_v49  ;;  %v3961_v55 = vpop.permute.xlu1 %3960  ;;  %12647 = vmatpush3.bf16.msra.mxu0 %v13397_v23 }
 0x1f1   :  { %v4752_v15 = vmul.f32 1.442695, %v4576_v47  ;;  %v3957_v1 = vpop.permute.xlu0 %3956  ;;  %v5187_v3 = vpack.c.bf16 %v5079_v41, %v5078_v43  ;;  %v4952_v0 = vmul.f32 %v13577_v6, %v16446_v51  ;;  %v4419_v61 = vsub.f32 %v3961_v55, %v16524_v11  ;;  %12648 = vmatprep.subr.bf16.mxu0 %v13398_v26  ;;  %v16574_v34 = vpop.f32.mrf.mxu1 }
 0x1f2   :  { %v4418_v58 = vsub.f32 %v3957_v1, %v16524_v11  ;;  %13590 = vpow2.f32 %v4754_v13  ;;  %v5081_v19 = vmul.f32 0.35355338, %v4953_v2  ;;  %4201 = vbcast.lane.b32.xlu1 %v16440_v12, 360  ;;  %4197 = vbcast.lane.b32.xlu0 %v16440_v12, 352  ;;  %v13400_v1 = vld [vmem:[%s20083_s2 + $0x118] sm:$0xff]  }
 0x1f3   :  { %v13579_v49 = vpop.eup %13578  ;;  %v5080_v23 = vmul.f32 0.35355338, %v4952_v0  ;;  %13592 = vpow2.f32 %v4752_v15  ;;  %v4579_v51 = vsel %vm16026_vm5, %v4419_v61, -1e+30  ;;  %12601 = vmatmul.mubr.bf16.gmra.mxu0 %v5187_v3  ;;  %v16583_v3 = vpop.f32.mrf.mxu0 }
 0x1f4   :  { %v4578_v62 = vsel %vm16032_vm6, %v4418_v58, -1e+30  ;;  %v13581_v41 = vpop.eup %13580  ;;  %v4955_v60 = vmul.f32 %v13579_v49, %v16463_v5  ;;  %v4758_v43 = vmul.f32 1.442695, %v4579_v51  ;;  %v3969_v47 = vpop.permute.xlu1 %3968  ;;  %12649 = vmatpush3.bf16.msra.mxu0 %v13398_v26 }
 0x1f5   :  { %v4756_v35 = vmul.f32 1.442695, %v4578_v62  ;;  %v3965_v6 = vpop.permute.xlu0 %3964  ;;  %v4954_v13 = vmul.f32 %v13581_v41, %v16425_v59  ;;  %v4421_v15 = vsub.f32 %v3969_v47, %v16524_v11  ;;  %v5188_v55 = vpack.c.bf16 %v5081_v19, %v5080_v23  ;;  %12650 = vmatprep.subr.bf16.mxu0 %v13399_v28  ;;  %v16590_v59 = vld [vmem:[%s20081_s3] sm:$0xff] }
 0x1f6   :  { %v4420_v2 = vsub.f32 %v3965_v6, %v16524_v11  ;;  %v5083_v5 = vmul.f32 0.35355338, %v4955_v60  ;;  %13594 = vpow2.f32 %v4758_v43  ;;  %4209 = vbcast.lane.b32.xlu1 %v16440_v12, 376  ;;  %4205 = vbcast.lane.b32.xlu0 %v16440_v12, 368  ;;  %v16594_v26 = vrot.slane %v16590_v59, %v15154_v38  ;;  %v16600_v12 = vpop.f32.mrf.mxu1 }
 0x1f7   :  { %v13583_v0 = vpop.eup %13582  ;;  %v5082_v61 = vmul.f32 0.35355338, %v4954_v13  ;;  %13596 = vpow2.f32 %v4756_v35  ;;  %v4581_v58 = vsel %vm16063_vm7, %v4421_v15, -1e+30  ;;  %12604 = vmatprep.mubr.bf16.mxu0 %v5188_v55  ;;  %v16605_v13 = vpop.f32.mrf.mxu0  ;;  %v13401_v15 = vld [vmem:[%s20083_s2 + $0x110] sm:$0xff]  }
 0x1f8   :  { %v4580_v19 = vsel %vm16069_vm8, %v4420_v2, -1e+30  ;;  %v13585_v49 = vpop.eup %13584  ;;  %v4762_v23 = vmul.f32 1.442695, %v4581_v58  ;;  %v4957_v62 = vmul.f32 %v13583_v0, %v2890_v48  ;;  %v3977_v41 = vpop.permute.xlu1 %3976  ;;  %12651 = vmatpush3.bf16.msra.mxu0 %v13399_v28 }
 0x1f9   :  { %v4760_v51 = vmul.f32 1.442695, %v4580_v19  ;;  %v3973_v60 = vpop.permute.xlu0 %3972  ;;  %v5189_v43 = vpack.c.bf16 %v5083_v5, %v5082_v61  ;;  %v4956_v47 = vmul.f32 %v13585_v49, %v16518_v4  ;;  %v4423_v35 = vsub.f32 %v3977_v41, %v16524_v11  ;;  %12652 = vmatprep.subr.bf16.mxu0 %v13400_v1  ;;  %v16616_v5 = vpop.f32.mrf.mxu1 }
 0x1fa   :  { %v4422_v6 = vsub.f32 %v3973_v60, %v16524_v11  ;;  %13598 = vpow2.f32 %v4762_v23  ;;  %v5085_v2 = vmul.f32 0.35355338, %v4957_v62  ;;  %4220 = vbcast.lane.b32.xlu1 %v16594_v26, 264  ;;  %4216 = vbcast.lane.b32.xlu0 %v16594_v26, 256  ;;  %v4279_v62 = vcombine.high %v16590_v59, %v16590_v59 }
 0x1fb   :  { %v13587_v48 = vpop.eup %13586  ;;  %v5084_v28 = vmul.f32 0.35355338, %v4956_v47  ;;  %13600 = vpow2.f32 %v4760_v51  ;;  %v4583_v4 = vsel %vm16082_vm9, %v4423_v35, -1e+30  ;;  %12605 = vmatmul.mubr.bf16.gmra.mxu0 %v5189_v43  ;;  %v16624_v47 = vpop.f32.mrf.mxu0 }
 0x1fc   :  { %v4582_v55 = vsel %vm16101_vm10, %v4422_v6, -1e+30  ;;  %v13589_v0 = vpop.eup %13588  ;;  %v4959_v61 = vmul.f32 %v13587_v48, %v16539_v63  ;;  %v4766_v58 = vmul.f32 1.442695, %v4583_v4  ;;  %v3985_v49 = vpop.permute.xlu1 %3984  ;;  %12653 = vmatpush3.bf16.msra.mxu0 %v13400_v1  ;;  %v13402_v63 = vld [vmem:[%s20083_s2 + $0x108] sm:$0xff]  }
 0x1fd   :  { %v4764_v19 = vmul.f32 1.442695, %v4582_v55  ;;  %v3981_v23 = vpop.permute.xlu0 %3980  ;;  %v4958_v51 = vmul.f32 %v13589_v0, %v16497_v57  ;;  %v4425_v41 = vsub.f32 %v3985_v49, %v16524_v11  ;;  %v5190_v43 = vpack.c.bf16 %v5085_v2, %v5084_v28  ;;  %12654 = vmatprep.subr.bf16.mxu0 %v13401_v15  ;;  %v16635_v48 = vpop.f32.mrf.mxu1 }
 0x1fe   :  { %v4424_v60 = vsub.f32 %v3981_v23, %v16524_v11  ;;  %v5087_v35 = vmul.f32 0.35355338, %v4959_v61  ;;  %13602 = vpow2.f32 %v4766_v58  ;;  %4228 = vbcast.lane.b32.xlu1 %v16594_v26, 280  ;;  %4224 = vbcast.lane.b32.xlu0 %v16594_v26, 272  ;;  %v16639_v49 = vrot.slane %v4279_v62, %v15890_v50 }
 0x1ff   :  { %v13591_v1 = vpop.eup %13590  ;;  %v5086_v57 = vmul.f32 0.35355338, %v4958_v51  ;;  %13604 = vpow2.f32 %v4764_v19  ;;  %v4585_v6 = vsel %vm16128_vm11, %v4425_v41, -1e+30  ;;  %12608 = vmatprep.mubr.bf16.mxu0 %v5190_v43 }
 0x200   :  { %v4584_v2 = vsel %vm16134_vm12, %v4424_v60, -1e+30  ;;  %v13593_v28 = vpop.eup %13592  ;;  %v4770_v4 = vmul.f32 1.442695, %v4585_v6  ;;  %v4961_v0 = vmul.f32 %v13591_v1, %v16465_v52  ;;  %v3993_v61 = vpop.permute.xlu1 %3992  ;;  %12655 = vmatpush3.bf16.msra.mxu0 %v13401_v15  ;;  %v13403_v52 = vld [vmem:[%s20083_s2 + $0x100] sm:$0xff]  }
 0x201   :  { %v4768_v55 = vmul.f32 1.442695, %v4584_v2  ;;  %v3989_v58 = vpop.permute.xlu0 %3988  ;;  %v5191_v19 = vpack.c.bf16 %v5087_v35, %v5086_v57  ;;  %v4960_v23 = vmul.f32 %v13593_v28, %v16427_v40  ;;  %v4427_v51 = vsub.f32 %v3993_v61, %v16524_v11  ;;  %v16644_v60 = vpop.f32.mrf.mxu0  ;;  %12656 = vmatprep.subr.bf16.mxu0 %v13402_v63 }
 0x202   :  { %v4426_v41 = vsub.f32 %v3989_v58, %v16524_v11  ;;  %13606 = vpow2.f32 %v4770_v4  ;;  %v5089_v43 = vmul.f32 0.35355338, %v4961_v0  ;;  %4236 = vbcast.lane.b32.xlu1 %v16594_v26, 296  ;;  %4232 = vbcast.lane.b32.xlu0 %v16594_v26, 288  ;;  %v16655_v1 = vpop.f32.mrf.mxu1  ;;  %v16660_v61 = vrot.slane %v16639_v49, %v15890_v50 }
 0x203   :  { %v13595_v15 = vpop.eup %13594  ;;  %v5088_v62 = vmul.f32 0.35355338, %v4960_v23  ;;  %13608 = vpow2.f32 %v4768_v55  ;;  %v4587_v40 = vsel %vm16150_vm13, %v4427_v51, -1e+30  ;;  %12609 = vmatmul.mubr.bf16.gmra.mxu0 %v5191_v19  ;;  %v16665_v51 = vpop.f32.mrf.mxu0 }
 0x204   :  { %v4586_v35 = vsel %vm16156_vm14, %v4426_v41, -1e+30  ;;  %v13597_v57 = vpop.eup %13596  ;;  %v4963_v6 = vmul.f32 %v13595_v15, %v16448_v16  ;;  %v4774_v2 = vmul.f32 1.442695, %v4587_v40  ;;  %v4001_v4 = vpop.permute.xlu1 %4000  ;;  %12657 = vmatpush3.bf16.msra.mxu0 %v13402_v63  ;;  %v16670_v16 = vld [vmem:[%s20083_s2 + $0x1b8] sm:$0xff]  }
 0x205   :  { %v4772_v28 = vmul.f32 1.442695, %v4586_v35  ;;  %v3997_v0 = vpop.permute.xlu0 %3996  ;;  %v4962_v55 = vmul.f32 %v13597_v57, %v16410_v42  ;;  %v4429_v58 = vsub.f32 %v4001_v4, %v16524_v11  ;;  %v5192_v23 = vpack.c.bf16 %v5089_v43, %v5088_v62  ;;  %12658 = vmatprep.subr.bf16.mxu0 %v13403_v52  ;;  %v16678_v62 = vpop.f32.mrf.mxu1 }
 0x206   :  { %v4428_v19 = vsub.f32 %v3997_v0, %v16524_v11  ;;  %v5091_v41 = vmul.f32 0.35355338, %v4963_v6  ;;  %13610 = vpow2.f32 %v4774_v2  ;;  %4244 = vbcast.lane.b32.xlu1 %v16594_v26, 312  ;;  %4240 = vbcast.lane.b32.xlu0 %v16594_v26, 304  ;;  %v16683_v0 = vrot.slane %v16660_v61, %v14382_v24 }
 0x207   :  { %v13599_v42 = vpop.eup %13598  ;;  %v5090_v63 = vmul.f32 0.35355338, %v4962_v55  ;;  %13612 = vpow2.f32 %v4772_v28  ;;  %v4589_v43 = vsel %vm16165_vm15, %v4429_v58, -1e+30  ;;  %12628 = vmatprep.mubr.bf16.mxu1 %v5192_v23  ;;  %v16688_v23 = vpop.f32.mrf.mxu0 }
 0x208   :  { %v4588_v15 = vsel %vm16177_vm1, %v4428_v19, -1e+30  ;;  %v13601_v40 = vpop.eup %13600  ;;  %v4778_v35 = vmul.f32 1.442695, %v4589_v43  ;;  %v4965_v6 = vmul.f32 %v13599_v42, %v16541_v7  ;;  %v4009_v2 = vpop.permute.xlu1 %4008  ;;  %12659 = vmatpush3.bf16.msra.mxu0 %v13403_v52  ;;  %v13405_v7 = vld [vmem:[%s20083_s2 + $0x170] sm:$0xff]  }
 0x209   :  { %v4776_v57 = vmul.f32 1.442695, %v4588_v15  ;;  %v4005_v4 = vpop.permute.xlu0 %4004  ;;  %v5193_v28 = vpack.c.bf16 %v5091_v41, %v5090_v63  ;;  %v4964_v55 = vmul.f32 %v13601_v40, %v16499_v54  ;;  %v4431_v58 = vsub.f32 %v4009_v2, %v16524_v11  ;;  %12708 = vmatprep.subr.bf16.mxu0 %v16670_v16  ;;  %v16700_v63 = vpop.f32.mrf.mxu1 }
 0x20a   :  { %v4430_v19 = vsub.f32 %v4005_v4, %v16524_v11  ;;  %13614 = vpow2.f32 %v4778_v35  ;;  %v5093_v42 = vmul.f32 0.35355338, %v4965_v6  ;;  %4252 = vbcast.lane.b32.xlu1 %v16594_v26, 328  ;;  %4248 = vbcast.lane.b32.xlu0 %v16594_v26, 320 }
 0x20b   :  { %v13603_v52 = vpop.eup %13602  ;;  %v5092_v54 = vmul.f32 0.35355338, %v4964_v55  ;;  %13616 = vpow2.f32 %v4776_v57  ;;  %v4591_v11 = vsel %vm16209_vm2, %v4431_v58, -1e+30  ;;  %12629 = vmatmul.mubr.bf16.vlgmr.msra.gmra.mxu1 %v5193_v28  ;;  %v16712_v28 = vpop.f32.mrf.mxu1 }
 0x20c   :  { %v4590_v41 = vsel %vm16215_vm0, %v4430_v19, -1e+30  ;;  %v13605_v43 = vpop.eup %13604  ;;  %v4967_v15 = vmul.f32 %v13603_v52, %v16520_v25  ;;  %v4782_v40 = vmul.f32 1.442695, %v4591_v11  ;;  %v4020_v6 = vpop.permute.xlu1 %4019  ;;  %12677 = vmatpush3.bf16.msra.mxu1 %v16510_v37  ;;  %v13406_v25 = vld [vmem:[%s20083_s2 + $0x168] sm:$0xff]  }
 0x20d   :  { %v4780_v35 = vmul.f32 1.442695, %v4590_v41  ;;  %v4016_v2 = vpop.permute.xlu0 %4015  ;;  %v4966_v57 = vmul.f32 %v13605_v43, %v16482_v20  ;;  %v4433_v4 = vsub.f32 %v4020_v6, %v16683_v0  ;;  %v5194_v58 = vpack.c.bf16 %v5093_v42, %v5092_v54  ;;  %v16707_v19 = vpop.f32.mrf.mxu0  ;;  %12678 = vmatprep.subr.bf16.mxu1 %v13405_v7 }
 0x20e   :  { %v4432_v55 = vsub.f32 %v4016_v2, %v16683_v0  ;;  %v5095_v52 = vmul.f32 0.35355338, %v4967_v15  ;;  %13618 = vpow2.f32 %v4782_v40  ;;  %4260 = vbcast.lane.b32.xlu1 %v16594_v26, 344  ;;  %4256 = vbcast.lane.b32.xlu0 %v16594_v26, 336 }
 0x20f   :  { %v13607_v20 = vpop.eup %13606  ;;  %v5094_v37 = vmul.f32 0.35355338, %v4966_v57  ;;  %13620 = vpow2.f32 %v4780_v35  ;;  %v4593_v42 = vsel %vm16002_vm3, %v4433_v4, -1e+30  ;;  %12632 = vmatprep.mubr.bf16.mxu1 %v5194_v58  ;;  %v16724_v4 = vpop.f32.mrf.mxu0 }
 0x210   :  { %v4592_v54 = vsel %vm16008_vm4, %v4432_v55, -1e+30  ;;  %v13609_v11 = vpop.eup %13608  ;;  %v4786_v41 = vmul.f32 1.442695, %v4593_v42  ;;  %v4969_v15 = vmul.f32 %v13607_v20, %v16616_v5  ;;  %v4028_v40 = vpop.permute.xlu1 %4027  ;;  %12679 = vmatpush3.bf16.msra.mxu1 %v13405_v7  ;;  %v13407_v55 = vld [vmem:[%s20083_s2 + $0x160] sm:$0xff]  }
 0x211   :  { %v4784_v43 = vmul.f32 1.442695, %v4592_v54  ;;  %v4024_v6 = vpop.permute.xlu0 %4023  ;;  %v5195_v2 = vpack.c.bf16 %v5095_v52, %v5094_v37  ;;  %v4968_v38 = vmul.f32 %v13609_v11, %v16574_v34  ;;  %v4435_v35 = vsub.f32 %v4028_v40, %v16683_v0  ;;  %12680 = vmatprep.subr.bf16.mxu1 %v13406_v25  ;;  %v16729_v58 = vpop.f32.mrf.mxu1 }
 0x212   :  { %v4434_v57 = vsub.f32 %v4024_v6, %v16683_v0  ;;  %13622 = vpow2.f32 %v4786_v41  ;;  %v5097_v5 = vmul.f32 0.35355338, %v4969_v15  ;;  %4268 = vbcast.lane.b32.xlu1 %v16594_v26, 360  ;;  %4264 = vbcast.lane.b32.xlu0 %v16594_v26, 352 }
 0x213   :  { %v13611_v34 = vpop.eup %13610  ;;  %v5096_v7 = vmul.f32 0.35355338, %v4968_v38  ;;  %13624 = vpow2.f32 %v4784_v43  ;;  %v4595_v52 = vsel %vm16026_vm5, %v4435_v35, -1e+30  ;;  %12633 = vmatmul.mubr.bf16.gmra.mxu1 %v5195_v2  ;;  %v16741_v35 = vpop.f32.mrf.mxu0  ;;  %v13408_v2 = vld [vmem:[%s20083_s2 + $0x158] sm:$0xff]  }
 0x214   :  { %v4594_v20 = vsel %vm16032_vm6, %v4434_v57, -1e+30  ;;  %v13613_v37 = vpop.eup %13612  ;;  %v4971_v42 = vmul.f32 %v13611_v34, %v16600_v12  ;;  %v4790_v54 = vmul.f32 1.442695, %v4595_v52  ;;  %v4036_v41 = vpop.permute.xlu1 %4035  ;;  %12681 = vmatpush3.bf16.msra.mxu1 %v13406_v25 }
 0x215   :  { %v4788_v11 = vmul.f32 1.442695, %v4594_v20  ;;  %v4032_v15 = vpop.permute.xlu0 %4031  ;;  %v4970_v40 = vmul.f32 %v13613_v37, %v16557_v36  ;;  %v4437_v38 = vsub.f32 %v4036_v41, %v16683_v0  ;;  %v5196_v6 = vpack.c.bf16 %v5097_v5, %v5096_v7  ;;  %12682 = vmatprep.subr.bf16.mxu1 %v13407_v55  ;;  %v16746_v12 = vpop.f32.mrf.mxu1 }
 0x216   :  { %v4436_v43 = vsub.f32 %v4032_v15, %v16683_v0  ;;  %v5099_v57 = vmul.f32 0.35355338, %v4971_v42  ;;  %13626 = vpow2.f32 %v4790_v54  ;;  %4276 = vbcast.lane.b32.xlu1 %v16594_v26, 376  ;;  %4272 = vbcast.lane.b32.xlu0 %v16594_v26, 368 }
 0x217   :  { %v13615_v36 = vpop.eup %13614  ;;  %v5098_v25 = vmul.f32 0.35355338, %v4970_v40  ;;  %13628 = vpow2.f32 %v4788_v11  ;;  %v4597_v5 = vsel %vm16063_vm7, %v4437_v38, -1e+30  ;;  %12636 = vmatprep.mubr.bf16.mxu1 %v5196_v6  ;;  %v16758_v40 = vpop.f32.mrf.mxu0  ;;  %v13409_v38 = vld [vmem:[%s20083_s2 + $0x150] sm:$0xff]  }
 0x218   :  { %v4596_v34 = vsel %vm16069_vm8, %v4436_v43, -1e+30  ;;  %v13617_v7 = vpop.eup %13616  ;;  %v4794_v52 = vmul.f32 1.442695, %v4597_v5  ;;  %v4973_v37 = vmul.f32 %v13615_v36, %v16700_v63  ;;  %v4044_v42 = vpop.permute.xlu1 %4043  ;;  %12683 = vmatpush3.bf16.msra.mxu1 %v13407_v55 }
 0x219   :  { %v4792_v20 = vmul.f32 1.442695, %v4596_v34  ;;  %v4040_v54 = vpop.permute.xlu0 %4039  ;;  %v5197_v41 = vpack.c.bf16 %v5099_v57, %v5098_v25  ;;  %v4972_v26 = vmul.f32 %v13617_v7, %v16655_v1  ;;  %v4439_v11 = vsub.f32 %v4044_v42, %v16683_v0  ;;  %12684 = vmatprep.subr.bf16.mxu1 %v13408_v2  ;;  %v16763_v43 = vpop.f32.mrf.mxu1 }
 0x21a   :  { %v4438_v15 = vsub.f32 %v4040_v54, %v16683_v0  ;;  %13630 = vpow2.f32 %v4794_v52  ;;  %v5101_v63 = vmul.f32 0.35355338, %v4973_v37  ;;  %6649 = vperm.xlu0 %13233, %v16590_v59   ;;  %v16774_v54 = vpop.f32.mrf.mxu0 }
 0x21b   :  { %v13619_v55 = vpop.eup %13618  ;;  %v5100_v6 = vmul.f32 0.35355338, %v4972_v26  ;;  %13632 = vpow2.f32 %v4792_v20  ;;  %v4599_v1 = vsel %vm16082_vm9, %v4439_v11, -1e+30  ;;  %12637 = vmatmul.mubr.bf16.gmra.mxu1 %v5197_v41  ;;  %v16776_v26 = vpop.f32.mrf.mxu1 }
 0x21c   :  { %v4598_v57 = vsel %vm16101_vm10, %v4438_v15, -1e+30  ;;  %v13621_v36 = vpop.eup %13620  ;;  %v4975_v25 = vmul.f32 %v13619_v55, %v16678_v62  ;;  %v4798_v5 = vmul.f32 1.442695, %v4599_v1  ;;  %v4052_v7 = vpop.permute.xlu1 %4051  ;;  %12685 = vmatpush3.bf16.msra.mxu1 %v13408_v2  ;;  %v13410_v62 = vld [vmem:[%s20083_s2 + $0x148] sm:$0xff]  }
 0x21d   :  { %v4796_v34 = vmul.f32 1.442695, %v4598_v57  ;;  %v4048_v52 = vpop.permute.xlu0 %4047  ;;  %v4974_v59 = vmul.f32 %v13621_v36, %v16635_v48  ;;  %v4441_v37 = vsub.f32 %v4052_v7, %v16683_v0  ;;  %v5198_v42 = vpack.c.bf16 %v5101_v63, %v5100_v6  ;;  %12686 = vmatprep.subr.bf16.mxu1 %v13409_v38 }
 0x21e   :  { %v4440_v20 = vsub.f32 %v4048_v52, %v16683_v0  ;;  %v5103_v41 = vmul.f32 0.35355338, %v4975_v25  ;;  %13634 = vpow2.f32 %v4798_v5  ;;  %v4295_v25 = vcombine.high %v16639_v49, %v16639_v49 }
 0x21f   :  { %v13623_v11 = vpop.eup %13622  ;;  %v5102_v2 = vmul.f32 0.35355338, %v4974_v59  ;;  %13636 = vpow2.f32 %v4796_v34  ;;  %v4601_v48 = vsel %vm16128_vm11, %v4441_v37, -1e+30  ;;  %12640 = vmatprep.mubr.bf16.mxu1 %v5198_v42  ;;  %v16791_v59 = vpop.f32.mrf.mxu0 }
 0x220   :  { %v4600_v15 = vsel %vm16134_vm12, %v4440_v20, -1e+30  ;;  %v13625_v63 = vpop.eup %13624  ;;  %v4802_v55 = vmul.f32 1.442695, %v4601_v48  ;;  %v4977_v1 = vmul.f32 %v13623_v11, %v16624_v47  ;;  %v4060_v57 = vpop.permute.xlu1 %4059  ;;  %12687 = vmatpush3.bf16.msra.mxu1 %v13409_v38  ;;  %v13411_v47 = vld [vmem:[%s20083_s2 + $0x140] sm:$0xff]  }
 0x221   :  { %v4800_v6 = vmul.f32 1.442695, %v4600_v15  ;;  %v4056_v36 = vpop.permute.xlu0 %4055  ;;  %v5199_v5 = vpack.c.bf16 %v5103_v41, %v5102_v2  ;;  %v4976_v34 = vmul.f32 %v13625_v63, %v16583_v3  ;;  %v4443_v7 = vsub.f32 %v4060_v57, %v16683_v0  ;;  %12688 = vmatprep.subr.bf16.mxu1 %v13410_v62  ;;  %v16793_v37 = vpop.f32.mrf.mxu1 }
 0x222   :  { %v4442_v52 = vsub.f32 %v4056_v36, %v16683_v0  ;;  %13638 = vpow2.f32 %v4802_v55  ;;  %v5105_v20 = vmul.f32 0.35355338, %v4977_v1  ;;  %v16804_v55 = vrot.slane %v4295_v25, %v15890_v50 }
 0x223   :  { %v13627_v49 = vpop.eup %13626  ;;  %v5104_v38 = vmul.f32 0.35355338, %v4976_v34  ;;  %13640 = vpow2.f32 %v4800_v6  ;;  %v4603_v3 = vsel %vm16150_vm13, %v4443_v7, -1e+30  ;;  %12641 = vmatmul.mubr.bf16.gmra.mxu1 %v5199_v5  ;;  %v16809_v34 = vpop.f32.mrf.mxu0 }
 0x224   :  { %v4602_v42 = vsel %vm16156_vm14, %v4442_v52, -1e+30  ;;  %v13629_v41 = vpop.eup %13628  ;;  %v4979_v11 = vmul.f32 %v13627_v49, %v16605_v13  ;;  %v4806_v2 = vmul.f32 1.442695, %v4603_v3  ;;  %v4068_v15 = vpop.permute.xlu1 %4067  ;;  %12689 = vmatpush3.bf16.msra.mxu1 %v13410_v62  ;;  %v16816_v13 = vld [vmem:[%s20083_s2 + $0x1f8] sm:$0xff]  }
 0x225   :  { %v4804_v48 = vmul.f32 1.442695, %v4602_v42  ;;  %v4064_v63 = vpop.permute.xlu0 %4063  ;;  %v4978_v6 = vmul.f32 %v13629_v41, %v16566_v8  ;;  %v4445_v1 = vsub.f32 %v4068_v15, %v16683_v0  ;;  %v5200_v36 = vpack.c.bf16 %v5105_v20, %v5104_v38  ;;  %v16811_v5 = vpop.f32.mrf.mxu1  ;;  %12690 = vmatprep.subr.bf16.mxu1 %v13411_v47 }
 0x226   :  { %v4444_v57 = vsub.f32 %v4064_v63, %v16683_v0  ;;  %v5107_v25 = vmul.f32 0.35355338, %v4979_v11  ;;  %13642 = vpow2.f32 %v4806_v2  ;;  %v16825_v11 = vrot.slane %v16804_v55, %v14382_v24 }
 0x227   :  { %v13631_v62 = vpop.eup %13630  ;;  %v5106_v7 = vmul.f32 0.35355338, %v4978_v6  ;;  %13644 = vpow2.f32 %v4804_v48  ;;  %v4605_v8 = vsel %vm16165_vm15, %v4445_v1, -1e+30  ;;  %12660 = vmatprep.mubr.bf16.mxu0 %v5200_v36  ;;  %v16830_v6 = vpop.f32.mrf.mxu0 }
 0x228   :  { %v4604_v52 = vsel %vm16177_vm1, %v4444_v57, -1e+30  ;;  %v13633_v20 = vpop.eup %13632  ;;  %v4810_v49 = vmul.f32 1.442695, %v4605_v8  ;;  %v4981_v3 = vmul.f32 %v13631_v62, %v16707_v19  ;;  %v4076_v42 = vpop.permute.xlu1 %4075  ;;  %12691 = vmatpush3.bf16.msra.mxu1 %v13411_v47  ;;  %v13413_v19 = vld [vmem:[%s20083_s2 + $0x1b0] sm:$0xff]  }
 0x229   :  { %v4808_v38 = vmul.f32 1.442695, %v4604_v52  ;;  %v4072_v41 = vpop.permute.xlu0 %4071  ;;  %v5201_v2 = vpack.c.bf16 %v5107_v25, %v5106_v7  ;;  %v4980_v48 = vmul.f32 %v13633_v20, %v16665_v51  ;;  %v4447_v15 = vsub.f32 %v4076_v42, %v16683_v0  ;;  %v16832_v1 = vpop.f32.mrf.mxu1  ;;  %12740 = vmatprep.subr.bf16.mxu1 %v16816_v13 }
 0x22a   :  { %v4446_v63 = vsub.f32 %v4072_v41, %v16683_v0  ;;  %13646 = vpow2.f32 %v4810_v49  ;;  %v5109_v57 = vmul.f32 0.35355338, %v4981_v3  ;;  %v16847_v41 = vpop.f32.mrf.mxu0 }
 0x22b   :  { %v13635_v47 = vpop.eup %13634  ;;  %v5108_v36 = vmul.f32 0.35355338, %v4980_v48  ;;  %13648 = vpow2.f32 %v4808_v38  ;;  %v4607_v51 = vsel %vm16209_vm2, %v4447_v15, -1e+30  ;;  %12661 = vmatmul.mubr.bf16.vlgmr.msra.gmra.mxu0 %v5201_v2  ;;  %v16849_v48 = vpop.f32.mrf.mxu1 }
 0x22c   :  { %v4606_v0 = vsel %vm16215_vm0, %v4446_v63, -1e+30  ;;  %v13637_v25 = vpop.eup %13636  ;;  %v4983_v62 = vmul.f32 %v13635_v47, %v16688_v23  ;;  %v4814_v7 = vmul.f32 1.442695, %v4607_v51  ;;  %v4087_v52 = vpop.permute.xlu1 %4086  ;;  %12709 = vmatpush3.bf16.msra.mxu0 %v16670_v16  ;;  %v13414_v23 = vld [vmem:[%s20083_s2 + $0x1a8] sm:$0xff]  }
 0x22d   :  { %v4812_v8 = vmul.f32 1.442695, %v4606_v0  ;;  %v4083_v20 = vpop.permute.xlu0 %4082  ;;  %v4982_v49 = vmul.f32 %v13637_v25, %v16644_v60  ;;  %v4449_v38 = vsub.f32 %v4087_v52, %v16825_v11  ;;  %v5202_v42 = vpack.c.bf16 %v5109_v57, %v5108_v36  ;;  %12710 = vmatprep.subr.bf16.mxu0 %v13413_v19 }
 0x22e   :  { %v4448_v3 = vsub.f32 %v4083_v20, %v16825_v11  ;;  %v5111_v2 = vmul.f32 0.35355338, %v4983_v62  ;;  %13650 = vpow2.f32 %v4814_v7 }
 0x22f   :  { %v13639_v15 = vpop.eup %13638  ;;  %v5110_v16 = vmul.f32 0.35355338, %v4982_v49  ;;  %13652 = vpow2.f32 %v4812_v8  ;;  %v4609_v60 = vsel %vm16002_vm3, %v4449_v38, -1e+30  ;;  %12664 = vmatprep.mubr.bf16.mxu0 %v5202_v42  ;;  %v16858_v57 = vpop.f32.mrf.mxu0 }
 0x230   :  { %v4608_v63 = vsel %vm16008_vm4, %v4448_v3, -1e+30  ;;  %v13641_v47 = vpop.eup %13640  ;;  %v4818_v36 = vmul.f32 1.442695, %v4609_v60  ;;  %v4985_v0 = vmul.f32 %v13639_v15, %v16774_v54  ;;  %v4095_v25 = vpop.permute.xlu1 %4094  ;;  %12711 = vmatpush3.bf16.msra.mxu0 %v13413_v19  ;;  %v13415_v3 = vld [vmem:[%s20083_s2 + $0x1a0] sm:$0xff]  }
 0x231   :  { %v4816_v51 = vmul.f32 1.442695, %v4608_v63  ;;  %v4091_v62 = vpop.permute.xlu0 %4090  ;;  %v5203_v7 = vpack.c.bf16 %v5111_v2, %v5110_v16  ;;  %v4984_v8 = vmul.f32 %v13641_v47, %v16741_v35  ;;  %v4451_v52 = vsub.f32 %v4095_v25, %v16825_v11  ;;  %v16864_v49 = vpop.f32.mrf.mxu1  ;;  %12712 = vmatprep.subr.bf16.mxu0 %v13414_v23 }
 0x232   :  { %v4450_v20 = vsub.f32 %v4091_v62, %v16825_v11  ;;  %v16866_v38 = vpop.f32.mrf.mxu0  ;;  %13654 = vpow2.f32 %v4818_v36  ;;  %v5113_v54 = vmul.f32 0.35355338, %v4985_v0 }
 0x233   :  { %v13643_v42 = vpop.eup %13642  ;;  %v5112_v19 = vmul.f32 0.35355338, %v4984_v8  ;;  %13656 = vpow2.f32 %v4816_v51  ;;  %v4611_v35 = vsel %vm16026_vm5, %v4451_v52, -1e+30  ;;  %12665 = vmatmul.mubr.bf16.gmra.mxu0 %v5203_v7  ;;  %v16881_v52 = vpop.f32.mrf.mxu1  ;;  %v13416_v7 = vld [vmem:[%s20083_s2 + $0x198] sm:$0xff]  }
 0x234   :  { %v4610_v2 = vsel %vm16032_vm6, %v4450_v20, -1e+30  ;;  %v16875_v15 = vpop.f32.mrf.mxu0  ;;  %v13645_v16 = vpop.eup %13644  ;;  %v4987_v60 = vmul.f32 %v13643_v42, %v16758_v40  ;;  %v4822_v63 = vmul.f32 1.442695, %v4611_v35  ;;  %12713 = vmatpush3.bf16.msra.mxu0 %v13414_v23 }
 0x235   :  { %v4820_v47 = vmul.f32 1.442695, %v4610_v2  ;;  %v4103_v25 = vpop.permute.xlu1 %4102  ;;  %v4099_v36 = vpop.permute.xlu0 %4098  ;;  %v4986_v0 = vmul.f32 %v13645_v16, %v16724_v4  ;;  %v5204_v8 = vpack.c.bf16 %v5113_v54, %v5112_v19  ;;  %12714 = vmatprep.subr.bf16.mxu0 %v13415_v3 }
 0x236   :  { %v4453_v51 = vsub.f32 %v4103_v25, %v16825_v11  ;;  %v4452_v62 = vsub.f32 %v4099_v36, %v16825_v11  ;;  %v5115_v40 = vmul.f32 0.35355338, %v4987_v60  ;;  %13658 = vpow2.f32 %v4822_v63  ;;  %v16890_v54 = vpop.f32.mrf.mxu0 }
 0x237   :  { %v13647_v20 = vpop.eup %13646  ;;  %v5114_v42 = vmul.f32 0.35355338, %v4986_v0  ;;  %13660 = vpow2.f32 %v4820_v47  ;;  %12668 = vmatprep.mubr.bf16.mxu0 %v5204_v8 }
 0x238   :  { %v4613_v4 = vsel %vm16063_vm7, %v4453_v51, -1e+30  ;;  %v4612_v23 = vsel %vm16069_vm8, %v4452_v62, -1e+30  ;;  %v13649_v19 = vpop.eup %13648  ;;  %v4989_v16 = vmul.f32 %v13647_v20, %v16847_v41  ;;  %12715 = vmatpush3.bf16.msra.mxu0 %v13415_v3  ;;  %v16896_v51 = vpop.f32.mrf.mxu1  ;;  %v13417_v62 = vld [vmem:[%s20083_s2 + $0x190] sm:$0xff]  }
 0x239   :  { %v4826_v35 = vmul.f32 1.442695, %v4613_v4  ;;  %v4824_v2 = vmul.f32 1.442695, %v4612_v23  ;;  %v4111_v25 = vpop.permute.xlu1 %4110  ;;  %v4107_v60 = vpop.permute.xlu0 %4106  ;;  %v5205_v63 = vpack.c.bf16 %v5115_v40, %v5114_v42  ;;  %v4988_v47 = vmul.f32 %v13649_v19, %v16809_v34  ;;  %12716 = vmatprep.subr.bf16.mxu0 %v13416_v7 }
 0x23a   :  { %v4455_v36 = vsub.f32 %v4111_v25, %v16825_v11  ;;  %v4454_v0 = vsub.f32 %v4107_v60, %v16825_v11  ;;  %v5117_v8 = vmul.f32 0.35355338, %v4989_v16  ;;  %v16905_v40 = vpop.f32.mrf.mxu0 }
 0x23b   :  { %13662 = vpow2.f32 %v4826_v35  ;;  %v13651_v41 = vpop.eup %13650  ;;  %v5116_v20 = vmul.f32 0.35355338, %v4988_v47  ;;  %12669 = vmatmul.mubr.bf16.gmra.mxu0 %v5205_v63  ;;  %v13418_v63 = vld [vmem:[%s20083_s2 + $0x188] sm:$0xff]  }
 0x23c   :  { %13664 = vpow2.f32 %v4824_v2  ;;  %v4615_v3 = vsel %vm16082_vm9, %v4455_v36, -1e+30  ;;  %v4614_v34 = vsel %vm16101_vm10, %v4454_v0, -1e+30  ;;  %v13653_v42 = vpop.eup %13652  ;;  %v4991_v4 = vmul.f32 %v13651_v41, %v16830_v6  ;;  %12717 = vmatpush3.bf16.msra.mxu0 %v13416_v7  ;;  %v16911_v36 = vpop.f32.mrf.mxu1 }
 0x23d   :  { %v4830_v23 = vmul.f32 1.442695, %v4615_v3  ;;  %v4828_v19 = vmul.f32 1.442695, %v4614_v34  ;;  %v4119_v25 = vpop.permute.xlu1 %4118  ;;  %v4115_v35 = vpop.permute.xlu0 %4114  ;;  %v4990_v16 = vmul.f32 %v13653_v42, %v16791_v59  ;;  %v5206_v47 = vpack.c.bf16 %v5117_v8, %v5116_v20  ;;  %12718 = vmatprep.subr.bf16.mxu0 %v13417_v62 }
 0x23e   :  { %v4457_v2 = vsub.f32 %v4119_v25, %v16825_v11  ;;  %v4456_v60 = vsub.f32 %v4115_v35, %v16825_v11  ;;  %v5119_v6 = vmul.f32 0.35355338, %v4991_v4  ;;  %v16920_v8 = vpop.f32.mrf.mxu0 }
 0x23f   :  { %13666 = vpow2.f32 %v4830_v23  ;;  %v13655_v0 = vpop.eup %13654  ;;  %v5118_v41 = vmul.f32 0.35355338, %v4990_v16  ;;  %12672 = vmatprep.mubr.bf16.mxu0 %v5206_v47 }
 0x240   :  { %13668 = vpow2.f32 %v4828_v19  ;;  %v4617_v59 = vsel %vm16128_vm11, %v4457_v2, -1e+30  ;;  %v4616_v7 = vsel %vm16134_vm12, %v4456_v60, -1e+30  ;;  %v13657_v20 = vpop.eup %13656  ;;  %v4993_v42 = vmul.f32 %v13655_v0, %v16763_v43  ;;  %12719 = vmatpush3.bf16.msra.mxu0 %v13417_v62  ;;  %v16926_v2 = vpop.f32.mrf.mxu1  ;;  %v13419_v60 = vld [vmem:[%s20083_s2 + $0x180] sm:$0xff]  }
 0x241   :  { %v4834_v3 = vmul.f32 1.442695, %v4617_v59  ;;  %v4832_v34 = vmul.f32 1.442695, %v4616_v7  ;;  %v4127_v25 = vpop.permute.xlu1 %4126  ;;  %v4123_v4 = vpop.permute.xlu0 %4122  ;;  %v5207_v23 = vpack.c.bf16 %v5119_v6, %v5118_v41  ;;  %v4992_v19 = vmul.f32 %v13657_v20, %v16729_v58  ;;  %12720 = vmatprep.subr.bf16.mxu0 %v13418_v63 }
 0x242   :  { %v4459_v35 = vsub.f32 %v4127_v25, %v16825_v11  ;;  %v4458_v16 = vsub.f32 %v4123_v4, %v16825_v11  ;;  %v5121_v47 = vmul.f32 0.35355338, %v4993_v42  ;;  %v16935_v6 = vpop.f32.mrf.mxu0  ;;  %v4325_v42 = vcombine.high %v16660_v61, %v16660_v61 }
 0x243   :  { %13670 = vpow2.f32 %v4834_v3  ;;  %v13659_v43 = vpop.eup %13658  ;;  %v5120_v0 = vmul.f32 0.35355338, %v4992_v19  ;;  %12673 = vmatmul.mubr.bf16.gmra.mxu0 %v5207_v23 }
 0x244   :  { %13672 = vpow2.f32 %v4832_v34  ;;  %v4619_v62 = vsel %vm16150_vm13, %v4459_v35, -1e+30  ;;  %v4618_v58 = vsel %vm16156_vm14, %v4458_v16, -1e+30  ;;  %v13661_v41 = vpop.eup %13660  ;;  %v4995_v59 = vmul.f32 %v13659_v43, %v16746_v12  ;;  %12721 = vmatpush3.bf16.msra.mxu0 %v13418_v63  ;;  %v16943_v35 = vpop.f32.mrf.mxu1 }
 0x245   :  { %v4838_v7 = vmul.f32 1.442695, %v4619_v62  ;;  %v4836_v20 = vmul.f32 1.442695, %v4618_v58  ;;  %v4135_v25 = vpop.permute.xlu1 %4134  ;;  %v4131_v3 = vpop.permute.xlu0 %4130  ;;  %v4994_v34 = vmul.f32 %v13661_v41, %v16712_v28  ;;  %v5208_v23 = vpack.c.bf16 %v5121_v47, %v5120_v0  ;;  %12722 = vmatprep.subr.bf16.mxu0 %v13419_v60 }
 0x246   :  { %v4461_v4 = vsub.f32 %v4135_v25, %v16825_v11  ;;  %v4460_v19 = vsub.f32 %v4131_v3, %v16825_v11  ;;  %v5123_v16 = vmul.f32 0.35355338, %v4995_v59  ;;  %v16949_v28 = vpop.f32.mrf.mxu0 }
 0x247   :  { %13674 = vpow2.f32 %v4838_v7  ;;  %v5122_v43 = vmul.f32 0.35355338, %v4994_v34  ;;  %12692 = vmatprep.mubr.bf16.mxu1 %v5208_v23  ;;  %v16953_v7 = vrot.slane %v4325_v42, %v14382_v24 }
 0x248   :  { %v13663_v12 = vpop.eup %13662  ;;  %13676 = vpow2.f32 %v4836_v20  ;;  %v4621_v62 = vsel %vm16165_vm15, %v4461_v4, -1e+30  ;;  %v4620_v61 = vsel %vm16177_vm1, %v4460_v19, -1e+30  ;;  %12723 = vmatpush3.bf16.msra.mxu0 %v13419_v60  ;;  %v16958_v4 = vpop.f32.mrf.mxu1  ;;  %v13421_v19 = vld [vmem:[%s20083_s2 + $0x1f0] sm:$0xff]  }
 0x249   :  { %v13665_v63 = vpop.eup %13664  ;;  %v4842_v58 = vmul.f32 1.442695, %v4621_v62  ;;  %v4840_v47 = vmul.f32 1.442695, %v4620_v61  ;;  %v4997_v0 = vmul.f32 %v13663_v12, %v16832_v1  ;;  %v4143_v41 = vpop.permute.xlu1 %4142  ;;  %v5209_v20 = vpack.c.bf16 %v5123_v16, %v5122_v43 }
 0x24a   :  { %v4139_v59 = vpop.permute.xlu0 %4138  ;;  %v4996_v25 = vmul.f32 %v13665_v63, %v16793_v37  ;;  %v4463_v3 = vsub.f32 %v4143_v41, %v16825_v11  ;;  %v20557_v1 = vmov 0.0   ;;  %v16970_v16 = vpop.f32.mrf.mxu1 }
 0x24b   :  { %v4462_v34 = vsub.f32 %v4139_v59, %v16825_v11  ;;  %12772 = vmatprep.subr.bf16.mxu0 %v20557_v1  ;;  %13678 = vpow2.f32 %v4842_v58  ;;  %v5125_v23 = vmul.f32 0.35355338, %v4997_v0  ;;  %12693 = vmatmul.mubr.bf16.vlgmr.msra.gmra.mxu1 %v5209_v20  ;;  %v16968_v11 = vpop.f32.mrf.mxu0 }
 0x24c   :  { %v13667_v42 = vpop.eup %13666  ;;  %v5124_v12 = vmul.f32 0.35355338, %v4996_v25  ;;  %13680 = vpow2.f32 %v4840_v47  ;;  %v4623_v37 = vsel %vm16209_vm2, %v4463_v3, -1e+30  ;;  %12741 = vmatpush3.bf16.msra.mxu1 %v16816_v13  ;;  %v13422_v25 = vld [vmem:[%s20083_s2 + $0x1e8] sm:$0xff]  }
 0x24d   :  { %v4622_v60 = vsel %vm16215_vm0, %v4462_v34, -1e+30  ;;  %v13669_v43 = vpop.eup %13668  ;;  %v4999_v62 = vmul.f32 %v13667_v42, %v16811_v5  ;;  %v4846_v61 = vmul.f32 1.442695, %v4623_v37  ;;  %v4154_v58 = vpop.permute.xlu1 %4153  ;;  %12742 = vmatprep.subr.bf16.mxu1 %v13421_v19 }
 0x24e   :  { %v4844_v63 = vmul.f32 1.442695, %v4622_v60  ;;  %v4150_v0 = vpop.permute.xlu0 %4149  ;;  %v4998_v47 = vmul.f32 %v13669_v43, %v16776_v26  ;;  %v4465_v41 = vsub.f32 %v4154_v58, %v16953_v7  ;;  %v5210_v20 = vpack.c.bf16 %v5125_v23, %v5124_v12  ;;  %v16984_v42 = vpop.f32.mrf.mxu0 }
 0x24f   :  { %v4464_v59 = vsub.f32 %v4150_v0, %v16953_v7  ;;  %v5127_v3 = vmul.f32 0.35355338, %v4999_v62  ;;  %13682 = vpow2.f32 %v4846_v61  ;;  %v16986_v23 = vpop.f32.mrf.mxu1 }
 0x250   :  { %v13671_v5 = vpop.eup %13670  ;;  %v5126_v34 = vmul.f32 0.35355338, %v4998_v47  ;;  %13684 = vpow2.f32 %v4844_v63  ;;  %v4625_v13 = vsel %vm16002_vm3, %v4465_v41, -1e+30  ;;  %12696 = vmatprep.mubr.bf16.mxu1 %v5210_v20  ;;  %12743 = vmatpush3.bf16.msra.mxu1 %v13421_v19  ;;  %v13423_v41 = vld [vmem:[%s20083_s2 + $0x1e0] sm:$0xff]   ;;  %v16999_v19 = vpop.f32.mrf.mxu0 }
 0x251   :  { %v4624_v26 = vsel %vm16008_vm4, %v4464_v59, -1e+30  ;;  %v13673_v12 = vpop.eup %13672  ;;  %v4850_v37 = vmul.f32 1.442695, %v4625_v13  ;;  %v5001_v43 = vmul.f32 %v13671_v5, %v16896_v51  ;;  %v4162_v62 = vpop.permute.xlu1 %4161  ;;  %12744 = vmatprep.subr.bf16.mxu1 %v13422_v25 }
 0x252   :  { %v4848_v60 = vmul.f32 1.442695, %v4624_v26  ;;  %v4158_v61 = vpop.permute.xlu0 %4157  ;;  %v5211_v63 = vpack.c.bf16 %v5127_v3, %v5126_v34  ;;  %v5000_v58 = vmul.f32 %v13673_v12, %v16864_v49  ;;  %v4467_v0 = vsub.f32 %v4162_v62, %v16953_v7  ;;  %v17001_v3 = vpop.f32.mrf.mxu1 }
 0x253   :  { %v4466_v47 = vsub.f32 %v4158_v61, %v16953_v7  ;;  %13686 = vpow2.f32 %v4850_v37  ;;  %v5129_v59 = vmul.f32 0.35355338, %v5001_v43 }
 0x254   :  { %v13675_v20 = vpop.eup %13674  ;;  %v5128_v13 = vmul.f32 0.35355338, %v5000_v58  ;;  %13688 = vpow2.f32 %v4848_v60  ;;  %v4627_v51 = vsel %vm16026_vm5, %v4467_v0, -1e+30  ;;  %12697 = vmatmul.mubr.bf16.gmra.mxu1 %v5211_v63  ;;  %v13424_v63 = vld [vmem:[%s20083_s2 + $0x1d8] sm:$0xff]  }
 0x255   :  { %v4626_v49 = vsel %vm16032_vm6, %v4466_v47, -1e+30  ;;  %v13677_v5 = vpop.eup %13676  ;;  %v5003_v34 = vmul.f32 %v13675_v20, %v16881_v52  ;;  %v4854_v26 = vmul.f32 1.442695, %v4627_v51  ;;  %v4170_v37 = vpop.permute.xlu1 %4169  ;;  %12745 = vmatpush3.bf16.msra.mxu1 %v13422_v25 }
 0x256   :  { %v4852_v12 = vmul.f32 1.442695, %v4626_v49  ;;  %v4166_v43 = vpop.permute.xlu0 %4165  ;;  %v5002_v60 = vmul.f32 %v13677_v5, %v16849_v48  ;;  %v4469_v62 = vsub.f32 %v4170_v37, %v16953_v7  ;;  %v5212_v58 = vpack.c.bf16 %v5129_v59, %v5128_v13  ;;  %12746 = vmatprep.subr.bf16.mxu1 %v13423_v41  ;;  %v17014_v20 = vpop.f32.mrf.mxu0 }
 0x257   :  { %v4468_v61 = vsub.f32 %v4166_v43, %v16953_v7  ;;  %v5131_v0 = vmul.f32 0.35355338, %v5003_v34  ;;  %13690 = vpow2.f32 %v4854_v26  ;;  %v17016_v59 = vpop.f32.mrf.mxu1 }
 0x258   :  { %v13679_v52 = vpop.eup %13678  ;;  %v5130_v47 = vmul.f32 0.35355338, %v5002_v60  ;;  %13692 = vpow2.f32 %v4852_v12  ;;  %v4629_v25 = vsel %vm16063_vm7, %v4469_v62, -1e+30  ;;  %12700 = vmatprep.mubr.bf16.mxu1 %v5212_v58  ;;  %v13425_v62 = vld [vmem:[%s20083_s2 + $0x1d0] sm:$0xff]  }
 0x259   :  { %v4628_v48 = vsel %vm16069_vm8, %v4468_v61, -1e+30  ;;  %v13681_v13 = vpop.eup %13680  ;;  %v4858_v51 = vmul.f32 1.442695, %v4629_v25  ;;  %v5005_v5 = vmul.f32 %v13679_v52, %v16958_v4  ;;  %v4178_v34 = vpop.permute.xlu1 %4177  ;;  %12747 = vmatpush3.bf16.msra.mxu1 %v13423_v41 }
 0x25a   :  { %v4856_v49 = vmul.f32 1.442695, %v4628_v48  ;;  %v4174_v26 = vpop.permute.xlu0 %4173  ;;  %v5213_v12 = vpack.c.bf16 %v5131_v0, %v5130_v47  ;;  %v5004_v37 = vmul.f32 %v13681_v13, %v16926_v2  ;;  %v4471_v43 = vsub.f32 %v4178_v34, %v16953_v7  ;;  %12748 = vmatprep.subr.bf16.mxu1 %v13424_v63  ;;  %v17029_v41 = vpop.f32.mrf.mxu0 }
 0x25b   :  { %v4470_v60 = vsub.f32 %v4174_v26, %v16953_v7  ;;  %13694 = vpow2.f32 %v4858_v51  ;;  %v5133_v61 = vmul.f32 0.35355338, %v5005_v5  ;;  %v17031_v0 = vpop.f32.mrf.mxu1 }
 0x25c   :  { %v13683_v58 = vpop.eup %13682  ;;  %v5132_v25 = vmul.f32 0.35355338, %v5004_v37  ;;  %13696 = vpow2.f32 %v4856_v49  ;;  %v4631_v4 = vsel %vm16082_vm9, %v4471_v43, -1e+30  ;;  %12701 = vmatmul.mubr.bf16.gmra.mxu1 %v5213_v12  ;;  %v13426_v12 = vld [vmem:[%s20083_s2 + $0x1c8] sm:$0xff]  }
 0x25d   :  { %v4630_v2 = vsel %vm16101_vm10, %v4470_v60, -1e+30  ;;  %v13685_v52 = vpop.eup %13684  ;;  %v5007_v47 = vmul.f32 %v13683_v58, %v16943_v35  ;;  %v4862_v48 = vmul.f32 1.442695, %v4631_v4  ;;  %v4186_v51 = vpop.permute.xlu1 %4185  ;;  %12749 = vmatpush3.bf16.msra.mxu1 %v13424_v63 }
 0x25e   :  { %v4860_v13 = vmul.f32 1.442695, %v4630_v2  ;;  %v4182_v5 = vpop.permute.xlu0 %4181  ;;  %v5006_v49 = vmul.f32 %v13685_v52, %v16911_v36  ;;  %v4473_v34 = vsub.f32 %v4186_v51, %v16953_v7  ;;  %v5214_v37 = vpack.c.bf16 %v5133_v61, %v5132_v25  ;;  %12750 = vmatprep.subr.bf16.mxu1 %v13425_v62  ;;  %v17044_v58 = vpop.f32.mrf.mxu0 }
 0x25f   :  { %v4472_v26 = vsub.f32 %v4182_v5, %v16953_v7  ;;  %v5135_v43 = vmul.f32 0.35355338, %v5007_v47  ;;  %13698 = vpow2.f32 %v4862_v48  ;;  %v17046_v61 = vpop.f32.mrf.mxu1 }
 0x260   :  { %v13687_v35 = vpop.eup %13686  ;;  %v5134_v60 = vmul.f32 0.35355338, %v5006_v49  ;;  %13700 = vpow2.f32 %v4860_v13  ;;  %v4633_v63 = vsel %vm16128_vm11, %v4473_v34, -1e+30  ;;  %12704 = vmatprep.mubr.bf16.mxu1 %v5214_v37  ;;  %v13427_v34 = vld [vmem:[%s20083_s2 + $0x1c0] sm:$0xff]  }
 0x261   :  { %v4632_v36 = vsel %vm16134_vm12, %v4472_v26, -1e+30  ;;  %v13689_v25 = vpop.eup %13688  ;;  %v5009_v4 = vmul.f32 %v13687_v35, %v16890_v54  ;;  %v4866_v2 = vmul.f32 1.442695, %v4633_v63  ;;  %v4194_v47 = vpop.permute.xlu1 %4193  ;;  %12751 = vmatpush3.bf16.msra.mxu1 %v13425_v62 }
 0x262   :  { %v4864_v52 = vmul.f32 1.442695, %v4632_v36  ;;  %v4190_v48 = vpop.permute.xlu0 %4189  ;;  %v5008_v13 = vmul.f32 %v13689_v25, %v16866_v38  ;;  %v5215_v51 = vpack.c.bf16 %v5135_v43, %v5134_v60  ;;  %v4475_v5 = vsub.f32 %v4194_v47, %v16953_v7  ;;  %12752 = vmatprep.subr.bf16.mxu1 %v13426_v12  ;;  %v17059_v43 = vpop.f32.mrf.mxu0 }
 0x263   :  { %v4474_v49 = vsub.f32 %v4190_v48, %v16953_v7  ;;  %v5137_v26 = vmul.f32 0.35355338, %v5009_v4  ;;  %13702 = vpow2.f32 %v4866_v2  ;;  %v17061_v35 = vpop.f32.mrf.mxu1 }
 0x264   :  { %v13691_v54 = vpop.eup %13690  ;;  %v5136_v37 = vmul.f32 0.35355338, %v5008_v13  ;;  %13704 = vpow2.f32 %v4864_v52  ;;  %v4635_v62 = vsel %vm16150_vm13, %v4475_v5, -1e+30  ;;  %12705 = vmatmul.mubr.bf16.gmra.mxu1 %v5215_v51  ;;  %v4327_v52 = vcombine.high %v16804_v55, %v16804_v55 }
 0x265   :  { %v4634_v38 = vsel %vm16156_vm14, %v4474_v49, -1e+30  ;;  %v13693_v60 = vpop.eup %13692  ;;  %v5011_v63 = vmul.f32 %v13691_v54, %v16875_v15  ;;  %v4870_v36 = vmul.f32 1.442695, %v4635_v62  ;;  %v4202_v4 = vpop.permute.xlu1 %4201  ;;  %12753 = vmatpush3.bf16.msra.mxu1 %v13426_v12 }
 0x266   :  { %v4868_v25 = vmul.f32 1.442695, %v4634_v38  ;;  %v4198_v2 = vpop.permute.xlu0 %4197  ;;  %v5010_v47 = vmul.f32 %v13693_v60, %v16858_v57  ;;  %v4477_v48 = vsub.f32 %v4202_v4, %v16953_v7  ;;  %v5216_v51 = vpack.c.bf16 %v5137_v26, %v5136_v37  ;;  %12754 = vmatprep.subr.bf16.mxu1 %v13427_v34  ;;  %v17073_v12 = vpop.f32.mrf.mxu0 }
 0x267   :  { %v4476_v13 = vsub.f32 %v4198_v2, %v16953_v7  ;;  %v5139_v5 = vmul.f32 0.35355338, %v5011_v63  ;;  %13706 = vpow2.f32 %v4870_v36  ;;  %v17075_v57 = vpop.f32.mrf.mxu1  ;;  %v17079_v36 = vrot.slane %v4327_v52, %v14382_v24 }
 0x268   :  { %v13695_v49 = vpop.eup %13694  ;;  %v5138_v15 = vmul.f32 0.35355338, %v5010_v47  ;;  %13708 = vpow2.f32 %v4868_v25  ;;  %v4637_v54 = vsel %vm16165_vm15, %v4477_v48, -1e+30  ;;  %12724 = vmatprep.mubr.bf16.mxu0 %v5216_v51  ;;  %v20558_v48 = vld [vmem:[#allocation43_spill] sm:$0xff] }
 0x269   :  { %v4636_v55 = vsel %vm16177_vm1, %v4476_v13, -1e+30  ;;  %v13697_v62 = vpop.eup %13696  ;;  %v5013_v26 = vmul.f32 %v13695_v49, %v16949_v28  ;;  %v4874_v37 = vmul.f32 1.442695, %v4637_v54  ;;  %v4210_v60 = vpop.permute.xlu1 %4209  ;;  %12755 = vmatpush3.bf16.msra.mxu1 %v13427_v34  ;;  %v2293_v28 = vmul.f32 %v20558_v48, %v14738_v44 }
 0x26a   :  { %v4872_v38 = vmul.f32 1.442695, %v4636_v55  ;;  %v4206_v63 = vpop.permute.xlu0 %4205  ;;  %v5012_v25 = vmul.f32 %v13697_v62, %v16920_v8  ;;  %v4479_v4 = vsub.f32 %v4210_v60, %v16953_v7  ;;  %v5217_v47 = vpack.c.bf16 %v5139_v5, %v5138_v15  ;;  %12792 = vmatprep.subr.bf16.mxu1 %v20557_v1 }
 0x26b   :  { %v4478_v2 = vsub.f32 %v4206_v63, %v16953_v7  ;;  %v5141_v13 = vmul.f32 0.35355338, %v5013_v26  ;;  %13710 = vpow2.f32 %v4874_v37  ;;  %v12534_v52 = vpop.f32.mrf.mxu0  ;;  %v17091_v7 = vpop.f32.mrf.mxu1  ;;  %v14121_v37 = vld [vmem:[%s20083_s2 + $0x38] sm:$0xff]  }
 0x26c   :  { %v13699_v51 = vpop.eup %13698  ;;  %v5140_v49 = vmul.f32 0.35355338, %v5012_v25  ;;  %13712 = vpow2.f32 %v4872_v38  ;;  %v4639_v34 = vsel %vm16209_vm2, %v4479_v4, -1e+30  ;;  %12725 = vmatmul.mubr.bf16.vlgmr.msra.gmra.mxu0 %v5217_v47  ;;  %v17093_v55 = vadd.f32 %v12534_v52, %v2293_v28  ;;  %v20562_v47 = vld [vmem:[#allocation49_spill] sm:$0xff] }
 0x26d   :  { %v4638_v8 = vsel %vm16215_vm0, %v4478_v2, -1e+30  ;;  %v13701_v5 = vpop.eup %13700  ;;  %v4878_v15 = vmul.f32 1.442695, %v4639_v34  ;;  %v4221_v44 = vpop.permute.xlu1 %4220  ;;  %v5015_v26 = vmul.f32 %v13699_v51, %v16935_v6  ;;  %12773 = vmatpush3.bf16.msra.mxu0 %v14121_v37  ;;  %v20561_v2 = vld [vmem:[#allocation10_spill] sm:$0xff] }
 0x26e   :  { %v4876_v54 = vmul.f32 1.442695, %v4638_v8  ;;  %20559 = vst [vmem:[#allocation43_spill] sm:$0xff] %v17093_v55  ;;  %v4217_v62 = vpop.permute.xlu0 %4216  ;;  %v4481_v38 = vsub.f32 %v4221_v44, %v17079_v36  ;;  %v17101_v63 = vpop.f32.mrf.mxu0  ;;  %v5218_v25 = vpack.c.bf16 %v5141_v13, %v5140_v49  ;;  %v5014_v4 = vmul.f32 %v13701_v5, %v16905_v40  ;;  %12774 = vmatprep.subr.bf16.mxu0 %v20557_v1 }
 0x26f   :  { %v4480_v60 = vsub.f32 %v4217_v62, %v17079_v36  ;;  %20560 = vst [vmem:[#allocation276_spill] sm:$0xff] %v17101_v63  ;;  %v2294_v48 = vmul.f32 %v20562_v47, %v20561_v2  ;;  %13714 = vpow2.f32 %v4878_v15  ;;  %v5143_v6 = vmul.f32 0.35355338, %v5015_v26  ;;  %v17111_v49 = vpop.f32.mrf.mxu1 }
 0x270   :  { %v13703_v28 = vpop.eup %13702  ;;  %13716 = vpow2.f32 %v4876_v54  ;;  %v4641_v51 = vsel %vm16002_vm3, %v4481_v38, -1e+30  ;;  %v12535_v8 = vpop.f32.mrf.mxu0  ;;  %12728 = vmatprep.mubr.bf16.mxu0 %v5218_v25  ;;  %v5142_v13 = vmul.f32 0.35355338, %v5014_v4  ;;  %v20566_v25 = vld [vmem:[#allocation55_spill] sm:$0xff]  ;;  %vm20852_vm3 = vcmask 130048  }
 0x271   :  { %v4640_v34 = vsel %vm16008_vm4, %v4480_v60, -1e+30  ;;  %v13705_v40 = vpop.eup %13704  ;;  %v5017_v52 = vmul.f32 %v13703_v28, %v17014_v20  ;;  %v4882_v5 = vmul.f32 1.442695, %v4641_v51  ;;  %v17114_v15 = vadd.f32 %v12535_v8, %v2294_v48  ;;  %v4229_v62 = vpop.permute.xlu1 %4228  ;;  %12775 = vmatpush3.bf16.msra.mxu0 %v14122_v29  ;;  %v20565_v60 = vld [vmem:[#allocation16_spill] sm:$0xff]  ;;  %vm20856_vm4 = vmmov %vm20852_vm3 }
 0x272   :  { %v4880_v44 = vmul.f32 1.442695, %v4640_v34  ;;  %v4225_v54 = vpop.permute.xlu0 %4224  ;;  %v5016_v21 = vmul.f32 %v13705_v40, %v16984_v42  ;;  %v4483_v26 = vsub.f32 %v4229_v62, %v17079_v36  ;;  %v17122_v38 = vpop.f32.mrf.mxu0  ;;  %v5219_v20 = vpack.c.bf16 %v5143_v6, %v5142_v13  ;;  %12776 = vmatprep.subr.bf16.mxu0 %v20557_v1 }
 0x273   :  { %20563 = vst [vmem:[#allocation10_spill] sm:$0xff] %v17114_v15  ;;  %v4482_v37 = vsub.f32 %v4225_v54, %v17079_v36  ;;  %20564 = vst [vmem:[#allocation49_spill] sm:$0xff] %v17122_v38  ;;  %v2297_v4 = vmul.f32 %v20566_v25, %v20565_v60  ;;  %v5145_v2 = vmul.f32 0.35355338, %v5017_v52  ;;  %13718 = vpow2.f32 %v4882_v5  ;;  %v17131_v34 = vpop.f32.mrf.mxu1 }
 0x274   :  { %v13707_v47 = vpop.eup %13706  ;;  %v5144_v48 = vmul.f32 0.35355338, %v5016_v21  ;;  %13720 = vpow2.f32 %v4880_v44  ;;  %v4643_v42 = vsel %vm16026_vm5, %v4483_v26, -1e+30  ;;  %v12538_v51 = vpop.f32.mrf.mxu0  ;;  %12729 = vmatmul.mubr.bf16.gmra.mxu0 %v5219_v20  ;;  %v20569_v26 = vld [vmem:[#allocation15_spill] sm:$0xff]  ;;  %vm20860_vm5 = vmmov %vm20852_vm3 }
 0x275   :  { %v4642_v28 = vsel %vm16032_vm6, %v4482_v37, -1e+30  ;;  %v13709_v6 = vpop.eup %13708  ;;  %v4886_v8 = vmul.f32 1.442695, %v4643_v42  ;;  %v17133_v40 = vadd.f32 %v12538_v51, %v2297_v4  ;;  %v4237_v52 = vpop.permute.xlu1 %4236  ;;  %v5019_v62 = vmul.f32 %v13707_v47, %v16999_v19  ;;  %12777 = vmatpush3.bf16.msra.mxu0 %v14123_v45  ;;  %v20570_v37 = vld [vmem:[#allocation61_spill] sm:$0xff]  ;;  %v20573_v45 = vld [vmem:[#allocation20_spill] sm:$0xff]  ;;  %vm20861_vm6 = vmmov %vm20852_vm3 }
 0x276   :  { %v4884_v13 = vmul.f32 1.442695, %v4642_v28  ;;  %v4233_v5 = vpop.permute.xlu0 %4232  ;;  %v4485_v32 = vsub.f32 %v4237_v52, %v17079_v36  ;;  %v17141_v54 = vpop.f32.mrf.mxu0  ;;  %v5220_v29 = vpack.c.bf16 %v5145_v2, %v5144_v48  ;;  %v5018_v21 = vmul.f32 %v13709_v6, %v16968_v11  ;;  %12778 = vmatprep.subr.bf16.mxu0 %v20557_v1 }
 0x277   :  { %20567 = vst [vmem:[#allocation16_spill] sm:$0xff] %v17133_v40  ;;  %v4484_v44 = vsub.f32 %v4233_v5, %v17079_v36  ;;  %20568 = vst [vmem:[#allocation55_spill] sm:$0xff] %v17141_v54  ;;  %v2298_v20 = vmul.f32 %v20570_v37, %v20569_v26  ;;  %13722 = vpow2.f32 %v4886_v8  ;;  %v5147_v19 = vmul.f32 0.35355338, %v5019_v62  ;;  %v17151_v48 = vpop.f32.mrf.mxu1 }
 0x278   :  { %v13711_v60 = vpop.eup %13710  ;;  %13724 = vpow2.f32 %v4884_v13  ;;  %v4645_v25 = vsel %vm16063_vm7, %v4485_v32, -1e+30  ;;  %v12539_v47 = vpop.f32.mrf.mxu0  ;;  %12732 = vmatprep.mubr.bf16.mxu0 %v5220_v29  ;;  %v5146_v2 = vmul.f32 0.35355338, %v5018_v21  ;;  %v20574_v32 = vld [vmem:[#allocation67_spill] sm:$0xff]  ;;  %vm20866_vm7 = vmmov %vm20852_vm3 }
 0x279   :  { %v4644_v4 = vsel %vm16069_vm8, %v4484_v44, -1e+30  ;;  %v13713_v11 = vpop.eup %13712  ;;  %v5021_v42 = vmul.f32 %v13711_v60, %v17073_v12  ;;  %v4890_v28 = vmul.f32 1.442695, %v4645_v25  ;;  %v17154_v6 = vadd.f32 %v12539_v47, %v2298_v20  ;;  %v4245_v8 = vpop.permute.xlu1 %4244  ;;  %12779 = vmatpush3.bf16.msra.mxu0 %v14124_v31  ;;  %v20577_v31 = vld [vmem:[#allocation19_spill] sm:$0xff]  ;;  %vm20870_vm8 = vmmov %vm20852_vm3 }
 0x27a   :  { %v4888_v51 = vmul.f32 1.442695, %v4644_v4  ;;  %v4241_v13 = vpop.permute.xlu0 %4240  ;;  %v5020_v18 = vmul.f32 %v13713_v11, %v17044_v58  ;;  %v4487_v52 = vsub.f32 %v4245_v8, %v17079_v36  ;;  %v17162_v62 = vpop.f32.mrf.mxu0  ;;  %v5221_v12 = vpack.c.bf16 %v5147_v19, %v5146_v2  ;;  %12780 = vmatprep.subr.bf16.mxu0 %v20557_v1 }
 0x27b   :  { %20571 = vst [vmem:[#allocation15_spill] sm:$0xff] %v17154_v6  ;;  %v4486_v5 = vsub.f32 %v4241_v13, %v17079_v36  ;;  %20572 = vst [vmem:[#allocation61_spill] sm:$0xff] %v17162_v62  ;;  %v2301_v44 = vmul.f32 %v20574_v32, %v20573_v45  ;;  %v5149_v29 = vmul.f32 0.35355338, %v5021_v42  ;;  %13726 = vpow2.f32 %v4890_v28  ;;  %v17171_v60 = vpop.f32.mrf.mxu1 }
 0x27c   :  { %v13715_v21 = vpop.eup %13714  ;;  %v5148_v26 = vmul.f32 0.35355338, %v5020_v18  ;;  %13728 = vpow2.f32 %v4888_v51  ;;  %v4647_v58 = vsel %vm16082_vm9, %v4487_v52, -1e+30  ;;  %v12542_v20 = vpop.f32.mrf.mxu0  ;;  %12733 = vmatmul.mubr.bf16.gmra.mxu0 %v5221_v12  ;;  %v20578_v18 = vld [vmem:[#allocation73_spill] sm:$0xff]  ;;  %vm20874_vm9 = vmmov %vm20852_vm3 }
 0x27d   :  { %v4646_v37 = vsel %vm16101_vm10, %v4486_v5, -1e+30  ;;  %v13717_v19 = vpop.eup %13716  ;;  %v4894_v25 = vmul.f32 1.442695, %v4647_v58  ;;  %v17173_v47 = vadd.f32 %v12542_v20, %v2301_v44  ;;  %v4253_v2 = vpop.permute.xlu1 %4252  ;;  %v5023_v42 = vmul.f32 %v13715_v21, %v17059_v43  ;;  %12781 = vmatpush3.bf16.msra.mxu0 %v14125_v53  ;;  %vm20875_vm10 = vmmov %vm20852_vm3 }
 0x27e   :  { %v4892_v4 = vmul.f32 1.442695, %v4646_v37  ;;  %v4249_v11 = vpop.permute.xlu0 %4248  ;;  %v4489_v33 = vsub.f32 %v4253_v2, %v17079_v36  ;;  %v17181_v51 = vpop.f32.mrf.mxu0  ;;  %v5222_v8 = vpack.c.bf16 %v5149_v29, %v5148_v26  ;;  %v5022_v13 = vmul.f32 %v13717_v19, %v17029_v41  ;;  %12782 = vmatprep.subr.bf16.mxu0 %v20557_v1 }
 0x27f   :  { %20575 = vst [vmem:[#allocation20_spill] sm:$0xff] %v17173_v47  ;;  %v4488_v28 = vsub.f32 %v4249_v11, %v17079_v36  ;;  %20576 = vst [vmem:[#allocation67_spill] sm:$0xff] %v17181_v51  ;;  %v2302_v52 = vmul.f32 %v20578_v18, %v20577_v31  ;;  %13730 = vpow2.f32 %v4894_v25  ;;  %v5151_v43 = vmul.f32 0.35355338, %v5023_v42  ;;  %v17191_v29 = vpop.f32.mrf.mxu1  ;;  %v20581_v11 = vld [vmem:[#allocation24_spill] sm:$0xff]  ;;  %v20582_v42 = vld [vmem:[#allocation79_spill] sm:$0xff] }
 0x280   :  { %v13719_v5 = vpop.eup %13718  ;;  %13732 = vpow2.f32 %v4892_v4  ;;  %v4649_v12 = vsel %vm16128_vm11, %v4489_v33, -1e+30  ;;  %v12543_v32 = vpop.f32.mrf.mxu0  ;;  %12736 = vmatprep.mubr.bf16.mxu0 %v5222_v8  ;;  %v5150_v44 = vmul.f32 0.35355338, %v5022_v13  ;;  %v2305_v53 = vmul.f32 %v20582_v42, %v20581_v11  ;;  %v20691_v47 = vld [vmem:[#allocation149_spill] sm:$0xff]  ;;  %vm20881_vm11 = vmmov %vm20852_vm3 }
 0x281   :  { %v4648_v45 = vsel %vm16134_vm12, %v4488_v28, -1e+30  ;;  %v13721_v41 = vpop.eup %13720  ;;  %v5025_v21 = vmul.f32 %v13719_v5, %v17016_v59  ;;  %v4898_v26 = vmul.f32 1.442695, %v4649_v12  ;;  %v17194_v37 = vadd.f32 %v12543_v32, %v2302_v52  ;;  %v4261_v20 = vpop.permute.xlu1 %4260  ;;  %12783 = vmatpush3.bf16.msra.mxu0 %v14126_v30  ;;  %vm20886_vm12 = vmmov %vm20852_vm3 }
 0x282   :  { %v4896_v58 = vmul.f32 1.442695, %v4648_v45  ;;  %v4257_v19 = vpop.permute.xlu0 %4256  ;;  %v5024_v56 = vmul.f32 %v13721_v41, %v16986_v23  ;;  %v4491_v25 = vsub.f32 %v4261_v20, %v17079_v36  ;;  %v17202_v2 = vpop.f32.mrf.mxu0  ;;  %v5223_v59 = vpack.c.bf16 %v5151_v43, %v5150_v44  ;;  %12784 = vmatprep.subr.bf16.mxu0 %v20557_v1  ;;  %v20586_v20 = vld [vmem:[#allocation85_spill] sm:$0xff] }
 0x283   :  { %20579 = vst [vmem:[#allocation19_spill] sm:$0xff] %v17194_v37  ;;  %v4490_v4 = vsub.f32 %v4257_v19, %v17079_v36  ;;  %20580 = vst [vmem:[#allocation73_spill] sm:$0xff] %v17202_v2  ;;  %v5153_v33 = vmul.f32 0.35355338, %v5025_v21  ;;  %13734 = vpow2.f32 %v4898_v26  ;;  %v17211_v18 = vpop.f32.mrf.mxu1 }
 0x284   :  { %v13723_v28 = vpop.eup %13722  ;;  %v5152_v8 = vmul.f32 0.35355338, %v5024_v56  ;;  %13736 = vpow2.f32 %v4896_v58  ;;  %v4651_v23 = vsel %vm16150_vm13, %v4491_v25, -1e+30  ;;  %v12546_v31 = vpop.f32.mrf.mxu0  ;;  %12737 = vmatmul.mubr.bf16.gmra.mxu0 %v5223_v59  ;;  %v20585_v58 = vld [vmem:[#allocation23_spill] sm:$0xff]  ;;  %vm20891_vm13 = vmmov %vm20852_vm3 }
 0x285   :  { %v4650_v13 = vsel %vm16156_vm14, %v4490_v4, -1e+30  ;;  %v13725_v52 = vpop.eup %13724  ;;  %v5027_v43 = vmul.f32 %v13723_v28, %v17001_v3  ;;  %v4902_v5 = vmul.f32 1.442695, %v4651_v23  ;;  %v17214_v45 = vadd.f32 %v12546_v31, %v2305_v53  ;;  %v4269_v32 = vpop.permute.xlu1 %4268  ;;  %12785 = vmatpush3.bf16.msra.mxu0 %v14127_v46  ;;  %vm20892_vm14 = vmmov %vm20852_vm3 }
 0x286   :  { %v4900_v12 = vmul.f32 1.442695, %v4650_v13  ;;  %v4265_v44 = vpop.permute.xlu0 %4264  ;;  %v5026_v27 = vmul.f32 %v13725_v52, %v16970_v16  ;;  %v4493_v41 = vsub.f32 %v4269_v32, %v17079_v36  ;;  %v17222_v26 = vpop.f32.mrf.mxu0  ;;  %v5224_v3 = vpack.c.bf16 %v5153_v33, %v5152_v8  ;;  %12786 = vmatprep.subr.bf16.mxu0 %v20557_v1 }
 0x287   :  { %20583 = vst [vmem:[#allocation24_spill] sm:$0xff] %v17214_v45  ;;  %v4492_v21 = vsub.f32 %v4265_v44, %v17079_v36  ;;  %20584 = vst [vmem:[#allocation79_spill] sm:$0xff] %v17222_v26  ;;  %v2306_v19 = vmul.f32 %v20586_v20, %v20585_v58  ;;  %v5155_v30 = vmul.f32 0.35355338, %v5027_v43  ;;  %13738 = vpow2.f32 %v4902_v5  ;;  %v17231_v11 = vpop.f32.mrf.mxu1  ;;  %v20589_v5 = vld [vmem:[#allocation44_spill] sm:$0xff] }
 0x288   :  { %v13727_v56 = vpop.eup %13726  ;;  %v5154_v25 = vmul.f32 0.35355338, %v5026_v27  ;;  %13740 = vpow2.f32 %v4900_v12  ;;  %v4653_v16 = vsel %vm16165_vm15, %v4493_v41, -1e+30  ;;  %v12547_v59 = vpop.f32.mrf.mxu0  ;;  %12756 = vmatprep.mubr.bf16.mxu1 %v5224_v3  ;;  %vm20898_vm15 = vmmov %vm20852_vm3 }
 0x289   :  { %v4652_v4 = vsel %vm16177_vm1, %v4492_v21, -1e+30  ;;  %v13729_v42 = vpop.eup %13728  ;;  %v5029_v53 = vmul.f32 %v13727_v56, %v17075_v57  ;;  %v4906_v33 = vmul.f32 1.442695, %v4653_v16  ;;  %v17234_v8 = vadd.f32 %v12547_v59, %v2306_v19  ;;  %v4277_v23 = vpop.permute.xlu1 %4276  ;;  %12787 = vmatpush3.bf16.msra.mxu0 %v14128_v22  ;;  %v20588_v57 = vld [vmem:[#allocation28_spill] sm:$0xff]  ;;  %v14129_v19 = vld [vmem:[%s20083_s2 + $0x78] sm:$0xff]   ;;  %vm20903_vm1 = vmmov %vm20852_vm3 }
 0x28a   :  { %v4904_v28 = vmul.f32 1.442695, %v4652_v4  ;;  %v4273_v13 = vpop.permute.xlu0 %4272  ;;  %v5028_v39 = vmul.f32 %v13729_v42, %v17046_v61  ;;  %v4495_v31 = vsub.f32 %v4277_v23, %v17079_v36  ;;  %v5225_v43 = vpack.c.bf16 %v5155_v30, %v5154_v25  ;;  %12812 = vmatprep.subr.bf16.mxu0 %v20557_v1  ;;  %v20592_v56 = vld [vmem:[#allocation27_spill] sm:$0xff]  ;;  %v20593_v25 = vld [vmem:[#allocation50_spill] sm:$0xff] }
 0x28b   :  { %20587 = vst [vmem:[#allocation23_spill] sm:$0xff] %v17234_v8  ;;  %v4494_v52 = vsub.f32 %v4273_v13, %v17079_v36  ;;  %v2309_v12 = vmul.f32 %v20589_v5, %v20588_v57  ;;  %v5157_v32 = vmul.f32 0.35355338, %v5029_v53  ;;  %13742 = vpow2.f32 %v4906_v33  ;;  %v12566_v41 = vpop.f32.mrf.mxu1 }
 0x28c   :  { %v13731_v44 = vpop.eup %13730  ;;  %v5156_v46 = vmul.f32 0.35355338, %v5028_v39  ;;  %13744 = vpow2.f32 %v4904_v28  ;;  %v4655_v27 = vsel %vm16209_vm2, %v4495_v31, -1e+30  ;;  %12757 = vmatmul.mubr.bf16.vlgmr.msra.gmra.mxu1 %v5225_v43  ;;  %v2310_v16 = vmul.f32 %v20593_v25, %v20592_v56  ;;  %v20596_v39 = vld [vmem:[#allocation32_spill] sm:$0xff]  ;;  %vm20904_vm2 = vmmov %vm20903_vm1 }
 0x28d   :  { %v4654_v61 = vsel %vm16215_vm0, %v4494_v52, -1e+30  ;;  %v13733_v36 = vpop.eup %13732  ;;  %v4910_v21 = vmul.f32 1.442695, %v4655_v27  ;;  %v17249_v58 = vadd.f32 %v12566_v41, %v2309_v12  ;;  %v5031_v20 = vmul.f32 %v13731_v44, %v17061_v35  ;;  %12793 = vmatpush3.bf16.msra.mxu1 %v14129_v19  ;;  %v17255_v30 = vpop.f32.mrf.mxu1  ;;  %v20597_v31 = vld [vmem:[#allocation56_spill] sm:$0xff] }
 0x28e   :  { %v4908_v3 = vmul.f32 1.442695, %v4654_v61  ;;  %20591 = vst [vmem:[#allocation28_spill] sm:$0xff] %v17255_v30  ;;  %v5226_v10 = vpack.c.bf16 %v5157_v32, %v5156_v46  ;;  %v5030_v14 = vmul.f32 %v13733_v36, %v17031_v0  ;;  %12794 = vmatprep.subr.bf16.mxu1 %v20557_v1  ;;  %v14130_v0 = vld [vmem:[%s20083_s2 + $0x70] sm:$0xff]   ;;  %v2313_v52 = vmul.f32 %v20597_v31, %v20596_v39  ;;  %v14132_v36 = vld [vmem:[%s20081_s3] sm:$0xff] }
 0x28f   :  { %20590 = vst [vmem:[#allocation85_spill] sm:$0xff] %v17249_v58  ;;  %13746 = vpow2.f32 %v4910_v21  ;;  %v5159_v4 = vmul.f32 0.35355338, %v5031_v20  ;;  %v12567_v35 = vpop.f32.mrf.mxu1  ;;  %vm14261_vm0 = vmmov 0   ;;  %v14181_v30 = vld [vmem:[%s20083_s2 + $0xc0] sm:$0xff]  }
 0x290   :  { %v13735_v59 = vpop.eup %13734  ;;  %13748 = vpow2.f32 %v4908_v3  ;;  %12760 = vmatprep.mubr.bf16.mxu1 %v5226_v10  ;;  %v5158_v42 = vmul.f32 0.35355338, %v5030_v14  ;;  %v17262_v28 = vadd.f32 %v12567_v35, %v2310_v16  ;;  %v20603_v35 = vld [vmem:[#allocation68_spill] sm:$0xff]  ;;  %12788 = vmatprep.mubr.msk.bf16.mxu0 %vm14261_vm0, %v20557_v1 }
 0x291   :  { %v13737_v53 = vpop.eup %13736  ;;  %v5033_v33 = vmul.f32 %v13735_v59, %v17151_v48  ;;  %12795 = vmatpush3.bf16.msra.mxu1 %v14130_v0  ;;  %v17268_v13 = vpop.f32.mrf.mxu1  ;;  %v20602_v59 = vld [vmem:[#allocation36_spill] sm:$0xff] }
 0x292   :  { %20594 = vst [vmem:[#allocation44_spill] sm:$0xff] %v17262_v28  ;;  %v5032_v23 = vmul.f32 %v13737_v53, %v17111_v49  ;;  %20595 = vst [vmem:[#allocation27_spill] sm:$0xff] %v17268_v13  ;;  %v5227_v22 = vpack.c.bf16 %v5159_v4, %v5158_v42  ;;  %12796 = vmatprep.subr.bf16.mxu1 %v20557_v1  ;;  %v14131_v49 = vld [vmem:[%s20083_s2 + $0x68] sm:$0xff]   ;;  %v2317_v42 = vmul.f32 %v20603_v35, %v20602_v59 }
 0x293   :  { %v5161_v43 = vmul.f32 0.35355338, %v5033_v33  ;;  %v12570_v5 = vpop.f32.mrf.mxu1 }
 0x294   :  { %v13739_v57 = vpop.eup %13738  ;;  %v5160_v48 = vmul.f32 0.35355338, %v5032_v23  ;;  %12761 = vmatmul.mubr.bf16.gmra.mxu1 %v5227_v22  ;;  %v17273_v32 = vadd.f32 %v12570_v5, %v2313_v52 }
 0x295   :  { %v13741_v12 = vpop.eup %13740  ;;  %v5035_v44 = vmul.f32 %v13739_v57, %v17131_v34  ;;  %12797 = vmatpush3.bf16.msra.mxu1 %v14131_v49  ;;  %v17279_v46 = vpop.f32.mrf.mxu1  ;;  %v20606_v57 = vld [vmem:[#allocation35_spill] sm:$0xff] }
 0x296   :  { %20598 = vst [vmem:[#allocation50_spill] sm:$0xff] %v17273_v32  ;;  %20599 = vst [vmem:[#allocation32_spill] sm:$0xff] %v17279_v46  ;;  %v6650_v27 = vpop.permute.xlu0 %6649  ;;  %v5228_v61 = vpack.c.bf16 %v5161_v43, %v5160_v48  ;;  %v5034_v41 = vmul.f32 %v13741_v12, %v17091_v7  ;;  %12798 = vmatprep.subr.bf16.mxu1 %v20557_v1  ;;  %v14133_v7 = vld [vmem:[%s20083_s2 + $0x60] sm:$0xff]   ;;  %v20607_v48 = vld [vmem:[#allocation74_spill] sm:$0xff] }
 0x297   :  { %v6652_v21 = vsub.f32 %v6650_v27, %v14132_v36  ;;  %v5163_v3 = vmul.f32 0.35355338, %v5035_v44  ;;  %v17286_v20 = vpop.f32.mrf.mxu1  ;;  %v2318_v5 = vmul.f32 %v20607_v48, %v20606_v57  ;;  %v14135_v27 = vld [vmem:[%s20083_s2 + $0x50] sm:$0xff]   ;;  %v20611_v36 = vld [vmem:[#allocation80_spill] sm:$0xff] }
 0x298   :  { %v13743_v34 = vpop.eup %13742  ;;  %20600 = vst [vmem:[#allocation56_spill] sm:$0xff] %v17286_v20  ;;  %12764 = vmatprep.mubr.bf16.mxu1 %v5228_v61  ;;  %v5162_v19 = vmul.f32 0.35355338, %v5034_v41 }
 0x299   :  { %v13745_v10 = vpop.eup %13744  ;;  %v5037_v14 = vmul.f32 %v13743_v34, %v17231_v11  ;;  %v6653_v56 = vmul.f32 1.442695, %v6652_v21  ;;  %12799 = vmatpush3.bf16.msra.mxu1 %v14133_v7  ;;  %v17293_v16 = vpop.f32.mrf.mxu1 }
 0x29a   :  { %v5036_v25 = vmul.f32 %v13745_v10, %v17191_v29  ;;  %20601 = vst [vmem:[#allocation277_spill] sm:$0xff] %v17293_v16  ;;  %v5229_v4 = vpack.c.bf16 %v5163_v3, %v5162_v19  ;;  %12800 = vmatprep.subr.bf16.mxu1 %v20557_v1  ;;  %v14134_v29 = vld [vmem:[%s20083_s2 + $0x58] sm:$0xff]   ;;  %v14136_v19 = vld [vmem:[%s20083_s2 + $0x48] sm:$0xff]   ;;  %v17333_v7 = vpop.f32.mrf.mxu0 }
 0x29b   :  { %v5165_v53 = vmul.f32 0.35355338, %v5037_v14  ;;  %13750 = vpow2.f32 %v6653_v56  ;;  %v12574_v0 = vpop.f32.mrf.mxu1  ;;  %v14137_v56 = vld [vmem:[%s20083_s2 + $0x40] sm:$0xff]   ;;  %20613 = vst [vmem:[#allocation80_spill] sm:$0xff] %v17333_v7 }
 0x29c   :  { %v13747_v33 = vpop.eup %13746  ;;  %v5164_v11 = vmul.f32 0.35355338, %v5036_v25  ;;  %12765 = vmatmul.mubr.bf16.gmra.mxu1 %v5229_v4  ;;  %v17298_v22 = vadd.f32 %v12574_v0, %v2317_v42  ;;  %v20614_v25 = vld [vmem:[#allocation46_spill] sm:$0xff]  ;;  %v20615_v4 = vld [vmem:[#allocation91_spill] sm:$0xff] }
 0x29d   :  { %v13749_v23 = vpop.eup %13748  ;;  %v5039_v39 = vmul.f32 %v13747_v33, %v17211_v18  ;;  %12801 = vmatpush3.bf16.msra.mxu1 %v14134_v29  ;;  %v17304_v31 = vpop.f32.mrf.mxu1  ;;  %v2325_v59 = vmul.f32 %v20615_v4, %v20614_v25  ;;  %v20618_v33 = vld [vmem:[#allocation45_spill] sm:$0xff]  ;;  %v14175_v7 = vld [vmem:[%s20082_s1 + $0x140] sm:$0xff]  }
 0x29e   :  { %20604 = vst [vmem:[#allocation36_spill] sm:$0xff] %v17298_v22  ;;  %20605 = vst [vmem:[#allocation68_spill] sm:$0xff] %v17304_v31  ;;  %v5230_v52 = vpack.c.bf16 %v5165_v53, %v5164_v11  ;;  %v5038_v43 = vmul.f32 %v13749_v23, %v17171_v60  ;;  %12802 = vmatprep.subr.bf16.mxu1 %v20557_v1  ;;  %v20610_v60 = vld [vmem:[#allocation40_spill] sm:$0xff]  ;;  %v20619_v11 = vld [vmem:[#allocation98_spill] sm:$0xff]  ;;  %v6601_v37 = vunpack.c.h.bf16 %v14175_v7 }
 0x29f   :  { %v5167_v12 = vmul.f32 0.35355338, %v5039_v39  ;;  %v12575_v44 = vpop.f32.mrf.mxu1  ;;  %v2321_v21 = vmul.f32 %v20611_v36, %v20610_v60  ;;  %v2326_v0 = vmul.f32 %v20619_v11, %v20618_v33  ;;  %v20701_v22 = vld [vmem:[#allocation159_spill] sm:$0xff] }
 0x2a0   :  { %12768 = vmatprep.mubr.bf16.mxu1 %v5230_v52  ;;  %v5166_v49 = vmul.f32 0.35355338, %v5038_v43  ;;  %v17310_v18 = vadd.f32 %v12575_v44, %v2318_v5  ;;  %v20622_v52 = vld [vmem:[#allocation58_spill] sm:$0xff]  ;;  %v20623_v43 = vld [vmem:[#allocation104_spill] sm:$0xff]  ;;  %v20626_v44 = vld [vmem:[#allocation57_spill] sm:$0xff] }
 0x2a1   :  { %12803 = vmatpush3.bf16.msra.mxu1 %v14135_v27  ;;  %v17315_v61 = vpop.f32.mrf.mxu1  ;;  %v2329_v57 = vmul.f32 %v20623_v43, %v20622_v52  ;;  %v20639_v43 = vld [vmem:[#allocation82_spill] sm:$0xff] }
 0x2a2   :  { %20608 = vst [vmem:[#allocation35_spill] sm:$0xff] %v17310_v18  ;;  %20609 = vst [vmem:[#allocation74_spill] sm:$0xff] %v17315_v61  ;;  %v5231_v41 = vpack.c.bf16 %v5167_v12, %v5166_v49  ;;  %12804 = vmatprep.subr.bf16.mxu1 %v20557_v1  ;;  %v20627_v49 = vld [vmem:[#allocation110_spill] sm:$0xff]  ;;  %v14177_v61 = vld [vmem:[%s20082_s1 + $0x148] sm:$0xff]  }
 0x2a3   :  { %v12578_v3 = vpop.f32.mrf.mxu1  ;;  %v2330_v27 = vmul.f32 %v20627_v49, %v20626_v44  ;;  %v6602_v31 = vunpack.c.l.bf16 %v14177_v61  ;;  %v6603_v20 = vunpack.c.h.bf16 %v14177_v61 }
 0x2a4   :  { %12769 = vmatmul.mubr.bf16.gmra.mxu1 %v5231_v41  ;;  %v17320_v34 = vadd.f32 %v12578_v3, %v2321_v21  ;;  %v20630_v21 = vld [vmem:[#allocation70_spill] sm:$0xff]  ;;  %v20631_v3 = vld [vmem:[#allocation116_spill] sm:$0xff] }
 0x2a5   :  { %12805 = vmatpush3.bf16.msra.mxu1 %v14136_v19  ;;  %v2333_v19 = vmul.f32 %v20631_v3, %v20630_v21  ;;  %12808 = vmatprep.mubr.msk.bf16.mxu1 %vm14261_vm0, %v20557_v1 }
 0x2a6   :  { %20612 = vst [vmem:[#allocation40_spill] sm:$0xff] %v17320_v34  ;;  %12806 = vmatprep.subr.bf16.mxu1 %v20557_v1 }
 0x2a8   :  { %v17326_v10 = vpop.eup %13750 }
 0x2a9   :  { %v6658_v14 = vrot.slane %v17326_v10, %v14382_v24  ;;  %12807 = vmatpush3.bf16.msra.mxu1 %v14137_v56 }
 0x2aa   :  { %12832 = vmatprep.subr.bf16.mxu1 %v20557_v1 }
 0x2ab   :  { %6668 = vbcast.lane.b32.xlu0 %v6658_v14, 272  ;;  %6660 = vbcast.lane.b32.xlu1 %v6658_v14, 256  ;;  %v12598_v35 = vpop.f32.mrf.mxu0 }
 0x2ac   :  { %v17338_v42 = vadd.f32 %v12598_v35, %v2325_v59  ;;  %v20634_v59 = vld [vmem:[#allocation69_spill] sm:$0xff]  ;;  %v20635_v35 = vld [vmem:[#allocation122_spill] sm:$0xff] }
 0x2ad   :  { %v17340_v53 = vpop.f32.mrf.mxu0  ;;  %v2334_v33 = vmul.f32 %v20635_v35, %v20634_v59 }
 0x2ae   :  { %20616 = vst [vmem:[#allocation46_spill] sm:$0xff] %v17338_v42  ;;  %20617 = vst [vmem:[#allocation91_spill] sm:$0xff] %v17340_v53  ;;  %v20672_v42 = vld [vmem:[#allocation129_spill] sm:$0xff]  ;;  %v20681_v53 = vld [vmem:[#allocation139_spill] sm:$0xff] }
 0x2af   :  { %6676 = vbcast.lane.b32.xlu0 %v6658_v14, 288  ;;  %6664 = vbcast.lane.b32.xlu1 %v6658_v14, 264  ;;  %v12599_v23 = vpop.f32.mrf.mxu0 }
 0x2b0   :  { %v17344_v39 = vadd.f32 %v12599_v23, %v2326_v0  ;;  %v17370_v23 = vpop.f32.mrf.mxu1 }
 0x2b1   :  { %v17346_v29 = vpop.f32.mrf.mxu0  ;;  %20637 = vst [vmem:[#allocation122_spill] sm:$0xff] %v17370_v23 }
 0x2b2   :  { %20620 = vst [vmem:[#allocation45_spill] sm:$0xff] %v17344_v39  ;;  %20621 = vst [vmem:[#allocation98_spill] sm:$0xff] %v17346_v29  ;;  %v17382_v21 = vpop.f32.mrf.mxu1 }
 0x2b3   :  { %6684 = vbcast.lane.b32.xlu0 %v6658_v14, 304  ;;  %6672 = vbcast.lane.b32.xlu1 %v6658_v14, 280  ;;  %v12602_v48 = vpop.f32.mrf.mxu0 }
 0x2b4   :  { %v17350_v5 = vadd.f32 %v12602_v48, %v2329_v57  ;;  %v20640_v57 = vld [vmem:[#allocation128_spill] sm:$0xff] }
 0x2b5   :  { %v17352_v12 = vpop.f32.mrf.mxu0  ;;  %v2337_v48 = vmul.f32 %v20640_v57, %v20639_v43  ;;  %20643 = vst [vmem:[#allocation128_spill] sm:$0xff] %v17382_v21  ;;  %v20649_v43 = vld [vmem:[#allocation94_spill] sm:$0xff]  ;;  %v20650_v57 = vld [vmem:[#allocation92_spill] sm:$0xff] }
 0x2b6   :  { %20624 = vst [vmem:[#allocation58_spill] sm:$0xff] %v17350_v5  ;;  %20625 = vst [vmem:[#allocation104_spill] sm:$0xff] %v17352_v12  ;;  %v20664_v12 = vld [vmem:[#allocation117_spill] sm:$0xff]  ;;  %v14174_v21 = vld [vmem:[%s20083_s2 + $0xd8] sm:$0xff]  }
 0x2b7   :  { %6692 = vbcast.lane.b32.xlu0 %v6658_v14, 320  ;;  %6680 = vbcast.lane.b32.xlu1 %v6658_v14, 296  ;;  %v12603_v41 = vpop.f32.mrf.mxu0 }
 0x2b8   :  { %v17356_v60 = vadd.f32 %v12603_v41, %v2330_v27  ;;  %v20642_v27 = vld [vmem:[#allocation6_spill] sm:$0xff] }
 0x2b9   :  { %v17358_v36 = vpop.f32.mrf.mxu0  ;;  %v17380_v41 = vrot.slane %v17326_v10, %v20642_v27 }
 0x2ba   :  { %20628 = vst [vmem:[#allocation57_spill] sm:$0xff] %v17356_v60  ;;  %20629 = vst [vmem:[#allocation110_spill] sm:$0xff] %v17358_v36 }
 0x2bb   :  { %6700 = vbcast.lane.b32.xlu0 %v6658_v14, 336  ;;  %6688 = vbcast.lane.b32.xlu1 %v6658_v14, 312  ;;  %v12606_v56 = vpop.f32.mrf.mxu0 }
 0x2bc   :  { %v17362_v25 = vadd.f32 %v12606_v56, %v2333_v19  ;;  %v20645_v19 = vld [vmem:[#allocation81_spill] sm:$0xff]  ;;  %v20646_v56 = vld [vmem:[#allocation134_spill] sm:$0xff] }
 0x2bd   :  { %v17364_v4 = vpop.f32.mrf.mxu0  ;;  %v2338_v59 = vmul.f32 %v20646_v56, %v20645_v19 }
 0x2be   :  { %20632 = vst [vmem:[#allocation70_spill] sm:$0xff] %v17362_v25  ;;  %20633 = vst [vmem:[#allocation116_spill] sm:$0xff] %v17364_v4 }
 0x2bf   :  { %6708 = vbcast.lane.b32.xlu0 %v6658_v14, 352  ;;  %6696 = vbcast.lane.b32.xlu1 %v6658_v14, 328  ;;  %v12607_v11 = vpop.f32.mrf.mxu0 }
 0x2c0   :  { %v17368_v0 = vadd.f32 %v12607_v11, %v2334_v33  ;;  %v17391_v11 = vpop.f32.mrf.mxu1 }
 0x2c1   :  { %v17372_v52 = vpop.f32.mrf.mxu0  ;;  %20648 = vst [vmem:[#allocation134_spill] sm:$0xff] %v17391_v11  ;;  %v6600_v11 = vunpack.c.l.bf16 %v14175_v7  ;;  %v14178_v7 = vld [vmem:[%s20083_s2 + $0xc8] sm:$0xff]  }
 0x2c2   :  { %20636 = vst [vmem:[#allocation69_spill] sm:$0xff] %v17368_v0  ;;  %20638 = vst [vmem:[#allocation278_spill] sm:$0xff] %v17372_v52 }
 0x2c3   :  { %6716 = vbcast.lane.b32.xlu0 %v6658_v14, 368  ;;  %6704 = vbcast.lane.b32.xlu1 %v6658_v14, 344  ;;  %v12610_v44 = vpop.f32.mrf.mxu0 }
 0x2c4   :  { %v17376_v49 = vadd.f32 %v12610_v44, %v2337_v48  ;;  %v2341_v48 = vmul.f32 %v20650_v57, %v20649_v43 }
 0x2c5   :  { %v17384_v3 = vpop.f32.mrf.mxu0 }
 0x2c6   :  { %20641 = vst [vmem:[#allocation82_spill] sm:$0xff] %v17376_v49  ;;  %20644 = vst [vmem:[#allocation6_spill] sm:$0xff] %v17384_v3 }
 0x2c7   :  { %6727 = vbcast.lane.b32.xlu0 %v17380_v41, 256  ;;  %6712 = vbcast.lane.b32.xlu1 %v6658_v14, 360  ;;  %v12611_v35 = vpop.f32.mrf.mxu0 }
 0x2c8   :  { %v17389_v33 = vadd.f32 %v12611_v35, %v2338_v59  ;;  %v20655_v59 = vld [vmem:[#allocation107_spill] sm:$0xff]  ;;  %v20656_v35 = vld [vmem:[#allocation105_spill] sm:$0xff] }
 0x2c9   :  { %v2345_v50 = vmul.f32 %v20656_v35, %v20655_v59 }
 0x2ca   :  { %20647 = vst [vmem:[#allocation81_spill] sm:$0xff] %v17389_v33 }
 0x2cb   :  { %6735 = vbcast.lane.b32.xlu0 %v17380_v41, 272  ;;  %6720 = vbcast.lane.b32.xlu1 %v6658_v14, 376  ;;  %v12630_v44 = vpop.f32.mrf.mxu1 }
 0x2cc   :  { %v17396_v27 = vadd.f32 %v12630_v44, %v2341_v48  ;;  %v20659_v48 = vld [vmem:[#allocation106_spill] sm:$0xff]  ;;  %v20660_v44 = vld [vmem:[#allocation111_spill] sm:$0xff] }
 0x2cd   :  { %v17398_v24 = vpop.f32.mrf.mxu1  ;;  %v2346_v49 = vmul.f32 %v20660_v44, %v20659_v48 }
 0x2ce   :  { %20651 = vst [vmem:[#allocation94_spill] sm:$0xff] %v17396_v27  ;;  %20652 = vst [vmem:[#allocation92_spill] sm:$0xff] %v17398_v24  ;;  %v20663_v27 = vld [vmem:[#allocation119_spill] sm:$0xff] }
 0x2cf   :  { %6743 = vbcast.lane.b32.xlu0 %v17380_v41, 288  ;;  %v17401_v19 = vpop.f32.mrf.mxu1  ;;  %v2349_v59 = vmul.f32 %v20664_v12, %v20663_v27 }
 0x2d0   :  { %20653 = vst [vmem:[#allocation279_spill] sm:$0xff] %v17401_v19 }
 0x2d1   :  { %v17403_v56 = vpop.f32.mrf.mxu1 }
 0x2d2   :  { %20654 = vst [vmem:[#allocation280_spill] sm:$0xff] %v17403_v56  ;;  %v14156_v56 = vld [vmem:[%s20082_s1 + $0x50] sm:$0xff]  }
 0x2d3   :  { %6751 = vbcast.lane.b32.xlu0 %v17380_v41, 304  ;;  %v12634_v43 = vpop.f32.mrf.mxu1  ;;  %v6541_v29 = vunpack.c.h.bf16 %v14156_v56 }
 0x2d4   :  { %v17408_v57 = vadd.f32 %v12634_v43, %v2345_v50 }
 0x2d5   :  { %v17410_v14 = vpop.f32.mrf.mxu1 }
 0x2d6   :  { %20657 = vst [vmem:[#allocation107_spill] sm:$0xff] %v17408_v57  ;;  %20658 = vst [vmem:[#allocation105_spill] sm:$0xff] %v17410_v14  ;;  %v20667_v57 = vld [vmem:[#allocation118_spill] sm:$0xff]  ;;  %v20668_v14 = vld [vmem:[#allocation123_spill] sm:$0xff] }
 0x2d7   :  { %6759 = vbcast.lane.b32.xlu0 %v17380_v41, 320  ;;  %v12635_v3 = vpop.f32.mrf.mxu1  ;;  %v2350_v48 = vmul.f32 %v20668_v14, %v20667_v57  ;;  %v20676_v14 = vld [vmem:[#allocation130_spill] sm:$0xff] }
 0x2d8   :  { %v17415_v4 = vadd.f32 %v12635_v3, %v2346_v49 }
 0x2d9   :  { %v17417_v5 = vpop.f32.mrf.mxu1 }
 0x2da   :  { %20661 = vst [vmem:[#allocation106_spill] sm:$0xff] %v17415_v4  ;;  %20662 = vst [vmem:[#allocation111_spill] sm:$0xff] %v17417_v5  ;;  %v20671_v4 = vld [vmem:[#allocation131_spill] sm:$0xff] }
 0x2db   :  { %6767 = vbcast.lane.b32.xlu0 %v17380_v41, 336  ;;  %v12638_v35 = vpop.f32.mrf.mxu1  ;;  %v2353_v12 = vmul.f32 %v20672_v42, %v20671_v4  ;;  %v17449_v42 = vpop.f32.mrf.mxu0  ;;  %v20680_v4 = vld [vmem:[#allocation141_spill] sm:$0xff] }
 0x2dc   :  { %v17422_v50 = vadd.f32 %v12638_v35, %v2349_v59  ;;  %v20674_v35 = vld [vmem:[#allocation7_spill] sm:$0xff]  ;;  %20679 = vst [vmem:[#allocation130_spill] sm:$0xff] %v17449_v42 }
 0x2dd   :  { %v17424_v43 = vpop.f32.mrf.mxu1 }
 0x2de   :  { %20665 = vst [vmem:[#allocation119_spill] sm:$0xff] %v17422_v50  ;;  %20666 = vst [vmem:[#allocation117_spill] sm:$0xff] %v17424_v43  ;;  %v17440_v50 = vrot.slane %v17326_v10, %v20674_v35  ;;  %v20677_v43 = vld [vmem:[#allocation138_spill] sm:$0xff] }
 0x2df   :  { %6775 = vbcast.lane.b32.xlu0 %v17380_v41, 352  ;;  %v12639_v44 = vpop.f32.mrf.mxu1  ;;  %v20682_v35 = vld [vmem:[#allocation142_spill] sm:$0xff] }
 0x2e0   :  { %v17429_v49 = vadd.f32 %v12639_v44, %v2350_v48  ;;  %v2354_v48 = vmul.f32 %v20677_v43, %v20676_v14  ;;  %v20685_v43 = vld [vmem:[#allocation140_spill] sm:$0xff] }
 0x2e1   :  { %v17431_v3 = vpop.f32.mrf.mxu1  ;;  %v20686_v14 = vld [vmem:[#allocation144_spill] sm:$0xff] }
 0x2e2   :  { %20669 = vst [vmem:[#allocation118_spill] sm:$0xff] %v17429_v49  ;;  %20670 = vst [vmem:[#allocation123_spill] sm:$0xff] %v17431_v3  ;;  %v2358_v26 = vmul.f32 %v20686_v14, %v20685_v43  ;;  %v20696_v43 = vld [vmem:[#allocation154_spill] sm:$0xff]  ;;  %v14155_v3 = vld [vmem:[%s20082_s1 + $0x48] sm:$0xff]  }
 0x2e3   :  { %6783 = vbcast.lane.b32.xlu0 %v17380_v41, 368  ;;  %v12642_v27 = vpop.f32.mrf.mxu1  ;;  %v6538_v52 = vunpack.c.l.bf16 %v14155_v3  ;;  %v6539_v5 = vunpack.c.h.bf16 %v14155_v3 }
 0x2e4   :  { %v17436_v59 = vadd.f32 %v12642_v27, %v2353_v12  ;;  %v2357_v12 = vmul.f32 %v20681_v53, %v20680_v4  ;;  %v20690_v4 = vld [vmem:[#allocation151_spill] sm:$0xff] }
 0x2e5   :  { %v17442_v57 = vpop.f32.mrf.mxu1  ;;  %v2361_v18 = vmul.f32 %v20691_v47, %v20690_v4  ;;  %v20700_v4 = vld [vmem:[#allocation161_spill] sm:$0xff] }
 0x2e6   :  { %20673 = vst [vmem:[#allocation131_spill] sm:$0xff] %v17436_v59  ;;  %20675 = vst [vmem:[#allocation129_spill] sm:$0xff] %v17442_v57  ;;  %v20683_v59 = vld [vmem:[#allocation136_spill] sm:$0xff]  ;;  %v2365_v51 = vmul.f32 %v20701_v22, %v20700_v4  ;;  %v20710_v4 = vld [vmem:[#allocation170_spill] sm:$0xff] }
 0x2e7   :  { %6794 = vbcast.lane.b32.xlu0 %v17440_v50, 256  ;;  %v12643_v44 = vpop.f32.mrf.mxu1  ;;  %v2355_v45 = vmul.f32 %v20683_v59, %v20682_v35 }
 0x2e8   :  { %v17447_v24 = vadd.f32 %v12643_v44, %v2354_v48 }
 0x2ea   :  { %20678 = vst [vmem:[#allocation7_spill] sm:$0xff] %v17447_v24 }
 0x2eb   :  { %6802 = vbcast.lane.b32.xlu0 %v17440_v50, 272  ;;  %v12662_v27 = vpop.f32.mrf.mxu0 }
 0x2ec   :  { %v17456_v57 = vadd.f32 %v12662_v27, %v2357_v12  ;;  %v20692_v12 = vld [vmem:[#allocation152_spill] sm:$0xff]  ;;  %v20693_v27 = vld [vmem:[#allocation146_spill] sm:$0xff] }
 0x2ed   :  { %v5894_v34 = vpop.f32.mrf.mxu0  ;;  %v2359_v35 = vmul.f32 %v20693_v27, %v20692_v12  ;;  %v20703_v12 = vld [vmem:[#allocation156_spill] sm:$0xff] }
 0x2ee   :  { %20684 = vst [vmem:[#allocation138_spill] sm:$0xff] %v17456_v57  ;;  %v17460_v23 = vadd.f32 %v5894_v34, %v2355_v45  ;;  %v20695_v34 = vld [vmem:[#allocation150_spill] sm:$0xff] }
 0x2ef   :  { %6810 = vbcast.lane.b32.xlu0 %v17440_v50, 288  ;;  %v12663_v48 = vpop.f32.mrf.mxu0  ;;  %v2362_v14 = vmul.f32 %v20696_v43, %v20695_v34  ;;  %v20706_v34 = vld [vmem:[#allocation164_spill] sm:$0xff] }
 0x2f0   :  { %20687 = vst [vmem:[#allocation141_spill] sm:$0xff] %v17460_v23  ;;  %v17463_v44 = vadd.f32 %v12663_v48, %v2358_v26 }
 0x2f1   :  { %v17465_v53 = vpop.f32.mrf.mxu0 }
 0x2f2   :  { %20688 = vst [vmem:[#allocation139_spill] sm:$0xff] %v17463_v44  ;;  %20689 = vst [vmem:[#allocation142_spill] sm:$0xff] %v17465_v53  ;;  %v20756_v53 = vld [vmem:[#allocation12_spill] sm:$0xff] }
 0x2f3   :  { %6818 = vbcast.lane.b32.xlu0 %v17440_v50, 304  ;;  %v12666_v59 = vpop.f32.mrf.mxu0 }
 0x2f4   :  { %v17472_v57 = vadd.f32 %v12666_v59, %v2361_v18  ;;  %v20702_v59 = vld [vmem:[#allocation162_spill] sm:$0xff] }
 0x2f5   :  { %v5910_v45 = vpop.f32.mrf.mxu0  ;;  %v2363_v27 = vmul.f32 %v20703_v12, %v20702_v59  ;;  %v20713_v59 = vld [vmem:[#allocation166_spill] sm:$0xff] }
 0x2f6   :  { %20694 = vst [vmem:[#allocation136_spill] sm:$0xff] %v17472_v57  ;;  %v17476_v23 = vadd.f32 %v5910_v45, %v2359_v35  ;;  %v20705_v45 = vld [vmem:[#allocation160_spill] sm:$0xff] }
 0x2f7   :  { %6826 = vbcast.lane.b32.xlu0 %v17440_v50, 320  ;;  %v12667_v26 = vpop.f32.mrf.mxu0  ;;  %v2366_v43 = vmul.f32 %v20706_v34, %v20705_v45  ;;  %v20716_v34 = vld [vmem:[#allocation169_spill] sm:$0xff] }
 0x2f8   :  { %20697 = vst [vmem:[#allocation140_spill] sm:$0xff] %v17476_v23  ;;  %v17479_v48 = vadd.f32 %v12667_v26, %v2362_v14 }
 0x2f9   :  { %v17481_v47 = vpop.f32.mrf.mxu0 }
 0x2fa   :  { %20698 = vst [vmem:[#allocation144_spill] sm:$0xff] %v17479_v48  ;;  %20699 = vst [vmem:[#allocation151_spill] sm:$0xff] %v17481_v47  ;;  %v20711_v48 = vld [vmem:[#allocation171_spill] sm:$0xff] }
 0x2fb   :  { %6834 = vbcast.lane.b32.xlu0 %v17440_v50, 336  ;;  %v12670_v18 = vpop.f32.mrf.mxu0  ;;  %v2369_v40 = vmul.f32 %v20711_v48, %v20710_v4 }
 0x2fc   :  { %v17488_v57 = vadd.f32 %v12670_v18, %v2365_v51  ;;  %v20712_v18 = vld [vmem:[#allocation175_spill] sm:$0xff] }
 0x2fd   :  { %v5926_v35 = vpop.f32.mrf.mxu0  ;;  %v2367_v12 = vmul.f32 %v20713_v59, %v20712_v18  ;;  %v20721_v18 = vld [vmem:[#allocation179_spill] sm:$0xff] }
 0x2fe   :  { %20704 = vst [vmem:[#allocation149_spill] sm:$0xff] %v17488_v57  ;;  %v17492_v23 = vadd.f32 %v5926_v35, %v2363_v27  ;;  %v20715_v27 = vld [vmem:[#allocation8_spill] sm:$0xff] }
 0x2ff   :  { %6842 = vbcast.lane.b32.xlu0 %v17440_v50, 352  ;;  %v12671_v14 = vpop.f32.mrf.mxu0  ;;  %v17508_v35 = vrot.slane %v17326_v10, %v20715_v27  ;;  %v20723_v27 = vld [vmem:[#allocation153_spill] sm:$0xff] }
 0x300   :  { %20707 = vst [vmem:[#allocation152_spill] sm:$0xff] %v17492_v23  ;;  %v17495_v26 = vadd.f32 %v12671_v14, %v2366_v43  ;;  %v20717_v43 = vld [vmem:[#allocation177_spill] sm:$0xff] }
 0x301   :  { %v17497_v22 = vpop.f32.mrf.mxu0  ;;  %v2370_v14 = vmul.f32 %v20717_v43, %v20716_v34  ;;  %v20727_v34 = vld [vmem:[#allocation158_spill] sm:$0xff] }
 0x302   :  { %20708 = vst [vmem:[#allocation146_spill] sm:$0xff] %v17495_v26  ;;  %20709 = vst [vmem:[#allocation150_spill] sm:$0xff] %v17497_v22  ;;  %v17517_v26 = vpop.f32.mrf.mxu1 }
 0x303   :  { %6850 = vbcast.lane.b32.xlu0 %v17440_v50, 368  ;;  %v12674_v51 = vpop.f32.mrf.mxu0  ;;  %20720 = vst [vmem:[#allocation162_spill] sm:$0xff] %v17517_v26 }
 0x304   :  { %v17504_v57 = vadd.f32 %v12674_v51, %v2369_v40  ;;  %v20722_v40 = vld [vmem:[#allocation148_spill] sm:$0xff] }
 0x305   :  { %v5942_v45 = vpop.f32.mrf.mxu0  ;;  %v2373_v51 = vmul.f32 %v20722_v40, %v20721_v18  ;;  %v20731_v40 = vld [vmem:[#allocation187_spill] sm:$0xff] }
 0x306   :  { %20714 = vst [vmem:[#allocation154_spill] sm:$0xff] %v17504_v57  ;;  %v17512_v23 = vadd.f32 %v5942_v45, %v2367_v12  ;;  %v20724_v57 = vld [vmem:[#allocation174_spill] sm:$0xff] }
 0x307   :  { %6861 = vbcast.lane.b32.xlu0 %v17508_v35, 256  ;;  %v12675_v48 = vpop.f32.mrf.mxu0  ;;  %v2371_v22 = vmul.f32 %v20724_v57, %v20723_v27  ;;  %v20726_v45 = vld [vmem:[#allocation178_spill] sm:$0xff] }
 0x308   :  { %20718 = vst [vmem:[#allocation161_spill] sm:$0xff] %v17512_v23  ;;  %v17515_v4 = vadd.f32 %v12675_v48, %v2370_v14  ;;  %v2374_v43 = vmul.f32 %v20727_v34, %v20726_v45  ;;  %v20737_v45 = vld [vmem:[#allocation176_spill] sm:$0xff] }
 0x30a   :  { %20719 = vst [vmem:[#allocation159_spill] sm:$0xff] %v17515_v4  ;;  %v20732_v4 = vld [vmem:[#allocation168_spill] sm:$0xff] }
 0x30b   :  { %6869 = vbcast.lane.b32.xlu0 %v17508_v35, 272  ;;  %v12694_v59 = vpop.f32.mrf.mxu1  ;;  %v2377_v47 = vmul.f32 %v20732_v4, %v20731_v40  ;;  %v20741_v40 = vld [vmem:[#allocation195_spill] sm:$0xff] }
 0x30c   :  { %v17524_v32 = vadd.f32 %v12694_v59, %v2373_v51  ;;  %v20733_v51 = vld [vmem:[#allocation172_spill] sm:$0xff]  ;;  %v20734_v59 = vld [vmem:[#allocation183_spill] sm:$0xff] }
 0x30d   :  { %v6039_v12 = vpop.f32.mrf.mxu1  ;;  %v2375_v27 = vmul.f32 %v20734_v59, %v20733_v51  ;;  %v20744_v51 = vld [vmem:[#allocation191_spill] sm:$0xff] }
 0x30e   :  { %20725 = vst [vmem:[#allocation156_spill] sm:$0xff] %v17524_v32  ;;  %v17528_v23 = vadd.f32 %v6039_v12, %v2371_v22  ;;  %v20736_v12 = vld [vmem:[#allocation186_spill] sm:$0xff] }
 0x30f   :  { %6877 = vbcast.lane.b32.xlu0 %v17508_v35, 288  ;;  %v12695_v14 = vpop.f32.mrf.mxu1  ;;  %v2378_v34 = vmul.f32 %v20737_v45, %v20736_v12  ;;  %v14138_v12 = vld [vmem:[%s20082_s1] sm:$0xff]  }
 0x310   :  { %20728 = vst [vmem:[#allocation160_spill] sm:$0xff] %v17528_v23  ;;  %v17531_v48 = vadd.f32 %v12695_v14, %v2374_v43  ;;  %v6520_v45 = vunpack.c.l.bf16 %v14138_v12 }
 0x311   :  { %v17533_v18 = vpop.f32.mrf.mxu1 }
 0x312   :  { %20729 = vst [vmem:[#allocation164_spill] sm:$0xff] %v17531_v48  ;;  %20730 = vst [vmem:[#allocation170_spill] sm:$0xff] %v17533_v18  ;;  %v20742_v48 = vld [vmem:[#allocation184_spill] sm:$0xff] }
 0x313   :  { %6885 = vbcast.lane.b32.xlu0 %v17508_v35, 304  ;;  %v2381_v54 = vmul.f32 %v20742_v48, %v20741_v40 }
 0x314   :  { %v12698_v57 = vpop.f32.mrf.mxu1 }
 0x315   :  { %v17540_v32 = vadd.f32 %v12698_v57, %v2377_v47  ;;  %v20743_v57 = vld [vmem:[#allocation188_spill] sm:$0xff] }
 0x316   :  { %v6055_v22 = vpop.f32.mrf.mxu1  ;;  %v2379_v59 = vmul.f32 %v20744_v51, %v20743_v57  ;;  %v14139_v51 = vld [vmem:[%s20082_s1 + $0x8] sm:$0xff]  }
 0x317   :  { %20735 = vst [vmem:[#allocation171_spill] sm:$0xff] %v17540_v32  ;;  %v17544_v23 = vadd.f32 %v6055_v22, %v2375_v27  ;;  %6893 = vbcast.lane.b32.xlu0 %v17508_v35, 320  ;;  %v6523_v55 = vunpack.c.h.bf16 %v14139_v51 }
 0x318   :  { %v12699_v43 = vpop.f32.mrf.mxu1 }
 0x319   :  { %20738 = vst [vmem:[#allocation175_spill] sm:$0xff] %v17544_v23  ;;  %v17547_v14 = vadd.f32 %v12699_v43, %v2378_v34  ;;  %v6521_v43 = vunpack.c.h.bf16 %v14138_v12  ;;  %v20746_v23 = vld [vmem:[#allocation194_spill] sm:$0xff] }
 0x31a   :  { %v17549_v4 = vpop.f32.mrf.mxu1 }
 0x31b   :  { %20739 = vst [vmem:[#allocation166_spill] sm:$0xff] %v17547_v14  ;;  %20740 = vst [vmem:[#allocation8_spill] sm:$0xff] %v17549_v4  ;;  %6901 = vbcast.lane.b32.xlu0 %v17508_v35, 336  ;;  %v20747_v14 = vld [vmem:[#allocation192_spill] sm:$0xff] }
 0x31c   :  { %v12702_v47 = vpop.f32.mrf.mxu1  ;;  %v2382_v48 = vmul.f32 %v20747_v14, %v20746_v23  ;;  %v20751_v23 = vld [vmem:[#allocation203_spill] sm:$0xff]  ;;  %v20752_v14 = vld [vmem:[#allocation200_spill] sm:$0xff] }
 0x31d   :  { %v17556_v32 = vadd.f32 %v12702_v47, %v2381_v54  ;;  %v6669_v27 = vpop.permute.xlu0 %6668  ;;  %v6661_v22 = vpop.permute.xlu1 %6660 }
 0x31e   :  { %v6071_v34 = vpop.f32.mrf.mxu1  ;;  %v7191_v44 = vmul.f32 %v6661_v22, %v6520_v45  ;;  %v17582_v22 = vrot.slane %v17326_v10, %v20756_v53 }
 0x31f   :  { %20745 = vst [vmem:[#allocation169_spill] sm:$0xff] %v17556_v32  ;;  %v17563_v40 = vadd.f32 %v6071_v34, %v2379_v59  ;;  %6909 = vbcast.lane.b32.xlu0 %v17508_v35, 352  ;;  %v6522_v32 = vunpack.c.l.bf16 %v14139_v51  ;;  %v2385_v59 = vmul.f32 %v20752_v14, %v20751_v23  ;;  %v20757_v23 = vld [vmem:[#allocation202_spill] sm:$0xff] }
 0x320   :  { %v12703_v4 = vpop.f32.mrf.mxu1 }
 0x321   :  { %20748 = vst [vmem:[#allocation177_spill] sm:$0xff] %v17563_v40  ;;  %v17566_v57 = vadd.f32 %v12703_v4, %v2382_v48  ;;  %v6677_v54 = vpop.permute.xlu0 %6676  ;;  %v6665_v47 = vpop.permute.xlu1 %6664  ;;  %v20753_v48 = vld [vmem:[#allocation204_spill] sm:$0xff]  ;;  %v20754_v40 = vld [vmem:[#allocation199_spill] sm:$0xff]  ;;  %v7193_v45 = vmul.f32 %v6669_v27, %v6522_v32 }
 0x322   :  { %v7192_v46 = vmul.f32 %v6665_v47, %v6521_v43  ;;  %v17571_v12 = vpop.f32.mrf.mxu1  ;;  %v14140_v43 = vld [vmem:[%s20082_s1 + $0x10] sm:$0xff]  }
 0x323   :  { %20749 = vst [vmem:[#allocation179_spill] sm:$0xff] %v17566_v57  ;;  %20750 = vst [vmem:[#allocation148_spill] sm:$0xff] %v17571_v12  ;;  %6917 = vbcast.lane.b32.xlu0 %v17508_v35, 368  ;;  %v2383_v57 = vmul.f32 %v20754_v40, %v20753_v48  ;;  %v6524_v47 = vunpack.c.l.bf16 %v14140_v43  ;;  %v20758_v40 = vld [vmem:[#allocation206_spill] sm:$0xff] }
 0x324   :  { %v7319_v34 = vpack.c.bf16 %v7192_v46, %v7191_v44  ;;  %v12706_v4 = vpop.f32.mrf.mxu1  ;;  %v6525_v44 = vunpack.c.h.bf16 %v14140_v43  ;;  %v2386_v14 = vmul.f32 %v20758_v40, %v20757_v23  ;;  %v20762_v43 = vld [vmem:[#allocation212_spill] sm:$0xff]  ;;  %v20764_v40 = vld [vmem:[#allocation189_spill] sm:$0xff] }
 0x325   :  { %v17578_v28 = vadd.f32 %v12706_v4, %v2385_v59  ;;  %v6685_v18 = vpop.permute.xlu0 %6684  ;;  %v6673_v58 = vpop.permute.xlu1 %6672  ;;  %v7195_v12 = vmul.f32 %v6677_v54, %v6524_v47  ;;  %v14142_v54 = vld [vmem:[%s20082_s1 + $0x20] sm:$0xff]  }
 0x326   :  { %v7194_v51 = vmul.f32 %v6673_v58, %v6523_v55  ;;  %v6087_v46 = vpop.f32.mrf.mxu1  ;;  %7383 = vxpose.xlu1.c.b16.start [1/8] (narrow) %v7319_v34, 16  ;;  %v14141_v55 = vld [vmem:[%s20082_s1 + $0x18] sm:$0xff]   ;;  %v6528_v47 = vunpack.c.l.bf16 %v14142_v54 }
 0x327   :  { %20755 = vst [vmem:[#allocation153_spill] sm:$0xff] %v17578_v28  ;;  %v17589_v59 = vadd.f32 %v6087_v46, %v2383_v57  ;;  %6928 = vbcast.lane.b32.xlu0 %v17582_v22, 256  ;;  %v17594_v28 = vpop.f32.mrf.mxu0  ;;  %v6526_v58 = vunpack.c.l.bf16 %v14141_v55  ;;  %v6527_v57 = vunpack.c.h.bf16 %v14141_v55  ;;  %v20763_v46 = vld [vmem:[#allocation185_spill] sm:$0xff] }
 0x328   :  { %v7320_v4 = vpack.c.bf16 %v7194_v51, %v7193_v45  ;;  %v12707_v53 = vpop.f32.mrf.mxu1  ;;  %20761 = vst [vmem:[#allocation158_spill] sm:$0xff] %v17594_v28  ;;  %v2389_v23 = vmul.f32 %v20763_v46, %v20762_v43  ;;  %v6529_v43 = vunpack.c.h.bf16 %v14142_v54  ;;  %v20767_v46 = vld [vmem:[#allocation211_spill] sm:$0xff] }
 0x329   :  { %20759 = vst [vmem:[#allocation174_spill] sm:$0xff] %v17589_v59  ;;  %v17592_v48 = vadd.f32 %v12707_v53, %v2386_v14  ;;  %v6693_v32 = vpop.permute.xlu0 %6692  ;;  %v6681_v27 = vpop.permute.xlu1 %6680  ;;  %v20765_v14 = vld [vmem:[#allocation208_spill] sm:$0xff] }
 0x32a   :  { %v7196_v34 = vmul.f32 %v6681_v27, %v6525_v44  ;;  %7384 = vxpose.xlu1.c.b16.cont [2/8] (narrow) %v7320_v4, 16  ;;  %v2387_v53 = vmul.f32 %v20765_v14, %v20764_v40  ;;  %v7197_v27 = vmul.f32 %v6685_v18, %v6526_v58 }
 0x32b   :  { %20760 = vst [vmem:[#allocation178_spill] sm:$0xff] %v17592_v48  ;;  %6936 = vbcast.lane.b32.xlu0 %v17582_v22, 272 }
 0x32c   :  { %v7321_v45 = vpack.c.bf16 %v7196_v34, %v7195_v12  ;;  %v12726_v51 = vpop.f32.mrf.mxu0  ;;  %v20768_v12 = vld [vmem:[#allocation193_spill] sm:$0xff] }
 0x32d   :  { %v17607_v59 = vadd.f32 %v12726_v51, %v2389_v23  ;;  %v6701_v44 = vpop.permute.xlu0 %6700  ;;  %v6689_v4 = vpop.permute.xlu1 %6688  ;;  %v2390_v34 = vmul.f32 %v20768_v12, %v20767_v46 }
 0x32e   :  { %v7198_v55 = vmul.f32 %v6689_v4, %v6527_v57  ;;  %v6184_v48 = vpop.f32.mrf.mxu0  ;;  %7385 = vxpose.xlu1.c.b16.cont [3/8] (narrow) %v7321_v45, 16  ;;  %v7199_v45 = vmul.f32 %v6693_v32, %v6528_v47  ;;  %v20772_v4 = vld [vmem:[#allocation220_spill] sm:$0xff] }
 0x32f   :  { %20766 = vst [vmem:[#allocation187_spill] sm:$0xff] %v17607_v59  ;;  %v17611_v28 = vadd.f32 %v6184_v48, %v2387_v53  ;;  %6944 = vbcast.lane.b32.xlu0 %v17582_v22, 288  ;;  %v14143_v48 = vld [vmem:[%s20082_s1 + $0x28] sm:$0xff]  }
 0x330   :  { %v7322_v23 = vpack.c.bf16 %v7198_v55, %v7197_v27  ;;  %v12727_v51 = vpop.f32.mrf.mxu0  ;;  %v6530_v40 = vunpack.c.l.bf16 %v14143_v48  ;;  %v6531_v54 = vunpack.c.h.bf16 %v14143_v48  ;;  %v20773_v27 = vld [vmem:[#allocation201_spill] sm:$0xff] }
 0x331   :  { %20769 = vst [vmem:[#allocation168_spill] sm:$0xff] %v17611_v28  ;;  %v17618_v18 = vadd.f32 %v12727_v51, %v2390_v34  ;;  %v6709_v58 = vpop.permute.xlu0 %6708  ;;  %v6697_v57 = vpop.permute.xlu1 %6696  ;;  %v2393_v55 = vmul.f32 %v20773_v27, %v20772_v4  ;;  %v20774_v34 = vld [vmem:[#allocation205_spill] sm:$0xff]  ;;  %v20775_v51 = vld [vmem:[#allocation216_spill] sm:$0xff]  ;;  %v20777_v27 = vld [vmem:[#allocation219_spill] sm:$0xff] }
 0x332   :  { %v7200_v14 = vmul.f32 %v6697_v57, %v6529_v43  ;;  %v17623_v53 = vpop.f32.mrf.mxu0  ;;  %7386 = vxpose.xlu1.c.b16.cont [4/8] (narrow) %v7322_v23, 16  ;;  %v2391_v32 = vmul.f32 %v20775_v51, %v20774_v34  ;;  %v14144_v43 = vld [vmem:[%s20082_s1 + $0x30] sm:$0xff]  }
 0x333   :  { %20770 = vst [vmem:[#allocation172_spill] sm:$0xff] %v17618_v18  ;;  %20771 = vst [vmem:[#allocation183_spill] sm:$0xff] %v17623_v53  ;;  %6952 = vbcast.lane.b32.xlu0 %v17582_v22, 304  ;;  %v7201_v18 = vmul.f32 %v6701_v44, %v6530_v40  ;;  %v6532_v23 = vunpack.c.l.bf16 %v14144_v43  ;;  %v6533_v4 = vunpack.c.h.bf16 %v14144_v43 }
 0x334   :  { %v7323_v46 = vpack.c.bf16 %v7200_v14, %v7199_v45  ;;  %v12730_v12 = vpop.f32.mrf.mxu0  ;;  %v20778_v45 = vld [vmem:[#allocation209_spill] sm:$0xff] }
 0x335   :  { %v17630_v47 = vadd.f32 %v12730_v12, %v2393_v55  ;;  %v6717_v59 = vpop.permute.xlu0 %6716  ;;  %v6705_v28 = vpop.permute.xlu1 %6704  ;;  %v2394_v14 = vmul.f32 %v20778_v45, %v20777_v27  ;;  %v7203_v51 = vmul.f32 %v6709_v58, %v6532_v23  ;;  %v20783_v27 = vld [vmem:[#allocation217_spill] sm:$0xff] }
 0x336   :  { %v7202_v57 = vmul.f32 %v6705_v28, %v6531_v54  ;;  %v6200_v48 = vpop.f32.mrf.mxu0  ;;  %7387 = vxpose.xlu1.c.b16.cont [5/8] (narrow) %v7323_v46, 16  ;;  %v14145_v28 = vld [vmem:[%s20082_s1 + $0x38] sm:$0xff]  }
 0x337   :  { %20776 = vst [vmem:[#allocation186_spill] sm:$0xff] %v17630_v47  ;;  %v17637_v53 = vadd.f32 %v6200_v48, %v2391_v32  ;;  %6960 = vbcast.lane.b32.xlu0 %v17582_v22, 320  ;;  %v6534_v54 = vunpack.c.l.bf16 %v14145_v28  ;;  %v6535_v32 = vunpack.c.h.bf16 %v14145_v28  ;;  %v20782_v48 = vld [vmem:[#allocation228_spill] sm:$0xff]  ;;  %v20788_v28 = vld [vmem:[#allocation225_spill] sm:$0xff] }
 0x338   :  { %v7324_v55 = vpack.c.bf16 %v7202_v57, %v7201_v18  ;;  %v12731_v12 = vpop.f32.mrf.mxu0  ;;  %v2397_v18 = vmul.f32 %v20783_v27, %v20782_v48 }
 0x339   :  { %20779 = vst [vmem:[#allocation176_spill] sm:$0xff] %v17637_v53  ;;  %v17640_v34 = vadd.f32 %v12731_v12, %v2394_v14  ;;  %v17642_v44 = vpop.permute.xlu0 %6727  ;;  %v6713_v40 = vpop.permute.xlu1 %6712  ;;  %v20784_v14 = vld [vmem:[#allocation221_spill] sm:$0xff]  ;;  %v20785_v12 = vld [vmem:[#allocation224_spill] sm:$0xff] }
 0x33a   :  { %v7204_v46 = vmul.f32 %v6713_v40, %v6533_v4  ;;  %v17647_v43 = vpop.f32.mrf.mxu0  ;;  %7388 = vxpose.xlu1.c.b16.cont [6/8] (narrow) %v7324_v55, 16  ;;  %v2395_v58 = vmul.f32 %v20785_v12, %v20784_v14  ;;  %v7205_v4 = vmul.f32 %v6717_v59, %v6534_v54  ;;  %v20787_v55 = vld [vmem:[#allocation227_spill] sm:$0xff]  ;;  %v20792_v59 = vld [vmem:[#allocation236_spill] sm:$0xff] }
 0x33b   :  { %20780 = vst [vmem:[#allocation195_spill] sm:$0xff] %v17640_v34  ;;  %20781 = vst [vmem:[#allocation184_spill] sm:$0xff] %v17647_v43  ;;  %6968 = vbcast.lane.b32.xlu0 %v17582_v22, 336  ;;  %v2398_v43 = vmul.f32 %v20788_v28, %v20787_v55  ;;  %v20798_v55 = vld [vmem:[#allocation241_spill] sm:$0xff] }
 0x33c   :  { %v7325_v57 = vpack.c.bf16 %v7204_v46, %v7203_v51  ;;  %v12734_v45 = vpop.f32.mrf.mxu0 }
 0x33d   :  { %v17654_v23 = vadd.f32 %v12734_v45, %v2397_v18  ;;  %v17656_v47 = vpop.permute.xlu0 %6735  ;;  %v6721_v53 = vpop.permute.xlu1 %6720 }
 0x33e   :  { %v7206_v40 = vmul.f32 %v6721_v53, %v6535_v32  ;;  %v6216_v34 = vpop.f32.mrf.mxu0  ;;  %7389 = vxpose.xlu1.c.b16.cont [7/8] (narrow) %v7325_v57, 16  ;;  %v20793_v53 = vld [vmem:[#allocation233_spill] sm:$0xff] }
 0x33f   :  { %20786 = vst [vmem:[#allocation188_spill] sm:$0xff] %v17654_v23  ;;  %v17660_v48 = vadd.f32 %v6216_v34, %v2395_v58  ;;  %6976 = vbcast.lane.b32.xlu0 %v17582_v22, 352  ;;  %v2401_v54 = vmul.f32 %v20793_v53, %v20792_v59  ;;  %v20794_v57 = vld [vmem:[#allocation237_spill] sm:$0xff]  ;;  %v20795_v34 = vld [vmem:[#allocation232_spill] sm:$0xff] }
 0x340   :  { %v7326_v51 = vpack.c.bf16 %v7206_v40, %v7205_v4  ;;  %v12735_v46 = vpop.f32.mrf.mxu0  ;;  %v2399_v14 = vmul.f32 %v20795_v34, %v20794_v57  ;;  %v20797_v40 = vld [vmem:[#allocation235_spill] sm:$0xff] }
 0x341   :  { %20789 = vst [vmem:[#allocation191_spill] sm:$0xff] %v17660_v48  ;;  %v17663_v27 = vadd.f32 %v12735_v46, %v2398_v43  ;;  %v17665_v18 = vpop.permute.xlu0 %6743  ;;  %v17680_v43 = vrot.slane %v17326_v10, %v14858_v9  ;;  %v2402_v28 = vmul.f32 %v20798_v55, %v20797_v40  ;;  %v20802_v9 = vld [vmem:[#allocation244_spill] sm:$0xff]  ;;  %v20804_v40 = vld [vmem:[#allocation218_spill] sm:$0xff] }
 0x342   :  { %v17667_v45 = vpop.f32.mrf.mxu0  ;;  %7390 = vxpose.xlu1.c.b16.end [8/8] (narrow) %v7326_v51, 16 }
 0x343   :  { %20790 = vst [vmem:[#allocation194_spill] sm:$0xff] %v17663_v27  ;;  %20791 = vst [vmem:[#allocation192_spill] sm:$0xff] %v17667_v45  ;;  %6984 = vbcast.lane.b32.xlu0 %v17582_v22, 368  ;;  %v20818_v27 = vld [vmem:[#allocation238_spill] sm:$0xff] }
 0x344   :  { %v12738_v32 = vpop.f32.mrf.mxu0 }
 0x345   :  { %v17674_v12 = vadd.f32 %v12738_v32, %v2401_v54  ;;  %v17676_v58 = vpop.permute.xlu0 %6751  ;;  %v17692_v54 = vpop.f32.mrf.mxu1  ;;  %v20803_v32 = vld [vmem:[#allocation214_spill] sm:$0xff] }
 0x346   :  { %v6232_v4 = vpop.f32.mrf.mxu0  ;;  %6731 = vbcast.lane.b32.xlu1 %v17380_v41, 264  ;;  %20801 = vst [vmem:[#allocation199_spill] sm:$0xff] %v17692_v54  ;;  %v2405_v57 = vmul.f32 %v20803_v32, %v20802_v9 }
 0x347   :  { %20796 = vst [vmem:[#allocation203_spill] sm:$0xff] %v17674_v12  ;;  %v17685_v51 = vadd.f32 %v6232_v4, %v2399_v14  ;;  %6995 = vbcast.lane.b32.xlu0 %v17680_v43, 256  ;;  %v20805_v14 = vld [vmem:[#allocation240_spill] sm:$0xff] }
 0x348   :  { %v12739_v46 = vpop.f32.mrf.mxu0  ;;  %v2403_v4 = vmul.f32 %v20805_v14, %v20804_v40 }
 0x349   :  { %20799 = vst [vmem:[#allocation200_spill] sm:$0xff] %v17685_v51  ;;  %v17688_v59 = vadd.f32 %v12739_v46, %v2402_v28  ;;  %v17690_v53 = vpop.permute.xlu0 %6759  ;;  %v20807_v46 = vld [vmem:[#allocation243_spill] sm:$0xff]  ;;  %v20808_v51 = vld [vmem:[#allocation222_spill] sm:$0xff] }
 0x34a   :  { %6739 = vbcast.lane.b32.xlu1 %v17380_v41, 280  ;;  %v2406_v23 = vmul.f32 %v20808_v51, %v20807_v46  ;;  %v20814_v51 = vld [vmem:[#allocation234_spill] sm:$0xff] }
 0x34b   :  { %20800 = vst [vmem:[#allocation204_spill] sm:$0xff] %v17688_v59  ;;  %7003 = vbcast.lane.b32.xlu0 %v17680_v43, 272 }
 0x34c   :  { %v12758_v34 = vpop.f32.mrf.mxu1 }
 0x34d   :  { %v17700_v55 = vadd.f32 %v12758_v34, %v2405_v57  ;;  %v17702_v12 = vpop.permute.xlu0 %6767  ;;  %v20812_v57 = vld [vmem:[#allocation251_spill] sm:$0xff]  ;;  %v20813_v34 = vld [vmem:[#allocation230_spill] sm:$0xff] }
 0x34e   :  { %v6329_v28 = vpop.f32.mrf.mxu1  ;;  %6747 = vbcast.lane.b32.xlu1 %v17380_v41, 296  ;;  %v2409_v14 = vmul.f32 %v20813_v34, %v20812_v57 }
 0x34f   :  { %20806 = vst [vmem:[#allocation12_spill] sm:$0xff] %v17700_v55  ;;  %v17707_v48 = vadd.f32 %v6329_v28, %v2403_v4  ;;  %7011 = vbcast.lane.b32.xlu0 %v17680_v43, 288  ;;  %v20815_v4 = vld [vmem:[#allocation248_spill] sm:$0xff] }
 0x350   :  { %v12759_v9 = vpop.f32.mrf.mxu1  ;;  %v2407_v28 = vmul.f32 %v20815_v4, %v20814_v51 }
 0x351   :  { %20809 = vst [vmem:[#allocation202_spill] sm:$0xff] %v17707_v48  ;;  %v17710_v32 = vadd.f32 %v12759_v9, %v2406_v23  ;;  %v17712_v59 = vpop.permute.xlu0 %6775  ;;  %v20817_v9 = vld [vmem:[#allocation250_spill] sm:$0xff] }
 0x352   :  { %v17714_v40 = vpop.f32.mrf.mxu1  ;;  %6755 = vbcast.lane.b32.xlu1 %v17380_v41, 312  ;;  %v2410_v45 = vmul.f32 %v20818_v27, %v20817_v9  ;;  %v20824_v27 = vld [vmem:[#allocation249_spill] sm:$0xff] }
 0x353   :  { %20810 = vst [vmem:[#allocation206_spill] sm:$0xff] %v17710_v32  ;;  %20811 = vst [vmem:[#allocation212_spill] sm:$0xff] %v17714_v40  ;;  %7019 = vbcast.lane.b32.xlu0 %v17680_v43, 304 }
 0x354   :  { %v12762_v55 = vpop.f32.mrf.mxu1 }
 0x355   :  { %v17722_v46 = vadd.f32 %v12762_v55, %v2409_v14  ;;  %v17724_v48 = vpop.permute.xlu0 %6783  ;;  %v20822_v55 = vld [vmem:[#allocation258_spill] sm:$0xff] }
 0x356   :  { %v6345_v23 = vpop.f32.mrf.mxu1  ;;  %6763 = vbcast.lane.b32.xlu1 %v17380_v41, 328  ;;  %v20823_v14 = vld [vmem:[#allocation246_spill] sm:$0xff] }
 0x357   :  { %20816 = vst [vmem:[#allocation185_spill] sm:$0xff] %v17722_v46  ;;  %v17729_v32 = vadd.f32 %v6345_v23, %v2407_v28  ;;  %7027 = vbcast.lane.b32.xlu0 %v17680_v43, 320  ;;  %v2413_v4 = vmul.f32 %v20823_v14, %v20822_v55  ;;  %v20825_v28 = vld [vmem:[#allocation254_spill] sm:$0xff] }
 0x358   :  { %v12763_v57 = vpop.f32.mrf.mxu1  ;;  %v2411_v23 = vmul.f32 %v20825_v28, %v20824_v27 }
 0x359   :  { %20819 = vst [vmem:[#allocation189_spill] sm:$0xff] %v17729_v32  ;;  %v17732_v34 = vadd.f32 %v12763_v57, %v2410_v45  ;;  %v17734_v40 = vpop.permute.xlu0 %6794  ;;  %v20827_v57 = vld [vmem:[#allocation257_spill] sm:$0xff] }
 0x35a   :  { %v17736_v51 = vpop.f32.mrf.mxu1  ;;  %6771 = vbcast.lane.b32.xlu1 %v17380_v41, 344 }
 0x35b   :  { %20820 = vst [vmem:[#allocation208_spill] sm:$0xff] %v17732_v34  ;;  %20821 = vst [vmem:[#allocation211_spill] sm:$0xff] %v17736_v51  ;;  %7035 = vbcast.lane.b32.xlu0 %v17680_v43, 336  ;;  %v20828_v34 = vld [vmem:[#allocation252_spill] sm:$0xff] }
 0x35c   :  { %v12766_v46 = vpop.f32.mrf.mxu1  ;;  %v2414_v51 = vmul.f32 %v20828_v34, %v20827_v57  ;;  %v20834_v34 = vld [vmem:[#allocation262_spill] sm:$0xff] }
 0x35d   :  { %v17744_v9 = vadd.f32 %v12766_v46, %v2413_v4  ;;  %v17746_v32 = vpop.permute.xlu0 %6802  ;;  %v20832_v46 = vld [vmem:[#allocation264_spill] sm:$0xff]  ;;  %v20833_v4 = vld [vmem:[#allocation259_spill] sm:$0xff] }
 0x35e   :  { %v6361_v45 = vpop.f32.mrf.mxu1  ;;  %6779 = vbcast.lane.b32.xlu1 %v17380_v41, 360  ;;  %v2417_v28 = vmul.f32 %v20833_v4, %v20832_v46 }
 0x35f   :  { %20826 = vst [vmem:[#allocation193_spill] sm:$0xff] %v17744_v9  ;;  %v17751_v54 = vadd.f32 %v6361_v45, %v2411_v23  ;;  %7043 = vbcast.lane.b32.xlu0 %v17680_v43, 352  ;;  %v20835_v23 = vld [vmem:[#allocation261_spill] sm:$0xff] }
 0x360   :  { %v12767_v55 = vpop.f32.mrf.mxu1  ;;  %v2415_v45 = vmul.f32 %v20835_v23, %v20834_v34 }
 0x361   :  { %20829 = vst [vmem:[#allocation220_spill] sm:$0xff] %v17751_v54  ;;  %v17754_v14 = vadd.f32 %v12767_v55, %v2414_v51  ;;  %v17756_v24 = vpop.permute.xlu0 %6810  ;;  %v17772_v51 = vrot.slane %v17326_v10, %v14987_v17 }
 0x362   :  { %v17758_v27 = vpop.f32.mrf.mxu1  ;;  %6787 = vbcast.lane.b32.xlu1 %v17380_v41, 376  ;;  %v20837_v41 = vld [vmem:[#allocation263_spill] sm:$0xff] }
 0x363   :  { %20830 = vst [vmem:[#allocation201_spill] sm:$0xff] %v17754_v14  ;;  %20831 = vst [vmem:[#allocation205_spill] sm:$0xff] %v17758_v27  ;;  %7051 = vbcast.lane.b32.xlu0 %v17680_v43, 368  ;;  %v20838_v14 = vld [vmem:[#allocation267_spill] sm:$0xff] }
 0x364   :  { %v12770_v9 = vpop.f32.mrf.mxu1  ;;  %v2418_v46 = vmul.f32 %v20838_v14, %v20837_v41 }
 0x365   :  { %v17766_v57 = vadd.f32 %v12770_v9, %v2417_v28  ;;  %v17768_v54 = vpop.permute.xlu0 %6818 }
 0x366   :  { %v6377_v55 = vpop.f32.mrf.mxu1  ;;  %6798 = vbcast.lane.b32.xlu1 %v17440_v50, 264 }
 0x367   :  { %20836 = vst [vmem:[#allocation216_spill] sm:$0xff] %v17766_v57  ;;  %v17777_v4 = vadd.f32 %v6377_v55, %v2415_v45  ;;  %7062 = vbcast.lane.b32.xlu0 %v17772_v51, 256  ;;  %v14146_v57 = vld [vmem:[%s20083_s2 + $0xb8] sm:$0xff]  }
 0x368   :  { %v12771_v27 = vpop.f32.mrf.mxu1 }
 0x369   :  { %20839 = vst [vmem:[#allocation219_spill] sm:$0xff] %v17777_v4  ;;  %v17780_v34 = vadd.f32 %v12771_v27, %v2418_v46  ;;  %v17782_v9 = vpop.permute.xlu0 %6826 }
 0x36a   :  { %6806 = vbcast.lane.b32.xlu1 %v17440_v50, 280 }
 0x36b   :  { %20840 = vst [vmem:[#allocation209_spill] sm:$0xff] %v17780_v34  ;;  %7070 = vbcast.lane.b32.xlu0 %v17772_v51, 272 }
 0x36d   :  { %v17786_v17 = vpop.permute.xlu0 %6834 }
 0x36e   :  { %6814 = vbcast.lane.b32.xlu1 %v17440_v50, 296 }
 0x36f   :  { %7078 = vbcast.lane.b32.xlu0 %v17772_v51, 288 }
 0x371   :  { %v17790_v14 = vpop.permute.xlu0 %6842 }
 0x372   :  { %6822 = vbcast.lane.b32.xlu1 %v17440_v50, 312 }
 0x373   :  { %7086 = vbcast.lane.b32.xlu0 %v17772_v51, 304 }
 0x375   :  { %v17794_v27 = vpop.permute.xlu0 %6850 }
 0x376   :  { %6830 = vbcast.lane.b32.xlu1 %v17440_v50, 328 }
 0x377   :  { %7094 = vbcast.lane.b32.xlu0 %v17772_v51, 320 }
 0x379   :  { %v17798_v28 = vpop.permute.xlu0 %6861 }
 0x37a   :  { %6838 = vbcast.lane.b32.xlu1 %v17440_v50, 344 }
 0x37b   :  { %7102 = vbcast.lane.b32.xlu0 %v17772_v51, 336 }
 0x37d   :  { %v17802_v23 = vpop.permute.xlu0 %6869 }
 0x37e   :  { %6846 = vbcast.lane.b32.xlu1 %v17440_v50, 360 }
 0x37f   :  { %7110 = vbcast.lane.b32.xlu0 %v17772_v51, 352 }
 0x381   :  { %v17806_v45 = vpop.permute.xlu0 %6877 }
 0x382   :  { %6854 = vbcast.lane.b32.xlu1 %v17440_v50, 376 }
 0x383   :  { %7118 = vbcast.lane.b32.xlu0 %v17772_v51, 368 }
 0x385   :  { %v17810_v55 = vpop.permute.xlu0 %6885 }
 0x386   :  { %6865 = vbcast.lane.b32.xlu1 %v17508_v35, 264 }
 0x388   :  { %v7391_v41 = vpop.trf.xlu1 }
 0x389   :  { %v17813_v46 = vpop.permute.xlu0 %6893  ;;  %12789 = vmatmul.mubr.bf16.vlgmr.msra.gmra.mxu0 %v7391_v41  ;;  %v14147_v41 = vld [vmem:[%s20083_s2 + $0xb0] sm:$0xff]  }
 0x38a   :  { %6873 = vbcast.lane.b32.xlu1 %v17508_v35, 280  ;;  %12813 = vmatpush3.bf16.msra.mxu0 %v14146_v57  ;;  %v14148_v57 = vld [vmem:[%s20083_s2 + $0xa8] sm:$0xff]  }
 0x38b   :  { %12814 = vmatprep.subr.bf16.mxu0 %v20557_v1  ;;  %12828 = vmatprep.mubr.msk.bf16.mxu0 %vm14261_vm0, %v20557_v1 }
 0x38d   :  { %v17822_v50 = vpop.permute.xlu0 %6901 }
 0x38e   :  { %6881 = vbcast.lane.b32.xlu1 %v17508_v35, 296  ;;  %12815 = vmatpush3.bf16.msra.mxu0 %v14147_v41  ;;  %v14149_v41 = vld [vmem:[%s20083_s2 + $0xa0] sm:$0xff]  }
 0x38f   :  { %12816 = vmatprep.subr.bf16.mxu0 %v20557_v1 }
 0x391   :  { %v17829_v4 = vpop.permute.xlu0 %6909 }
 0x392   :  { %6889 = vbcast.lane.b32.xlu1 %v17508_v35, 312  ;;  %12817 = vmatpush3.bf16.msra.mxu0 %v14148_v57  ;;  %v14150_v57 = vld [vmem:[%s20083_s2 + $0x98] sm:$0xff]  }
 0x393   :  { %12818 = vmatprep.subr.bf16.mxu0 %v20557_v1 }
 0x395   :  { %v17836_v34 = vpop.permute.xlu0 %6917 }
 0x396   :  { %6897 = vbcast.lane.b32.xlu1 %v17508_v35, 328  ;;  %12819 = vmatpush3.bf16.msra.mxu0 %v14149_v41  ;;  %v14151_v41 = vld [vmem:[%s20083_s2 + $0x90] sm:$0xff]  }
 0x397   :  { %12820 = vmatprep.subr.bf16.mxu0 %v20557_v1 }
 0x399   :  { %v17843_v33 = vpop.permute.xlu0 %6928 }
 0x39a   :  { %6905 = vbcast.lane.b32.xlu1 %v17508_v35, 344  ;;  %12821 = vmatpush3.bf16.msra.mxu0 %v14150_v57  ;;  %v14152_v57 = vld [vmem:[%s20083_s2 + $0x88] sm:$0xff]  }
 0x39b   :  { %12822 = vmatprep.subr.bf16.mxu0 %v20557_v1 }
 0x39d   :  { %v17850_v38 = vpop.permute.xlu0 %6936 }
 0x39e   :  { %6913 = vbcast.lane.b32.xlu1 %v17508_v35, 360  ;;  %12823 = vmatpush3.bf16.msra.mxu0 %v14151_v41  ;;  %v14153_v41 = vld [vmem:[%s20083_s2 + $0x80] sm:$0xff]  }
 0x39f   :  { %12824 = vmatprep.subr.bf16.mxu0 %v20557_v1 }
 0x3a1   :  { %v17857_v63 = vpop.permute.xlu0 %6944 }
 0x3a2   :  { %6921 = vbcast.lane.b32.xlu1 %v17508_v35, 376  ;;  %12825 = vmatpush3.bf16.msra.mxu0 %v14152_v57  ;;  %v14154_v57 = vld [vmem:[%s20082_s1 + $0x40] sm:$0xff]  }
 0x3a3   :  { %12826 = vmatprep.subr.bf16.mxu0 %v20557_v1  ;;  %v6536_v49 = vunpack.c.l.bf16 %v14154_v57 }
 0x3a5   :  { %v17864_v26 = vpop.permute.xlu0 %6952  ;;  %v7207_v25 = vmul.f32 %v17642_v44, %v6536_v49  ;;  %v6540_v49 = vunpack.c.l.bf16 %v14156_v56  ;;  %v14158_v56 = vld [vmem:[%s20082_s1 + $0x60] sm:$0xff]  }
 0x3a6   :  { %6932 = vbcast.lane.b32.xlu1 %v17582_v22, 264  ;;  %12827 = vmatpush3.bf16.msra.mxu0 %v14153_v41  ;;  %v6537_v41 = vunpack.c.h.bf16 %v14154_v57  ;;  %v7209_v57 = vmul.f32 %v17656_v47, %v6538_v52 }
 0x3a7   :  { %12852 = vmatprep.subr.bf16.mxu0 %v20557_v1 }
 0x3a9   :  { %v17871_v13 = vpop.permute.xlu0 %6960 }
 0x3aa   :  { %6940 = vbcast.lane.b32.xlu1 %v17582_v22, 280 }
 0x3ad   :  { %v17875_v35 = vpop.permute.xlu0 %6968 }
 0x3ae   :  { %6948 = vbcast.lane.b32.xlu1 %v17582_v22, 296 }
 0x3b1   :  { %v17881_v42 = vpop.permute.xlu0 %6976 }
 0x3b2   :  { %6956 = vbcast.lane.b32.xlu1 %v17582_v22, 312 }
 0x3b5   :  { %v17889_v36 = vpop.permute.xlu0 %6984 }
 0x3b6   :  { %6964 = vbcast.lane.b32.xlu1 %v17582_v22, 328 }
 0x3b8   :  { %v6732_v0 = vpop.permute.xlu1 %6731 }
 0x3b9   :  { %v7208_v60 = vmul.f32 %v6732_v0, %v6537_v41  ;;  %v7211_v41 = vmul.f32 %v17665_v18, %v6540_v49  ;;  %v17900_v52 = vpop.permute.xlu0 %6995  ;;  %v6544_v18 = vunpack.c.l.bf16 %v14158_v56  ;;  %v6545_v49 = vunpack.c.h.bf16 %v14158_v56 }
 0x3ba   :  { %6972 = vbcast.lane.b32.xlu1 %v17582_v22, 344 }
 0x3bb   :  { %v7327_v19 = vpack.c.bf16 %v7208_v60, %v7207_v25  ;;  %v14157_v60 = vld [vmem:[%s20082_s1 + $0x58] sm:$0xff]  }
 0x3bc   :  { %v6740_v39 = vpop.permute.xlu1 %6739  ;;  %v6542_v25 = vunpack.c.l.bf16 %v14157_v60  ;;  %v6543_v8 = vunpack.c.h.bf16 %v14157_v60 }
 0x3bd   :  { %v7210_v44 = vmul.f32 %v6740_v39, %v6539_v5  ;;  %7439 = vxpose.xlu0.c.b16.start [1/8] (narrow) %v7327_v19, 16 }
 0x3be   :  { %6980 = vbcast.lane.b32.xlu1 %v17582_v22, 360  ;;  %v7213_v19 = vmul.f32 %v17676_v58, %v6542_v25  ;;  %v14159_v58 = vld [vmem:[%s20082_s1 + $0x68] sm:$0xff]  }
 0x3bf   :  { %v7328_v0 = vpack.c.bf16 %v7210_v44, %v7209_v57  ;;  %v17908_v44 = vpop.permute.xlu0 %7003  ;;  %v6547_v60 = vunpack.c.h.bf16 %v14159_v58 }
 0x3c0   :  { %v6748_v3 = vpop.permute.xlu1 %6747  ;;  %v7273_v15 = vmul.f32 %v17908_v44, %v6602_v31  ;;  %v14182_v31 = vld [vmem:[%s20082_s1 + $0xc8] sm:$0xff]  }
 0x3c1   :  { %v7212_v47 = vmul.f32 %v6748_v3, %v6541_v29  ;;  %7440 = vxpose.xlu0.c.b16.cont [2/8] (narrow) %v7328_v0, 16  ;;  %v6546_v3 = vunpack.c.l.bf16 %v14159_v58  ;;  %v6571_v44 = vunpack.c.h.bf16 %v14182_v31 }
 0x3c2   :  { %6988 = vbcast.lane.b32.xlu1 %v17582_v22, 376  ;;  %v7215_v22 = vmul.f32 %v17690_v53, %v6544_v18 }
 0x3c3   :  { %v7329_v39 = vpack.c.bf16 %v7212_v47, %v7211_v41  ;;  %v7217_v47 = vmul.f32 %v17702_v12, %v6546_v3  ;;  %v17919_v53 = vpop.permute.xlu0 %7011  ;;  %v14161_v12 = vld [vmem:[%s20082_s1 + $0x78] sm:$0xff]  }
 0x3c4   :  { %v6756_v5 = vpop.permute.xlu1 %6755 }
 0x3c5   :  { %v7214_v57 = vmul.f32 %v6756_v5, %v6543_v8  ;;  %7441 = vxpose.xlu0.c.b16.cont [3/8] (narrow) %v7329_v39, 16  ;;  %v14160_v39 = vld [vmem:[%s20082_s1 + $0x70] sm:$0xff]  }
 0x3c6   :  { %6999 = vbcast.lane.b32.xlu1 %v17680_v43, 264  ;;  %v6548_v5 = vunpack.c.l.bf16 %v14160_v39  ;;  %v6549_v56 = vunpack.c.h.bf16 %v14160_v39 }
 0x3c7   :  { %v7330_v29 = vpack.c.bf16 %v7214_v57, %v7213_v19  ;;  %v17927_v58 = vpop.permute.xlu0 %7019 }
 0x3c8   :  { %v6764_v0 = vpop.permute.xlu1 %6763 }
 0x3c9   :  { %v7216_v41 = vmul.f32 %v6764_v0, %v6545_v49  ;;  %7442 = vxpose.xlu0.c.b16.cont [4/8] (narrow) %v7330_v29, 16  ;;  %v7219_v49 = vmul.f32 %v17712_v59, %v6548_v5  ;;  %v6550_v29 = vunpack.c.l.bf16 %v14161_v12  ;;  %v14162_v59 = vld [vmem:[%s20082_s1 + $0x80] sm:$0xff]  }
 0x3ca   :  { %7007 = vbcast.lane.b32.xlu1 %v17680_v43, 280 }
 0x3cb   :  { %v7331_v8 = vpack.c.bf16 %v7216_v41, %v7215_v22  ;;  %v6551_v22 = vunpack.c.h.bf16 %v14161_v12 }
 0x3cc   :  { %v6772_v25 = vpop.permute.xlu1 %6771 }
 0x3cd   :  { %v7218_v19 = vmul.f32 %v6772_v25, %v6547_v60  ;;  %7443 = vxpose.xlu0.c.b16.cont [5/8] (narrow) %v7331_v8, 16  ;;  %v7221_v60 = vmul.f32 %v17724_v48, %v6550_v29  ;;  %v6552_v8 = vunpack.c.l.bf16 %v14162_v59  ;;  %v17938_v48 = vpop.permute.xlu0 %7027 }
 0x3ce   :  { %7015 = vbcast.lane.b32.xlu1 %v17680_v43, 296 }
 0x3cf   :  { %v7332_v18 = vpack.c.bf16 %v7218_v19, %v7217_v47  ;;  %v6553_v47 = vunpack.c.h.bf16 %v14162_v59  ;;  %v7223_v19 = vmul.f32 %v17734_v40, %v6552_v8  ;;  %v14164_v40 = vld [vmem:[%s20082_s1 + $0x90] sm:$0xff]  }
 0x3d0   :  { %v6780_v57 = vpop.permute.xlu1 %6779 }
 0x3d1   :  { %v7220_v0 = vmul.f32 %v6780_v57, %v6549_v56  ;;  %7444 = vxpose.xlu0.c.b16.cont [6/8] (narrow) %v7332_v18, 16  ;;  %v14163_v56 = vld [vmem:[%s20082_s1 + $0x88] sm:$0xff]  }
 0x3d2   :  { %7023 = vbcast.lane.b32.xlu1 %v17680_v43, 312  ;;  %v6554_v18 = vunpack.c.l.bf16 %v14163_v56 }
 0x3d3   :  { %v7333_v3 = vpack.c.bf16 %v7220_v0, %v7219_v49  ;;  %v6555_v49 = vunpack.c.h.bf16 %v14163_v56 }
 0x3d4   :  { %v6788_v41 = vpop.permute.xlu1 %6787  ;;  %v7225_v0 = vmul.f32 %v17746_v32, %v6554_v18  ;;  %v14165_v32 = vld [vmem:[%s20082_s1 + $0x98] sm:$0xff]  }
 0x3d5   :  { %v7222_v25 = vmul.f32 %v6788_v41, %v6551_v22  ;;  %7445 = vxpose.xlu0.c.b16.cont [7/8] (narrow) %v7333_v3, 16  ;;  %v6556_v22 = vunpack.c.l.bf16 %v14164_v40  ;;  %v6557_v41 = vunpack.c.h.bf16 %v14164_v40 }
 0x3d6   :  { %7031 = vbcast.lane.b32.xlu1 %v17680_v43, 328 }
 0x3d7   :  { %v7334_v39 = vpack.c.bf16 %v7222_v25, %v7221_v60  ;;  %v17946_v60 = vpop.permute.xlu0 %7035  ;;  %v7227_v25 = vmul.f32 %v17756_v24, %v6556_v22 }
 0x3d8   :  { %v6799_v5 = vpop.permute.xlu1 %6798 }
 0x3d9   :  { %v7224_v57 = vmul.f32 %v6799_v5, %v6553_v47  ;;  %7446 = vxpose.xlu0.c.b16.end [8/8] (narrow) %v7334_v39, 16  ;;  %v6558_v47 = vunpack.c.l.bf16 %v14165_v32  ;;  %v6559_v5 = vunpack.c.h.bf16 %v14165_v32 }
 0x3da   :  { %7039 = vbcast.lane.b32.xlu1 %v17680_v43, 344 }
 0x3db   :  { %v7335_v12 = vpack.c.bf16 %v7224_v57, %v7223_v19  ;;  %v7229_v18 = vmul.f32 %v17768_v54, %v6558_v47  ;;  %v14166_v57 = vld [vmem:[%s20082_s1 + $0xa0] sm:$0xff]   ;;  %v17957_v24 = vpop.permute.xlu0 %7043  ;;  %v14167_v54 = vld [vmem:[%s20082_s1 + $0xa8] sm:$0xff]  }
 0x3dc   :  { %v6807_v29 = vpop.permute.xlu1 %6806  ;;  %v6562_v22 = vunpack.c.l.bf16 %v14167_v54 }
 0x3dd   :  { %v7226_v3 = vmul.f32 %v6807_v29, %v6555_v49  ;;  %7495 = vxpose.xlu0.c.b16.start [1/8] (narrow) %v7335_v12, 16  ;;  %v6560_v49 = vunpack.c.l.bf16 %v14166_v57  ;;  %v6561_v29 = vunpack.c.h.bf16 %v14166_v57  ;;  %v14169_v57 = vld [vmem:[%s20082_s1 + $0xb8] sm:$0xff]  }
 0x3de   :  { %7047 = vbcast.lane.b32.xlu1 %v17680_v43, 360  ;;  %v7233_v32 = vmul.f32 %v17786_v17, %v6562_v22 }
 0x3df   :  { %v7336_v59 = vpack.c.bf16 %v7226_v3, %v7225_v0 }
 0x3e0   :  { %v6815_v8 = vpop.permute.xlu1 %6814 }
 0x3e1   :  { %v7228_v39 = vmul.f32 %v6815_v8, %v6557_v41  ;;  %7496 = vxpose.xlu0.c.b16.cont [2/8] (narrow) %v7336_v59, 16  ;;  %v6563_v41 = vunpack.c.h.bf16 %v14167_v54  ;;  %v17965_v59 = vpop.permute.xlu0 %7051 }
 0x3e2   :  { %7055 = vbcast.lane.b32.xlu1 %v17680_v43, 376  ;;  %v7231_v43 = vmul.f32 %v17782_v9, %v6560_v49  ;;  %v14168_v9 = vld [vmem:[%s20082_s1 + $0xb0] sm:$0xff]   ;;  %v6566_v49 = vunpack.c.l.bf16 %v14169_v57 }
 0x3e3   :  { %v7337_v19 = vpack.c.bf16 %v7228_v39, %v7227_v25  ;;  %v6564_v47 = vunpack.c.l.bf16 %v14168_v9 }
 0x3e4   :  { %v6823_v56 = vpop.permute.xlu1 %6822 }
 0x3e5   :  { %v7230_v12 = vmul.f32 %v6823_v56, %v6559_v5  ;;  %7497 = vxpose.xlu0.c.b16.cont [3/8] (narrow) %v7337_v19, 16  ;;  %v6565_v5 = vunpack.c.h.bf16 %v14168_v9  ;;  %v17976_v17 = vpop.permute.xlu0 %7062  ;;  %v20841_v9 = vld [vmem:[#allocation97_spill] sm:$0xff] }
 0x3e6   :  { %7066 = vbcast.lane.b32.xlu1 %v17772_v51, 264 }
 0x3e7   :  { %v7338_v0 = vpack.c.bf16 %v7230_v12, %v7229_v18  ;;  %v7235_v18 = vmul.f32 %v17790_v14, %v6564_v47  ;;  %v18000_v47 = vrot.slane %v17326_v10, %v20841_v9  ;;  %v14172_v9 = vld [vmem:[%s20083_s2 + $0xe8] sm:$0xff]  }
 0x3e8   :  { %v6831_v40 = vpop.permute.xlu1 %6830 }
 0x3e9   :  { %v7232_v3 = vmul.f32 %v6831_v40, %v6561_v29  ;;  %7498 = vxpose.xlu0.c.b16.cont [4/8] (narrow) %v7338_v0, 16  ;;  %v6567_v29 = vunpack.c.h.bf16 %v14169_v57  ;;  %v17981_v14 = vpop.permute.xlu0 %7070  ;;  %20842 = vst [vmem:[#allocation228_spill] sm:$0xff] %v18000_v47 }
 0x3ea   :  { %7074 = vbcast.lane.b32.xlu1 %v17772_v51, 280 }
 0x3eb   :  { %v7339_v8 = vpack.c.bf16 %v7232_v3, %v7231_v43  ;;  %v7237_v43 = vmul.f32 %v17794_v27, %v6566_v49 }
 0x3ec   :  { %v6839_v25 = vpop.permute.xlu1 %6838 }
 0x3ed   :  { %v7234_v39 = vmul.f32 %v6839_v25, %v6563_v41  ;;  %7499 = vxpose.xlu0.c.b16.cont [5/8] (narrow) %v7339_v8, 16  ;;  %v17988_v8 = vpop.permute.xlu0 %7078 }
 0x3ee   :  { %7082 = vbcast.lane.b32.xlu1 %v17772_v51, 296 }
 0x3ef   :  { %v7340_v19 = vpack.c.bf16 %v7234_v39, %v7233_v32 }
 0x3f0   :  { %v6847_v56 = vpop.permute.xlu1 %6846 }
 0x3f1   :  { %v7236_v12 = vmul.f32 %v6847_v56, %v6565_v5  ;;  %7500 = vxpose.xlu0.c.b16.cont [6/8] (narrow) %v7340_v19, 16  ;;  %v17994_v27 = vpop.permute.xlu0 %7086 }
 0x3f2   :  { %7090 = vbcast.lane.b32.xlu1 %v17772_v51, 312 }
 0x3f3   :  { %v7341_v0 = vpack.c.bf16 %v7236_v12, %v7235_v18 }
 0x3f4   :  { %v6855_v40 = vpop.permute.xlu1 %6854 }
 0x3f5   :  { %v7238_v54 = vmul.f32 %v6855_v40, %v6567_v29  ;;  %7501 = vxpose.xlu0.c.b16.cont [7/8] (narrow) %v7341_v0, 16  ;;  %v18005_v5 = vpop.permute.xlu0 %7094  ;;  %v14170_v40 = vld [vmem:[%s20083_s2 + $0xf8] sm:$0xff]  }
 0x3f6   :  { %7098 = vbcast.lane.b32.xlu1 %v17772_v51, 328 }
 0x3f7   :  { %v7342_v22 = vpack.c.bf16 %v7238_v54, %v7237_v43  ;;  %v14171_v54 = vld [vmem:[%s20083_s2 + $0xf0] sm:$0xff]  }
 0x3f8   :  { %v17983_v3 = vpop.permute.xlu1 %6865 }
 0x3f9   :  { %7502 = vxpose.xlu0.c.b16.end [8/8] (narrow) %v7342_v22, 16 }
 0x3fa   :  { %7106 = vbcast.lane.b32.xlu1 %v17772_v51, 344 }
 0x3fc   :  { %v17986_v41 = vpop.permute.xlu1 %6873 }
 0x3fe   :  { %7114 = vbcast.lane.b32.xlu1 %v17772_v51, 360 }
 0x400   :  { %v17991_v25 = vpop.permute.xlu1 %6881 }
 0x402   :  { %7122 = vbcast.lane.b32.xlu1 %v17772_v51, 376  ;;  %v18011_v51 = vpop.permute.xlu0 %7102 }
 0x404   :  { %v17996_v32 = vpop.permute.xlu1 %6889 }
 0x406   :  { %7133 = vbcast.lane.b32.xlu1 %v18000_v47, 264  ;;  %v18018_v18 = vpop.permute.xlu0 %7110 }
 0x408   :  { %v18003_v39 = vpop.permute.xlu1 %6897 }
 0x40a   :  { %7145 = vbcast.lane.b32.xlu1 %v18000_v47, 288  ;;  %v18024_v49 = vpop.permute.xlu0 %7118 }
 0x40c   :  { %v18008_v19 = vpop.permute.xlu1 %6905 }
 0x40e   :  { %7149 = vbcast.lane.b32.xlu1 %v18000_v47, 296 }
 0x410   :  { %v18013_v56 = vpop.permute.xlu1 %6913 }
 0x412   :  { %7157 = vbcast.lane.b32.xlu1 %v18000_v47, 312 }
 0x414   :  { %v18016_v10 = vpop.permute.xlu1 %6921 }
 0x416   :  { %7165 = vbcast.lane.b32.xlu1 %v18000_v47, 328 }
 0x418   :  { %v18021_v57 = vpop.permute.xlu1 %6932 }
 0x41a   :  { %7173 = vbcast.lane.b32.xlu1 %v18000_v47, 344 }
 0x41c   :  { %v18026_v12 = vpop.permute.xlu1 %6940 }
 0x41e   :  { %7177 = vbcast.lane.b32.xlu1 %v18000_v47, 352 }
 0x41f   :  { %v7447_v29 = vpop.trf.xlu0 }
 0x420   :  { %v18029_v0 = vpop.permute.xlu1 %6948  ;;  %12809 = vmatmul.mubr.bf16.vlgmr.msra.gmra.mxu1 %v7447_v29 }
 0x421   :  { %12833 = vmatpush3.bf16.msra.mxu1 %v14170_v40  ;;  %12848 = vmatprep.mubr.msk.bf16.mxu1 %vm14261_vm0, %v20557_v1  ;;  %v14173_v40 = vld [vmem:[%s20083_s2 + $0xe0] sm:$0xff]  }
 0x422   :  { %7181 = vbcast.lane.b32.xlu1 %v18000_v47, 360  ;;  %12834 = vmatprep.subr.bf16.mxu1 %v20557_v1  ;;  %v6570_v47 = vunpack.c.l.bf16 %v14182_v31  ;;  %v7242_v31 = vmul.f32 %v17986_v41, %v6571_v44  ;;  %v14187_v44 = vld [vmem:[%s20083_s2 + $0x130] sm:$0xff]  }
 0x424   :  { %v18038_v43 = vpop.permute.xlu1 %6956 }
 0x425   :  { %12835 = vmatpush3.bf16.msra.mxu1 %v14171_v54 }
 0x426   :  { %12836 = vmatprep.subr.bf16.mxu1 %v20557_v1 }
 0x428   :  { %v18044_v22 = vpop.permute.xlu1 %6964 }
 0x429   :  { %12837 = vmatpush3.bf16.msra.mxu1 %v14172_v9 }
 0x42a   :  { %12838 = vmatprep.subr.bf16.mxu1 %v20557_v1 }
 0x42c   :  { %v18050_v29 = vpop.permute.xlu1 %6972 }
 0x42d   :  { %12839 = vmatpush3.bf16.msra.mxu1 %v14173_v40  ;;  %v14176_v40 = vld [vmem:[%s20083_s2 + $0xd0] sm:$0xff]  }
 0x42e   :  { %12840 = vmatprep.subr.bf16.mxu1 %v20557_v1 }
 0x430   :  { %v18056_v54 = vpop.permute.xlu1 %6980 }
 0x431   :  { %12841 = vmatpush3.bf16.msra.mxu1 %v14174_v21  ;;  %v7271_v21 = vmul.f32 %v17900_v52, %v6600_v11 }
 0x432   :  { %12842 = vmatprep.subr.bf16.mxu1 %v20557_v1 }
 0x434   :  { %v18062_v9 = vpop.permute.xlu1 %6988 }
 0x435   :  { %12843 = vmatpush3.bf16.msra.mxu1 %v14176_v40  ;;  %v14179_v40 = vld [vmem:[%s20082_s1 + $0xc0] sm:$0xff]  }
 0x436   :  { %12844 = vmatprep.subr.bf16.mxu1 %v20557_v1  ;;  %v6569_v62 = vunpack.c.h.bf16 %v14179_v40  ;;  %v6568_v52 = vunpack.c.l.bf16 %v14179_v40 }
 0x438   :  { %v7000_v2 = vpop.permute.xlu1 %6999 }
 0x439   :  { %v7272_v6 = vmul.f32 %v7000_v2, %v6601_v37  ;;  %12845 = vmatpush3.bf16.msra.mxu1 %v14178_v7  ;;  %v14180_v37 = vld [vmem:[%s20082_s1 + $0x150] sm:$0xff]  }
 0x43a   :  { %12846 = vmatprep.subr.bf16.mxu1 %v20557_v1  ;;  %v6604_v2 = vunpack.c.l.bf16 %v14180_v37  ;;  %v6605_v7 = vunpack.c.h.bf16 %v14180_v37 }
 0x43b   :  { %v7359_v11 = vpack.c.bf16 %v7272_v6, %v7271_v21  ;;  %v7240_v6 = vmul.f32 %v17983_v3, %v6569_v62 }
 0x43c   :  { %v7008_v16 = vpop.permute.xlu1 %7007  ;;  %v7275_v37 = vmul.f32 %v17919_v53, %v6604_v2 }
 0x43d   :  { %v7274_v61 = vmul.f32 %v7008_v16, %v6603_v20  ;;  %7663 = vxpose.xlu0.c.b16.start [1/8] (narrow) %v7359_v11, 16  ;;  %12847 = vmatpush3.bf16.msra.mxu1 %v14181_v30  ;;  %v14183_v20 = vld [vmem:[%s20082_s1 + $0x158] sm:$0xff]   ;;  %v7239_v30 = vmul.f32 %v17798_v28, %v6568_v52  ;;  %v14185_v28 = vld [vmem:[%s20082_s1 + $0xd0] sm:$0xff]  }
 0x43e   :  { %12872 = vmatprep.subr.bf16.mxu1 %v20557_v1  ;;  %v6606_v16 = vunpack.c.l.bf16 %v14183_v20  ;;  %v6607_v3 = vunpack.c.h.bf16 %v14183_v20  ;;  %v6573_v53 = vunpack.c.h.bf16 %v14185_v28  ;;  %v6572_v2 = vunpack.c.l.bf16 %v14185_v28 }
 0x43f   :  { %v7360_v21 = vpack.c.bf16 %v7274_v61, %v7273_v15  ;;  %v7503_v40 = vpop.trf.xlu0  ;;  %v14184_v15 = vld [vmem:[%s20083_s2 + $0x138] sm:$0xff]   ;;  %v7343_v61 = vpack.c.bf16 %v7240_v6, %v7239_v30  ;;  %v7241_v20 = vmul.f32 %v17802_v23, %v6570_v47  ;;  %v18117_v30 = vpop.f32.mrf.mxu0 }
 0x440   :  { %v7016_v11 = vpop.permute.xlu1 %7015  ;;  %12829 = vmatmul.mubr.bf16.vlgmr.msra.gmra.mxu0 %v7503_v40  ;;  %v14188_v23 = vld [vmem:[%s20082_s1 + $0xd8] sm:$0xff]   ;;  %v7243_v28 = vmul.f32 %v17806_v45, %v6572_v2  ;;  %v14191_v45 = vld [vmem:[%s20082_s1 + $0xe0] sm:$0xff]  }
 0x441   :  { %v7276_v62 = vmul.f32 %v7016_v11, %v6605_v7  ;;  %7664 = vxpose.xlu0.c.b16.cont [2/8] (narrow) %v7360_v21, 16  ;;  %12853 = vmatpush3.bf16.msra.mxu0 %v14184_v15  ;;  %v14186_v7 = vld [vmem:[%s20082_s1 + $0x160] sm:$0xff]   ;;  %v7277_v11 = vmul.f32 %v17927_v58, %v6606_v16  ;;  %v6575_v47 = vunpack.c.h.bf16 %v14188_v23  ;;  %v6574_v16 = vunpack.c.l.bf16 %v14188_v23 }
 0x442   :  { %12854 = vmatprep.subr.bf16.mxu0 %v20557_v1  ;;  %12868 = vmatprep.mubr.msk.bf16.mxu0 %vm14261_vm0, %v20557_v1  ;;  %v6608_v21 = vunpack.c.l.bf16 %v14186_v7  ;;  %v6609_v41 = vunpack.c.h.bf16 %v14186_v7  ;;  %v14190_v7 = vld [vmem:[%s20083_s2 + $0x128] sm:$0xff]   ;;  %v6577_v2 = vunpack.c.h.bf16 %v14191_v45 }
 0x443   :  { %v7361_v52 = vpack.c.bf16 %v7276_v62, %v7275_v37  ;;  %v7344_v37 = vpack.c.bf16 %v7242_v31, %v7241_v20  ;;  %v7244_v62 = vmul.f32 %v17991_v25, %v6573_v53  ;;  %v7246_v20 = vmul.f32 %v17996_v32, %v6575_v47 }
 0x444   :  { %v7024_v40 = vpop.permute.xlu1 %7023  ;;  %v7279_v31 = vmul.f32 %v17938_v48, %v6608_v21 }
 0x445   :  { %v7278_v6 = vmul.f32 %v7024_v40, %v6607_v3  ;;  %7551 = vxpose.xlu1.c.b16.start [1/8] (narrow) %v7343_v61, 16  ;;  %7665 = vxpose.xlu0.c.b16.cont [3/8] (narrow) %v7361_v52, 16  ;;  %v14189_v3 = vld [vmem:[%s20082_s1 + $0x168] sm:$0xff]   ;;  %v7345_v40 = vpack.c.bf16 %v7244_v62, %v7243_v28 }
 0x446   :  { %12855 = vmatpush3.bf16.msra.mxu0 %v14187_v44  ;;  %v6610_v15 = vunpack.c.l.bf16 %v14189_v3  ;;  %v6611_v53 = vunpack.c.h.bf16 %v14189_v3  ;;  %v14194_v28 = vld [vmem:[%s20082_s1 + $0xe8] sm:$0xff]  }
 0x447   :  { %v7362_v58 = vpack.c.bf16 %v7278_v6, %v7277_v11  ;;  %12856 = vmatprep.subr.bf16.mxu0 %v20557_v1  ;;  %v6576_v11 = vunpack.c.l.bf16 %v14191_v45  ;;  %v14192_v6 = vld [vmem:[%s20082_s1 + $0x170] sm:$0xff]   ;;  %v14196_v45 = vld [vmem:[%s20083_s2 + $0x118] sm:$0xff]  }
 0x448   :  { %v7032_v61 = vpop.permute.xlu1 %7031  ;;  %v7281_v32 = vmul.f32 %v17946_v60, %v6610_v15  ;;  %v6613_v23 = vunpack.c.h.bf16 %v14192_v6  ;;  %v6578_v15 = vunpack.c.l.bf16 %v14194_v28 }
 0x449   :  { %v7280_v25 = vmul.f32 %v7032_v61, %v6609_v41  ;;  %7552 = vxpose.xlu1.c.b16.cont [2/8] (narrow) %v7344_v37, 16  ;;  %7666 = vxpose.xlu0.c.b16.cont [4/8] (narrow) %v7362_v58, 16  ;;  %v18129_v52 = vpop.f32.mrf.mxu0  ;;  %v6612_v41 = vunpack.c.l.bf16 %v14192_v6  ;;  %v7245_v37 = vmul.f32 %v17810_v55, %v6574_v16  ;;  %v14193_v58 = vld [vmem:[%s20083_s2 + $0x120] sm:$0xff]   ;;  %v7248_v61 = vmul.f32 %v18003_v39, %v6577_v2 }
 0x44a   :  { %20843 = vst [vmem:[#allocation217_spill] sm:$0xff] %v18129_v52  ;;  %12857 = vmatpush3.bf16.msra.mxu0 %v14190_v7  ;;  %v6579_v55 = vunpack.c.h.bf16 %v14194_v28  ;;  %v7247_v7 = vmul.f32 %v17813_v46, %v6576_v11  ;;  %v14198_v11 = vld [vmem:[%s20082_s1 + $0x180] sm:$0xff]   ;;  %v14201_v28 = vld [vmem:[%s20082_s1 + $0x188] sm:$0xff]  }
 0x44b   :  { %v7363_v48 = vpack.c.bf16 %v7280_v25, %v7279_v31  ;;  %v12790_v21 = vpop.f32.mrf.mxu0  ;;  %12858 = vmatprep.subr.bf16.mxu0 %v20557_v1  ;;  %v7346_v3 = vpack.c.bf16 %v7246_v20, %v7245_v37  ;;  %v14195_v31 = vld [vmem:[%s20082_s1 + $0x178] sm:$0xff]   ;;  %v7283_v39 = vmul.f32 %v17957_v24, %v6612_v41  ;;  %v6616_v41 = vunpack.c.l.bf16 %v14198_v11 }
 0x44c   :  { %v7040_v44 = vpop.permute.xlu1 %7039  ;;  %v6614_v25 = vunpack.c.l.bf16 %v14195_v31  ;;  %v6615_v20 = vunpack.c.h.bf16 %v14195_v31  ;;  %v7347_v2 = vpack.c.bf16 %v7248_v61, %v7247_v7  ;;  %v14197_v21 = vld [vmem:[%s20082_s1 + $0xf0] sm:$0xff]   ;;  %v7249_v37 = vmul.f32 %v17822_v50, %v6578_v15 }
 0x44d   :  { %v7282_v62 = vmul.f32 %v7040_v44, %v6611_v53  ;;  %7553 = vxpose.xlu1.c.b16.cont [3/8] (narrow) %v7345_v40, 16  ;;  %7667 = vxpose.xlu0.c.b16.cont [5/8] (narrow) %v7363_v48, 16  ;;  %v7436_v47 = vpop.f32.mrf.mxu0  ;;  %v7250_v48 = vmul.f32 %v18008_v19, %v6579_v55  ;;  %v6581_v6 = vunpack.c.h.bf16 %v14197_v21  ;;  %v6580_v24 = vunpack.c.l.bf16 %v14197_v21 }
 0x44e   :  { %12859 = vmatpush3.bf16.msra.mxu0 %v14193_v58  ;;  %v6618_v55 = vunpack.c.l.bf16 %v14201_v28  ;;  %v7287_v15 = vmul.f32 %v17976_v17, %v6616_v41  ;;  %v6619_v31 = vunpack.c.h.bf16 %v14201_v28  ;;  %v14206_v41 = vld [vmem:[%s20082_s1 + $0x108] sm:$0xff]  }
 0x44f   :  { %v7364_v16 = vpack.c.bf16 %v7282_v62, %v7281_v32  ;;  %v12791_v60 = vpop.f32.mrf.mxu0  ;;  %12860 = vmatprep.subr.bf16.mxu0 %v20557_v1  ;;  %v7285_v32 = vmul.f32 %v17965_v59, %v6614_v25  ;;  %v6617_v62 = vunpack.c.h.bf16 %v14198_v11  ;;  %v7348_v47 = vpack.c.bf16 %v7250_v48, %v7249_v37  ;;  %v14202_v25 = vld [vmem:[%s20083_s2 + $0x108] sm:$0xff]   ;;  %v14207_v37 = vld [vmem:[%s20082_s1 + $0x198] sm:$0xff]  }
 0x450   :  { %v7048_v53 = vpop.permute.xlu1 %7047  ;;  %v7252_v58 = vmul.f32 %v18013_v56, %v6581_v6  ;;  %v7251_v60 = vmul.f32 %v17829_v4, %v6580_v24  ;;  %v7289_v21 = vmul.f32 %v17981_v14, %v6618_v55  ;;  %v6586_v14 = vunpack.c.l.bf16 %v14206_v41 }
 0x451   :  { %v7284_v40 = vmul.f32 %v7048_v53, %v6613_v23  ;;  %7554 = vxpose.xlu1.c.b16.cont [4/8] (narrow) %v7346_v3, 16  ;;  %7668 = vxpose.xlu0.c.b16.cont [6/8] (narrow) %v7364_v16, 16  ;;  %v14199_v23 = vld [vmem:[%s20083_s2 + $0x110] sm:$0xff]   ;;  %v14200_v3 = vld [vmem:[%s20082_s1 + $0xf8] sm:$0xff]  }
 0x452   :  { %12861 = vmatpush3.bf16.msra.mxu0 %v14196_v45  ;;  %v6583_v61 = vunpack.c.h.bf16 %v14200_v3  ;;  %v6582_v59 = vunpack.c.l.bf16 %v14200_v3  ;;  %v7349_v53 = vpack.c.bf16 %v7252_v58, %v7251_v60 }
 0x453   :  { %v7365_v46 = vpack.c.bf16 %v7284_v40, %v7283_v39  ;;  %12862 = vmatprep.subr.bf16.mxu0 %v20557_v1  ;;  %v14203_v39 = vld [vmem:[%s20082_s1 + $0x100] sm:$0xff]  }
 0x454   :  { %v7056_v44 = vpop.permute.xlu1 %7055  ;;  %v7254_v7 = vmul.f32 %v18016_v10, %v6583_v61  ;;  %v6585_v40 = vunpack.c.h.bf16 %v14203_v39  ;;  %v6584_v17 = vunpack.c.l.bf16 %v14203_v39  ;;  %v7253_v48 = vmul.f32 %v17836_v34, %v6582_v59  ;;  %v14208_v61 = vld [vmem:[%s20082_s1 + $0x110] sm:$0xff]  }
 0x455   :  { %v7286_v19 = vmul.f32 %v7056_v44, %v6615_v20  ;;  %7555 = vxpose.xlu1.c.b16.cont [5/8] (narrow) %v7347_v2, 16  ;;  %7669 = vxpose.xlu0.c.b16.cont [7/8] (narrow) %v7365_v46, 16  ;;  %v14204_v20 = vld [vmem:[%s20082_s1 + $0x190] sm:$0xff]   ;;  %v14205_v46 = vld [vmem:[%s20083_s2 + $0x100] sm:$0xff]   ;;  %v6587_v44 = vunpack.c.h.bf16 %v14206_v41  ;;  %v6588_v28 = vunpack.c.l.bf16 %v14208_v61 }
 0x456   :  { %12863 = vmatpush3.bf16.msra.mxu0 %v14199_v23  ;;  %v6620_v45 = vunpack.c.l.bf16 %v14204_v20  ;;  %v6621_v6 = vunpack.c.h.bf16 %v14204_v20  ;;  %v7350_v24 = vpack.c.bf16 %v7254_v7, %v7253_v48  ;;  %v7256_v11 = vmul.f32 %v18021_v57, %v6585_v40  ;;  %v14212_v48 = vld [vmem:[%s20082_s1 + $0x120] sm:$0xff]  }
 0x457   :  { %v7366_v50 = vpack.c.bf16 %v7286_v19, %v7285_v32  ;;  %12864 = vmatprep.subr.bf16.mxu0 %v20557_v1  ;;  %v6622_v32 = vunpack.c.l.bf16 %v14207_v37  ;;  %v7258_v3 = vmul.f32 %v18026_v12, %v6587_v44 }
 0x458   :  { %v7067_v16 = vpop.permute.xlu1 %7066  ;;  %v7291_v23 = vmul.f32 %v17988_v8, %v6620_v45 }
 0x459   :  { %v7288_v56 = vmul.f32 %v7067_v16, %v6617_v62  ;;  %7556 = vxpose.xlu1.c.b16.cont [6/8] (narrow) %v7348_v47, 16  ;;  %7670 = vxpose.xlu0.c.b16.end [8/8] (narrow) %v7366_v50, 16  ;;  %v7255_v62 = vmul.f32 %v17843_v33, %v6584_v17  ;;  %v6623_v47 = vunpack.c.h.bf16 %v14207_v37  ;;  %v6589_v50 = vunpack.c.h.bf16 %v14208_v61  ;;  %v14209_v33 = vld [vmem:[%s20082_s1 + $0x1a0] sm:$0xff]   ;;  %v14216_v61 = vld [vmem:[%s20082_s1 + $0x130] sm:$0xff]  }
 0x45a   :  { %12865 = vmatpush3.bf16.msra.mxu0 %v14202_v25  ;;  %v6624_v55 = vunpack.c.l.bf16 %v14209_v33  ;;  %v7257_v16 = vmul.f32 %v17850_v38, %v6586_v14  ;;  %v7293_v60 = vmul.f32 %v17994_v27, %v6622_v32  ;;  %v6625_v12 = vunpack.c.h.bf16 %v14209_v33  ;;  %v14210_v25 = vld [vmem:[%s20082_s1 + $0x118] sm:$0xff]   ;;  %v14211_v38 = vld [vmem:[%s20082_s1 + $0x1a8] sm:$0xff]  }
 0x45b   :  { %v7367_v4 = vpack.c.bf16 %v7288_v56, %v7287_v15  ;;  %12866 = vmatprep.subr.bf16.mxu0 %v20557_v1  ;;  %v7351_v58 = vpack.c.bf16 %v7256_v11, %v7255_v62  ;;  %v6590_v39 = vunpack.c.l.bf16 %v14210_v25  ;;  %v6626_v40 = vunpack.c.l.bf16 %v14211_v38  ;;  %v14214_v14 = vld [vmem:[%s20082_s1 + $0x128] sm:$0xff]  }
 0x45c   :  { %v7075_v2 = vpop.permute.xlu1 %7074  ;;  %v7352_v56 = vpack.c.bf16 %v7258_v3, %v7257_v16  ;;  %v7295_v17 = vmul.f32 %v18005_v5, %v6624_v55  ;;  %v6595_v37 = vunpack.c.h.bf16 %v14214_v14  ;;  %v6596_v55 = vunpack.c.l.bf16 %v14216_v61 }
 0x45d   :  { %v7290_v10 = vmul.f32 %v7075_v2, %v6619_v31  ;;  %7557 = vxpose.xlu1.c.b16.cont [7/8] (narrow) %v7349_v53, 16  ;;  %7719 = vxpose.xlu0.c.b16.start [1/8] (narrow) %v7367_v4, 16  ;;  %v7260_v31 = vmul.f32 %v18029_v0, %v6589_v50  ;;  %v6591_v53 = vunpack.c.h.bf16 %v14210_v25  ;;  %v7259_v4 = vmul.f32 %v17857_v63, %v6588_v28  ;;  %v14213_v63 = vld [vmem:[%s20082_s1 + $0x1b0] sm:$0xff]  }
 0x45e   :  { %12867 = vmatpush3.bf16.msra.mxu0 %v14205_v46  ;;  %v6627_v0 = vunpack.c.h.bf16 %v14211_v38  ;;  %v6628_v46 = vunpack.c.l.bf16 %v14213_v63  ;;  %v7297_v11 = vmul.f32 %v18011_v51, %v6626_v40  ;;  %v7266_v3 = vmul.f32 %v18050_v29, %v6595_v37  ;;  %v14217_v29 = vld [vmem:[%s20082_s1 + $0x138] sm:$0xff]   ;;  %v20853_v37 = vld [vmem:[#allocation65_spill] sm:$0xff] }
 0x45f   :  { %v7368_v34 = vpack.c.bf16 %v7290_v10, %v7289_v21  ;;  %12892 = vmatprep.subr.bf16.mxu0 %v20557_v1  ;;  %v7353_v45 = vpack.c.bf16 %v7260_v31, %v7259_v4  ;;  %v7262_v2 = vmul.f32 %v18038_v43, %v6591_v53  ;;  %v6593_v21 = vunpack.c.h.bf16 %v14212_v48  ;;  %v14218_v4 = vld [vmem:[%s20083_s2 + $0x178] sm:$0xff]  }
 0x460   :  { %v7083_v19 = vpop.permute.xlu1 %7082  ;;  %v6629_v43 = vunpack.c.h.bf16 %v14213_v63  ;;  %v6597_v50 = vunpack.c.h.bf16 %v14216_v61  ;;  %v14222_v63 = vld [vmem:[%s20083_s2 + $0x158] sm:$0xff]  }
 0x461   :  { %v7292_v57 = vmul.f32 %v7083_v19, %v6621_v6  ;;  %7558 = vxpose.xlu1.c.b16.end [8/8] (narrow) %v7350_v24, 16  ;;  %7720 = vxpose.xlu0.c.b16.cont [2/8] (narrow) %v7368_v34, 16  ;;  %v6592_v6 = vunpack.c.l.bf16 %v14212_v48  ;;  %v7261_v24 = vmul.f32 %v17864_v26, %v6590_v39  ;;  %v7264_v34 = vmul.f32 %v18044_v22, %v6593_v21  ;;  %v14215_v26 = vld [vmem:[%s20082_s1 + $0x1b8] sm:$0xff]   ;;  %v20847_v48 = vld [vmem:[#allocation28_spill] sm:$0xff] }
 0x462   :  { %v6594_v19 = vunpack.c.l.bf16 %v14214_v14  ;;  %v6630_v62 = vunpack.c.l.bf16 %v14215_v26  ;;  %v6631_v22 = vunpack.c.h.bf16 %v14215_v26  ;;  %v7268_v16 = vmul.f32 %v18056_v54, %v6597_v50  ;;  %v14223_v14 = vld [vmem:[%s20083_s2 + $0x150] sm:$0xff]  }
 0x463   :  { %v7369_v59 = vpack.c.bf16 %v7292_v57, %v7291_v23  ;;  %v7354_v44 = vpack.c.bf16 %v7262_v2, %v7261_v24  ;;  %v7263_v23 = vmul.f32 %v17871_v13, %v6592_v6  ;;  %v7299_v57 = vmul.f32 %v18018_v18, %v6628_v46  ;;  %v20848_v46 = vld [vmem:[#allocation66_spill] sm:$0xff]  ;;  %v20855_v26 = vld [vmem:[#allocation61_spill] sm:$0xff] }
 0x464   :  { %v7091_v8 = vpop.permute.xlu1 %7090  ;;  %v7265_v33 = vmul.f32 %v17875_v35, %v6594_v19  ;;  %v7301_v13 = vmul.f32 %v18024_v49, %v6630_v62 }
 0x465   :  { %v7294_v15 = vmul.f32 %v7091_v8, %v6623_v47  ;;  %7607 = vxpose.xlu1.c.b16.start [1/8] (narrow) %v7351_v58, 16  ;;  %7721 = vxpose.xlu0.c.b16.cont [3/8] (narrow) %v7369_v59, 16  ;;  %v7355_v58 = vpack.c.bf16 %v7264_v34, %v7263_v23 }
 0x466   :  { %v7356_v8 = vpack.c.bf16 %v7266_v3, %v7265_v33  ;;  %v20859_v3 = vld [vmem:[#allocation56_spill] sm:$0xff] }
 0x467   :  { %v7370_v7 = vpack.c.bf16 %v7294_v15, %v7293_v60  ;;  %v6599_v60 = vunpack.c.h.bf16 %v14217_v29 }
 0x468   :  { %v7099_v27 = vpop.permute.xlu1 %7098 }
 0x469   :  { %v7296_v20 = vmul.f32 %v7099_v27, %v6625_v12  ;;  %7608 = vxpose.xlu1.c.b16.cont [2/8] (narrow) %v7352_v56, 16  ;;  %7722 = vxpose.xlu0.c.b16.cont [4/8] (narrow) %v7370_v7, 16  ;;  %v7267_v12 = vmul.f32 %v17881_v42, %v6596_v55  ;;  %v6598_v56 = vunpack.c.l.bf16 %v14217_v29  ;;  %v7270_v49 = vmul.f32 %v18062_v9, %v6599_v60  ;;  %v20844_v7 = vld [vmem:[#allocation228_spill] sm:$0xff]  ;;  %v20863_v29 = vld [vmem:[#allocation34_spill] sm:$0xff] }
 0x46b   :  { %v7371_v10 = vpack.c.bf16 %v7296_v20, %v7295_v17  ;;  %v7357_v35 = vpack.c.bf16 %v7268_v16, %v7267_v12  ;;  %v7269_v25 = vmul.f32 %v17889_v36, %v6598_v56  ;;  %v14219_v17 = vld [vmem:[%s20083_s2 + $0x170] sm:$0xff]   ;;  %v14220_v20 = vld [vmem:[%s20083_s2 + $0x168] sm:$0xff]   ;;  %v20864_v12 = vld [vmem:[#allocation15_spill] sm:$0xff] }
 0x46c   :  { %v7107_v5 = vpop.permute.xlu1 %7106  ;;  %v20862_v16 = vld [vmem:[#allocation72_spill] sm:$0xff]  ;;  %v7977_v56 = vmul.f32 %v20864_v12, %v20864_v12 }
 0x46d   :  { %v7298_v41 = vmul.f32 %v7107_v5, %v6627_v0  ;;  %7609 = vxpose.xlu1.c.b16.cont [3/8] (narrow) %v7353_v45, 16  ;;  %7723 = vxpose.xlu0.c.b16.cont [5/8] (narrow) %v7371_v10, 16  ;;  %v7358_v54 = vpack.c.bf16 %v7270_v49, %v7269_v25  ;;  %v20845_v0 = vld [vmem:[#allocation48_spill] sm:$0xff]  ;;  %v20846_v45 = vld [vmem:[#allocation26_spill] sm:$0xff]  ;;  %v14221_v10 = vld [vmem:[%s20083_s2 + $0x160] sm:$0xff]   ;;  %v2315_v60 = vmul.f32 %v20863_v29, %v20862_v16 }
 0x46e   :  { %v2307_v2 = vmul.f32 %v20846_v45, %v20845_v0  ;;  %v20849_v5 = vld [vmem:[#allocation29_spill] sm:$0xff]  ;;  %v8119_v45 = vsel %vm20870_vm8, %v7977_v56, 0.0  ;;  %v20888_v56 = vld [vmem:[#allocation86_spill] sm:$0xff] }
 0x46f   :  { %v7372_v32 = vpack.c.bf16 %v7298_v41, %v7297_v11  ;;  %v2312_v24 = vmul.f32 %v20849_v5, %v20848_v46  ;;  %v20850_v11 = vld [vmem:[#allocation10_spill] sm:$0xff]  ;;  %v14231_v46 = vld [vmem:[%s20083_s2 + $0x1e8] sm:$0xff]   ;;  %v20873_v5 = vld [vmem:[#allocation73_spill] sm:$0xff] }
 0x470   :  { %v7115_v51 = vpop.permute.xlu1 %7114  ;;  %v18299_v21 = vadd.f32 %v20847_v48, %v2307_v2  ;;  %v7973_v41 = vmul.f32 %v20850_v11, %v20850_v11  ;;  %v14230_v48 = vld [vmem:[%s20083_s2 + $0x1a8] sm:$0xff]  }
 0x471   :  { %v7300_v47 = vmul.f32 %v7115_v51, %v6629_v43  ;;  %7610 = vxpose.xlu1.c.b16.cont [4/8] (narrow) %v7354_v44, 16  ;;  %7724 = vxpose.xlu0.c.b16.cont [6/8] (narrow) %v7372_v32, 16  ;;  %v20851_v43 = vld [vmem:[#allocation277_spill] sm:$0xff] }
 0x472   :  { %v7986_v6 = vmul.f32 %v18299_v21, %v18299_v21  ;;  %v18316_v44 = vadd.f32 %v20851_v43, %v2312_v24  ;;  %v20854_v32 = vld [vmem:[#allocation13_spill] sm:$0xff]  ;;  %v8107_v51 = vsel %vm20856_vm4, %v7973_v41, 0.0 }
 0x473   :  { %v7373_v59 = vpack.c.bf16 %v7300_v47, %v7299_v57  ;;  %v2296_v19 = vmul.f32 %v20854_v32, %v20853_v37  ;;  %v14224_v57 = vld [vmem:[%s20083_s2 + $0x148] sm:$0xff]   ;;  %v20857_v47 = vld [vmem:[#allocation31_spill] sm:$0xff] }
 0x474   :  { %v7123_v28 = vpop.permute.xlu1 %7122  ;;  %v8146_v34 = vsel %vm20852_vm3, %v7986_v6, 0.0  ;;  %v7991_v23 = vmul.f32 %v18316_v44, %v18316_v44  ;;  %v20872_v6 = vld [vmem:[#allocation17_spill] sm:$0xff] }
 0x475   :  { %v7302_v18 = vmul.f32 %v7123_v28, %v6631_v22  ;;  %7611 = vxpose.xlu1.c.b16.cont [5/8] (narrow) %v7355_v58, 16  ;;  %7725 = vxpose.xlu0.c.b16.cont [7/8] (narrow) %v7373_v59, 16  ;;  %v18326_v62 = vadd.f32 %v20855_v26, %v2296_v19  ;;  %v20858_v22 = vld [vmem:[#allocation62_spill] sm:$0xff]  ;;  %v14225_v28 = vld [vmem:[%s20083_s2 + $0x140] sm:$0xff]  }
 0x476   :  { %v2314_v58 = vmul.f32 %v20858_v22, %v20857_v47  ;;  %v8161_v50 = vsel %vm20860_vm5, %v7991_v23, 0.0  ;;  %v14234_v19 = vld [vmem:[%s20083_s2 + $0x198] sm:$0xff]   ;;  %v20878_v47 = vld [vmem:[#allocation19_spill] sm:$0xff] }
 0x477   :  { %v7374_v15 = vpack.c.bf16 %v7302_v18, %v7301_v13  ;;  %v7975_v59 = vmul.f32 %v18326_v62, %v18326_v62  ;;  %v20876_v26 = vld [vmem:[#allocation90_spill] sm:$0xff]  ;;  %v7981_v22 = vmul.f32 %v20878_v47, %v20878_v47 }
 0x478   :  { %v18256_v31 = vpop.permute.xlu1 %7133  ;;  %v18338_v61 = vadd.f32 %v20859_v3, %v2314_v58  ;;  %v20879_v58 = vld [vmem:[#allocation134_spill] sm:$0xff] }
 0x479   :  { %7612 = vxpose.xlu1.c.b16.cont [6/8] (narrow) %v7356_v8, 16  ;;  %7726 = vxpose.xlu0.c.b16.end [8/8] (narrow) %v7374_v15, 16  ;;  %v8113_v18 = vsel %vm20861_vm6, %v7975_v59, 0.0  ;;  %v14226_v8 = vld [vmem:[%s20083_s2 + $0x1b8] sm:$0xff]   ;;  %v14236_v59 = vld [vmem:[%s20083_s2 + $0x190] sm:$0xff]   ;;  %v8131_v16 = vsel %vm20886_vm12, %v7981_v22, 0.0 }
 0x47a   :  { %v7993_v13 = vmul.f32 %v18338_v61, %v18338_v61  ;;  %v14227_v15 = vld [vmem:[%s20083_s2 + $0x1f8] sm:$0xff]  }
 0x47c   :  { %v18260_v53 = vpop.permute.xlu1 %7145  ;;  %v8167_v25 = vsel %vm20866_vm7, %v7993_v13, 0.0  ;;  %v14237_v13 = vld [vmem:[%s20083_s2 + $0x1d0] sm:$0xff]  }
 0x47d   :  { %7613 = vxpose.xlu1.c.b16.cont [7/8] (narrow) %v7357_v35, 16  ;;  %v20865_v35 = vld [vmem:[#allocation68_spill] sm:$0xff] }
 0x47e   :  { %v18366_v49 = vadd.f32 %v20865_v35, %v2315_v60  ;;  %v14238_v60 = vld [vmem:[%s20083_s2 + $0x188] sm:$0xff]  }
 0x480   :  { %v18263_v39 = vpop.permute.xlu1 %7149  ;;  %v7994_v2 = vmul.f32 %v18366_v49, %v18366_v49 }
 0x481   :  { %7614 = vxpose.xlu1.c.b16.end [8/8] (narrow) %v7358_v54, 16  ;;  %v14228_v54 = vld [vmem:[%s20083_s2 + $0x1b0] sm:$0xff]  }
 0x482   :  { %7129 = vbcast.lane.b32.xlu0 %v20844_v7, 256  ;;  %v8170_v41 = vsel %vm20874_vm9, %v7994_v2, 0.0 }
 0x484   :  { %v18267_v42 = vpop.permute.xlu1 %7157 }
 0x486   :  { %7137 = vbcast.lane.b32.xlu0 %v20844_v7, 272 }
 0x488   :  { %v18270_v9 = vpop.permute.xlu1 %7165 }
 0x48a   :  { %7141 = vbcast.lane.b32.xlu0 %v20844_v7, 280 }
 0x48c   :  { %v18274_v36 = vpop.permute.xlu1 %7173 }
 0x48e   :  { %7153 = vbcast.lane.b32.xlu0 %v20844_v7, 304 }
 0x490   :  { %v18277_v38 = vpop.permute.xlu1 %7177 }
 0x492   :  { %7161 = vbcast.lane.b32.xlu0 %v20844_v7, 320 }
 0x494   :  { %v18280_v40 = vpop.permute.xlu1 %7181 }
 0x496   :  { %7169 = vbcast.lane.b32.xlu0 %v20844_v7, 336 }
 0x49a   :  { %7185 = vbcast.lane.b32.xlu0 %v20844_v7, 368 }
 0x49e   :  { %7189 = vbcast.lane.b32.xlu0 %v20844_v7, 376  ;;  %v20867_v7 = vld [vmem:[#allocation78_spill] sm:$0xff] }
 0x49f   :  { %v7671_v33 = vpop.trf.xlu0 }
 0x4a7   :  { %v7559_v27 = vpop.trf.xlu1 }
 0x4a8   :  { %12849 = vmatmul.mubr.bf16.vlgmr.msra.gmra.mxu1 %v7559_v27  ;;  %v20868_v27 = vld [vmem:[#allocation33_spill] sm:$0xff] }
 0x4a9   :  { %12873 = vmatpush3.bf16.msra.mxu1 %v14218_v4  ;;  %12888 = vmatprep.mubr.msk.bf16.mxu1 %vm14261_vm0, %v20557_v1  ;;  %v2316_v4 = vmul.f32 %v20868_v27, %v20867_v7 }
 0x4aa   :  { %12874 = vmatprep.subr.bf16.mxu1 %v20557_v1 }
 0x4ad   :  { %12875 = vmatpush3.bf16.msra.mxu1 %v14219_v17  ;;  %v14229_v17 = vld [vmem:[%s20083_s2 + $0x1f0] sm:$0xff]  }
 0x4ae   :  { %12876 = vmatprep.subr.bf16.mxu1 %v20557_v1 }
 0x4b1   :  { %12877 = vmatpush3.bf16.msra.mxu1 %v14220_v20  ;;  %v20869_v20 = vld [vmem:[#allocation74_spill] sm:$0xff] }
 0x4b2   :  { %12878 = vmatprep.subr.bf16.mxu1 %v20557_v1  ;;  %v18380_v0 = vadd.f32 %v20869_v20, %v2316_v4 }
 0x4b4   :  { %v7995_v43 = vmul.f32 %v18380_v0, %v18380_v0 }
 0x4b5   :  { %12879 = vmatpush3.bf16.msra.mxu1 %v14221_v10  ;;  %v20871_v10 = vld [vmem:[#allocation77_spill] sm:$0xff] }
 0x4b6   :  { %12880 = vmatprep.subr.bf16.mxu1 %v20557_v1  ;;  %v8173_v37 = vsel %vm20875_vm10, %v7995_v43, 0.0 }
 0x4b9   :  { %12881 = vmatpush3.bf16.msra.mxu1 %v14222_v63  ;;  %v2300_v63 = vmul.f32 %v20872_v6, %v20871_v10  ;;  %v20894_v10 = vld [vmem:[#allocation41_spill] sm:$0xff] }
 0x4ba   :  { %12882 = vmatprep.subr.bf16.mxu1 %v20557_v1 }
 0x4bb   :  { %v18396_v24 = vadd.f32 %v20873_v5, %v2300_v63  ;;  %v20895_v63 = vld [vmem:[#allocation23_spill] sm:$0xff]  ;;  %v20896_v5 = vld [vmem:[#allocation98_spill] sm:$0xff] }
 0x4bd   :  { %8147 = vadd.xlane.f32.xlu0 %v8146_v34  ;;  %12883 = vmatpush3.bf16.msra.mxu1 %v14223_v14  ;;  %v14232_v34 = vld [vmem:[%s20083_s2 + $0x1a0] sm:$0xff]   ;;  %v7979_v32 = vmul.f32 %v18396_v24, %v18396_v24 }
 0x4be   :  { %12884 = vmatprep.subr.bf16.mxu1 %v20557_v1  ;;  %v14233_v14 = vld [vmem:[%s20083_s2 + $0x1e0] sm:$0xff]  }
 0x4bf   :  { %v7727_v20 = vpop.trf.xlu0 }
 0x4c1   :  { %8108 = vadd.xlane.f32.xlu0 %v8107_v51  ;;  %12885 = vmatpush3.bf16.msra.mxu1 %v14224_v57  ;;  %v20877_v51 = vld [vmem:[#allocation37_spill] sm:$0xff]  ;;  %v14235_v57 = vld [vmem:[%s20083_s2 + $0x1d8] sm:$0xff]  }
 0x4c2   :  { %12886 = vmatprep.subr.bf16.mxu1 %v20557_v1  ;;  %v2320_v23 = vmul.f32 %v20877_v51, %v20876_v26 }
 0x4c4   :  { %v18425_v3 = vadd.f32 %v20879_v58, %v2320_v23  ;;  %v14242_v23 = vld [vmem:[%s20082_s1 + $0x1c0] sm:$0xff]  }
 0x4c5   :  { %8162 = vadd.xlane.f32.xlu0 %v8161_v50  ;;  %12887 = vmatpush3.bf16.msra.mxu1 %v14225_v28  ;;  %v8125_v50 = vsel %vm20881_vm11, %v7979_v32, 0.0  ;;  %v20882_v28 = vld [vmem:[#allocation89_spill] sm:$0xff]  ;;  %v20901_v32 = vld [vmem:[#allocation280_spill] sm:$0xff]  ;;  %v6632_v22 = vunpack.c.l.bf16 %v14242_v23 }
 0x4c6   :  { %12912 = vmatprep.subr.bf16.mxu1 %v20557_v1  ;;  %20880 = vst [vmem:[#allocation221_spill] sm:$0xff] %v18425_v3  ;;  %v7999_v29 = vmul.f32 %v18425_v3, %v18425_v3  ;;  %v21136_v3 = vld [vmem:[#allocation192_spill] sm:$0xff] }
 0x4c7   :  { %v7615_v55 = vpop.trf.xlu1 }
 0x4c8   :  { %12869 = vmatmul.mubr.bf16.vlgmr.msra.gmra.mxu0 %v7615_v55  ;;  %12889 = vmatmul.mubr.bf16.vlgmr.msra.gmra.mxu1 %v7671_v33  ;;  %v20883_v33 = vld [vmem:[#allocation21_spill] sm:$0xff]  ;;  %v8185_v27 = vsel %vm20891_vm13, %v7999_v29, 0.0 }
 0x4c9   :  { %8114 = vadd.xlane.f32.xlu0 %v8113_v18  ;;  %12893 = vmatpush3.bf16.msra.mxu0 %v14226_v8  ;;  %v2304_v55 = vmul.f32 %v20883_v33, %v20882_v28  ;;  %v20884_v18 = vld [vmem:[#allocation80_spill] sm:$0xff]  ;;  %v20907_v29 = vld [vmem:[#allocation45_spill] sm:$0xff] }
 0x4ca   :  { %12894 = vmatprep.subr.bf16.mxu0 %v20557_v1  ;;  %12908 = vmatprep.mubr.msk.bf16.mxu0 %vm14261_vm0, %v20557_v1 }
 0x4cb   :  { %12913 = vmatpush3.bf16.msra.mxu1 %v14227_v15  ;;  %12928 = vmatprep.mubr.msk.bf16.mxu1 %vm14261_vm0, %v20557_v1  ;;  %v18439_v8 = vadd.f32 %v20884_v18, %v2304_v55  ;;  %v20887_v15 = vld [vmem:[#allocation39_spill] sm:$0xff]  ;;  %v20905_v55 = vld [vmem:[#allocation93_spill] sm:$0xff]  ;;  %vm20910_vm0 = vmmov %vm20903_vm1 }
 0x4cc   :  { %12914 = vmatprep.subr.bf16.mxu1 %v20557_v1  ;;  %v2322_v35 = vmul.f32 %v20888_v56, %v20887_v15  ;;  %v20908_v15 = vld [vmem:[#allocation279_spill] sm:$0xff]  ;;  %vm20915_vm3 = vmmov %vm20910_vm0 }
 0x4cd   :  { %8168 = vadd.xlane.f32.xlu0 %v8167_v25  ;;  %12895 = vmatpush3.bf16.msra.mxu0 %v14228_v54  ;;  %20885 = vst [vmem:[#allocation224_spill] sm:$0xff] %v18439_v8  ;;  %v14239_v25 = vld [vmem:[%s20083_s2 + $0x1c8] sm:$0xff]   ;;  %v7983_v4 = vmul.f32 %v18439_v8, %v18439_v8  ;;  %vm20920_vm4 = vmmov %vm20910_vm0 }
 0x4ce   :  { %12896 = vmatprep.subr.bf16.mxu0 %v20557_v1  ;;  %v20889_v54 = vld [vmem:[#allocation128_spill] sm:$0xff]  ;;  %vm20921_vm5 = vmmov %vm20910_vm0 }
 0x4cf   :  { %12915 = vmatpush3.bf16.msra.mxu1 %v14229_v17  ;;  %v18455_v7 = vadd.f32 %v20889_v54, %v2322_v35  ;;  %v14240_v17 = vld [vmem:[%s20083_s2 + $0x180] sm:$0xff]   ;;  %v14243_v54 = vld [vmem:[%s20082_s1 + $0x1c8] sm:$0xff]   ;;  %vm20927_vm6 = vmmov %vm20910_vm0 }
 0x4d0   :  { %12916 = vmatprep.subr.bf16.mxu1 %v20557_v1  ;;  %vm20932_vm7 = vmmov %vm20910_vm0 }
 0x4d1   :  { %8120 = vadd.xlane.f32.xlu0 %v8119_v45  ;;  %12897 = vmatpush3.bf16.msra.mxu0 %v14230_v48  ;;  %20890 = vst [vmem:[#allocation227_spill] sm:$0xff] %v18455_v7  ;;  %v14241_v45 = vld [vmem:[%s20083_s2 + $0x1c0] sm:$0xff]   ;;  %v8001_v2 = vmul.f32 %v18455_v7, %v18455_v7  ;;  %v8137_v48 = vsel %vm20892_vm14, %v7983_v4, 0.0  ;;  %v20911_v4 = vld [vmem:[#allocation114_spill] sm:$0xff]  ;;  %vm20933_vm8 = vmmov %vm20910_vm0 }
 0x4d2   :  { %12898 = vmatprep.subr.bf16.mxu0 %v20557_v1  ;;  %vm20935_vm9 = vmmov %vm20910_vm0  ;;  %v21128_v7 = vld [vmem:[#allocation116_spill] sm:$0xff] }
 0x4d3   :  { %12917 = vmatpush3.bf16.msra.mxu1 %v14231_v46  ;;  %v7985_v46 = vmul.f32 %v20895_v63, %v20895_v63  ;;  %v8191_v43 = vsel %vm20898_vm15, %v8001_v2, 0.0  ;;  %vm20937_vm10 = vmmov %vm20910_vm0 }
 0x4d4   :  { %12918 = vmatprep.subr.bf16.mxu1 %v20557_v1  ;;  %vm20946_vm11 = vmmov %vm20910_vm0 }
 0x4d5   :  { %8171 = vadd.xlane.f32.xlu0 %v8170_v41  ;;  %12899 = vmatpush3.bf16.msra.mxu0 %v14232_v34  ;;  %v20899_v34 = vld [vmem:[#allocation103_spill] sm:$0xff]  ;;  %v8143_v26 = vsel %vm20903_vm1, %v7985_v46, 0.0  ;;  %vm20956_vm12 = vmmov %vm20910_vm0 }
 0x4d6   :  { %12900 = vmatprep.subr.bf16.mxu0 %v20557_v1  ;;  %vm20960_vm13 = vmmov %vm20910_vm0 }
 0x4d7   :  { %12919 = vmatpush3.bf16.msra.mxu1 %v14233_v14  ;;  %v20900_v14 = vld [vmem:[#allocation87_spill] sm:$0xff]  ;;  %vm20962_vm14 = vmmov %vm20910_vm0 }
 0x4d8   :  { %12920 = vmatprep.subr.bf16.mxu1 %v20557_v1  ;;  %vm20964_vm15 = vmmov %vm20910_vm0 }
 0x4d9   :  { %8174 = vadd.xlane.f32.xlu0 %v8173_v37  ;;  %12901 = vmatpush3.bf16.msra.mxu0 %v14234_v19  ;;  %v2340_v37 = vmul.f32 %v20900_v14, %v20899_v34  ;;  %v20916_v14 = vld [vmem:[#allocation115_spill] sm:$0xff]  ;;  %vm20965_vm1 = vmmov %vm20910_vm0 }
 0x4da   :  { %12902 = vmatprep.subr.bf16.mxu0 %v20557_v1 }
 0x4db   :  { %12921 = vmatpush3.bf16.msra.mxu1 %v14235_v57  ;;  %v18481_v19 = vadd.f32 %v20901_v32, %v2340_v37  ;;  %v6633_v57 = vunpack.c.h.bf16 %v14242_v23  ;;  %v20917_v37 = vld [vmem:[#allocation100_spill] sm:$0xff]  ;;  %v14245_v23 = vld [vmem:[%s20082_s1 + $0x1d8] sm:$0xff]  }
 0x4dc   :  { %12922 = vmatprep.subr.bf16.mxu1 %v20557_v1  ;;  %v2344_v32 = vmul.f32 %v20917_v37, %v20916_v14  ;;  %v20929_v14 = vld [vmem:[#allocation112_spill] sm:$0xff] }
 0x4dd   :  { %8126 = vadd.xlane.f32.xlu0 %v8125_v50  ;;  %12903 = vmatpush3.bf16.msra.mxu0 %v14236_v59  ;;  %20902 = vst [vmem:[#allocation236_spill] sm:$0xff] %v18481_v19  ;;  %v8019_v59 = vmul.f32 %v18481_v19, %v18481_v19  ;;  %v7304_v28 = vmul.f32 %v18256_v31, %v6633_v57  ;;  %v6634_v31 = vunpack.c.l.bf16 %v14243_v54  ;;  %v6638_v57 = vunpack.c.l.bf16 %v14245_v23 }
 0x4de   :  { %12904 = vmatprep.subr.bf16.mxu0 %v20557_v1 }
 0x4df   :  { %12923 = vmatpush3.bf16.msra.mxu1 %v14237_v13  ;;  %v20906_v13 = vld [vmem:[#allocation99_spill] sm:$0xff] }
 0x4e0   :  { %12924 = vmatprep.subr.bf16.mxu1 %v20557_v1  ;;  %v2342_v18 = vmul.f32 %v20906_v13, %v20905_v55  ;;  %v6639_v55 = vunpack.c.h.bf16 %v14245_v23 }
 0x4e1   :  { %8132 = vadd.xlane.f32.xlu0 %v8131_v16  ;;  %12905 = vmatpush3.bf16.msra.mxu0 %v14238_v60  ;;  %v8005_v60 = vmul.f32 %v20907_v29, %v20907_v29 }
 0x4e2   :  { %12906 = vmatprep.subr.bf16.mxu0 %v20557_v1  ;;  %v18498_v56 = vadd.f32 %v20908_v15, %v2342_v18  ;;  %v14246_v18 = vld [vmem:[%s20082_s1 + $0x1e0] sm:$0xff]  }
 0x4e3   :  { %12925 = vmatpush3.bf16.msra.mxu1 %v14239_v25  ;;  %v8245_v25 = vsel %vm20910_vm0, %v8019_v59, 0.0  ;;  %v8203_v46 = vsel %vm20915_vm3, %v8005_v60, 0.0  ;;  %vm20977_vm3 = vmmov %vm20910_vm0 }
 0x4e4   :  { %12926 = vmatprep.subr.bf16.mxu1 %v20557_v1  ;;  %v20893_v1 = vld [vmem:[#allocation102_spill] sm:$0xff]  ;;  %20909 = vst [vmem:[#allocation233_spill] sm:$0xff] %v18498_v56 }
 0x4e5   :  { %8186 = vadd.xlane.f32.xlu0 %v8185_v27  ;;  %12907 = vmatpush3.bf16.msra.mxu0 %v14240_v17  ;;  %v2324_v6 = vmul.f32 %v20894_v10, %v20893_v1  ;;  %v6635_v27 = vunpack.c.h.bf16 %v14243_v54  ;;  %v20912_v17 = vld [vmem:[#allocation51_spill] sm:$0xff]  ;;  %v8021_v10 = vmul.f32 %v18498_v56, %v18498_v56  ;;  %v6641_v54 = vunpack.c.h.bf16 %v14246_v18 }
 0x4e7   :  { %12927 = vmatpush3.bf16.msra.mxu1 %v14241_v45  ;;  %v18475_v41 = vadd.f32 %v20896_v5, %v2324_v6  ;;  %v14244_v45 = vld [vmem:[%s20082_s1 + $0x1d0] sm:$0xff]   ;;  %v8251_v59 = vsel %vm20920_vm4, %v8021_v10, 0.0  ;;  %v20925_v10 = vld [vmem:[#allocation278_spill] sm:$0xff]  ;;  %vm20979_vm4 = vmmov %vm20910_vm0 }
 0x4e8   :  { %12909 = vmatmul.mubr.bf16.vlgmr.msra.gmra.mxu0 %v7727_v20  ;;  %v2328_v20 = vmul.f32 %v20912_v17, %v20911_v4  ;;  %v6637_v2 = vunpack.c.h.bf16 %v14244_v45  ;;  %v6636_v5 = vunpack.c.l.bf16 %v14244_v45 }
 0x4e9   :  { %8138 = vadd.xlane.f32.xlu0 %v8137_v48  ;;  %20897 = vst [vmem:[#allocation225_spill] sm:$0xff] %v18475_v41  ;;  %v8003_v51 = vmul.f32 %v18475_v41, %v18475_v41  ;;  %v20913_v48 = vld [vmem:[#allocation110_spill] sm:$0xff]  ;;  %v21099_v41 = vld [vmem:[#allocation101_spill] sm:$0xff] }
 0x4ea   :  { %v18510_v1 = vadd.f32 %v20913_v48, %v2328_v20  ;;  %v14247_v20 = vld [vmem:[%s20082_s1 + $0x1e8] sm:$0xff]  }
 0x4eb   :  { %v8197_v50 = vsel %vm20904_vm2, %v8003_v51, 0.0  ;;  %v6642_v45 = vunpack.c.l.bf16 %v14247_v20  ;;  %vm20971_vm2 = vmmov %vm20910_vm0 }
 0x4ec   :  { %20914 = vst [vmem:[#allocation237_spill] sm:$0xff] %v18510_v1 }
 0x4ed   :  { %8192 = vadd.xlane.f32.xlu0 %v8191_v43 }
 0x4f1   :  { %8144 = vadd.xlane.f32.xlu0 %v8143_v26  ;;  %v7308_v26 = vmul.f32 %v18263_v39, %v6637_v2  ;;  %v20924_v2 = vld [vmem:[#allocation57_spill] sm:$0xff] }
 0x4f2   :  { %v8009_v48 = vmul.f32 %v20924_v2, %v20924_v2  ;;  %v21071_v2 = vld [vmem:[#allocation159_spill] sm:$0xff] }
 0x4f4   :  { %v7130_v58 = vpop.permute.xlu0 %7129 }
 0x4f5   :  { %v7303_v33 = vmul.f32 %v7130_v58, %v6632_v22  ;;  %8198 = vadd.xlane.f32.xlu0 %v8197_v50  ;;  %v20918_v22 = vld [vmem:[#allocation111_spill] sm:$0xff] }
 0x4f6   :  { %v18522_v58 = vadd.f32 %v20918_v22, %v2344_v32  ;;  %v14248_v32 = vld [vmem:[%s20082_s1 + $0x1f0] sm:$0xff]  }
 0x4f7   :  { %v7375_v16 = vpack.c.bf16 %v7304_v28, %v7303_v33  ;;  %v8007_v28 = vmul.f32 %v18510_v1, %v18510_v1  ;;  %v7307_v33 = vmul.f32 %v18260_v53, %v6636_v5  ;;  %v20922_v53 = vld [vmem:[#allocation126_spill] sm:$0xff]  ;;  %v7312_v5 = vmul.f32 %v18270_v9, %v6641_v54  ;;  %v21074_v1 = vld [vmem:[#allocation92_spill] sm:$0xff] }
 0x4f8   :  { %v7138_v35 = vpop.permute.xlu0 %7137  ;;  %20919 = vst [vmem:[#allocation232_spill] sm:$0xff] %v18522_v58 }
 0x4f9   :  { %7775 = vxpose.xlu1.c.b16.start [1/8] (narrow) %v7375_v16, 16  ;;  %8246 = vadd.xlane.f32.xlu0 %v8245_v25  ;;  %v7305_v43 = vmul.f32 %v7138_v35, %v6634_v31  ;;  %v7377_v39 = vpack.c.bf16 %v7308_v26, %v7307_v33  ;;  %v6640_v16 = vunpack.c.l.bf16 %v14246_v18  ;;  %v8209_v15 = vsel %vm20921_vm5, %v8007_v28, 0.0  ;;  %v20923_v31 = vld [vmem:[#allocation63_spill] sm:$0xff]  ;;  %vm20982_vm5 = vmmov %vm20910_vm0 }
 0x4fa   :  { %v8023_v35 = vmul.f32 %v18522_v58, %v18522_v58  ;;  %v7310_v25 = vmul.f32 %v18267_v42, %v6639_v55  ;;  %v6645_v26 = vunpack.c.h.bf16 %v14248_v32  ;;  %v6644_v33 = vunpack.c.l.bf16 %v14248_v32  ;;  %v20945_v32 = vld [vmem:[#allocation118_spill] sm:$0xff] }
 0x4fc   :  { %v7142_v6 = vpop.permute.xlu0 %7141  ;;  %v7316_v55 = vmul.f32 %v18280_v40, %v6645_v26  ;;  %v20934_v40 = vld [vmem:[#allocation70_spill] sm:$0xff]  ;;  %v8029_v26 = vmul.f32 %v20945_v32, %v20945_v32 }
 0x4fd   :  { %v7306_v34 = vmul.f32 %v7142_v6, %v6635_v27  ;;  %8204 = vadd.xlane.f32.xlu0 %v8203_v46  ;;  %v2332_v27 = vmul.f32 %v20923_v31, %v20922_v53  ;;  %v8257_v46 = vsel %vm20927_vm6, %v8023_v35, 0.0  ;;  %v7315_v35 = vmul.f32 %v18277_v38, %v6644_v33  ;;  %v18573_v38 = vpop.f32.mrf.mxu1  ;;  %vm20985_vm6 = vmmov %vm20910_vm0 }
 0x4fe   :  { %v8012_v53 = vmul.f32 %v20934_v40, %v20934_v40 }
 0x4ff   :  { %v7376_v51 = vpack.c.bf16 %v7306_v34, %v7305_v43  ;;  %v18543_v6 = vadd.f32 %v20925_v10, %v2332_v27  ;;  %v6643_v43 = vunpack.c.h.bf16 %v14247_v20  ;;  %v20928_v34 = vld [vmem:[#allocation127_spill] sm:$0xff] }
 0x500   :  { %v7154_v50 = vpop.permute.xlu0 %7153  ;;  %v2348_v37 = vmul.f32 %v20929_v14, %v20928_v34  ;;  %v20939_v10 = vld [vmem:[#allocation75_spill] sm:$0xff]  ;;  %v18579_v34 = vpop.f32.mrf.mxu1  ;;  %v20943_v14 = vld [vmem:[#allocation130_spill] sm:$0xff] }
 0x501   :  { %7776 = vxpose.xlu1.c.b16.cont [2/8] (narrow) %v7376_v51, 16  ;;  %8252 = vadd.xlane.f32.xlu0 %v8251_v59  ;;  %v7309_v13 = vmul.f32 %v7154_v50, %v6638_v57  ;;  %20926 = vst [vmem:[#allocation235_spill] sm:$0xff] %v18543_v6  ;;  %v20930_v57 = vld [vmem:[#allocation123_spill] sm:$0xff]  ;;  %v8215_v59 = vsel %vm20932_vm7, %v8009_v48, 0.0  ;;  %v8011_v9 = vmul.f32 %v18543_v6, %v18543_v6  ;;  %v20938_v48 = vld [vmem:[#allocation137_spill] sm:$0xff]  ;;  %20942 = vst [vmem:[#allocation244_spill] sm:$0xff] %v18579_v34 }
 0x502   :  { %v18553_v22 = vadd.f32 %v20930_v57, %v2348_v37  ;;  %v7314_v28 = vmul.f32 %v18274_v36, %v6643_v43  ;;  %vm20989_vm7 = vmmov %vm20910_vm0 }
 0x503   :  { %v7378_v4 = vpack.c.bf16 %v7310_v25, %v7309_v13  ;;  %v14249_v13 = vld [vmem:[%s20082_s1 + $0x1f8] sm:$0xff]   ;;  %v7381_v25 = vpack.c.bf16 %v7316_v55, %v7315_v35  ;;  %v20951_v55 = vld [vmem:[#allocation47_spill] sm:$0xff]  ;;  %v8275_v35 = vsel %vm20956_vm12, %v8029_v26, 0.0  ;;  %vm21005_vm12 = vmmov %vm20910_vm0 }
 0x504   :  { %v7162_v60 = vpop.permute.xlu0 %7161  ;;  %20931 = vst [vmem:[#allocation241_spill] sm:$0xff] %v18553_v22  ;;  %v6647_v18 = vunpack.c.h.bf16 %v14249_v13  ;;  %v6646_v36 = vunpack.c.l.bf16 %v14249_v13 }
 0x505   :  { %7777 = vxpose.xlu1.c.b16.cont [3/8] (narrow) %v7377_v39, 16  ;;  %8210 = vadd.xlane.f32.xlu0 %v8209_v15  ;;  %v7311_v17 = vmul.f32 %v7162_v60, %v6640_v16  ;;  %v8221_v60 = vsel %vm20933_vm8, %v8011_v9, 0.0  ;;  %v8027_v15 = vmul.f32 %v18553_v22, %v18553_v22  ;;  %v20949_v9 = vld [vmem:[#allocation143_spill] sm:$0xff]  ;;  %vm20991_vm8 = vmmov %vm20910_vm0 }
 0x507   :  { %v7379_v51 = vpack.c.bf16 %v7312_v5, %v7311_v17  ;;  %v8269_v31 = vsel %vm20935_vm9, %v8027_v15, 0.0  ;;  %v20936_v17 = vld [vmem:[#allocation69_spill] sm:$0xff]  ;;  %vm20997_vm9 = vmmov %vm20910_vm0 }
 0x508   :  { %v7170_v42 = vpop.permute.xlu0 %7169  ;;  %v8013_v20 = vmul.f32 %v20936_v17, %v20936_v17  ;;  %v20941_v5 = vld [vmem:[#allocation25_spill] sm:$0xff] }
 0x509   :  { %7778 = vxpose.xlu1.c.b16.cont [4/8] (narrow) %v7378_v4, 16  ;;  %8258 = vadd.xlane.f32.xlu0 %v8257_v46  ;;  %v7313_v23 = vmul.f32 %v7170_v42, %v6642_v45  ;;  %v8224_v45 = vsel %vm20937_vm10, %v8012_v53, 0.0  ;;  %v2336_v42 = vmul.f32 %v20939_v10, %v20938_v48  ;;  %v20940_v46 = vld [vmem:[#allocation54_spill] sm:$0xff]  ;;  %vm20998_vm10 = vmmov %vm20910_vm0 }
 0x50a   :  { %v2308_v43 = vmul.f32 %v20941_v5, %v20940_v46  ;;  %v20961_v46 = vld [vmem:[#allocation49_spill] sm:$0xff] }
 0x50b   :  { %v7380_v39 = vpack.c.bf16 %v7314_v28, %v7313_v23  ;;  %v18582_v37 = vadd.f32 %v20943_v14, %v2336_v42  ;;  %v20947_v23 = vld [vmem:[#allocation27_spill] sm:$0xff]  ;;  %v20950_v28 = vld [vmem:[#allocation124_spill] sm:$0xff] }
 0x50c   :  { %v7186_v50 = vpop.permute.xlu0 %7185  ;;  %v18588_v57 = vadd.f32 %v20947_v23, %v2308_v43  ;;  %v2352_v33 = vmul.f32 %v20950_v28, %v20949_v9  ;;  %v20966_v28 = vld [vmem:[#allocation147_spill] sm:$0xff] }
 0x50d   :  { %7779 = vxpose.xlu1.c.b16.cont [5/8] (narrow) %v7379_v51, 16  ;;  %8216 = vadd.xlane.f32.xlu0 %v8215_v59  ;;  %v7317_v27 = vmul.f32 %v7186_v50, %v6646_v36  ;;  %20944 = vst [vmem:[#allocation214_spill] sm:$0xff] %v18582_v37  ;;  %v8227_v51 = vsel %vm20946_vm11, %v8013_v20, 0.0  ;;  %v12810_v50 = vpop.f32.mrf.mxu1  ;;  %v20948_v59 = vmov 127   ;;  %v8015_v36 = vmul.f32 %v18582_v37, %v18582_v37  ;;  %v20959_v20 = vld [vmem:[#allocation11_spill] sm:$0xff]  ;;  %vm21003_vm11 = vmmov %vm20910_vm0  ;;  %v21047_v37 = vld [vmem:[#allocation165_spill] sm:$0xff] }
 0x50e   :  { %v7987_v53 = vmul.f32 %v18588_v57, %v18588_v57 }
 0x50f   :  { %v8233_v10 = vsel %vm20960_vm13, %v8015_v36, 0.0  ;;  %v20972_v36 = vld [vmem:[#allocation85_spill] sm:$0xff]  ;;  %vm21008_vm13 = vmmov %vm20910_vm0 }
 0x510   :  { %v7190_v16 = vpop.permute.xlu0 %7189  ;;  %v8149_v43 = vsel %vm20962_vm14, %v7987_v53, 0.0  ;;  %vm21011_vm14 = vmmov %vm20910_vm0 }
 0x511   :  { %7780 = vxpose.xlu1.c.b16.cont [6/8] (narrow) %v7380_v39, 16  ;;  %8222 = vadd.xlane.f32.xlu0 %v8221_v60  ;;  %v7318_v54 = vmul.f32 %v7190_v16, %v6647_v18  ;;  %v20952_v39 = vld [vmem:[#allocation9_spill] sm:$0xff]  ;;  %v7492_v18 = vpop.f32.mrf.mxu1  ;;  %v18595_v16 = vpop.f32.mrf.mxu0  ;;  %v20954_v60 = vld [vmem:[#allocation162_spill] sm:$0xff] }
 0x512   :  { %v2291_v13 = vmul.f32 %v20952_v39, %v20951_v55  ;;  %20953 = vst [vmem:[#allocation218_spill] sm:$0xff] %v18595_v16  ;;  %v18598_v15 = vadd.f32 %v20954_v60, %v2352_v33  ;;  %v20967_v33 = vld [vmem:[#allocation135_spill] sm:$0xff]  ;;  %v20969_v18 = vld [vmem:[#allocation142_spill] sm:$0xff] }
 0x513   :  { %v7382_v4 = vpack.c.bf16 %v7318_v54, %v7317_v27  ;;  %v12830_v27 = vpop.f32.mrf.mxu0  ;;  %v2356_v55 = vmul.f32 %v20967_v33, %v20966_v28  ;;  %v20968_v39 = vld [vmem:[#allocation7_spill] sm:$0xff]  ;;  %v20984_v33 = vld [vmem:[#allocation32_spill] sm:$0xff] }
 0x514   :  { %20955 = vst [vmem:[#allocation240_spill] sm:$0xff] %v18598_v15  ;;  %v8031_v42 = vmul.f32 %v18598_v15, %v18598_v15  ;;  %v20974_v27 = vld [vmem:[#allocation173_spill] sm:$0xff] }
 0x515   :  { %7781 = vxpose.xlu1.c.b16.cont [7/8] (narrow) %v7381_v25, 16  ;;  %8270 = vadd.xlane.f32.xlu0 %v8269_v31  ;;  %v20957_v25 = vld [vmem:[#allocation276_spill] sm:$0xff]  ;;  %v12811_v31 = vpop.f32.mrf.mxu1  ;;  %v7548_v48 = vpop.f32.mrf.mxu0  ;;  %v18630_v60 = vadd.f32 %v20969_v18, %v2356_v55  ;;  %v20986_v18 = vld [vmem:[#allocation59_spill] sm:$0xff]  ;;  %v21046_v15 = vld [vmem:[#allocation181_spill] sm:$0xff] }
 0x516   :  { %v18604_v54 = vadd.f32 %v20957_v25, %v2291_v13  ;;  %v8281_v50 = vsel %vm20964_vm15, %v8031_v42, 0.0  ;;  %v8033_v13 = vmul.f32 %v20968_v39, %v20968_v39  ;;  %v7988_v25 = vmul.f32 %v20972_v36, %v20972_v36  ;;  %v20973_v31 = vld [vmem:[#allocation163_spill] sm:$0xff]  ;;  %v20978_v42 = vld [vmem:[#allocation44_spill] sm:$0xff]  ;;  %vm21013_vm15 = vmmov %vm20910_vm0 }
 0x517   :  { %v12831_v26 = vpop.f32.mrf.mxu0  ;;  %20970 = vst [vmem:[#allocation243_spill] sm:$0xff] %v18630_v60  ;;  %v20208_v39 = vmov 1.0  }
 0x518   :  { %v7970_v14 = vmul.f32 %v18604_v54, %v18604_v54  ;;  %v20981_v26 = vld [vmem:[#allocation30_spill] sm:$0xff] }
 0x519   :  { %7782 = vxpose.xlu1.c.b16.end [8/8] (narrow) %v7382_v4, 16  ;;  %8225 = vadd.xlane.f32.xlu0 %v8224_v45  ;;  %v20958_v4 = vld [vmem:[#allocation53_spill] sm:$0xff] }
 0x51a   :  { %v2292_v45 = vmul.f32 %v20959_v20, %v20958_v4  ;;  %v2372_v4 = vmul.f32 %v20974_v27, %v20973_v31  ;;  %v8035_v20 = vmul.f32 %v18630_v60, %v18630_v60 }
 0x51c   :  { %v18614_v5 = vadd.f32 %v20961_v46, %v2292_v45  ;;  %v20975_v45 = vld [vmem:[#allocation170_spill] sm:$0xff]  ;;  %v7989_v46 = vmul.f32 %v20978_v42, %v20978_v42 }
 0x51d   :  { %8228 = vadd.xlane.f32.xlu0 %v8227_v51  ;;  %13234 = vset.pattern.permute.xlu1 %v20948_v59  ;;  %v20963_v51 = vld [vmem:[#allocation81_spill] sm:$0xff]  ;;  %v8098_v59 = vsel %vm20965_vm1, %v7970_v14, 0.0  ;;  %v18641_v48 = vadd.f32 %v20975_v45, %v2372_v4  ;;  %v20980_v14 = vld [vmem:[#allocation60_spill] sm:$0xff]  ;;  %v20990_v4 = vld [vmem:[#allocation55_spill] sm:$0xff] }
 0x51e   :  { %v8017_v23 = vmul.f32 %v20963_v51, %v20963_v51  ;;  %v7971_v9 = vmul.f32 %v18614_v5, %v18614_v5  ;;  %vm21014_vm1 = vmmov %vm20910_vm0 }
 0x51f   :  { %20976 = vst [vmem:[#allocation222_spill] sm:$0xff] %v18641_v48 }
 0x520   :  { %v8101_v53 = vsel %vm20910_vm0, %v7971_v9, 0.0  ;;  %v20983_v9 = vld [vmem:[#allocation43_spill] sm:$0xff] }
 0x521   :  { %8276 = vadd.xlane.f32.xlu0 %v8275_v35  ;;  %v8239_v35 = vsel %vm20971_vm2, %v8017_v23, 0.0  ;;  %v2311_v23 = vmul.f32 %v20981_v26, %v20980_v14  ;;  %v7972_v28 = vmul.f32 %v20983_v9, %v20983_v9  ;;  %v20994_v26 = vld [vmem:[#allocation151_spill] sm:$0xff]  ;;  %vm21020_vm2 = vmmov %vm20910_vm0 }
 0x523   :  { %v18655_v55 = vadd.f32 %v20984_v33, %v2311_v23  ;;  %v8104_v45 = vsel %vm20991_vm8, %v7972_v28, 0.0 }
 0x525   :  { %8234 = vadd.xlane.f32.xlu0 %v8233_v10  ;;  %v8287_v10 = vsel %vm20977_vm3, %v8033_v13, 0.0  ;;  %v8155_v13 = vsel %vm20985_vm6, %v7989_v46, 0.0  ;;  %v20993_v46 = vld [vmem:[#allocation145_spill] sm:$0xff]  ;;  %vm21026_vm3 = vmmov %vm20910_vm0 }
 0x526   :  { %8150 = vadd.xlane.f32.xlu1 %v8149_v43  ;;  %v8152_v43 = vsel %vm20979_vm4, %v7988_v25, 0.0  ;;  %vm21028_vm4 = vmmov %vm20910_vm0 }
 0x527   :  { %vm21034_vm6 = vmmov %vm20910_vm0 }
 0x529   :  { %8282 = vadd.xlane.f32.xlu0 %v8281_v50  ;;  %v8051_v50 = vmul.f32 %v18641_v48, %v18641_v48 }
 0x52a   :  { %8099 = vadd.xlane.f32.xlu1 %v8098_v59  ;;  %v8293_v59 = vsel %vm20982_vm5, %v8035_v20, 0.0 }
 0x52b   :  { %v8341_v27 = vsel %vm20989_vm7, %v8051_v50, 0.0  ;;  %vm21037_vm7 = vmmov %vm20910_vm0 }
 0x52d   :  { %8240 = vadd.xlane.f32.xlu0 %v8239_v35  ;;  %v20987_v35 = vld [vmem:[#allocation14_spill] sm:$0xff] }
 0x52e   :  { %8102 = vadd.xlane.f32.xlu1 %v8101_v53  ;;  %v2295_v25 = vmul.f32 %v20987_v35, %v20986_v18  ;;  %v20988_v53 = vld [vmem:[#allocation139_spill] sm:$0xff]  ;;  %v20999_v18 = vld [vmem:[#allocation180_spill] sm:$0xff]  ;;  %v21000_v35 = vld [vmem:[#allocation182_spill] sm:$0xff] }
 0x52f   :  { %v8037_v31 = vmul.f32 %v20988_v53, %v20988_v53 }
 0x530   :  { %v18664_v20 = vadd.f32 %v20990_v4, %v2295_v25  ;;  %v2376_v25 = vmul.f32 %v21000_v35, %v20999_v18  ;;  %v21001_v4 = vld [vmem:[#allocation8_spill] sm:$0xff] }
 0x531   :  { %8288 = vadd.xlane.f32.xlu0 %v8287_v10  ;;  %v7990_v10 = vmul.f32 %v18655_v55, %v18655_v55  ;;  %v8299_v50 = vsel %vm20997_vm9, %v8037_v31, 0.0  ;;  %v21009_v35 = vld [vmem:[#allocation16_spill] sm:$0xff] }
 0x532   :  { %8153 = vadd.xlane.f32.xlu1 %v8152_v43  ;;  %v20992_v43 = vld [vmem:[#allocation157_spill] sm:$0xff]  ;;  %v7974_v28 = vmul.f32 %v18664_v20, %v18664_v20 }
 0x533   :  { %v2360_v14 = vmul.f32 %v20993_v46, %v20992_v43  ;;  %v21004_v46 = vld [vmem:[#allocation50_spill] sm:$0xff] }
 0x534   :  { %v7992_v31 = vmul.f32 %v21004_v46, %v21004_v46 }
 0x535   :  { %8294 = vadd.xlane.f32.xlu0 %v8293_v59  ;;  %v18672_v23 = vadd.f32 %v20994_v26, %v2360_v14  ;;  %v20996_v59 = vld [vmem:[#allocation164_spill] sm:$0xff]  ;;  %v21006_v14 = vld [vmem:[#allocation71_spill] sm:$0xff]  ;;  %v21007_v26 = vld [vmem:[#allocation18_spill] sm:$0xff] }
 0x536   :  { %8156 = vadd.xlane.f32.xlu1 %v8155_v13  ;;  %v8053_v33 = vmul.f32 %v20996_v59, %v20996_v59  ;;  %v8158_v13 = vsel %vm20998_vm10, %v7990_v10, 0.0  ;;  %v8110_v10 = vsel %vm21005_vm12, %v7974_v28, 0.0  ;;  %v21022_v59 = vld [vmem:[#allocation196_spill] sm:$0xff]  ;;  %vm21042_vm10 = vmmov %vm20910_vm0 }
 0x537   :  { %20995 = vst [vmem:[#allocation251_spill] sm:$0xff] %v18672_v23  ;;  %vm21048_vm12 = vmmov %vm20910_vm0 }
 0x538   :  { %v8347_v43 = vsel %vm21003_vm11, %v8053_v33, 0.0  ;;  %vm21045_vm11 = vmmov %vm20910_vm0 }
 0x539   :  { %8342 = vadd.xlane.f32.xlu0 %v8341_v27  ;;  %v8039_v27 = vmul.f32 %v18672_v23, %v18672_v23 }
 0x53a   :  { %8105 = vadd.xlane.f32.xlu1 %v8104_v45  ;;  %v18685_v45 = vadd.f32 %v21001_v4, %v2376_v25  ;;  %v7976_v25 = vmul.f32 %v21009_v35, %v21009_v35  ;;  %v21010_v4 = vld [vmem:[#allocation67_spill] sm:$0xff] }
 0x53b   :  { %v8305_v18 = vsel %vm21008_vm13, %v8039_v27, 0.0  ;;  %vm21052_vm13 = vmmov %vm20910_vm0 }
 0x53c   :  { %21002 = vst [vmem:[#allocation230_spill] sm:$0xff] %v18685_v45  ;;  %v8116_v27 = vsel %vm21014_vm1, %v7976_v25, 0.0  ;;  %vm21059_vm1 = vmmov %vm20910_vm0 }
 0x53d   :  { %8300 = vadd.xlane.f32.xlu0 %v8299_v50  ;;  %v2299_v50 = vmul.f32 %v21007_v26, %v21006_v14 }
 0x53e   :  { %8159 = vadd.xlane.f32.xlu1 %v8158_v13  ;;  %v8055_v13 = vmul.f32 %v18685_v45, %v18685_v45 }
 0x53f   :  { %v18699_v33 = vadd.f32 %v21010_v4, %v2299_v50  ;;  %v21015_v50 = vld [vmem:[#allocation167_spill] sm:$0xff] }
 0x540   :  { %v8353_v26 = vsel %vm21013_vm15, %v8055_v13, 0.0  ;;  %v21016_v4 = vld [vmem:[#allocation155_spill] sm:$0xff] }
 0x541   :  { %8348 = vadd.xlane.f32.xlu0 %v8347_v43  ;;  %v8164_v43 = vsel %vm21011_vm14, %v7992_v31, 0.0  ;;  %v7978_v45 = vmul.f32 %v18699_v33, %v18699_v33  ;;  %vm21053_vm14 = vmmov %vm20910_vm0 }
 0x542   :  { %8111 = vadd.xlane.f32.xlu1 %v8110_v10  ;;  %v21012_v10 = vld [vmem:[#allocation144_spill] sm:$0xff] }
 0x543   :  { %v8041_v14 = vmul.f32 %v21012_v10, %v21012_v10  ;;  %v8122_v10 = vsel %vm20910_vm0, %v7978_v45, 0.0 }
 0x545   :  { %8306 = vadd.xlane.f32.xlu0 %v8305_v18  ;;  %v2364_v18 = vmul.f32 %v21016_v4, %v21015_v50  ;;  %v21023_v50 = vld [vmem:[#allocation190_spill] sm:$0xff] }
 0x546   :  { %v8148_v16 = vpop.xlane.xlu0 %8147  ;;  %8165 = vadd.xlane.f32.xlu1 %v8164_v43  ;;  %v21019_v43 = vld [vmem:[#allocation166_spill] sm:$0xff]  ;;  %v2380_v4 = vmul.f32 %v21023_v50, %v21022_v59 }
 0x547   :  { %v8499_v28 = vmul.f32 0.0625, %v8148_v16  ;;  %v21017_v16 = vld [vmem:[#allocation150_spill] sm:$0xff]  ;;  %v8057_v13 = vmul.f32 %v21019_v43, %v21019_v43 }
 0x548   :  { %v18713_v31 = vadd.f32 %v21017_v16, %v2364_v18  ;;  %v21027_v16 = vld [vmem:[#allocation35_spill] sm:$0xff]  ;;  %v21031_v50 = vld [vmem:[#allocation38_spill] sm:$0xff] }
 0x549   :  { %v8627_v52 = vadd.f32 1e-05, %v8499_v28  ;;  %8354 = vadd.xlane.f32.xlu0 %v8353_v26  ;;  %v8311_v28 = vsel %vm21020_vm2, %v8041_v14, 0.0  ;;  %v21021_v26 = vld [vmem:[#allocation36_spill] sm:$0xff]  ;;  %v8359_v14 = vsel %vm21026_vm3, %v8057_v13, 0.0  ;;  %v7997_v43 = vmul.f32 %v21027_v16, %v21027_v16  ;;  %vm21061_vm2 = vmmov %vm20910_vm0 }
 0x54a   :  { %v18710_v23 = vpop.xlane.xlu0 %8108  ;;  %8117 = vadd.xlane.f32.xlu1 %v8116_v27  ;;  %21018 = vst [vmem:[#allocation234_spill] sm:$0xff] %v18713_v31  ;;  %v7996_v25 = vmul.f32 %v21021_v26, %v21021_v26  ;;  %v21024_v27 = vld [vmem:[#allocation148_spill] sm:$0xff]  ;;  %vm21068_vm3 = vmmov %vm20910_vm0 }
 0x54b   :  { %13752 = vrsqrt.f32 %v8627_v52  ;;  %v8043_v52 = vmul.f32 %v18713_v31, %v18713_v31  ;;  %v18728_v18 = vadd.f32 %v21024_v27, %v2380_v4  ;;  %v21032_v31 = vld [vmem:[#allocation266_spill] sm:$0xff]  ;;  %v21033_v4 = vld [vmem:[#allocation20_spill] sm:$0xff] }
 0x54c   :  { %v8176_v45 = vsel %vm21028_vm4, %v7996_v25, 0.0  ;;  %v7980_v27 = vmul.f32 %v21033_v4, %v21033_v4  ;;  %v21035_v25 = vld [vmem:[#allocation122_spill] sm:$0xff]  ;;  %vm21072_vm4 = vmmov %vm20910_vm0 }
 0x54d   :  { %8312 = vadd.xlane.f32.xlu0 %v8311_v28  ;;  %21025 = vst [vmem:[#allocation248_spill] sm:$0xff] %v18728_v18  ;;  %v21029_v28 = vld [vmem:[#allocation265_spill] sm:$0xff]  ;;  %v8059_v13 = vmul.f32 %v18728_v18, %v18728_v18  ;;  %v21043_v18 = vld [vmem:[#allocation79_spill] sm:$0xff] }
 0x54e   :  { %v18723_v53 = vpop.xlane.xlu0 %8162  ;;  %8123 = vadd.xlane.f32.xlu1 %v8122_v10  ;;  %v9001_v48 = vadd.s32 16, %v21029_v28  ;;  %v21030_v10 = vld [vmem:[#allocation84_spill] sm:$0xff]  ;;  %vm8996_vm9 = vcmp.eq.s32.totalorder %v21032_v31, %v21029_v28  ;;  %v8128_v51 = vsel %vm21045_vm11, %v7980_v27, 0.0  ;;  %vm21097_vm11 = vmmov %vm20910_vm0 }
 0x54f   :  { %v2319_v60 = vmul.f32 %v21031_v50, %v21030_v10  ;;  %v21040_v50 = vld [vmem:[#allocation22_spill] sm:$0xff]  ;;  %12960 = vmatprep.subr.msk.mxu1 %vm8996_vm9, %v20208_v39 }
 0x550   :  { %vm9003_vm5 = vcmp.eq.s32.totalorder %v21032_v31, %v9001_v48  ;;  %v21038_v48 = vld [vmem:[#allocation268_spill] sm:$0xff] }
 0x551   :  { %8360 = vadd.xlane.f32.xlu0 %v8359_v14  ;;  %v8317_v14 = vsel %vm21034_vm6, %v8043_v52, 0.0  ;;  %12932 = vmatprep.subr.msk.mxu0 %vm9003_vm5, %v20208_v39  ;;  %v18747_v34 = vadd.f32 %v21035_v25, %v2319_v60  ;;  %vm9002_vm8 = vcmp.eq.s32.totalorder %v21032_v31, %v21038_v48  ;;  %v21039_v52 = vld [vmem:[#allocation83_spill] sm:$0xff]  ;;  %v8365_v48 = vsel %vm21042_vm10, %v8059_v13, 0.0  ;;  %v21049_v13 = vld [vmem:[#allocation158_spill] sm:$0xff]  ;;  %vm21082_vm6 = vmmov %vm20910_vm0 }
 0x552   :  { %v18735_v59 = vpop.xlane.xlu0 %8114  ;;  %8177 = vadd.xlane.f32.xlu1 %v8176_v45  ;;  %v8179_v45 = vsel %vm21037_vm7, %v7997_v43, 0.0  ;;  %12933 = vmatpush3.msk.msra.mxu0 %vm9003_vm5, %v20208_v39  ;;  %v2303_v60 = vmul.f32 %v21040_v50, %v21039_v52  ;;  %vm21076_vm5 = vmmov %vm20910_vm0 }
 0x553   :  { %21036 = vst [vmem:[#allocation250_spill] sm:$0xff] %v18747_v34  ;;  %12934 = vmatprep.subr.msk.mxu0 %vm9002_vm8, %v20208_v39  ;;  %v7998_v50 = vmul.f32 %v18747_v34, %v18747_v34  ;;  %vm21083_vm7 = vmmov %vm20910_vm0 }
 0x554   :  { %12935 = vmatpush3.msk.msra.mxu0 %vm9002_vm8, %v20208_v39  ;;  %v2368_v39 = vmul.f32 %v21047_v37, %v21046_v15  ;;  %v21054_v37 = vld [vmem:[#allocation210_spill] sm:$0xff]  ;;  %vm21088_vm8 = vmmov %vm20910_vm0 }
 0x555   :  { %8318 = vadd.xlane.f32.xlu0 %v8317_v14  ;;  %v21041_v14 = vld [vmem:[#allocation146_spill] sm:$0xff]  ;;  %vm21093_vm10 = vmmov %vm20910_vm0 }
 0x556   :  { %v18755_v10 = vpop.xlane.xlu0 %8168  ;;  %8180 = vadd.xlane.f32.xlu1 %v8179_v45  ;;  %v8045_v25 = vmul.f32 %v21041_v14, %v21041_v14  ;;  %v18769_v45 = vadd.f32 %v21043_v18, %v2303_v60  ;;  %v18781_v14 = vadd.f32 %v21049_v13, %v2368_v39  ;;  %v21051_v18 = vld [vmem:[#allocation179_spill] sm:$0xff]  ;;  %v21055_v15 = vld [vmem:[#allocation198_spill] sm:$0xff] }
 0x557   :  { %v8061_v60 = vmul.f32 %v21051_v18, %v21051_v18  ;;  %v21056_v39 = vld [vmem:[#allocation3_spill] sm:$0xff]  ;;  %v21060_v18 = vld [vmem:[#allocation40_spill] sm:$0xff] }
 0x558   :  { %v13753_v43 = vpop.eup %13752  ;;  %21044 = vst [vmem:[#allocation238_spill] sm:$0xff] %v18769_v45  ;;  %21050 = vst [vmem:[#allocation258_spill] sm:$0xff] %v18781_v14  ;;  %v8323_v27 = vsel %vm21052_vm13, %v8045_v25, 0.0  ;;  %vm8995_vm15 = vcmp.eq.s32.totalorder %v21032_v31, %v21056_v39  ;;  %v8047_v13 = vmul.f32 %v18781_v14, %v18781_v14  ;;  %v21057_v25 = vld [vmem:[#allocation199_spill] sm:$0xff]  ;;  %v8000_v22 = vmul.f32 %v21060_v18, %v21060_v18  ;;  %v21064_v39 = vld [vmem:[#allocation42_spill] sm:$0xff] }
 0x559   :  { %8366 = vadd.xlane.f32.xlu0 %v8365_v48  ;;  %v8883_v52 = vmul.f32 %v13753_v43, %v18299_v21  ;;  %v8182_v21 = vsel %vm21053_vm14, %v7998_v50, 0.0  ;;  %v7982_v43 = vmul.f32 %v18769_v45, %v18769_v45  ;;  %v2384_v48 = vmul.f32 %v21055_v15, %v21054_v37  ;;  %v21066_v14 = vld [vmem:[#allocation91_spill] sm:$0xff]  ;;  %vm21104_vm13 = vmmov %vm20910_vm0  ;;  %v21132_v18 = vld [vmem:[#allocation229_spill] sm:$0xff] }
 0x55a   :  { %v18777_v32 = vpop.xlane.xlu0 %8120  ;;  %8129 = vadd.xlane.f32.xlu1 %v8128_v51  ;;  %v8371_v50 = vsel %vm21059_vm1, %v8061_v60, 0.0  ;;  %vm21110_vm14 = vmmov %vm20910_vm0 }
 0x55b   :  { %12936 = vmatprep.mubr.msk.f32.mxu0 %vm21048_vm12, %v8883_v52  ;;  %v8134_v37 = vsel %vm21061_vm2, %v7982_v43, 0.0  ;;  %v8329_v43 = vsel %vm20910_vm0, %v8047_v13, 0.0  ;;  %vm21101_vm12 = vmmov %vm20910_vm0 }
 0x55c   :  { %vm21116_vm1 = vmmov %vm20910_vm0 }
 0x55d   :  { %8324 = vadd.xlane.f32.xlu0 %v8323_v27  ;;  %v18798_v27 = vadd.f32 %v21057_v25, %v2384_v48  ;;  %v21063_v48 = vld [vmem:[#allocation95_spill] sm:$0xff]  ;;  %v21065_v25 = vld [vmem:[#allocation24_spill] sm:$0xff]  ;;  %vm21118_vm2 = vmmov %vm20910_vm0 }
 0x55e   :  { %v18791_v51 = vpop.xlane.xlu0 %8171  ;;  %8183 = vadd.xlane.f32.xlu1 %v8182_v21  ;;  %v21062_v21 = vmov 1.0   ;;  %v2323_v60 = vmul.f32 %v21064_v39, %v21063_v48  ;;  %v21069_v48 = vld [vmem:[#allocation96_spill] sm:$0xff] }
 0x55f   :  { %v7783_v52 = vpop.trf.xlu1  ;;  %21058 = vst [vmem:[#allocation246_spill] sm:$0xff] %v18798_v27  ;;  %v21070_v39 = vld [vmem:[#allocation88_spill] sm:$0xff] }
 0x560   :  { %12929 = vmatmul.mubr.bf16.vlgmr.msra.gmra.mxu1 %v7783_v52  ;;  %v8063_v52 = vmul.f32 %v18798_v27, %v18798_v27  ;;  %v18820_v17 = vadd.f32 %v21066_v14, %v2323_v60  ;;  %v2339_v6 = vmul.f32 %v21070_v39, %v21069_v48  ;;  %v8049_v27 = vmul.f32 %v21071_v2, %v21071_v2  ;;  %v21077_v60 = vld [vmem:[#allocation197_spill] sm:$0xff]  ;;  %v21079_v2 = vld [vmem:[#allocation178_spill] sm:$0xff] }
 0x561   :  { %8372 = vadd.xlane.f32.xlu0 %v8371_v50  ;;  %12961 = vmatpush3.msk.msra.mxu1 %vm8996_vm9, %v21062_v21  ;;  %v7984_v50 = vmul.f32 %v21065_v25, %v21065_v25  ;;  %vm21090_vm9 = vmmov %vm20910_vm0 }
 0x562   :  { %v18808_v15 = vpop.xlane.xlu0 %8174  ;;  %8135 = vadd.xlane.f32.xlu1 %v8134_v37  ;;  %12962 = vmatprep.subr.msk.mxu1 %vm8995_vm15, %v21062_v21  ;;  %21067 = vst [vmem:[#allocation249_spill] sm:$0xff] %v18820_v17  ;;  %v8188_v37 = vsel %vm21068_vm3, %v8000_v22, 0.0  ;;  %v8377_v13 = vsel %vm21072_vm4, %v8063_v52, 0.0  ;;  %v18833_v56 = vadd.f32 %v21074_v1, %v2339_v6  ;;  %v8002_v22 = vmul.f32 %v18820_v17, %v18820_v17  ;;  %v21102_v17 = vld [vmem:[#allocation105_spill] sm:$0xff]  ;;  %vm21120_vm3 = vmmov %vm20910_vm0 }
 0x563   :  { %12963 = vmatpush3.msk.msra.mxu1 %vm8995_vm15, %v21062_v21  ;;  %v8140_v14 = vsel %vm21076_vm5, %v7984_v50, 0.0  ;;  %v8065_v52 = vmul.f32 %v21079_v2, %v21079_v2  ;;  %v8335_v1 = vsel %vm21082_vm6, %v8049_v27, 0.0  ;;  %vm21111_vm15 = vmmov %vm20910_vm0 }
 0x564   :  { %21075 = vst [vmem:[#allocation257_spill] sm:$0xff] %v18833_v56  ;;  %v8194_v50 = vsel %vm21083_vm7, %v8002_v22, 0.0  ;;  %vm21125_vm4 = vmmov %vm20910_vm0 }
 0x565   :  { %8330 = vadd.xlane.f32.xlu0 %v8329_v43  ;;  %v21078_v43 = vld [vmem:[#allocation207_spill] sm:$0xff]  ;;  %v8383_v27 = vsel %vm21088_vm8, %v8065_v52, 0.0  ;;  %v21096_v52 = vld [vmem:[#allocation94_spill] sm:$0xff]  ;;  %vm21131_vm5 = vmmov %vm20910_vm0 }
 0x566   :  { %v18823_v40 = vpop.xlane.xlu0 %8126  ;;  %8189 = vadd.xlane.f32.xlu1 %v8188_v37  ;;  %v2388_v37 = vmul.f32 %v21078_v43, %v21077_v60  ;;  %v21084_v60 = vld [vmem:[#allocation226_spill] sm:$0xff]  ;;  %v21085_v43 = vld [vmem:[#allocation239_spill] sm:$0xff]  ;;  %vm21139_vm6 = vmmov %vm20910_vm0 }
 0x567   :  { %v2404_v19 = vmul.f32 %v21085_v43, %v21084_v60  ;;  %v21091_v60 = vld [vmem:[#allocation108_spill] sm:$0xff]  ;;  %vm21142_vm7 = vmmov %vm20910_vm0 }
 0x568   :  { %v18830_v58 = vpop.f32.mrf.mxu1  ;;  %vm21147_vm8 = vmmov %vm20910_vm0 }
 0x569   :  { %21073 = vst [vmem:[#allocation254_spill] sm:$0xff] %v18830_v58  ;;  %8378 = vadd.xlane.f32.xlu0 %v8377_v13  ;;  %v21080_v58 = vld [vmem:[#allocation183_spill] sm:$0xff]  ;;  %v8018_v13 = vmul.f32 %v18833_v56, %v18833_v56 }
 0x56a   :  { %v18840_v48 = vpop.xlane.xlu0 %8132  ;;  %8141 = vadd.xlane.f32.xlu1 %v8140_v14  ;;  %v12850_v39 = vpop.f32.mrf.mxu1  ;;  %v18845_v29 = vadd.f32 %v21080_v58, %v2388_v37  ;;  %v21086_v37 = vld [vmem:[#allocation212_spill] sm:$0xff] }
 0x56b   :  { %v18858_v2 = vadd.f32 %v21086_v37, %v2404_v19  ;;  %v21094_v37 = vld [vmem:[#allocation104_spill] sm:$0xff] }
 0x56c   :  { %21081 = vst [vmem:[#allocation252_spill] sm:$0xff] %v18845_v29  ;;  %v7604_v6 = vpop.f32.mrf.mxu1  ;;  %v8067_v58 = vmul.f32 %v18845_v29, %v18845_v29 }
 0x56d   :  { %8336 = vadd.xlane.f32.xlu0 %v8335_v1  ;;  %21087 = vst [vmem:[#allocation264_spill] sm:$0xff] %v18858_v2  ;;  %v21089_v1 = vld [vmem:[#allocation46_spill] sm:$0xff]  ;;  %v8242_v6 = vsel %vm21090_vm9, %v8018_v13, 0.0  ;;  %vm21148_vm9 = vmmov %vm20910_vm0 }
 0x56e   :  { %v18853_v14 = vpop.xlane.xlu0 %8186  ;;  %8195 = vadd.xlane.f32.xlu1 %v8194_v50  ;;  %v12851_v39 = vpop.f32.mrf.mxu1  ;;  %v8004_v22 = vmul.f32 %v21089_v1, %v21089_v1  ;;  %v21092_v50 = vld [vmem:[#allocation52_spill] sm:$0xff]  ;;  %v8389_v19 = vsel %vm21093_vm10, %v8067_v58, 0.0  ;;  %v8020_v1 = vmul.f32 %v21096_v52, %v21096_v52  ;;  %v21106_v52 = vld [vmem:[#allocation215_spill] sm:$0xff]  ;;  %vm21152_vm10 = vmmov %vm20910_vm0 }
 0x56f   :  { %v2327_v43 = vmul.f32 %v21092_v50, %v21091_v60  ;;  %v8083_v39 = vmul.f32 %v18858_v2, %v18858_v2  ;;  %v21100_v50 = vld [vmem:[#allocation172_spill] sm:$0xff] }
 0x570   :  { %v8200_v13 = vsel %vm21097_vm11, %v8004_v22, 0.0  ;;  %v8069_v2 = vmul.f32 %v21100_v50, %v21100_v50  ;;  %v21109_v50 = vld [vmem:[#allocation206_spill] sm:$0xff]  ;;  %vm21156_vm11 = vmmov %vm20910_vm0 }
 0x571   :  { %8384 = vadd.xlane.f32.xlu0 %v8383_v27  ;;  %v18872_v29 = vadd.f32 %v21094_v37, %v2327_v43  ;;  %v8437_v58 = vsel %vm21101_vm12, %v8083_v39, 0.0  ;;  %v8248_v37 = vsel %vm21104_vm13, %v8020_v1, 0.0  ;;  %v8085_v39 = vmul.f32 %v21109_v50, %v21109_v50  ;;  %vm21161_vm13 = vmmov %vm20910_vm0 }
 0x572   :  { %v18864_v56 = vpop.xlane.xlu0 %8138  ;;  %8243 = vadd.xlane.f32.xlu1 %v8242_v6  ;;  %v21098_v6 = vld [vmem:[#allocation109_spill] sm:$0xff] }
 0x573   :  { %21095 = vst [vmem:[#allocation259_spill] sm:$0xff] %v18872_v29  ;;  %v2343_v60 = vmul.f32 %v21099_v41, %v21098_v6  ;;  %v8006_v22 = vmul.f32 %v18872_v29, %v18872_v29  ;;  %v21107_v41 = vld [vmem:[#allocation184_spill] sm:$0xff]  ;;  %v21113_v29 = vld [vmem:[#allocation247_spill] sm:$0xff] }
 0x575   :  { %8390 = vadd.xlane.f32.xlu0 %v8389_v19  ;;  %v18885_v43 = vadd.f32 %v21102_v17, %v2343_v60  ;;  %v21105_v19 = vld [vmem:[#allocation213_spill] sm:$0xff]  ;;  %v8395_v17 = vsel %vm21110_vm14, %v8069_v2, 0.0  ;;  %v8206_v1 = vsel %vm21111_vm15, %v8006_v22, 0.0  ;;  %v8443_v2 = vsel %vm21116_vm1, %v8085_v39, 0.0  ;;  %vm21164_vm15 = vmmov %vm20910_vm0 }
 0x576   :  { %v18877_v27 = vpop.xlane.xlu0 %8192  ;;  %8201 = vadd.xlane.f32.xlu1 %v8200_v13  ;;  %v2392_v13 = vmul.f32 %v21106_v52, %v21105_v19  ;;  %vm21170_vm1 = vmmov %vm20910_vm0 }
 0x577   :  { %21103 = vst [vmem:[#allocation262_spill] sm:$0xff] %v18885_v43  ;;  %v8022_v60 = vmul.f32 %v18885_v43, %v18885_v43 }
 0x578   :  { %v18895_v6 = vadd.f32 %v21107_v41, %v2392_v13  ;;  %v21114_v13 = vld [vmem:[#allocation211_spill] sm:$0xff] }
 0x579   :  { %8438 = vadd.xlane.f32.xlu0 %v8437_v58  ;;  %v21112_v58 = vld [vmem:[#allocation242_spill] sm:$0xff]  ;;  %v8254_v50 = vsel %vm21118_vm2, %v8022_v60, 0.0  ;;  %vm21171_vm2 = vmmov %vm20910_vm0 }
 0x57a   :  { %v18892_v63 = vpop.xlane.xlu0 %8144  ;;  %8249 = vadd.xlane.f32.xlu1 %v8248_v37  ;;  %21108 = vst [vmem:[#allocation261_spill] sm:$0xff] %v18895_v6  ;;  %v2408_v52 = vmul.f32 %v21113_v29, %v21112_v58  ;;  %v8071_v37 = vmul.f32 %v18895_v6, %v18895_v6  ;;  %v21119_v58 = vld [vmem:[#allocation107_spill] sm:$0xff]  ;;  %v21123_v6 = vld [vmem:[#allocation64_spill] sm:$0xff] }
 0x57c   :  { %v18910_v41 = vadd.f32 %v21114_v13, %v2408_v52  ;;  %v8024_v52 = vmul.f32 %v21119_v58, %v21119_v58 }
 0x57d   :  { %8396 = vadd.xlane.f32.xlu0 %v8395_v17  ;;  %v21117_v17 = vld [vmem:[#allocation58_spill] sm:$0xff] }
 0x57e   :  { %v18905_v19 = vpop.xlane.xlu0 %8198  ;;  %8207 = vadd.xlane.f32.xlu1 %v8206_v1  ;;  %21115 = vst [vmem:[#allocation263_spill] sm:$0xff] %v18910_v41  ;;  %v8008_v22 = vmul.f32 %v21117_v17, %v21117_v17  ;;  %v8087_v29 = vmul.f32 %v18910_v41, %v18910_v41  ;;  %v8401_v1 = vsel %vm20910_vm0, %v8071_v37, 0.0  ;;  %v21124_v17 = vld [vmem:[#allocation195_spill] sm:$0xff] }
 0x580   :  { %v8212_v39 = vsel %vm21120_vm3, %v8008_v22, 0.0  ;;  %v8449_v25 = vsel %vm21125_vm4, %v8087_v29, 0.0  ;;  %vm21177_vm3 = vmmov %vm20910_vm0 }
 0x581   :  { %8444 = vadd.xlane.f32.xlu0 %v8443_v2  ;;  %v21122_v2 = vld [vmem:[#allocation120_spill] sm:$0xff]  ;;  %vm21179_vm4 = vmmov %vm20910_vm0 }
 0x582   :  { %v18916_v43 = vpop.xlane.xlu0 %8246  ;;  %8255 = vadd.xlane.f32.xlu1 %v8254_v50  ;;  %v2331_v60 = vmul.f32 %v21123_v6, %v21122_v2  ;;  %v8073_v50 = vmul.f32 %v21124_v17, %v21124_v17  ;;  %v21133_v6 = vld [vmem:[#allocation223_spill] sm:$0xff]  ;;  %v21134_v17 = vld [vmem:[#allocation121_spill] sm:$0xff] }
 0x583   :  { %v2396_v2 = vmul.f32 %v21133_v6, %v21132_v18 }
 0x584   :  { %v18936_v58 = vadd.f32 %v21128_v7, %v2331_v60  ;;  %v21138_v60 = vld [vmem:[#allocation208_spill] sm:$0xff] }
 0x585   :  { %8402 = vadd.xlane.f32.xlu0 %v8401_v1  ;;  %v21130_v1 = vld [vmem:[#allocation106_spill] sm:$0xff]  ;;  %v18948_v7 = vadd.f32 %v21136_v3, %v2396_v2 }
 0x586   :  { %v18924_v13 = vpop.xlane.xlu0 %8204  ;;  %8213 = vadd.xlane.f32.xlu1 %v8212_v39  ;;  %21129 = vst [vmem:[#allocation48_spill] sm:$0xff] %v18936_v58  ;;  %v8025_v22 = vmul.f32 %v21130_v1, %v21130_v1  ;;  %v8260_v39 = vsel %vm21131_vm5, %v8024_v52, 0.0  ;;  %v8089_v1 = vmul.f32 %v21138_v60, %v21138_v60  ;;  %vm21181_vm5 = vmmov %vm20910_vm0 }
 0x587   :  { %21121 = vst [vmem:[#allocation267_spill] sm:$0xff] %v18924_v13  ;;  %21137 = vst [vmem:[#allocation26_spill] sm:$0xff] %v18948_v7  ;;  %v21140_v13 = vld [vmem:[#allocation117_spill] sm:$0xff] }
 0x588   :  { %v18931_v41 = vpop.f32.mrf.mxu0  ;;  %v18933_v37 = vpop.f32.mrf.mxu1  ;;  %v8263_v18 = vsel %vm21142_vm7, %v8025_v22, 0.0  ;;  %v8455_v22 = vsel %vm21147_vm8, %v8089_v1, 0.0  ;;  %v21155_v1 = vld [vmem:[#allocation119_spill] sm:$0xff]  ;;  %vm21187_vm7 = vmmov %vm20910_vm0 }
 0x589   :  { %21126 = vst [vmem:[#allocation97_spill] sm:$0xff] %v18931_v41  ;;  %21127 = vst [vmem:[#allocation228_spill] sm:$0xff] %v18933_v37  ;;  %8450 = vadd.xlane.f32.xlu0 %v8449_v25  ;;  %v21135_v41 = vld [vmem:[#allocation113_spill] sm:$0xff]  ;;  %v8407_v25 = vsel %vm21139_vm6, %v8073_v50, 0.0  ;;  %v8075_v50 = vmul.f32 %v18948_v7, %v18948_v7  ;;  %v18986_v7 = vadd.s32 32, %v21029_v28 }
 0x58a   :  { %v18943_v8 = vpop.xlane.xlu0 %8252  ;;  %8261 = vadd.xlane.f32.xlu1 %v8260_v39  ;;  %v12870_v29 = vpop.f32.mrf.mxu0  ;;  %v2347_v45 = vmul.f32 %v21135_v41, %v21134_v17  ;;  %v8010_v39 = vmul.f32 %v18936_v58, %v18936_v58  ;;  %v21143_v17 = vld [vmem:[#allocation256_spill] sm:$0xff]  ;;  %v21172_v58 = vld [vmem:[#allocation269_spill] sm:$0xff]  ;;  %vm21184_vm6 = vmmov %vm20910_vm0 }
 0x58b   :  { %v12890_v37 = vpop.f32.mrf.mxu1  ;;  %vm9396_vm12 = vcmp.eq.s32.totalorder %v21032_v31, %v18986_v7  ;;  %vm21190_vm8 = vmmov %vm20910_vm0 }
 0x58c   :  { %v7660_v52 = vpop.f32.mrf.mxu0  ;;  %v18954_v34 = vadd.f32 %v21140_v13, %v2347_v45  ;;  %v21144_v37 = vld [vmem:[#allocation253_spill] sm:$0xff]  ;;  %12988 = vmatprep.subr.msk.mxu0 %vm9396_vm12, %v21062_v21 }
 0x58d   :  { %8408 = vadd.xlane.f32.xlu0 %v8407_v25  ;;  %v7716_v41 = vpop.f32.mrf.mxu1  ;;  %v2412_v3 = vmul.f32 %v21144_v37, %v21143_v17  ;;  %v21145_v45 = vld [vmem:[#allocation205_spill] sm:$0xff]  ;;  %v8218_v25 = vsel %vm21148_vm9, %v8010_v39, 0.0  ;;  %v21151_v17 = vld [vmem:[#allocation76_spill] sm:$0xff]  ;;  %v8028_v39 = vmul.f32 %v21155_v1, %v21155_v1  ;;  %vm21192_vm9 = vmmov %vm20910_vm0 }
 0x58e   :  { %21141 = vst [vmem:[#allocation28_spill] sm:$0xff] %v18954_v34  ;;  %8264 = vadd.xlane.f32.xlu1 %v8263_v18  ;;  %v18961_v6 = vpop.xlane.xlu0 %8210  ;;  %v12871_v2 = vpop.f32.mrf.mxu0  ;;  %v8026_v52 = vmul.f32 %v18954_v34, %v18954_v34  ;;  %v21150_v18 = vld [vmem:[#allocation132_spill] sm:$0xff] }
 0x58f   :  { %v12891_v29 = vpop.f32.mrf.mxu1  ;;  %v18966_v13 = vadd.f32 %v21145_v45, %v2412_v3  ;;  %v2335_v37 = vmul.f32 %v21151_v17, %v21150_v18  ;;  %v8413_v3 = vsel %vm21152_vm10, %v8075_v50, 0.0  ;;  %v18991_v18 = vadd.s32 48, %v21029_v28  ;;  %v21158_v17 = vld [vmem:[#allocation133_spill] sm:$0xff]  ;;  %vm21194_vm10 = vmmov %vm20910_vm0 }
 0x590   :  { %v21153_v29 = vld [vmem:[#allocation6_spill] sm:$0xff]  ;;  %v21159_v50 = vld [vmem:[#allocation125_spill] sm:$0xff] }
 0x591   :  { %21146 = vst [vmem:[#allocation66_spill] sm:$0xff] %v18966_v13  ;;  %8456 = vadd.xlane.f32.xlu0 %v8455_v22  ;;  %v8091_v2 = vmul.f32 %v18966_v13, %v18966_v13  ;;  %v18980_v45 = vadd.f32 %v21153_v29, %v2335_v37  ;;  %v8266_v22 = vsel %vm21156_vm11, %v8026_v52, 0.0  ;;  %v2351_v13 = vmul.f32 %v21159_v50, %v21158_v17  ;;  %v21160_v37 = vld [vmem:[#allocation194_spill] sm:$0xff]  ;;  %v21162_v29 = vld [vmem:[#allocation129_spill] sm:$0xff]  ;;  %vm21196_vm11 = vmmov %vm20910_vm0 }
 0x592   :  { %v18972_v41 = vpop.xlane.xlu0 %8258  ;;  %8219 = vadd.xlane.f32.xlu1 %v8218_v25  ;;  %vm9612_vm14 = vcmp.eq.s32.totalorder %v21032_v31, %v18991_v18  ;;  %v8272_v17 = vsel %vm21164_vm15, %v8028_v39, 0.0  ;;  %vm21205_vm15 = vmmov %vm20910_vm0  ;;  %v8508_v18 = vmul.f32 0.0625, %v18808_v15 }
 0x593   :  { %21149 = vst [vmem:[#allocation29_spill] sm:$0xff] %v18972_v41  ;;  %21154 = vst [vmem:[#allocation10_spill] sm:$0xff] %v18980_v45  ;;  %v8461_v52 = vsel %vm21161_vm13, %v8091_v2, 0.0  ;;  %v8014_v50 = vmul.f32 %v18980_v45, %v18980_v45  ;;  %13016 = vmatprep.subr.msk.mxu1 %vm9612_vm14, %v21062_v21  ;;  %v21165_v2 = vld [vmem:[#allocation245_spill] sm:$0xff]  ;;  %v21213_v41 = vld [vmem:[#allocation270_spill] sm:$0xff] }
 0x594   :  { %vm21199_vm13 = vmmov %vm20910_vm0 }
 0x595   :  { %8414 = vadd.xlane.f32.xlu0 %v8413_v3  ;;  %v8077_v3 = vmul.f32 %v21160_v37, %v21160_v37  ;;  %v21166_v37 = vld [vmem:[#allocation231_spill] sm:$0xff]  ;;  %v8230_v45 = vsel %vm21171_vm2, %v8014_v50, 0.0  ;;  %vm21211_vm2 = vmmov %vm20910_vm0 }
 0x596   :  { %v18988_v25 = vpop.xlane.xlu0 %8216  ;;  %8267 = vadd.xlane.f32.xlu1 %v8266_v22  ;;  %v19007_v22 = vadd.f32 %v21162_v29, %v2351_v13  ;;  %v2400_v60 = vmul.f32 %v21166_v37, %v21165_v2  ;;  %v21176_v2 = vld [vmem:[#allocation82_spill] sm:$0xff] }
 0x597   :  { %21157 = vst [vmem:[#allocation277_spill] sm:$0xff] %v18988_v25  ;;  %v8419_v29 = vsel %vm21170_vm1, %v8077_v3, 0.0  ;;  %v21173_v25 = vld [vmem:[#allocation260_spill] sm:$0xff]  ;;  %v8016_v50 = vmul.f32 %v21176_v2, %v21176_v2  ;;  %v21186_v2 = vld [vmem:[#allocation141_spill] sm:$0xff]  ;;  %vm21208_vm1 = vmmov %vm20910_vm0 }
 0x598   :  { %21163 = vst [vmem:[#allocation65_spill] sm:$0xff] %v19007_v22  ;;  %v19021_v13 = vadd.f32 %v18117_v30, %v2400_v60  ;;  %v8030_v34 = vmul.f32 %v19007_v22, %v19007_v22  ;;  %v2416_v37 = vmul.f32 %v21173_v25, %v21172_v58  ;;  %v21180_v25 = vld [vmem:[#allocation131_spill] sm:$0xff] }
 0x599   :  { %8462 = vadd.xlane.f32.xlu0 %v8461_v52  ;;  %v21169_v52 = vld [vmem:[#allocation201_spill] sm:$0xff] }
 0x59a   :  { %8273 = vadd.xlane.f32.xlu1 %v8272_v17  ;;  %v19018_v1 = vpop.xlane.xlu0 %8222  ;;  %21168 = vst [vmem:[#allocation61_spill] sm:$0xff] %v19021_v13  ;;  %v8093_v39 = vmul.f32 %v21169_v52, %v21169_v52  ;;  %v8079_v30 = vmul.f32 %v19021_v13, %v19021_v13  ;;  %v19036_v60 = vadd.f32 %v18573_v38, %v2416_v37 }
 0x59b   :  { %21167 = vst [vmem:[#allocation13_spill] sm:$0xff] %v19018_v1  ;;  %v8032_v38 = vmul.f32 %v21180_v25, %v21180_v25 }
 0x59c   :  { %21175 = vst [vmem:[#allocation62_spill] sm:$0xff] %v19036_v60  ;;  %v8467_v3 = vsel %vm20910_vm0, %v8093_v39, 0.0  ;;  %v8095_v58 = vmul.f32 %v19036_v60, %v19036_v60  ;;  %v8236_v39 = vsel %vm21181_vm5, %v8016_v50, 0.0  ;;  %v8034_v60 = vmul.f32 %v21186_v2, %v21186_v2  ;;  %vm21219_vm5 = vmmov %vm21208_vm1 }
 0x59d   :  { %8420 = vadd.xlane.f32.xlu0 %v8419_v29  ;;  %v8278_v29 = vsel %vm21177_vm3, %v8030_v34, 0.0  ;;  %vm9395_vm0 = vcmp.eq.s32.totalorder %v21032_v31, %v21213_v41  ;;  %vm21214_vm3 = vmmov %vm21208_vm1 }
 0x59e   :  { %v19031_v17 = vpop.xlane.xlu0 %8270  ;;  %8231 = vadd.xlane.f32.xlu1 %v8230_v45  ;;  %v8425_v45 = vsel %vm21179_vm4, %v8079_v30, 0.0  ;;  %v8473_v13 = vsel %vm21184_vm6, %v8095_v58, 0.0  ;;  %v8284_v30 = vsel %vm21187_vm7, %v8032_v38, 0.0  ;;  %vm21216_vm4 = vmmov %vm21208_vm1 }
 0x59f   :  { %21174 = vst [vmem:[#allocation31_spill] sm:$0xff] %v19031_v17  ;;  %vm21221_vm7 = vmmov %vm21208_vm1 }
 0x5a1   :  { %8468 = vadd.xlane.f32.xlu0 %v8467_v3  ;;  %v21183_v3 = vld [vmem:[#allocation204_spill] sm:$0xff] }
 0x5a2   :  { %v19042_v52 = vpop.xlane.xlu0 %8225  ;;  %8279 = vadd.xlane.f32.xlu1 %v8278_v29  ;;  %v8081_v34 = vmul.f32 %v21183_v3, %v21183_v3 }
 0x5a3   :  { %21178 = vst [vmem:[#allocation56_spill] sm:$0xff] %v19042_v52 }
 0x5a4   :  { %v8431_v22 = vsel %vm21190_vm8, %v8081_v34, 0.0  ;;  %vm21223_vm8 = vmmov %vm21208_vm1 }
 0x5a5   :  { %8426 = vadd.xlane.f32.xlu0 %v8425_v45  ;;  %v21189_v45 = vld [vmem:[#allocation209_spill] sm:$0xff] }
 0x5a6   :  { %v19050_v37 = vpop.xlane.xlu0 %8228  ;;  %8237 = vadd.xlane.f32.xlu1 %v8236_v39  ;;  %v8097_v39 = vmul.f32 %v21189_v45, %v21189_v45 }
 0x5a7   :  { %21182 = vst [vmem:[#allocation72_spill] sm:$0xff] %v19050_v37  ;;  %v21191_v37 = vld [vmem:[#allocation160_spill] sm:$0xff] }
 0x5a8   :  { %v19055_v29 = vpop.f32.mrf.mxu0  ;;  %v8050_v58 = vmul.f32 %v21191_v37, %v21191_v37  ;;  %v21198_v37 = vld [vmem:[#allocation156_spill] sm:$0xff] }
 0x5a9   :  { %21185 = vst [vmem:[#allocation34_spill] sm:$0xff] %v19055_v29  ;;  %8474 = vadd.xlane.f32.xlu0 %v8473_v13  ;;  %v8290_v29 = vsel %vm21192_vm9, %v8034_v60, 0.0 }
 0x5aa   :  { %v19060_v25 = vpop.xlane.xlu0 %8276  ;;  %8285 = vadd.xlane.f32.xlu1 %v8284_v30  ;;  %v12910_v50 = vpop.f32.mrf.mxu0  ;;  %v8479_v30 = vsel %vm21194_vm10, %v8097_v39, 0.0  ;;  %vm21226_vm10 = vmmov %vm21208_vm1 }
 0x5ab   :  { %21188 = vst [vmem:[#allocation15_spill] sm:$0xff] %v19060_v25  ;;  %v21195_v50 = vld [vmem:[#allocation138_spill] sm:$0xff] }
 0x5ac   :  { %v7772_v3 = vpop.f32.mrf.mxu0  ;;  %v8036_v45 = vmul.f32 %v21195_v50, %v21195_v50 }
 0x5ad   :  { %8432 = vadd.xlane.f32.xlu0 %v8431_v22  ;;  %v8338_v3 = vsel %vm21196_vm11, %v8050_v58, 0.0 }
 0x5ae   :  { %v19068_v2 = vpop.xlane.xlu0 %8234  ;;  %8291 = vadd.xlane.f32.xlu1 %v8290_v29  ;;  %v12911_v13 = vpop.f32.mrf.mxu0  ;;  %v8052_v29 = vmul.f32 %v21198_v37, %v21198_v37 }
 0x5af   :  { %21193 = vst [vmem:[#allocation68_spill] sm:$0xff] %v19068_v2  ;;  %v8151_v38 = vpop.xlane.xlu1 %8150  ;;  %v8296_v13 = vsel %vm21199_vm13, %v8036_v45, 0.0  ;;  %v21202_v2 = vld [vmem:[#allocation5_spill] sm:$0xff]  ;;  %vm21227_vm13 = vmmov %vm21208_vm1 }
 0x5b0   :  { %v8500_v25 = vmul.f32 0.0625, %v8151_v38 }
 0x5b1   :  { %8480 = vadd.xlane.f32.xlu0 %v8479_v30  ;;  %v21201_v30 = vld [vmem:[#allocation255_spill] sm:$0xff] }
 0x5b2   :  { %v8628_v34 = vadd.f32 1e-05, %v8500_v25  ;;  %v19074_v17 = vpop.xlane.xlu0 %8282  ;;  %8339 = vadd.xlane.f32.xlu1 %v8338_v3  ;;  %v19083_v58 = vrot.slane %v21202_v2, %v21201_v30  ;;  %v21204_v3 = vld [vmem:[#allocation140_spill] sm:$0xff] }
 0x5b3   :  { %21197 = vst [vmem:[#allocation78_spill] sm:$0xff] %v19074_v17  ;;  %v8100_v22 = vpop.xlane.xlu1 %8099 }
 0x5b4   :  { %13754 = vrsqrt.f32 %v8628_v34  ;;  %v8483_v60 = vmul.f32 0.0625, %v8100_v22  ;;  %21203 = vst [vmem:[#allocation74_spill] sm:$0xff] %v19083_v58  ;;  %v8038_v34 = vmul.f32 %v21204_v3, %v21204_v3  ;;  %v8344_v22 = vsel %vm21205_vm15, %v8052_v29, 0.0  ;;  %vm21229_vm15 = vmmov %vm21208_vm1 }
 0x5b6   :  { %v8611_v38 = vadd.f32 1e-05, %v8483_v60  ;;  %v19079_v39 = vpop.xlane.xlu0 %8240  ;;  %8297 = vadd.xlane.f32.xlu1 %v8296_v13  ;;  %v7847_v60 = vcombine.high %v19083_v58, %v19083_v58  ;;  %v7832_v13 = vcombine.high %v21202_v2, %v21202_v2  ;;  %v8302_v3 = vsel %vm21208_vm1, %v8038_v34, 0.0 }
 0x5b7   :  { %21200 = vst [vmem:[#allocation33_spill] sm:$0xff] %v19079_v39  ;;  %v8103_v50 = vpop.xlane.xlu1 %8102  ;;  %v8504_v34 = vmul.f32 0.0625, %v18723_v53  ;;  %v21215_v53 = vld [vmem:[#allocation171_spill] sm:$0xff] }
 0x5b8   :  { %13756 = vrsqrt.f32 %v8611_v38  ;;  %v8484_v25 = vmul.f32 0.0625, %v8103_v50  ;;  %v21207_v38 = vld [vmem:[#allocation175_spill] sm:$0xff]  ;;  %v19104_v58 = vrot.slane %v7832_v13, %v21201_v30  ;;  %v21212_v13 = vld [vmem:[#allocation4_spill] sm:$0xff] }
 0x5b9   :  { %v8054_v50 = vmul.f32 %v21207_v38, %v21207_v38 }
 0x5ba   :  { %v8612_v17 = vadd.f32 1e-05, %v8484_v25  ;;  %v19088_v37 = vpop.xlane.xlu0 %8288  ;;  %8345 = vadd.xlane.f32.xlu1 %v8344_v22  ;;  %v8486_v25 = vmul.f32 0.0625, %v18710_v23 }
 0x5bb   :  { %21206 = vst [vmem:[#allocation77_spill] sm:$0xff] %v19088_v37  ;;  %v8154_v45 = vpop.xlane.xlu1 %8153  ;;  %v19101_v37 = vrot.slane %v7847_v60, %v21201_v30 }
 0x5bc   :  { %13758 = vrsqrt.f32 %v8612_v17  ;;  %v8501_v39 = vmul.f32 0.0625, %v8154_v45  ;;  %v21210_v45 = vld [vmem:[#allocation136_spill] sm:$0xff]  ;;  %v8614_v60 = vadd.f32 1e-05, %v8486_v25 }
 0x5bd   :  { %v8040_v38 = vmul.f32 %v21210_v45, %v21210_v45 }
 0x5be   :  { %v8629_v52 = vadd.f32 1e-05, %v8501_v39  ;;  %v19097_v29 = vpop.xlane.xlu0 %8294  ;;  %8303 = vadd.xlane.f32.xlu1 %v8302_v3  ;;  %v8350_v39 = vsel %vm21211_vm2, %v8054_v50, 0.0  ;;  %vm21231_vm2 = vmmov %vm21208_vm1 }
 0x5bf   :  { %21209 = vst [vmem:[#allocation17_spill] sm:$0xff] %v19097_v29  ;;  %v8157_v22 = vpop.xlane.xlu1 %8156  ;;  %v8308_v25 = vsel %vm21216_vm4, %v8040_v38, 0.0  ;;  %v8488_v38 = vmul.f32 0.0625, %v18735_v59  ;;  %v8506_v59 = vmul.f32 0.0625, %v18755_v10 }
 0x5c0   :  { %13760 = vrsqrt.f32 %v8629_v52  ;;  %v8502_v17 = vmul.f32 0.0625, %v8157_v22  ;;  %v7888_v52 = vrot.slane %v19101_v37, %v21212_v13  ;;  %v7862_v22 = vrot.slane %v19104_v58, %v21201_v30 }
 0x5c1   :  { %v13755_v2 = vpop.eup %13754  ;;  %v8616_v41 = vadd.f32 1e-05, %v8488_v38 }
 0x5c2   :  { %v8884_v3 = vmul.f32 %v13755_v2, %v18588_v57  ;;  %v8630_v23 = vadd.f32 1e-05, %v8502_v17  ;;  %v19111_v29 = vpop.xlane.xlu0 %8342  ;;  %8351 = vadd.xlane.f32.xlu1 %v8350_v39  ;;  %v8056_v17 = vmul.f32 %v21215_v53, %v21215_v53  ;;  %v8632_v2 = vadd.f32 1e-05, %v8504_v34  ;;  %v21220_v53 = vld [vmem:[#allocation271_spill] sm:$0xff] }
 0x5c3   :  { %v8106_v1 = vpop.xlane.xlu1 %8105  ;;  %v7900_v7 = vrot.slane %v7862_v22, %v21212_v13  ;;  %vm9611_vm6 = vcmp.eq.s32.totalorder %v21032_v31, %v21220_v53 }
 0x5c4   :  { %13762 = vrsqrt.f32 %v8630_v23  ;;  %v8485_v50 = vmul.f32 0.0625, %v8106_v1  ;;  %12937 = vmatmul.mubr.msk.f32.vlgmr.msra.gmra.mxu0 %vm21214_vm3, %v8884_v3  ;;  %v7878_v23 = vcombine.high %v7862_v22, %v7862_v22 }
 0x5c5   :  { %v13757_v57 = vpop.eup %13756  ;;  %12989 = vmatpush3.msk.msra.mxu0 %vm9396_vm12, %v21062_v21  ;;  %13764 = vrsqrt.f32 %v8614_v60  ;;  %vm21217_vm12 = vmmov %vm21208_vm1 }
 0x5c6   :  { %v8613_v39 = vadd.f32 1e-05, %v8485_v50  ;;  %v19127_v45 = vpop.xlane.xlu0 %8300  ;;  %8309 = vadd.xlane.f32.xlu1 %v8308_v25  ;;  %v8867_v1 = vmul.f32 %v13757_v57, %v18604_v54  ;;  %12990 = vmatprep.subr.msk.mxu0 %vm9395_vm0, %v21062_v21  ;;  %v21218_v50 = vld [vmem:[#allocation152_spill] sm:$0xff] }
 0x5c7   :  { %v8160_v3 = vpop.xlane.xlu1 %8159  ;;  %7918 = vperm.xlu0 %13233, %v7888_v52   ;;  %12991 = vmatpush3.msk.msra.mxu0 %vm9395_vm0, %v21062_v21  ;;  %v8042_v60 = vmul.f32 %v21218_v50, %v21218_v50  ;;  %v8356_v52 = vsel %vm21219_vm5, %v8056_v17, 0.0  ;;  %vm21232_vm0 = vmmov %vm21208_vm1 }
 0x5c8   :  { %13766 = vrsqrt.f32 %v8613_v39  ;;  %v8503_v54 = vmul.f32 0.0625, %v8160_v3  ;;  %12964 = vmatprep.mubr.msk.f32.mxu1 %vm21217_vm12, %v8867_v1  ;;  %v8507_v39 = vmul.f32 0.0625, %v18791_v51  ;;  %v7908_v1 = vrot.slane %v7878_v23, %v21212_v13  ;;  %vm21233_vm3 = vmmov %vm21232_vm0 }
 0x5c9   :  { %v13759_v34 = vpop.eup %13758  ;;  %13768 = vrsqrt.f32 %v8632_v2  ;;  %v21222_v2 = vld [vmem:[#allocation177_spill] sm:$0xff]  ;;  %v8314_v51 = vsel %vm21223_vm8, %v8042_v60, 0.0  ;;  %vm21235_vm4 = vmmov %vm21232_vm0 }
 0x5ca   :  { %v8868_v22 = vmul.f32 %v13759_v34, %v18614_v5  ;;  %v8631_v57 = vadd.f32 1e-05, %v8503_v54  ;;  %v19146_v25 = vpop.xlane.xlu0 %8348  ;;  %8357 = vadd.xlane.f32.xlu1 %v8356_v52  ;;  %v19154_v5 = vadd.s32 64, %v21029_v28  ;;  %v8058_v38 = vmul.f32 %v21222_v2, %v21222_v2  ;;  %vm21236_vm12 = vmmov %vm21232_vm0 }
 0x5cb   :  { %v8112_v3 = vpop.xlane.xlu1 %8111  ;;  %7930 = vperm.xlu0 %13233, %v7900_v7   ;;  %v8634_v54 = vadd.f32 1e-05, %v8506_v59  ;;  %v8490_v7 = vmul.f32 0.0625, %v18777_v32  ;;  %v8635_v60 = vadd.f32 1e-05, %v8507_v39  ;;  %vm21237_vm5 = vmmov %vm21232_vm0 }
 0x5cc   :  { %13770 = vrsqrt.f32 %v8631_v57  ;;  %v8487_v10 = vmul.f32 0.0625, %v8112_v3  ;;  %12965 = vmatmul.mubr.msk.f32.vlgmr.msra.gmra.mxu1 %vm21221_vm7, %v8868_v22  ;;  %vm9828_vm9 = vcmp.eq.s32.totalorder %v21032_v31, %v19154_v5  ;;  %v21225_v22 = vld [vmem:[#allocation149_spill] sm:$0xff]  ;;  %v8362_v57 = vsel %vm21226_vm10, %v8058_v38, 0.0  ;;  %vm21240_vm7 = vmmov %vm21232_vm0 }
 0x5cd   :  { %v13761_v17 = vpop.eup %13760  ;;  %13017 = vmatpush3.msk.msra.mxu1 %vm9612_vm14, %v21062_v21  ;;  %13772 = vrsqrt.f32 %v8616_v41  ;;  %vm21224_vm14 = vmmov %vm21208_vm1  ;;  %13044 = vmatprep.subr.msk.mxu0 %vm9828_vm9, %v21062_v21  ;;  %v8044_v15 = vmul.f32 %v21225_v22, %v21225_v22  ;;  %v19187_v41 = vadd.s32 80, %v21029_v28  ;;  %v8618_v53 = vadd.f32 1e-05, %v8490_v7  ;;  %v21299_v5 = vld [vmem:[#allocation273_spill] sm:$0xff] }
 0x5ce   :  { %v8615_v23 = vadd.f32 1e-05, %v8487_v10  ;;  %v19164_v34 = vpop.xlane.xlu0 %8306  ;;  %8315 = vadd.xlane.f32.xlu1 %v8314_v51  ;;  %v8885_v52 = vmul.f32 %v13761_v17, %v20972_v36  ;;  %13018 = vmatprep.subr.msk.mxu1 %vm9611_vm6, %v21062_v21  ;;  %v8636_v10 = vadd.f32 1e-05, %v8508_v18  ;;  %v8492_v17 = vmul.f32 0.0625, %v18823_v40  ;;  %vm21241_vm8 = vmmov %vm21232_vm0 }
 0x5cf   :  { %v8166_v59 = vpop.xlane.xlu1 %8165  ;;  %7938 = vperm.xlu0 %13233, %v7908_v1   ;;  %13019 = vmatpush3.msk.msra.mxu1 %vm9611_vm6, %v21062_v21  ;;  %vm10044_vm11 = vcmp.eq.s32.totalorder %v21032_v31, %v19187_v41  ;;  %v8320_v40 = vsel %vm21229_vm15, %v8044_v15, 0.0  ;;  %vm21239_vm6 = vmmov %vm21232_vm0 }
 0x5d0   :  { %13774 = vrsqrt.f32 %v8615_v23  ;;  %v8505_v32 = vmul.f32 0.0625, %v8166_v59  ;;  %12939 = vmatprep.mubr.msk.f32.mxu0 %vm21224_vm14, %v8885_v52  ;;  %13072 = vmatprep.subr.msk.mxu1 %vm10044_vm11, %v21062_v21  ;;  %vm21243_vm14 = vmmov %vm21232_vm0 }
 0x5d1   :  { %v13763_v36 = vpop.eup %13762  ;;  %13776 = vrsqrt.f32 %v8634_v54  ;;  %vm21244_vm10 = vmmov %vm21232_vm0 }
 0x5d2   :  { %v8633_v39 = vadd.f32 1e-05, %v8505_v32  ;;  %v19189_v3 = vpop.xlane.xlu0 %8354  ;;  %8363 = vadd.xlane.f32.xlu1 %v8362_v57  ;;  %v8886_v1 = vmul.f32 %v13763_v36, %v20978_v42  ;;  %13778 = vrsqrt.f32 %v8635_v60  ;;  %v13765_v38 = vpop.eup %13764  ;;  %v21228_v42 = vld [vmem:[#allocation169_spill] sm:$0xff]  ;;  %v8620_v32 = vadd.f32 1e-05, %v8492_v17  ;;  %vm21246_vm15 = vmmov %vm21232_vm0 }
 0x5d3   :  { %v8118_v51 = vpop.xlane.xlu1 %8117  ;;  %v8060_v7 = vmul.f32 %v21228_v42, %v21228_v42  ;;  %v8870_v57 = vmul.f32 %v13765_v38, %v20850_v11 }
 0x5d4   :  { %13780 = vrsqrt.f32 %v8633_v39  ;;  %v8489_v23 = vmul.f32 0.0625, %v8118_v51  ;;  %12940 = vmatmul.mubr.msk.f32.gmra.mxu0 %vm21227_vm13, %v8886_v1  ;;  %v21230_v51 = vld [vmem:[#allocation161_spill] sm:$0xff]  ;;  %vm21245_vm13 = vmmov %vm21232_vm0 }
 0x5d5   :  { %v13767_v54 = vpop.eup %13766  ;;  %13782 = vrsqrt.f32 %v8618_v53  ;;  %v8046_v15 = vmul.f32 %v21230_v51, %v21230_v51  ;;  %v8368_v53 = vsel %vm21232_vm0, %v8060_v7, 0.0 }
 0x5d6   :  { %v8617_v52 = vadd.f32 1e-05, %v8489_v23  ;;  %v19203_v60 = vpop.xlane.xlu0 %8312  ;;  %8321 = vadd.xlane.f32.xlu1 %v8320_v40  ;;  %v8869_v18 = vmul.f32 %v13767_v54, %v20983_v9  ;;  %v13769_v59 = vpop.eup %13768  ;;  %13784 = vrsqrt.f32 %v8636_v10 }
 0x5d7   :  { %v8124_v36 = vpop.xlane.xlu1 %8123  ;;  %v8888_v17 = vmul.f32 %v13769_v59, %v18316_v44  ;;  %v8326_v7 = vsel %vm21236_vm12, %v8046_v15, 0.0  ;;  %v8494_v59 = vmul.f32 0.0625, %v18840_v48  ;;  %vm21253_vm12 = vmmov %vm21232_vm0 }
 0x5d8   :  { %13786 = vrsqrt.f32 %v8617_v52  ;;  %v8491_v39 = vmul.f32 0.0625, %v8124_v36  ;;  %12967 = vmatprep.mubr.msk.f32.mxu1 %vm21208_vm1, %v8869_v18  ;;  %v21234_v52 = vld [vmem:[#allocation174_spill] sm:$0xff]  ;;  %vm21248_vm1 = vmmov %vm21232_vm0 }
 0x5d9   :  { %v13771_v1 = vpop.eup %13770  ;;  %12968 = vmatmul.mubr.msk.f32.gmra.mxu1 %vm21231_vm2, %v8870_v57  ;;  %13788 = vrsqrt.f32 %v8620_v32  ;;  %v8062_v18 = vmul.f32 %v21234_v52, %v21234_v52  ;;  %vm21249_vm2 = vmmov %vm21232_vm0 }
 0x5da   :  { %v8619_v23 = vadd.f32 1e-05, %v8491_v39  ;;  %v19212_v9 = vpop.xlane.xlu0 %8360  ;;  %8369 = vadd.xlane.f32.xlu1 %v8368_v53  ;;  %v8887_v10 = vmul.f32 %v13771_v1, %v18655_v55  ;;  %v13773_v38 = vpop.eup %13772 }
 0x5db   :  { %v8178_v11 = vpop.xlane.xlu1 %8177  ;;  %v8872_v39 = vmul.f32 %v13773_v38, %v18326_v62  ;;  %v8622_v38 = vadd.f32 1e-05, %v8494_v59 }
 0x5dc   :  { %13790 = vrsqrt.f32 %v8619_v23  ;;  %v8509_v54 = vmul.f32 0.0625, %v8178_v11  ;;  %12942 = vmatprep.mubr.msk.f32.mxu0 %vm21233_vm3, %v8887_v10  ;;  %v21238_v10 = vld [vmem:[#allocation154_spill] sm:$0xff]  ;;  %v8374_v11 = vsel %vm21240_vm7, %v8062_v18, 0.0  ;;  %vm21250_vm3 = vmmov %vm21232_vm0 }
 0x5dd   :  { %v13775_v40 = vpop.eup %13774  ;;  %12943 = vmatmul.mubr.msk.f32.gmra.mxu0 %vm21235_vm4, %v8888_v17  ;;  %v8048_v15 = vmul.f32 %v21238_v10, %v21238_v10  ;;  %vm21252_vm4 = vmmov %vm21232_vm0 }
 0x5de   :  { %v8637_v36 = vadd.f32 1e-05, %v8509_v54  ;;  %v19221_v57 = vpop.xlane.xlu0 %8318  ;;  %8327 = vadd.xlane.f32.xlu1 %v8326_v7  ;;  %v8871_v55 = vmul.f32 %v13775_v40, %v18664_v20  ;;  %v13777_v44 = vpop.eup %13776  ;;  %v8512_v54 = vmul.f32 0.0625, %v18853_v14  ;;  %vm21257_vm7 = vmmov %vm21232_vm0 }
 0x5df   :  { %v8181_v32 = vpop.xlane.xlu1 %8180  ;;  %v13779_v1 = vpop.eup %13778  ;;  %v8890_v7 = vmul.f32 %v13777_v44, %v18338_v61 }
 0x5e0   :  { %13792 = vrsqrt.f32 %v8637_v36  ;;  %v8510_v53 = vmul.f32 0.0625, %v8181_v32  ;;  %12970 = vmatprep.mubr.msk.f32.mxu1 %vm21237_vm5, %v8871_v55  ;;  %v8891_v18 = vmul.f32 %v13779_v1, %v18366_v49  ;;  %v8640_v49 = vadd.f32 1e-05, %v8512_v54  ;;  %vm21254_vm5 = vmmov %vm21232_vm0 }
 0x5e1   :  { %v13781_v23 = vpop.eup %13780  ;;  %12971 = vmatmul.mubr.msk.f32.gmra.mxu1 %vm21239_vm6, %v8872_v39  ;;  %v21242_v39 = vld [vmem:[#allocation153_spill] sm:$0xff]  ;;  %v8496_v1 = vmul.f32 0.0625, %v18864_v56  ;;  %vm21256_vm6 = vmmov %vm21232_vm0 }
 0x5e2   :  { %v8638_v20 = vadd.f32 1e-05, %v8510_v53  ;;  %v19231_v17 = vpop.xlane.xlu0 %8366  ;;  %8375 = vadd.xlane.f32.xlu1 %v8374_v11  ;;  %v8889_v48 = vmul.f32 %v13781_v23, %v21004_v46  ;;  %v13783_v62 = vpop.eup %13782  ;;  %v8064_v53 = vmul.f32 %v21242_v39, %v21242_v39  ;;  %v8332_v46 = vsel %vm21244_vm10, %v8048_v15, 0.0  ;;  %vm21262_vm10 = vmmov %vm21232_vm0 }
 0x5e3   :  { %v8130_v40 = vpop.xlane.xlu1 %8129  ;;  %v13785_v36 = vpop.eup %13784  ;;  %v8874_v44 = vmul.f32 %v13783_v62, %v20864_v12  ;;  %v8624_v62 = vadd.f32 1e-05, %v8496_v1 }
 0x5e4   :  { %13794 = vrsqrt.f32 %v8638_v20  ;;  %v8493_v55 = vmul.f32 0.0625, %v8130_v40  ;;  %12945 = vmatprep.mubr.msk.f32.mxu0 %vm21241_vm8, %v8889_v48  ;;  %v8892_v11 = vmul.f32 %v13785_v36, %v18380_v0  ;;  %v21247_v40 = vld [vmem:[#allocation168_spill] sm:$0xff]  ;;  %v8380_v12 = vsel %vm21232_vm0, %v8064_v53, 0.0  ;;  %vm21259_vm8 = vmmov %vm21232_vm0 }
 0x5e5   :  { %v13787_v32 = vpop.eup %13786  ;;  %12946 = vmatmul.mubr.msk.f32.gmra.mxu0 %vm21243_vm14, %v8890_v7  ;;  %13796 = vrsqrt.f32 %v8622_v38  ;;  %v8066_v7 = vmul.f32 %v21247_v40, %v21247_v40  ;;  %v8514_v38 = vmul.f32 0.0625, %v18877_v27  ;;  %vm21260_vm14 = vmmov %vm21232_vm0 }
 0x5e6   :  { %v8621_v59 = vadd.f32 1e-05, %v8493_v55  ;;  %v19242_v14 = vpop.xlane.xlu0 %8324  ;;  %8333 = vadd.xlane.f32.xlu1 %v8332_v46  ;;  %12948 = vmatprep.mubr.msk.f32.mxu0 %vm21245_vm13, %v8891_v18  ;;  %v8873_v61 = vmul.f32 %v13787_v32, %v21009_v35  ;;  %v13789_v20 = vpop.eup %13788  ;;  %v21251_v32 = vld [vmem:[#allocation202_spill] sm:$0xff]  ;;  %vm21263_vm13 = vmmov %vm21232_vm0 }
 0x5e7   :  { %v8184_v23 = vpop.xlane.xlu1 %8183  ;;  %v8876_v36 = vmul.f32 %v13789_v20, %v18396_v24  ;;  %v8082_v53 = vmul.f32 %v21251_v32, %v21251_v32  ;;  %v8386_v46 = vsel %vm21253_vm12, %v8066_v7, 0.0  ;;  %v8642_v24 = vadd.f32 1e-05, %v8514_v38  ;;  %v21258_v38 = vld [vmem:[#allocation12_spill] sm:$0xff]  ;;  %vm21278_vm12 = vmmov %vm21232_vm0 }
 0x5e8   :  { %13798 = vrsqrt.f32 %v8621_v59  ;;  %v8511_v15 = vmul.f32 0.0625, %v8184_v23  ;;  %12973 = vmatprep.mubr.msk.f32.mxu1 %vm21246_vm15, %v8873_v61  ;;  %v8498_v61 = vmul.f32 0.0625, %v18892_v63  ;;  %v21255_v23 = vld [vmem:[#allocation187_spill] sm:$0xff]  ;;  %v8516_v63 = vmul.f32 0.0625, %v18905_v19  ;;  %vm21267_vm15 = vmmov %vm21232_vm0 }
 0x5e9   :  { %v13791_v48 = vpop.eup %13790  ;;  %12949 = vmatmul.mubr.msk.f32.gmra.mxu0 %vm21248_vm1, %v8892_v11  ;;  %12974 = vmatmul.mubr.msk.f32.gmra.mxu1 %vm21249_vm2, %v8874_v44  ;;  %13800 = vrsqrt.f32 %v8640_v49  ;;  %v8068_v11 = vmul.f32 %v21255_v23, %v21255_v23  ;;  %v8434_v20 = vsel %vm21256_vm6, %v8082_v53, 0.0  ;;  %v8532_v53 = vmul.f32 0.0625, %v18916_v43  ;;  %v21264_v43 = vld [vmem:[#allocation250_spill] sm:$0xff]  ;;  %vm21269_vm1 = vmmov %vm21232_vm0 }
 0x5ea   :  { %v8639_v35 = vadd.f32 1e-05, %v8511_v15  ;;  %v19255_v56 = vpop.xlane.xlu0 %8372  ;;  %8381 = vadd.xlane.f32.xlu1 %v8380_v12  ;;  %v8875_v0 = vmul.f32 %v13791_v48, %v18699_v33  ;;  %v8626_v7 = vadd.f32 1e-05, %v8498_v61  ;;  %v8644_v19 = vadd.f32 1e-05, %v8516_v63  ;;  %vm21270_vm2 = vmmov %vm21232_vm0 }
 0x5eb   :  { %v8136_v54 = vpop.xlane.xlu1 %8135  ;;  %v21266_v63 = vld [vmem:[#allocation221_spill] sm:$0xff]  ;;  %vm21281_vm6 = vmmov %vm21232_vm0 }
 0x5ec   :  { %13802 = vrsqrt.f32 %v8639_v35  ;;  %v8495_v55 = vmul.f32 0.0625, %v8136_v54  ;;  %12976 = vmatprep.mubr.msk.f32.mxu1 %vm21250_vm3, %v8875_v0  ;;  %v8084_v54 = vmul.f32 %v21258_v38, %v21258_v38  ;;  %vm21274_vm3 = vmmov %vm21232_vm0 }
 0x5ed   :  { %v13793_v18 = vpop.eup %13792  ;;  %12977 = vmatmul.mubr.msk.f32.gmra.mxu1 %vm21252_vm4, %v8876_v36  ;;  %13804 = vrsqrt.f32 %v8624_v62  ;;  %v8392_v36 = vsel %vm21259_vm8, %v8068_v11, 0.0  ;;  %vm21275_vm4 = vmmov %vm21232_vm0 }
 0x5ee   :  { %v8623_v33 = vadd.f32 1e-05, %v8495_v55  ;;  %v19265_v59 = vpop.xlane.xlu0 %8330  ;;  %8387 = vadd.xlane.f32.xlu1 %v8386_v46  ;;  %v8893_v27 = vmul.f32 %v13793_v18, %v21021_v26  ;;  %vm21287_vm8 = vmmov %vm21232_vm0 }
 0x5ef   :  { %v8190_v44 = vpop.xlane.xlu1 %8189 }
 0x5f0   :  { %13806 = vrsqrt.f32 %v8623_v33  ;;  %v8513_v49 = vmul.f32 0.0625, %v8190_v44  ;;  %12951 = vmatprep.mubr.msk.f32.mxu0 %vm21254_vm5, %v8893_v27  ;;  %v21261_v44 = vld [vmem:[#allocation176_spill] sm:$0xff]  ;;  %vm21280_vm5 = vmmov %vm21232_vm0 }
 0x5f1   :  { %v13795_v1 = vpop.eup %13794  ;;  %13808 = vrsqrt.f32 %v8642_v24 }
 0x5f2   :  { %v8641_v15 = vadd.f32 1e-05, %v8513_v49  ;;  %v19273_v48 = vpop.xlane.xlu0 %8378  ;;  %8435 = vadd.xlane.f32.xlu1 %v8434_v20  ;;  %v8894_v26 = vmul.f32 %v13795_v1, %v21027_v16  ;;  %v13797_v35 = vpop.eup %13796  ;;  %v8070_v49 = vmul.f32 %v21261_v44, %v21261_v44  ;;  %v21320_v44 = vld [vmem:[#allocation237_spill] sm:$0xff] }
 0x5f3   :  { %v8142_v12 = vpop.xlane.xlu1 %8141  ;;  %v8878_v33 = vmul.f32 %v13797_v35, %v20878_v47  ;;  %v8660_v47 = vadd.f32 1e-05, %v8532_v53  ;;  %v21271_v53 = vld [vmem:[#allocation238_spill] sm:$0xff] }
 0x5f4   :  { %13810 = vrsqrt.f32 %v8641_v15  ;;  %v8497_v0 = vmul.f32 0.0625, %v8142_v12  ;;  %12952 = vmatmul.mubr.msk.f32.gmra.mxu0 %vm21257_vm7, %v8894_v26  ;;  %v21265_v15 = vld [vmem:[#allocation267_spill] sm:$0xff]  ;;  %vm21285_vm7 = vmmov %vm21232_vm0 }
 0x5f5   :  { %v13799_v62 = vpop.eup %13798  ;;  %13812 = vrsqrt.f32 %v8626_v7  ;;  %v8518_v26 = vmul.f32 0.0625, %v21265_v15 }
 0x5f6   :  { %v8625_v55 = vadd.f32 1e-05, %v8497_v0  ;;  %v19281_v18 = vpop.xlane.xlu0 %8336  ;;  %8393 = vadd.xlane.f32.xlu1 %v8392_v36  ;;  %v8877_v16 = vmul.f32 %v13799_v62, %v21033_v4  ;;  %v13801_v27 = vpop.eup %13800  ;;  %v8440_v4 = vsel %vm21263_vm13, %v8084_v54, 0.0  ;;  %v21268_v54 = vld [vmem:[#allocation189_spill] sm:$0xff] }
 0x5f7   :  { %v8196_v46 = vpop.xlane.xlu1 %8195  ;;  %v8896_v12 = vmul.f32 %v13801_v27, %v21266_v63  ;;  %v8086_v36 = vmul.f32 %v21268_v54, %v21268_v54  ;;  %v8534_v27 = vmul.f32 0.0625, %v18943_v8  ;;  %v21276_v8 = vld [vmem:[#allocation40_spill] sm:$0xff] }
 0x5f8   :  { %13814 = vrsqrt.f32 %v8625_v55  ;;  %v8515_v24 = vmul.f32 0.0625, %v8196_v46  ;;  %12979 = vmatprep.mubr.msk.f32.mxu1 %vm21260_vm14, %v8877_v16  ;;  %v8398_v55 = vsel %vm21270_vm2, %v8070_v49, 0.0  ;;  %v21273_v49 = vld [vmem:[#allocation186_spill] sm:$0xff]  ;;  %vm21288_vm14 = vmmov %vm21232_vm0 }
 0x5f9   :  { %v13803_v61 = vpop.eup %13802  ;;  %12980 = vmatmul.mubr.msk.f32.gmra.mxu1 %vm21262_vm10, %v8878_v33  ;;  %13816 = vrsqrt.f32 %v8644_v19  ;;  %v8646_v33 = vadd.f32 1e-05, %v8518_v26  ;;  %v8072_v15 = vmul.f32 %v21273_v49, %v21273_v49  ;;  %vm21292_vm10 = vmmov %vm21232_vm0 }
 0x5fa   :  { %v8643_v1 = vadd.f32 1e-05, %v8515_v24  ;;  %v19291_v11 = vpop.xlane.xlu0 %8384  ;;  %8441 = vadd.xlane.f32.xlu1 %v8440_v4  ;;  %v8895_v20 = vmul.f32 %v13803_v61, %v21264_v43  ;;  %v13805_v35 = vpop.eup %13804  ;;  %v21272_v61 = vld [vmem:[#allocation224_spill] sm:$0xff] }
 0x5fb   :  { %v8244_v7 = vpop.xlane.xlu1 %8243  ;;  %v8880_v4 = vmul.f32 %v13805_v35, %v21272_v61  ;;  %v8520_v35 = vmul.f32 0.0625, %v18961_v6  ;;  %v8404_v61 = vsel %vm21281_vm6, %v8072_v15, 0.0  ;;  %v21282_v6 = vld [vmem:[#allocation24_spill] sm:$0xff]  ;;  %v21286_v15 = vld [vmem:[#allocation191_spill] sm:$0xff]  ;;  %vm21308_vm6 = vmmov %vm21232_vm0 }
 0x5fc   :  { %13818 = vrsqrt.f32 %v8643_v1  ;;  %v8531_v0 = vmul.f32 0.0625, %v8244_v7  ;;  %12954 = vmatprep.mubr.msk.f32.mxu0 %vm21267_vm15, %v8895_v20  ;;  %v8446_v7 = vsel %vm21275_vm4, %v8086_v36, 0.0  ;;  %v21279_v36 = vld [vmem:[#allocation185_spill] sm:$0xff]  ;;  %vm21295_vm15 = vmmov %vm21232_vm0 }
 0x5fd   :  { %v13807_v62 = vpop.eup %13806  ;;  %12955 = vmatmul.mubr.msk.f32.gmra.mxu0 %vm21269_vm1, %v8896_v12  ;;  %13820 = vrsqrt.f32 %v8660_v47  ;;  %v8662_v12 = vadd.f32 1e-05, %v8534_v27  ;;  %vm21296_vm1 = vmmov %vm21232_vm0 }
 0x5fe   :  { %v8659_v16 = vadd.f32 1e-05, %v8531_v0  ;;  %v19301_v19 = vpop.xlane.xlu0 %8390  ;;  %8399 = vadd.xlane.f32.xlu1 %v8398_v55  ;;  %v8879_v46 = vmul.f32 %v13807_v62, %v21271_v53  ;;  %v13809_v1 = vpop.eup %13808  ;;  %v21277_v62 = vld [vmem:[#allocation227_spill] sm:$0xff]  ;;  %vm21302_vm4 = vmmov %vm21232_vm0 }
 0x5ff   :  { %v8202_v24 = vpop.xlane.xlu1 %8201  ;;  %v8898_v55 = vmul.f32 %v13809_v1, %v21277_v62  ;;  %v8648_v1 = vadd.f32 1e-05, %v8520_v35 }
 0x600   :  { %13822 = vrsqrt.f32 %v8659_v16  ;;  %v8517_v43 = vmul.f32 0.0625, %v8202_v24  ;;  %12982 = vmatprep.mubr.msk.f32.mxu1 %vm21232_vm0, %v8879_v46  ;;  %v8088_v24 = vmul.f32 %v21279_v36, %v21279_v36  ;;  %v21314_v36 = vld [vmem:[#allocation200_spill] sm:$0xff] }
 0x601   :  { %v13811_v20 = vpop.eup %13810  ;;  %12983 = vmatmul.mubr.msk.f32.gmra.mxu1 %vm21274_vm3, %v8880_v4  ;;  %13824 = vrsqrt.f32 %v8646_v33  ;;  %vm21301_vm3 = vmmov %vm21232_vm0 }
 0x602   :  { %v8645_v47 = vadd.f32 1e-05, %v8517_v43  ;;  %v19311_v26 = vpop.xlane.xlu0 %8438  ;;  %8447 = vadd.xlane.f32.xlu1 %v8446_v7  ;;  %v8897_v63 = vmul.f32 %v13811_v20, %v21276_v8  ;;  %v13813_v16 = vpop.eup %13812  ;;  %v21283_v43 = vld [vmem:[#allocation29_spill] sm:$0xff] }
 0x603   :  { %v8250_v0 = vpop.xlane.xlu1 %8249  ;;  %v8536_v20 = vmul.f32 0.0625, %v21283_v43  ;;  %v21291_v43 = vld [vmem:[#allocation277_spill] sm:$0xff] }
 0x604   :  { %13826 = vrsqrt.f32 %v8645_v47  ;;  %v8533_v53 = vmul.f32 0.0625, %v8250_v0  ;;  %12957 = vmatprep.mubr.msk.f32.mxu0 %vm21278_vm12, %v8897_v63  ;;  %v21284_v47 = vld [vmem:[#allocation23_spill] sm:$0xff] }
 0x605   :  { %v13815_v46 = vpop.eup %13814  ;;  %12958 = vmatmul.mubr.msk.f32.gmra.mxu0 %vm21280_vm5, %v8898_v55  ;;  %13828 = vrsqrt.f32 %v8662_v12  ;;  %v8882_v8 = vmul.f32 %v13813_v16, %v21284_v47  ;;  %v8074_v55 = vmul.f32 %v21286_v15, %v21286_v15  ;;  %v21290_v16 = vld [vmem:[#allocation225_spill] sm:$0xff]  ;;  %vm21305_vm5 = vmmov %vm21232_vm0 }
 0x606   :  { %v8661_v33 = vadd.f32 1e-05, %v8533_v53  ;;  %v19321_v27 = vpop.xlane.xlu0 %8396  ;;  %8405 = vadd.xlane.f32.xlu1 %v8404_v61  ;;  %v8881_v4 = vmul.f32 %v13815_v46, %v21282_v6  ;;  %v13817_v63 = vpop.eup %13816  ;;  %v8452_v53 = vsel %vm21288_vm14, %v8088_v24, 0.0  ;;  %v21289_v46 = vld [vmem:[#allocation249_spill] sm:$0xff]  ;;  %v19340_v24 = vadd.s32 96, %v21029_v28  ;;  %vm21316_vm14 = vmmov %vm21232_vm0 }
 0x607   :  { %v8208_v7 = vpop.xlane.xlu1 %8207  ;;  %v8900_v6 = vmul.f32 %v13817_v63, %v21290_v16 }
 0x608   :  { %13830 = vrsqrt.f32 %v8661_v33  ;;  %v8519_v0 = vmul.f32 0.0625, %v8208_v7  ;;  %12985 = vmatprep.mubr.msk.f32.mxu1 %vm21285_vm7, %v8881_v4  ;;  %v8664_v33 = vadd.f32 1e-05, %v8536_v20  ;;  %v8522_v4 = vmul.f32 0.0625, %v21291_v43  ;;  %vm21313_vm7 = vmmov %vm21232_vm0 }
 0x609   :  { %v13819_v62 = vpop.eup %13818  ;;  %12986 = vmatmul.mubr.msk.f32.gmra.mxu1 %vm21287_vm8, %v8882_v8  ;;  %13832 = vrsqrt.f32 %v8648_v1  ;;  %v21293_v8 = vld [vmem:[#allocation272_spill] sm:$0xff]  ;;  %v8410_v1 = vsel %vm21296_vm1, %v8074_v55, 0.0  ;;  %vm10260_vm2 = vcmp.eq.s32.totalorder %v21032_v31, %v19340_v24  ;;  %vm21315_vm8 = vmmov %vm21232_vm0  ;;  %v21397_v24 = vld [vmem:[#allocation275_spill] sm:$0xff] }
 0x60a   :  { %v8647_v12 = vadd.f32 1e-05, %v8519_v0  ;;  %v19331_v35 = vpop.xlane.xlu0 %8444  ;;  %8453 = vadd.xlane.f32.xlu1 %v8452_v53  ;;  %v8899_v61 = vmul.f32 %v13819_v62, %v21289_v46  ;;  %v13821_v47 = vpop.eup %13820  ;;  %vm9827_vm13 = vcmp.eq.s32.totalorder %v21032_v31, %v21293_v8  ;;  %v21294_v62 = vld [vmem:[#allocation220_spill] sm:$0xff]  ;;  %vm21328_vm1 = vmmov %vm21232_vm0 }
 0x60b   :  { %v8256_v7 = vpop.xlane.xlu1 %8255  ;;  %v8090_v63 = vmul.f32 %v21294_v62, %v21294_v62 }
 0x60c   :  { %13834 = vrsqrt.f32 %v8647_v12  ;;  %v8535_v15 = vmul.f32 0.0625, %v8256_v7  ;;  %12992 = vmatprep.mubr.msk.f32.mxu0 %vm21292_vm10, %v8899_v61  ;;  %v21297_v12 = vld [vmem:[#allocation257_spill] sm:$0xff]  ;;  %v21298_v61 = vld [vmem:[#allocation236_spill] sm:$0xff]  ;;  %vm21321_vm10 = vmmov %vm21232_vm0 }
 0x60d   :  { %v13823_v0 = vpop.eup %13822  ;;  %12993 = vmatmul.mubr.msk.f32.vlgmr.msra.gmra.mxu0 %vm21295_vm15, %v8900_v6  ;;  %v8916_v16 = vmul.f32 %v13821_v47, %v21298_v61  ;;  %13836 = vrsqrt.f32 %v8664_v33  ;;  %v8650_v6 = vadd.f32 1e-05, %v8522_v4  ;;  %v19368_v33 = vadd.s32 112, %v21029_v28  ;;  %v21300_v7 = vld [vmem:[#allocation188_spill] sm:$0xff]  ;;  %vm21324_vm15 = vmmov %vm21232_vm0 }
 0x60e   :  { %v8663_v20 = vadd.f32 1e-05, %v8535_v15  ;;  %v19346_v53 = vpop.xlane.xlu0 %8402  ;;  %8411 = vadd.xlane.f32.xlu1 %v8410_v1  ;;  %v8915_v46 = vmul.f32 %v13823_v0, %v21297_v12  ;;  %13045 = vmatpush3.msk.msra.mxu0 %vm9828_vm9, %v21062_v21  ;;  %v13825_v15 = vpop.eup %13824  ;;  %vm10043_vm9 = vcmp.eq.s32.totalorder %v21032_v31, %v21299_v5  ;;  %v8076_v47 = vmul.f32 %v21300_v7, %v21300_v7  ;;  %v21304_v12 = vld [vmem:[#allocation45_spill] sm:$0xff]  ;;  %v21310_v5 = vld [vmem:[#allocation94_spill] sm:$0xff] }
 0x60f   :  { %v8214_v43 = vpop.xlane.xlu1 %8213  ;;  %13046 = vmatprep.subr.msk.mxu0 %vm9827_vm13, %v21062_v21  ;;  %v8458_v0 = vsel %vm21302_vm4, %v8090_v63, 0.0  ;;  %vm10476_vm12 = vcmp.eq.s32.totalorder %v21032_v31, %v19368_v33  ;;  %vm21338_vm4 = vmmov %vm21232_vm0 }
 0x610   :  { %13838 = vrsqrt.f32 %v8663_v20  ;;  %v8521_v55 = vmul.f32 0.0625, %v8214_v43  ;;  %13020 = vmatprep.mubr.msk.f32.mxu1 %vm21232_vm0, %v8915_v46  ;;  %13047 = vmatpush3.msk.msra.mxu0 %vm9827_vm13, %v21062_v21  ;;  %v21303_v20 = vld [vmem:[#allocation46_spill] sm:$0xff]  ;;  %v8902_v46 = vmul.f32 %v13825_v15, %v21304_v12  ;;  %v8416_v15 = vsel %vm21308_vm6, %v8076_v47, 0.0  ;;  %vm21323_vm13 = vmmov %vm21232_vm0 }
 0x611   :  { %v13827_v4 = vpop.eup %13826  ;;  %13021 = vmatmul.mubr.msk.f32.vlgmr.msra.gmra.mxu1 %vm21301_vm3, %v8916_v16  ;;  %13100 = vmatprep.subr.msk.mxu0 %vm10260_vm2, %v21062_v21  ;;  %13840 = vrsqrt.f32 %v8650_v6  ;;  %v21306_v6 = vld [vmem:[#allocation193_spill] sm:$0xff]  ;;  %vm21336_vm3 = vmmov %vm21232_vm0 }
 0x612   :  { %v8649_v8 = vadd.f32 1e-05, %v8521_v55  ;;  %v19378_v1 = vpop.xlane.xlu0 %8450  ;;  %8459 = vadd.xlane.f32.xlu1 %v8458_v0  ;;  %v8901_v28 = vmul.f32 %v13827_v4, %v21303_v20  ;;  %13073 = vmatpush3.msk.msra.mxu1 %vm10044_vm11, %v21062_v21  ;;  %v13829_v61 = vpop.eup %13828  ;;  %v8092_v43 = vmul.f32 %v21306_v6, %v21306_v6  ;;  %vm21307_vm11 = vmmov %vm21232_vm0  ;;  %v21309_v55 = vld [vmem:[#allocation13_spill] sm:$0xff] }
 0x613   :  { %v8262_v63 = vpop.xlane.xlu1 %8261  ;;  %13074 = vmatprep.subr.msk.mxu1 %vm10043_vm9, %v21062_v21  ;;  %v8524_v4 = vmul.f32 0.0625, %v21309_v55  ;;  %v21312_v6 = vld [vmem:[#allocation233_spill] sm:$0xff]  ;;  %v8078_v55 = vmul.f32 %v21314_v36, %v21314_v36  ;;  %vm21345_vm6 = vmmov %vm21232_vm0 }
 0x614   :  { %13842 = vrsqrt.f32 %v8649_v8  ;;  %v8537_v16 = vmul.f32 0.0625, %v8262_v63  ;;  %12995 = vmatprep.mubr.msk.f32.mxu0 %vm21305_vm5, %v8901_v28  ;;  %13075 = vmatpush3.msk.msra.mxu1 %vm10043_vm9, %v21062_v21  ;;  %v21311_v28 = vld [vmem:[#allocation56_spill] sm:$0xff]  ;;  %vm21332_vm9 = vmmov %vm21232_vm0 }
 0x615   :  { %v13831_v41 = vpop.eup %13830  ;;  %12996 = vmatmul.mubr.msk.f32.gmra.mxu0 %vm21307_vm11, %v8902_v46  ;;  %13128 = vmatprep.subr.msk.mxu1 %vm10476_vm12, %v21062_v21  ;;  %v8525_v63 = vmul.f32 0.0625, %v21311_v28  ;;  %v8918_v46 = vmul.f32 %v13829_v61, %v21312_v6  ;;  %v21318_v61 = vld [vmem:[#allocation259_spill] sm:$0xff]  ;;  %vm21339_vm5 = vmmov %vm21232_vm0 }
 0x616   :  { %v8665_v0 = vadd.f32 1e-05, %v8537_v16  ;;  %v19406_v8 = vpop.xlane.xlu0 %8408  ;;  %8417 = vadd.xlane.f32.xlu1 %v8416_v15  ;;  %v8917_v20 = vmul.f32 %v13831_v41, %v21310_v5  ;;  %v13833_v7 = vpop.eup %13832  ;;  %v8464_v16 = vsel %vm21316_vm14, %v8092_v43, 0.0  ;;  %v8652_v15 = vadd.f32 1e-05, %v8524_v4  ;;  %v21317_v41 = vld [vmem:[#allocation31_spill] sm:$0xff]  ;;  %vm21343_vm11 = vmmov %vm21232_vm0 }
 0x617   :  { %v8265_v12 = vpop.xlane.xlu1 %8264  ;;  %v8540_v5 = vmul.f32 0.0625, %v21317_v41  ;;  %v8904_v38 = vmul.f32 %v13833_v7, %v21320_v44  ;;  %v21322_v4 = vld [vmem:[#allocation219_spill] sm:$0xff]  ;;  %v21325_v44 = vld [vmem:[#allocation262_spill] sm:$0xff]  ;;  %vm21355_vm14 = vmmov %vm21232_vm0 }
 0x618   :  { %13844 = vrsqrt.f32 %v8665_v0  ;;  %v8538_v47 = vmul.f32 0.0625, %v8265_v12  ;;  %13023 = vmatprep.mubr.msk.f32.mxu1 %vm21313_vm7, %v8917_v20  ;;  %v8653_v0 = vadd.f32 1e-05, %v8525_v63  ;;  %v21319_v12 = vld [vmem:[#allocation72_spill] sm:$0xff]  ;;  %vm21348_vm7 = vmmov %vm21232_vm0 }
 0x619   :  { %v13835_v62 = vpop.eup %13834  ;;  %13024 = vmatmul.mubr.msk.f32.gmra.mxu1 %vm21315_vm8, %v8918_v46  ;;  %v8526_v20 = vmul.f32 0.0625, %v21319_v12  ;;  %v21327_v12 = vld [vmem:[#allocation232_spill] sm:$0xff]  ;;  %vm21353_vm8 = vmmov %vm21232_vm0 }
 0x61a   :  { %v8666_v28 = vadd.f32 1e-05, %v8538_v47  ;;  %v19417_v49 = vpop.xlane.xlu0 %8456  ;;  %8465 = vadd.xlane.f32.xlu1 %v8464_v16  ;;  %v8903_v6 = vmul.f32 %v13835_v62, %v21318_v61  ;;  %v13837_v36 = vpop.eup %13836  ;;  %v8094_v47 = vmul.f32 %v21322_v4, %v21322_v4  ;;  %v8422_v16 = vsel %vm21324_vm15, %v8078_v55, 0.0  ;;  %vm21363_vm15 = vmmov %vm21232_vm0 }
 0x61b   :  { %v8220_v54 = vpop.xlane.xlu1 %8219  ;;  %v8668_v62 = vadd.f32 1e-05, %v8540_v5  ;;  %v8920_v23 = vmul.f32 %v13837_v36, %v21327_v12  ;;  %v21330_v5 = vld [vmem:[#allocation203_spill] sm:$0xff]  ;;  %v21335_v12 = vld [vmem:[#allocation57_spill] sm:$0xff] }
 0x61c   :  { %13846 = vrsqrt.f32 %v8666_v28  ;;  %v8523_v46 = vmul.f32 0.0625, %v8220_v54  ;;  %12998 = vmatprep.mubr.msk.f32.mxu0 %vm21321_vm10, %v8903_v6  ;;  %v8654_v54 = vadd.f32 1e-05, %v8526_v20  ;;  %v21326_v28 = vld [vmem:[#allocation15_spill] sm:$0xff]  ;;  %vm21357_vm10 = vmmov %vm21232_vm0 }
 0x61d   :  { %v13839_v43 = vpop.eup %13838  ;;  %12999 = vmatmul.mubr.msk.f32.gmra.mxu0 %vm21323_vm13, %v8904_v38  ;;  %13848 = vrsqrt.f32 %v8652_v15  ;;  %v8542_v61 = vmul.f32 0.0625, %v21326_v28  ;;  %vm21362_vm13 = vmmov %vm21232_vm0 }
 0x61e   :  { %v8651_v63 = vadd.f32 1e-05, %v8523_v46  ;;  %v19427_v41 = vpop.xlane.xlu0 %8414  ;;  %8423 = vadd.xlane.f32.xlu1 %v8422_v16  ;;  %v8919_v7 = vmul.f32 %v13839_v43, %v21325_v44  ;;  %13850 = vrsqrt.f32 %v8653_v0  ;;  %v13841_v4 = vpop.eup %13840  ;;  %v8080_v46 = vmul.f32 %v21330_v5, %v21330_v5  ;;  %v21331_v16 = vld [vmem:[#allocation68_spill] sm:$0xff] }
 0x61f   :  { %v8268_v6 = vpop.xlane.xlu1 %8267  ;;  %v8528_v43 = vmul.f32 0.0625, %v21331_v16  ;;  %v8470_v0 = vsel %vm21332_vm9, %v8094_v47, 0.0  ;;  %v8670_v28 = vadd.f32 1e-05, %v8542_v61  ;;  %v21337_v47 = vld [vmem:[#allocation216_spill] sm:$0xff]  ;;  %v21341_v61 = vld [vmem:[#allocation107_spill] sm:$0xff]  ;;  %vm21367_vm9 = vmmov %vm21232_vm0 }
 0x620   :  { %13852 = vrsqrt.f32 %v8651_v63  ;;  %v8539_v38 = vmul.f32 0.0625, %v8268_v6  ;;  %13026 = vmatprep.mubr.msk.f32.mxu1 %vm21328_vm1, %v8919_v7  ;;  %v19433_v55 = vpop.f32.mrf.mxu1  ;;  %v21334_v63 = vld [vmem:[#allocation58_spill] sm:$0xff]  ;;  %vm21364_vm1 = vmmov %vm21232_vm0 }
 0x621   :  { %21329 = vst [vmem:[#allocation73_spill] sm:$0xff] %v19433_v55  ;;  %v13843_v15 = vpop.eup %13842  ;;  %13027 = vmatmul.mubr.msk.f32.gmra.mxu1 %vm21232_vm0, %v8920_v23  ;;  %13854 = vrsqrt.f32 %v8668_v62  ;;  %v8906_v55 = vmul.f32 %v13841_v4, %v21335_v12  ;;  %v8096_v62 = vmul.f32 %v21337_v47, %v21337_v47 }
 0x622   :  { %v8667_v20 = vadd.f32 1e-05, %v8539_v38  ;;  %v19440_v36 = vpop.xlane.xlu0 %8462  ;;  %8471 = vadd.xlane.f32.xlu1 %v8470_v0  ;;  %v8905_v44 = vmul.f32 %v13843_v15, %v21334_v63  ;;  %v12930_v7 = vpop.f32.mrf.mxu1  ;;  %13856 = vrsqrt.f32 %v8654_v54  ;;  %v8656_v38 = vadd.f32 1e-05, %v8528_v43  ;;  %v21342_v63 = vld [vmem:[#allocation78_spill] sm:$0xff] }
 0x623   :  { %21333 = vst [vmem:[#allocation90_spill] sm:$0xff] %v19440_v36  ;;  %v8274_v6 = vpop.xlane.xlu1 %8273  ;;  %v8428_v15 = vsel %vm21339_vm5, %v8080_v46, 0.0  ;;  %vm21374_vm5 = vmmov %vm21232_vm0 }
 0x624   :  { %13858 = vrsqrt.f32 %v8667_v20  ;;  %v8541_v5 = vmul.f32 0.0625, %v8274_v6  ;;  %13001 = vmatprep.mubr.msk.f32.mxu0 %vm21336_vm3, %v8905_v44  ;;  %v7828_v23 = vpop.f32.mrf.mxu1  ;;  %v8544_v44 = vmul.f32 0.0625, %v21342_v63  ;;  %vm21370_vm3 = vmmov %vm21232_vm0 }
 0x625   :  { %v13845_v16 = vpop.eup %13844  ;;  %13002 = vmatmul.mubr.msk.f32.gmra.mxu0 %vm21338_vm4, %v8906_v55  ;;  %13860 = vrsqrt.f32 %v8670_v28  ;;  %v21344_v55 = vld [vmem:[#allocation33_spill] sm:$0xff]  ;;  %vm21371_vm4 = vmmov %vm21232_vm0 }
 0x626   :  { %v8669_v0 = vadd.f32 1e-05, %v8541_v5  ;;  %v19449_v54 = vpop.xlane.xlu0 %8420  ;;  %8429 = vadd.xlane.f32.xlu1 %v8428_v15  ;;  %v8921_v4 = vmul.f32 %v13845_v16, %v21341_v61  ;;  %v12931_v20 = vpop.f32.mrf.mxu1  ;;  %v8530_v12 = vmul.f32 0.0625, %v21344_v55  ;;  %v8476_v5 = vsel %vm21345_vm6, %v8096_v62, 0.0  ;;  %v21347_v16 = vld [vmem:[#allocation106_spill] sm:$0xff]  ;;  %vm21378_vm6 = vmmov %vm21232_vm0 }
 0x627   :  { %21340 = vst [vmem:[#allocation37_spill] sm:$0xff] %v19449_v54  ;;  %v8232_v7 = vpop.xlane.xlu1 %8231  ;;  %v8672_v61 = vadd.f32 1e-05, %v8544_v44 }
 0x628   :  { %13862 = vrsqrt.f32 %v8669_v0  ;;  %v8527_v6 = vmul.f32 0.0625, %v8232_v7  ;;  %13029 = vmatprep.mubr.msk.f32.mxu1 %vm21343_vm11, %v8921_v4  ;;  %v21349_v7 = vld [vmem:[#allocation77_spill] sm:$0xff]  ;;  %vm21375_vm11 = vmmov %vm21232_vm0 }
 0x629   :  { %v13847_v43 = vpop.eup %13846  ;;  %13864 = vrsqrt.f32 %v8656_v38  ;;  %v8658_v38 = vadd.f32 1e-05, %v8530_v12  ;;  %v8546_v55 = vmul.f32 0.0625, %v21349_v7  ;;  %v21356_v7 = vld [vmem:[#allocation17_spill] sm:$0xff] }
 0x62a   :  { %v8655_v46 = vadd.f32 1e-05, %v8527_v6  ;;  %v19456_v23 = vpop.xlane.xlu0 %8468  ;;  %8477 = vadd.xlane.f32.xlu1 %v8476_v5  ;;  %v8922_v15 = vmul.f32 %v13847_v43, %v21347_v16  ;;  %v13849_v28 = vpop.eup %13848  ;;  %v21351_v6 = vld [vmem:[#allocation48_spill] sm:$0xff]  ;;  %v21352_v16 = vld [vmem:[#allocation235_spill] sm:$0xff] }
 0x62b   :  { %21346 = vst [vmem:[#allocation19_spill] sm:$0xff] %v19456_v23  ;;  %v8280_v20 = vpop.xlane.xlu1 %8279  ;;  %v13851_v63 = vpop.eup %13850  ;;  %v8908_v44 = vmul.f32 %v13849_v28, %v21352_v16  ;;  %v21358_v28 = vld [vmem:[#allocation28_spill] sm:$0xff] }
 0x62c   :  { %13866 = vrsqrt.f32 %v8655_v46  ;;  %v8543_v0 = vmul.f32 0.0625, %v8280_v20  ;;  %13030 = vmatmul.mubr.msk.f32.gmra.mxu1 %vm21348_vm7, %v8922_v15  ;;  %v21354_v15 = vld [vmem:[#allocation70_spill] sm:$0xff]  ;;  %vm21380_vm7 = vmmov %vm21232_vm0 }
 0x62d   :  { %v13853_v4 = vpop.eup %13852  ;;  %13868 = vrsqrt.f32 %v8672_v61  ;;  %v8909_v20 = vmul.f32 %v13851_v63, %v21354_v15  ;;  %v21361_v63 = vld [vmem:[#allocation74_spill] sm:$0xff] }
 0x62e   :  { %v8671_v47 = vadd.f32 1e-05, %v8543_v0  ;;  %v19461_v62 = vpop.xlane.xlu0 %8426  ;;  %v8907_v23 = vmul.f32 %v13853_v4, %v21351_v6  ;;  %v13855_v5 = vpop.eup %13854  ;;  %v8674_v0 = vadd.f32 1e-05, %v8546_v55 }
 0x62f   :  { %21350 = vst [vmem:[#allocation134_spill] sm:$0xff] %v19461_v62  ;;  %v8238_v43 = vpop.xlane.xlu1 %8237  ;;  %v13857_v54 = vpop.eup %13856  ;;  %v8548_v62 = vmul.f32 0.0625, %v21356_v7 }
 0x630   :  { %13870 = vrsqrt.f32 %v8671_v47  ;;  %v8529_v46 = vmul.f32 0.0625, %v8238_v43  ;;  %13004 = vmatprep.mubr.msk.f32.mxu0 %vm21353_vm8, %v8907_v23  ;;  %v21359_v43 = vld [vmem:[#allocation69_spill] sm:$0xff]  ;;  %vm21383_vm8 = vmmov %vm21232_vm0 }
 0x631   :  { %v13859_v12 = vpop.eup %13858  ;;  %13872 = vrsqrt.f32 %v8658_v38  ;;  %13005 = vmatmul.mubr.msk.f32.gmra.mxu0 %vm21355_vm14, %v8908_v44  ;;  %v8910_v16 = vmul.f32 %v13857_v54, %v21359_v43  ;;  %v21360_v23 = vld [vmem:[#allocation241_spill] sm:$0xff]  ;;  %v7855_v38 = vrot.slane %v21361_v63, %v21201_v30  ;;  %v21365_v54 = vld [vmem:[#allocation119_spill] sm:$0xff]  ;;  %v21366_v43 = vld [vmem:[#allocation118_spill] sm:$0xff] }
 0x632   :  { %v8657_v4 = vadd.f32 1e-05, %v8529_v46  ;;  %13007 = vmatprep.mubr.msk.f32.mxu0 %vm21357_vm10, %v8909_v20  ;;  %v19470_v61 = vpop.xlane.xlu0 %8474  ;;  %v8923_v6 = vmul.f32 %v13859_v12, %v21358_v28  ;;  %v8924_v36 = vmul.f32 %v13855_v5, %v21360_v23  ;;  %v13861_v15 = vpop.eup %13860  ;;  %v8676_v20 = vadd.f32 1e-05, %v8548_v62  ;;  %v21368_v62 = vld [vmem:[#allocation214_spill] sm:$0xff]  ;;  %vm21384_vm14 = vmmov %vm21232_vm0 }
 0x633   :  { %v8286_v47 = vpop.xlane.xlu1 %8285  ;;  %v8564_v5 = vmul.f32 0.0625, %v19111_v29  ;;  %v8926_v23 = vmul.f32 %v13861_v15, %v21366_v43  ;;  %v8550_v29 = vmul.f32 0.0625, %v19127_v45  ;;  %v8566_v43 = vmul.f32 0.0625, %v19146_v25  ;;  %v21376_v25 = vld [vmem:[#allocation81_spill] sm:$0xff]  ;;  %vm21386_vm10 = vmmov %vm21232_vm0 }
 0x634   :  { %13874 = vrsqrt.f32 %v8657_v4  ;;  %v8545_v55 = vmul.f32 0.0625, %v8286_v47  ;;  %13032 = vmatprep.mubr.msk.f32.mxu1 %vm21362_vm13, %v8923_v6  ;;  %v7884_v4 = vrot.slane %v7855_v38, %v21212_v13  ;;  %v7877_v47 = vcombine.high %v7855_v38, %v7855_v38  ;;  %vm21389_vm13 = vmmov %vm21232_vm0 }
 0x635   :  { %v13863_v44 = vpop.eup %13862  ;;  %13008 = vmatmul.mubr.msk.f32.gmra.mxu0 %vm21363_vm15, %v8910_v16  ;;  %13033 = vmatmul.mubr.msk.f32.gmra.mxu1 %vm21364_vm1, %v8924_v36  ;;  %13876 = vrsqrt.f32 %v8674_v0  ;;  %vm21390_vm15 = vmmov %vm21232_vm0 }
 0x636   :  { %v13865_v46 = vpop.eup %13864  ;;  %v8673_v12 = vadd.f32 1e-05, %v8545_v55  ;;  %v8925_v7 = vmul.f32 %v13863_v44, %v21365_v54  ;;  %v19484_v6 = vpop.xlane.xlu0 %8432  ;;  %v21369_v55 = vld [vmem:[#allocation10_spill] sm:$0xff]  ;;  %v8692_v44 = vadd.f32 1e-05, %v8564_v5  ;;  %v7892_v38 = vrot.slane %v7877_v47, %v21212_v13  ;;  %v21372_v47 = vld [vmem:[#allocation65_spill] sm:$0xff] }
 0x637   :  { %v8292_v28 = vpop.xlane.xlu1 %8291  ;;  %v8912_v0 = vmul.f32 %v13865_v46, %v21368_v62  ;;  %v8678_v5 = vadd.f32 1e-05, %v8550_v29 }
 0x638   :  { %13878 = vrsqrt.f32 %v8673_v12  ;;  %v8547_v16 = vmul.f32 0.0625, %v8292_v28  ;;  %13035 = vmatprep.mubr.msk.f32.mxu1 %vm21232_vm0, %v8925_v7  ;;  %v7879_v12 = vcombine.high %v19101_v37, %v19101_v37  ;;  %v7848_v7 = vcombine.high %v19104_v58, %v19104_v58  ;;  %v21373_v58 = vld [vmem:[#allocation240_spill] sm:$0xff] }
 0x639   :  { %v13867_v36 = vpop.eup %13866  ;;  %13036 = vmatmul.mubr.msk.f32.gmra.mxu1 %vm21367_vm9, %v8926_v23  ;;  %13880 = vrsqrt.f32 %v8676_v20  ;;  %vm21395_vm9 = vmmov %vm21232_vm0 }
 0x63a   :  { %v8675_v63 = vadd.f32 1e-05, %v8547_v16  ;;  %v8911_v15 = vmul.f32 %v13867_v36, %v21369_v55  ;;  %v13869_v28 = vpop.eup %13868  ;;  %v19499_v23 = vpop.xlane.xlu0 %8480  ;;  %v7896_v62 = vrot.slane %v7879_v12, %v21212_v13  ;;  %v8552_v12 = vmul.f32 0.0625, %v19164_v34  ;;  %v21381_v34 = vld [vmem:[#allocation131_spill] sm:$0xff] }
 0x63b   :  { %v8340_v54 = vpop.xlane.xlu1 %8339  ;;  %7914 = vperm.xlu1 %13234, %v7884_v4   ;;  %v8928_v36 = vmul.f32 %v13869_v28, %v21373_v58 }
 0x63c   :  { %13882 = vrsqrt.f32 %v8675_v63  ;;  %v8563_v46 = vmul.f32 0.0625, %v8340_v54  ;;  %13010 = vmatprep.mubr.msk.f32.mxu0 %vm21370_vm3, %v8911_v15  ;;  %v7876_v63 = vrot.slane %v7848_v7, %v21201_v30  ;;  %v8694_v15 = vadd.f32 1e-05, %v8566_v43  ;;  %vm21396_vm3 = vmmov %vm21232_vm0 }
 0x63d   :  { %v13871_v45 = vpop.eup %13870  ;;  %13011 = vmatmul.mubr.msk.f32.gmra.mxu0 %vm21371_vm4, %v8912_v0  ;;  %13884 = vrsqrt.f32 %v8692_v44  ;;  %vm21398_vm4 = vmmov %vm21232_vm0 }
 0x63e   :  { %v13873_v20 = vpop.eup %13872  ;;  %v8691_v4 = vadd.f32 1e-05, %v8563_v46  ;;  %v8927_v37 = vmul.f32 %v13871_v45, %v21372_v47  ;;  %v14250_v45 = vld [vmem:[#allocation2 + $0x8] sm:$0xff]  ;;  %v7880_v47 = vcombine.high %v7876_v63, %v7876_v63 }
 0x63f   :  { %v8298_v16 = vpop.xlane.xlu1 %8297  ;;  %7922 = vperm.xlu1 %13234, %v7892_v38   ;;  %v8914_v55 = vmul.f32 %v13873_v20, %v21376_v25  ;;  %v21377_v38 = vld [vmem:[#allocation82_spill] sm:$0xff]  ;;  %v8680_v25 = vadd.f32 1e-05, %v8552_v12 }
 0x640   :  { %13886 = vrsqrt.f32 %v8691_v4  ;;  %v8549_v0 = vmul.f32 0.0625, %v8298_v16  ;;  %13038 = vmatprep.mubr.msk.f32.mxu1 %vm21374_vm5, %v8927_v37  ;;  %v7904_v4 = vrot.slane %v7876_v63, %v21212_v13  ;;  %v8568_v63 = vmul.f32 0.0625, %v19189_v3  ;;  %vm21401_vm5 = vmmov %vm21232_vm0 }
 0x641   :  { %v13875_v29 = vpop.eup %13874  ;;  %13039 = vmatmul.mubr.msk.f32.gmra.mxu1 %vm21375_vm11, %v8928_v36  ;;  %13888 = vrsqrt.f32 %v8678_v5  ;;  %v21379_v5 = vld [vmem:[#allocation244_spill] sm:$0xff]  ;;  %vm21405_vm11 = vmmov %vm21232_vm0 }
 0x642   :  { %v8677_v44 = vadd.f32 1e-05, %v8549_v0  ;;  %v7919_v54 = vpop.permute.xlu0 %7918  ;;  %v8913_v46 = vmul.f32 %v13875_v29, %v21377_v38  ;;  %v13877_v28 = vpop.eup %13876  ;;  %v21382_v0 = vld [vmem:[#allocation7_spill] sm:$0xff] }
 0x643   :  { %v7946_v30 = vmul.f32 %v14250_v45, %v7919_v54  ;;  %v8346_v7 = vpop.xlane.xlu1 %8345  ;;  %7926 = vperm.xlu1 %13234, %v7896_v62   ;;  %v8930_v29 = vmul.f32 %v13877_v28, %v21382_v0  ;;  %v21385_v45 = vld [vmem:[#allocation97_spill] sm:$0xff]  ;;  %v21387_v28 = vld [vmem:[#allocation243_spill] sm:$0xff]  ;;  %v21392_v0 = vld [vmem:[#allocation34_spill] sm:$0xff] }
 0x644   :  { %13890 = vrsqrt.f32 %v8677_v44  ;;  %v8565_v37 = vmul.f32 0.0625, %v8346_v7  ;;  %13013 = vmatprep.mubr.msk.f32.mxu0 %vm21378_vm6, %v8913_v46  ;;  %v14251_v44 = vld [vmem:[#allocation2 + $0x20] sm:$0xff]  ;;  %v7912_v46 = vrot.slane %v7880_v47, %v21212_v13  ;;  %v14252_v13 = vld [vmem:[#allocation2 + $0x30] sm:$0xff]  ;;  %vm21406_vm6 = vmmov %vm21232_vm0 }
 0x645   :  { %v13879_v20 = vpop.eup %13878  ;;  %v7954_v43 = vadd.f32 %v7946_v30, %v21379_v5  ;;  %13014 = vmatmul.mubr.msk.f32.gmra.mxu0 %vm21380_vm7, %v8914_v55  ;;  %13892 = vrsqrt.f32 %v8694_v15  ;;  %v8696_v5 = vadd.f32 1e-05, %v8568_v63  ;;  %vm21409_vm7 = vmmov %vm21232_vm0 }
 0x646   :  { %v8693_v16 = vadd.f32 1e-05, %v8565_v37  ;;  %v7931_v58 = vpop.permute.xlu0 %7930  ;;  %v8929_v36 = vmul.f32 %v13879_v20, %v21381_v34  ;;  %v13881_v62 = vpop.eup %13880  ;;  %v21388_v37 = vld [vmem:[#allocation141_spill] sm:$0xff]  ;;  %v21391_v34 = vld [vmem:[#allocation274_spill] sm:$0xff] }
 0x647   :  { %7963 = vst.msk [vmem:[#allocation2 + $0x8] sm:$0xff] %vm21383_vm8, %v7954_v43  ;;  %v7949_v54 = vmul.f32 %v14251_v44, %v7931_v58  ;;  %v8304_v38 = vpop.xlane.xlu1 %8303  ;;  %7934 = vperm.xlu1 %13234, %v7904_v4   ;;  %v8932_v12 = vmul.f32 %v13881_v62, %v21387_v28  ;;  %v8554_v4 = vmul.f32 0.0625, %v19203_v60  ;;  %vm10259_vm1 = vcmp.eq.s32.totalorder %v21032_v31, %v21391_v34  ;;  %v21393_v62 = vld [vmem:[#allocation160_spill] sm:$0xff]  ;;  %v21394_v44 = vld [vmem:[#allocation222_spill] sm:$0xff]  ;;  %vm21410_vm8 = vmmov %vm21232_vm0 }
 0x648   :  { %13894 = vrsqrt.f32 %v8693_v16  ;;  %v8551_v55 = vmul.f32 0.0625, %v8304_v38  ;;  %13041 = vmatprep.mubr.msk.f32.mxu1 %vm21384_vm14, %v8929_v36  ;;  %v21404_v34 = vld [vmem:[#allocation164_spill] sm:$0xff]  ;;  %vm21413_vm14 = vmmov %vm21232_vm0 }
 0x649   :  { %v13883_v15 = vpop.eup %13882  ;;  %v7957_v30 = vadd.f32 %v7949_v54, %v21385_v45  ;;  %13042 = vmatmul.mubr.msk.f32.gmra.mxu1 %vm21386_vm10, %v8930_v29  ;;  %13896 = vrsqrt.f32 %v8680_v25  ;;  %v8682_v38 = vadd.f32 1e-05, %v8554_v4  ;;  %vm21414_vm10 = vmmov %vm21232_vm0 }
 0x64a   :  { %v8679_v3 = vadd.f32 1e-05, %v8551_v55  ;;  %v7939_v7 = vpop.permute.xlu0 %7938  ;;  %v8931_v20 = vmul.f32 %v13883_v15, %v21388_v37  ;;  %v13885_v16 = vpop.eup %13884 }
 0x64b   :  { %7966 = vst.msk [vmem:[#allocation2 + $0x20] sm:$0xff] %vm21389_vm13, %v7957_v30  ;;  %v7951_v47 = vmul.f32 %v14252_v13, %v7939_v7  ;;  %v8352_v43 = vpop.xlane.xlu1 %8351  ;;  %7942 = vperm.xlu1 %13234, %v7912_v46   ;;  %v8948_v54 = vmul.f32 %v13885_v16, %v21394_v44  ;;  %v8570_v46 = vmul.f32 0.0625, %v19212_v9  ;;  %v21399_v30 = vld [vmem:[#allocation138_spill] sm:$0xff]  ;;  %v8556_v7 = vmul.f32 0.0625, %v19221_v57  ;;  %v21403_v13 = vld [vmem:[#allocation156_spill] sm:$0xff]  ;;  %vm21417_vm13 = vmmov %vm21232_vm0 }
 0x64c   :  { %13898 = vrsqrt.f32 %v8679_v3  ;;  %v8567_v58 = vmul.f32 0.0625, %v8352_v43  ;;  %13048 = vmatprep.mubr.msk.f32.mxu0 %vm21390_vm15, %v8931_v20  ;;  %v21400_v20 = vld [vmem:[#allocation139_spill] sm:$0xff]  ;;  %v8572_v16 = vmul.f32 0.0625, %v19231_v17  ;;  %vm21418_vm15 = vmmov %vm21232_vm0 }
 0x64d   :  { %v13887_v36 = vpop.eup %13886  ;;  %v7959_v29 = vadd.f32 %v7951_v47, %v21392_v0  ;;  %13049 = vmatmul.mubr.msk.f32.vlgmr.msra.gmra.mxu0 %vm21232_vm0, %v8932_v12  ;;  %13900 = vrsqrt.f32 %v8696_v5  ;;  %v8698_v3 = vadd.f32 1e-05, %v8570_v46  ;;  %v8684_v43 = vadd.f32 1e-05, %v8556_v7  ;;  %v21408_v17 = vld [vmem:[#allocation251_spill] sm:$0xff] }
 0x64e   :  { %v8695_v60 = vadd.f32 1e-05, %v8567_v58  ;;  %v8947_v25 = vmul.f32 %v13887_v36, %v21393_v62  ;;  %13101 = vmatpush3.msk.msra.mxu0 %vm10260_vm2, %v21062_v21  ;;  %v13889_v63 = vpop.eup %13888  ;;  %vm10475_vm2 = vcmp.eq.s32.totalorder %v21032_v31, %v21397_v24  ;;  %v21411_v24 = vld [vmem:[#allocation175_spill] sm:$0xff] }
 0x64f   :  { %7968 = vst.msk [vmem:[#allocation2 + $0x30] sm:$0xff] %vm21395_vm9, %v7959_v29  ;;  %v8310_v55 = vpop.xlane.xlu1 %8309  ;;  %13102 = vmatprep.subr.msk.mxu0 %vm10259_vm1, %v21062_v21  ;;  %v8934_v5 = vmul.f32 %v13889_v63, %v21400_v20  ;;  %v8558_v63 = vmul.f32 0.0625, %v19242_v14  ;;  %v21412_v14 = vld [vmem:[#allocation230_spill] sm:$0xff]  ;;  %vm21423_vm9 = vmmov %vm21232_vm0 }
 0x650   :  { %13902 = vrsqrt.f32 %v8695_v60  ;;  %v8553_v15 = vmul.f32 0.0625, %v8310_v55  ;;  %13076 = vmatprep.mubr.msk.f32.mxu1 %vm21396_vm3, %v8947_v25  ;;  %13103 = vmatpush3.msk.msra.mxu0 %vm10259_vm1, %v21062_v21  ;;  %v21407_v60 = vld [vmem:[#allocation140_spill] sm:$0xff]  ;;  %v8700_v25 = vadd.f32 1e-05, %v8572_v16  ;;  %vm21421_vm1 = vmmov %vm21232_vm0 }
 0x651   :  { %v13891_v9 = vpop.eup %13890  ;;  %13077 = vmatmul.mubr.msk.f32.vlgmr.msra.gmra.mxu1 %vm21398_vm4, %v8948_v54  ;;  %13904 = vrsqrt.f32 %v8682_v38  ;;  %vm21424_vm3 = vmmov %vm21232_vm0 }
 0x652   :  { %v8681_v45 = vadd.f32 1e-05, %v8553_v15  ;;  %v8933_v28 = vmul.f32 %v13891_v9, %v21399_v30  ;;  %13129 = vmatpush3.msk.msra.mxu1 %vm10476_vm12, %v21062_v21  ;;  %v13893_v12 = vpop.eup %13892  ;;  %vm21402_vm12 = vmmov %vm21232_vm0  ;;  %v8574_v30 = vmul.f32 0.0625, %v19255_v56  ;;  %v21416_v56 = vld [vmem:[#allocation144_spill] sm:$0xff] }
 0x653   :  { %v8358_v37 = vpop.xlane.xlu1 %8357  ;;  %13130 = vmatprep.subr.msk.mxu1 %vm10475_vm2, %v21062_v21  ;;  %v8950_v36 = vmul.f32 %v13893_v12, %v21404_v34  ;;  %vm21427_vm4 = vmmov %vm21232_vm0 }
 0x654   :  { %13906 = vrsqrt.f32 %v8681_v45  ;;  %v8569_v4 = vmul.f32 0.0625, %v8358_v37  ;;  %13051 = vmatprep.mubr.msk.f32.mxu0 %vm21401_vm5, %v8933_v28  ;;  %13131 = vmatpush3.msk.msra.mxu1 %vm10475_vm2, %v21062_v21  ;;  %v8686_v45 = vadd.f32 1e-05, %v8558_v63  ;;  %vm21426_vm2 = vmmov %vm21232_vm0 }
 0x655   :  { %v13895_v33 = vpop.eup %13894  ;;  %13052 = vmatmul.mubr.msk.f32.gmra.mxu0 %vm21402_vm12, %v8934_v5  ;;  %13908 = vrsqrt.f32 %v8698_v3  ;;  %v21415_v5 = vld [vmem:[#allocation136_spill] sm:$0xff]  ;;  %vm21429_vm5 = vmmov %vm21232_vm0 }
 0x656   :  { %v8697_v57 = vadd.f32 1e-05, %v8569_v4  ;;  %v8949_v47 = vmul.f32 %v13895_v33, %v21403_v13  ;;  %v13897_v0 = vpop.eup %13896  ;;  %v8702_v33 = vadd.f32 1e-05, %v8574_v30  ;;  %vm21430_vm12 = vmmov %vm21232_vm0 }
 0x657   :  { %v8316_v58 = vpop.xlane.xlu1 %8315  ;;  %v8936_v54 = vmul.f32 %v13897_v0, %v21408_v17 }
 0x658   :  { %13910 = vrsqrt.f32 %v8697_v57  ;;  %v8555_v29 = vmul.f32 0.0625, %v8316_v58  ;;  %13079 = vmatprep.mubr.msk.f32.mxu1 %vm21405_vm11, %v8949_v47  ;;  %v8560_v57 = vmul.f32 0.0625, %v19265_v59  ;;  %v21420_v59 = vld [vmem:[#allocation166_spill] sm:$0xff]  ;;  %vm21432_vm11 = vmmov %vm21232_vm0 }
 0x659   :  { %v13899_v31 = vpop.eup %13898  ;;  %13080 = vmatmul.mubr.msk.f32.gmra.mxu1 %vm21406_vm6, %v8950_v36  ;;  %13912 = vrsqrt.f32 %v8684_v43  ;;  %v21419_v36 = vld [vmem:[#allocation171_spill] sm:$0xff]  ;;  %vm21433_vm6 = vmmov %vm21232_vm0 }
 0x65a   :  { %v8683_v21 = vadd.f32 1e-05, %v8555_v29  ;;  %v8935_v62 = vmul.f32 %v13899_v31, %v21407_v60  ;;  %v13901_v38 = vpop.eup %13900  ;;  %v8688_v29 = vadd.f32 1e-05, %v8560_v57  ;;  %v8576_v31 = vmul.f32 0.0625, %v19273_v48  ;;  %v21422_v48 = vld [vmem:[#allocation234_spill] sm:$0xff] }
 0x65b   :  { %v8364_v44 = vpop.xlane.xlu1 %8363  ;;  %v8952_v12 = vmul.f32 %v13901_v38, %v21412_v14  ;;  %v8562_v38 = vmul.f32 0.0625, %v19281_v18  ;;  %v21425_v18 = vld [vmem:[#allocation248_spill] sm:$0xff] }
 0x65c   :  { %13914 = vrsqrt.f32 %v8683_v21  ;;  %v8571_v46 = vmul.f32 0.0625, %v8364_v44  ;;  %13054 = vmatprep.mubr.msk.f32.mxu0 %vm21409_vm7, %v8935_v62  ;;  %vm21435_vm7 = vmmov %vm21232_vm0 }
 0x65d   :  { %v13903_v55 = vpop.eup %13902  ;;  %13055 = vmatmul.mubr.msk.f32.gmra.mxu0 %vm21410_vm8, %v8936_v54  ;;  %13916 = vrsqrt.f32 %v8700_v25  ;;  %v8704_v54 = vadd.f32 1e-05, %v8576_v31  ;;  %vm21436_vm8 = vmmov %vm21232_vm0 }
 0x65e   :  { %v8699_v15 = vadd.f32 1e-05, %v8571_v46  ;;  %v8951_v9 = vmul.f32 %v13903_v55, %v21411_v24  ;;  %v13905_v3 = vpop.eup %13904 }
 0x65f   :  { %v8322_v28 = vpop.xlane.xlu1 %8321  ;;  %v8938_v47 = vmul.f32 %v13905_v3, %v21416_v56 }
 0x660   :  { %13918 = vrsqrt.f32 %v8699_v15  ;;  %v8557_v7 = vmul.f32 0.0625, %v8322_v28  ;;  %13082 = vmatprep.mubr.msk.f32.mxu1 %vm21413_vm14, %v8951_v9  ;;  %v8578_v28 = vmul.f32 0.0625, %v19291_v11  ;;  %v21428_v11 = vld [vmem:[#allocation146_spill] sm:$0xff]  ;;  %vm21438_vm14 = vmmov %vm21232_vm0 }
 0x661   :  { %v13907_v37 = vpop.eup %13906  ;;  %13083 = vmatmul.mubr.msk.f32.gmra.mxu1 %vm21414_vm10, %v8952_v12  ;;  %13920 = vrsqrt.f32 %v8686_v45  ;;  %vm21439_vm10 = vmmov %vm21232_vm0 }
 0x662   :  { %v8685_v20 = vadd.f32 1e-05, %v8557_v7  ;;  %v8937_v4 = vmul.f32 %v13907_v37, %v21415_v5  ;;  %v13909_v43 = vpop.eup %13908 }
 0x663   :  { %v8370_v13 = vpop.xlane.xlu1 %8369  ;;  %v8954_v60 = vmul.f32 %v13909_v43, %v21420_v59  ;;  %v8596_v43 = vmul.f32 0.0625, %v19311_v26 }
 0x664   :  { %13922 = vrsqrt.f32 %v8685_v20  ;;  %v8573_v16 = vmul.f32 0.0625, %v8370_v13  ;;  %13057 = vmatprep.mubr.msk.f32.mxu0 %vm21417_vm13, %v8937_v4  ;;  %v8580_v4 = vmul.f32 0.0625, %v19301_v19  ;;  %v21431_v19 = vld [vmem:[#allocation179_spill] sm:$0xff]  ;;  %vm21441_vm13 = vmmov %vm21232_vm0 }
 0x665   :  { %v13911_v58 = vpop.eup %13910  ;;  %13058 = vmatmul.mubr.msk.f32.gmra.mxu0 %vm21418_vm15, %v8938_v47  ;;  %13924 = vrsqrt.f32 %v8702_v33  ;;  %vm21442_vm15 = vmmov %vm21232_vm0 }
 0x666   :  { %v8701_v34 = vadd.f32 1e-05, %v8573_v16  ;;  %v8953_v0 = vmul.f32 %v13911_v58, %v21419_v36  ;;  %v13913_v62 = vpop.eup %13912  ;;  %v8708_v58 = vadd.f32 1e-05, %v8580_v4 }
 0x667   :  { %v8328_v21 = vpop.xlane.xlu1 %8327  ;;  %v8940_v55 = vmul.f32 %v13913_v62, %v21422_v48  ;;  %v21434_v62 = vld [vmem:[#allocation258_spill] sm:$0xff] }
 0x668   :  { %13926 = vrsqrt.f32 %v8701_v34  ;;  %v8559_v25 = vmul.f32 0.0625, %v8328_v21  ;;  %13085 = vmatprep.mubr.msk.f32.mxu1 %vm21421_vm1, %v8953_v0  ;;  %v8724_v21 = vadd.f32 1e-05, %v8596_v43  ;;  %vm21444_vm1 = vmmov %vm21232_vm0 }
 0x669   :  { %v13915_v63 = vpop.eup %13914  ;;  %13086 = vmatmul.mubr.msk.f32.gmra.mxu1 %vm21232_vm0, %v8954_v60  ;;  %13928 = vrsqrt.f32 %v8688_v29 }
 0x66a   :  { %v8687_v44 = vadd.f32 1e-05, %v8559_v25  ;;  %v8939_v17 = vmul.f32 %v13915_v63, %v21218_v50  ;;  %v13917_v15 = vpop.eup %13916  ;;  %v8690_v50 = vadd.f32 1e-05, %v8562_v38 }
 0x66b   :  { %v8376_v46 = vpop.xlane.xlu1 %8375  ;;  %v8956_v12 = vmul.f32 %v13917_v15, %v21425_v18 }
 0x66c   :  { %13930 = vrsqrt.f32 %v8687_v44  ;;  %v8575_v24 = vmul.f32 0.0625, %v8376_v46  ;;  %13060 = vmatprep.mubr.msk.f32.mxu0 %vm21423_vm9, %v8939_v17  ;;  %vm21446_vm9 = vmmov %vm21232_vm0 }
 0x66d   :  { %v13919_v9 = vpop.eup %13918  ;;  %13061 = vmatmul.mubr.msk.f32.gmra.mxu0 %vm21424_vm3, %v8940_v55  ;;  %13932 = vrsqrt.f32 %v8704_v54  ;;  %vm21447_vm3 = vmmov %vm21232_vm0 }
 0x66e   :  { %v8703_v45 = vadd.f32 1e-05, %v8575_v24  ;;  %v8955_v30 = vmul.f32 %v13919_v9, %v21222_v2  ;;  %v13921_v3 = vpop.eup %13920  ;;  %v8706_v2 = vadd.f32 1e-05, %v8578_v28 }
 0x66f   :  { %v8334_v14 = vpop.xlane.xlu1 %8333  ;;  %v8942_v57 = vmul.f32 %v13921_v3, %v21428_v11 }
 0x670   :  { %13934 = vrsqrt.f32 %v8703_v45  ;;  %v8561_v7 = vmul.f32 0.0625, %v8334_v14  ;;  %13088 = vmatprep.mubr.msk.f32.mxu1 %vm21426_vm2, %v8955_v30  ;;  %vm21449_vm2 = vmmov %vm21232_vm0 }
 0x671   :  { %v13923_v37 = vpop.eup %13922  ;;  %13089 = vmatmul.mubr.msk.f32.gmra.mxu1 %vm21427_vm4, %v8956_v12  ;;  %13936 = vrsqrt.f32 %v8690_v50  ;;  %vm21450_vm4 = vmmov %vm21232_vm0 }
 0x672   :  { %v8689_v20 = vadd.f32 1e-05, %v8561_v7  ;;  %v8941_v5 = vmul.f32 %v13923_v37, %v21225_v22  ;;  %v13925_v13 = vpop.eup %13924 }
 0x673   :  { %v8382_v33 = vpop.xlane.xlu1 %8381  ;;  %v8958_v36 = vmul.f32 %v13925_v13, %v21431_v19 }
 0x674   :  { %13938 = vrsqrt.f32 %v8689_v20  ;;  %v8577_v56 = vmul.f32 0.0625, %v8382_v33  ;;  %13063 = vmatprep.mubr.msk.f32.mxu0 %vm21429_vm5, %v8941_v5  ;;  %v8600_v20 = vmul.f32 0.0625, %v19378_v1  ;;  %vm21453_vm5 = vmmov %vm21232_vm0 }
 0x675   :  { %v13927_v47 = vpop.eup %13926  ;;  %13064 = vmatmul.mubr.msk.f32.gmra.mxu0 %vm21430_vm12, %v8942_v57  ;;  %13940 = vrsqrt.f32 %v8706_v2  ;;  %vm21454_vm12 = vmmov %vm21232_vm0 }
 0x676   :  { %v8705_v16 = vadd.f32 1e-05, %v8577_v56  ;;  %v8957_v22 = vmul.f32 %v13927_v47, %v21228_v42  ;;  %v13929_v0 = vpop.eup %13928  ;;  %v8582_v42 = vmul.f32 0.0625, %v19321_v27  ;;  %v21437_v27 = vld [vmem:[#allocation246_spill] sm:$0xff]  ;;  %v21445_v47 = vld [vmem:[#allocation252_spill] sm:$0xff] }
 0x677   :  { %v8388_v34 = vpop.xlane.xlu1 %8387  ;;  %v8944_v25 = vmul.f32 %v13929_v0, %v21434_v62  ;;  %v8728_v1 = vadd.f32 1e-05, %v8600_v20  ;;  %v21448_v0 = vld [vmem:[#allocation264_spill] sm:$0xff] }
 0x678   :  { %13942 = vrsqrt.f32 %v8705_v16  ;;  %v8579_v29 = vmul.f32 0.0625, %v8388_v34  ;;  %13091 = vmatprep.mubr.msk.f32.mxu1 %vm21432_vm11, %v8957_v22  ;;  %v8710_v46 = vadd.f32 1e-05, %v8582_v42  ;;  %v8586_v16 = vmul.f32 0.0625, %v19406_v8  ;;  %vm21458_vm11 = vmmov %vm21232_vm0  ;;  %v21460_v20 = vld [vmem:[#allocation176_spill] sm:$0xff] }
 0x679   :  { %v13931_v31 = vpop.eup %13930  ;;  %13092 = vmatmul.mubr.msk.f32.gmra.mxu1 %vm21433_vm6, %v8958_v36  ;;  %13944 = vrsqrt.f32 %v8708_v58  ;;  %vm21459_vm6 = vmmov %vm21232_vm0 }
 0x67a   :  { %v8707_v59 = vadd.f32 1e-05, %v8579_v29  ;;  %v8943_v26 = vmul.f32 %v13931_v31, %v21230_v51  ;;  %v13933_v63 = vpop.eup %13932  ;;  %v8598_v51 = vmul.f32 0.0625, %v19331_v35  ;;  %v21440_v35 = vld [vmem:[#allocation159_spill] sm:$0xff]  ;;  %v8714_v8 = vadd.f32 1e-05, %v8586_v16 }
 0x67b   :  { %v8436_v60 = vpop.xlane.xlu1 %8435  ;;  %v8960_v55 = vmul.f32 %v13933_v63, %v21437_v27 }
 0x67c   :  { %13946 = vrsqrt.f32 %v8707_v59  ;;  %v8595_v44 = vmul.f32 0.0625, %v8436_v60  ;;  %13066 = vmatprep.mubr.msk.f32.mxu0 %vm21435_vm7, %v8943_v26  ;;  %v8726_v50 = vadd.f32 1e-05, %v8598_v51  ;;  %v8602_v26 = vmul.f32 0.0625, %v19417_v49  ;;  %v21452_v49 = vld [vmem:[#allocation172_spill] sm:$0xff]  ;;  %vm21463_vm7 = vmmov %vm21232_vm0 }
 0x67d   :  { %v13935_v17 = vpop.eup %13934  ;;  %13067 = vmatmul.mubr.msk.f32.gmra.mxu0 %vm21436_vm8, %v8944_v25  ;;  %13948 = vrsqrt.f32 %v8724_v21  ;;  %vm21464_vm8 = vmmov %vm21232_vm0 }
 0x67e   :  { %v8723_v54 = vadd.f32 1e-05, %v8595_v44  ;;  %v8959_v38 = vmul.f32 %v13935_v17, %v21234_v52  ;;  %v13937_v15 = vpop.eup %13936  ;;  %v8584_v52 = vmul.f32 0.0625, %v19346_v53  ;;  %v21443_v53 = vld [vmem:[#allocation178_spill] sm:$0xff]  ;;  %v21451_v17 = vld [vmem:[#allocation187_spill] sm:$0xff] }
 0x67f   :  { %v8394_v48 = vpop.xlane.xlu1 %8393  ;;  %v8946_v14 = vmul.f32 %v13937_v15, %v21440_v35 }
 0x680   :  { %13950 = vrsqrt.f32 %v8723_v54  ;;  %v8581_v24 = vmul.f32 0.0625, %v8394_v48  ;;  %13094 = vmatprep.mubr.msk.f32.mxu1 %vm21438_vm14, %v8959_v38  ;;  %v8588_v38 = vmul.f32 0.0625, %v19427_v41  ;;  %vm21468_vm14 = vmmov %vm21232_vm0 }
 0x681   :  { %v13939_v9 = vpop.eup %13938  ;;  %13095 = vmatmul.mubr.msk.f32.gmra.mxu1 %vm21439_vm10, %v8960_v55  ;;  %13952 = vrsqrt.f32 %v8710_v46  ;;  %vm21469_vm10 = vmmov %vm21232_vm0 }
 0x682   :  { %v8709_v45 = vadd.f32 1e-05, %v8581_v24  ;;  %v8945_v30 = vmul.f32 %v13939_v9, %v21238_v10  ;;  %v13941_v18 = vpop.eup %13940  ;;  %v8712_v10 = vadd.f32 1e-05, %v8584_v52  ;;  %v21455_v9 = vld [vmem:[#allocation12_spill] sm:$0xff] }
 0x683   :  { %v8442_v28 = vpop.xlane.xlu1 %8441  ;;  %v8962_v2 = vmul.f32 %v13941_v18, %v21443_v53 }
 0x684   :  { %13954 = vrsqrt.f32 %v8709_v45  ;;  %v8597_v12 = vmul.f32 0.0625, %v8442_v28  ;;  %13069 = vmatprep.mubr.msk.f32.mxu0 %vm21441_vm13, %v8945_v30  ;;  %v12938_v57 = vpop.f32.mrf.mxu0  ;;  %v8716_v30 = vadd.f32 1e-05, %v8588_v38  ;;  %v21457_v28 = vld [vmem:[#allocation206_spill] sm:$0xff]  ;;  %vm21473_vm13 = vmmov %vm21232_vm0 }
 0x685   :  { %v13943_v3 = vpop.eup %13942  ;;  %13070 = vmatmul.mubr.msk.f32.gmra.mxu0 %vm21442_vm15, %v8946_v14  ;;  %13956 = vrsqrt.f32 %v8726_v50  ;;  %v21456_v50 = vld [vmem:[#allocation90_spill] sm:$0xff]  ;;  %vm21474_vm15 = vmmov %vm21232_vm0 }
 0x686   :  { %v8725_v7 = vadd.f32 1e-05, %v8597_v12  ;;  %v8961_v37 = vmul.f32 %v13943_v3, %v21242_v39  ;;  %v13945_v4 = vpop.eup %13944  ;;  %v9122_v29 = vpop.f32.mrf.mxu0  ;;  %v8604_v52 = vmul.f32 0.0625, %v21456_v50 }
 0x687   :  { %v8400_v5 = vpop.xlane.xlu1 %8399  ;;  %v8964_v43 = vmul.f32 %v13945_v4, %v21445_v47 }
 0x688   :  { %13958 = vrsqrt.f32 %v8725_v7  ;;  %v8583_v33 = vmul.f32 0.0625, %v8400_v5  ;;  %13097 = vmatprep.mubr.msk.f32.mxu1 %vm21444_vm1, %v8961_v37  ;;  %v8732_v53 = vadd.f32 1e-05, %v8604_v52  ;;  %v8608_v52 = vmul.f32 0.0625, %v19470_v61  ;;  %vm21477_vm1 = vmmov %vm21232_vm0 }
 0x689   :  { %v13947_v11 = vpop.eup %13946  ;;  %13098 = vmatmul.mubr.msk.f32.gmra.mxu1 %vm21232_vm0, %v8962_v2  ;;  %13960 = vrsqrt.f32 %v8712_v10  ;;  %v21461_v2 = vld [vmem:[#allocation37_spill] sm:$0xff] }
 0x68a   :  { %v8711_v13 = vadd.f32 1e-05, %v8583_v33  ;;  %v8963_v56 = vmul.f32 %v13947_v11, %v21247_v40  ;;  %v13949_v39 = vpop.eup %13948  ;;  %v8590_v4 = vmul.f32 0.0625, %v21461_v2  ;;  %v8736_v61 = vadd.f32 1e-05, %v8608_v52  ;;  %v14253_v52 = vld [vmem:[#allocation2] sm:$0xff] }
 0x68b   :  { %v8448_v22 = vpop.xlane.xlu1 %8447  ;;  %v8980_v40 = vmul.f32 %v13949_v39, %v21448_v0 }
 0x68c   :  { %13962 = vrsqrt.f32 %v8711_v13  ;;  %v8599_v58 = vmul.f32 0.0625, %v8448_v22  ;;  %v12966_v34 = vpop.f32.mrf.mxu1  ;;  %13104 = vmatprep.mubr.msk.f32.mxu0 %vm21446_vm9, %v8963_v56  ;;  %v21465_v22 = vld [vmem:[#allocation189_spill] sm:$0xff]  ;;  %vm21480_vm9 = vmmov %vm21232_vm0 }
 0x68d   :  { %v13951_v19 = vpop.eup %13950  ;;  %v19637_v36 = vadd.f32 %v12966_v34, %v12938_v57  ;;  %13105 = vmatmul.mubr.msk.f32.vlgmr.msra.gmra.mxu0 %vm21447_vm3, %v8964_v43  ;;  %13964 = vrsqrt.f32 %v8728_v1  ;;  %v21462_v57 = vld [vmem:[#allocation261_spill] sm:$0xff]  ;;  %v8718_v34 = vadd.f32 1e-05, %v8590_v4  ;;  %v8594_v4 = vmul.f32 0.0625, %v19484_v6  ;;  %vm21481_vm3 = vmmov %vm21232_vm0  ;;  %v21482_v6 = vld [vmem:[#allocation220_spill] sm:$0xff] }
 0x68e   :  { %v8727_v31 = vadd.f32 1e-05, %v8599_v58  ;;  %v9315_v21 = vpop.f32.mrf.mxu1  ;;  %v8979_v59 = vmul.f32 %v13951_v19, %v21251_v32  ;;  %v13953_v62 = vpop.eup %13952  ;;  %v8730_v32 = vadd.f32 1e-05, %v8602_v26  ;;  %v21466_v19 = vld [vmem:[#allocation19_spill] sm:$0xff] }
 0x68f   :  { %v19643_v42 = vadd.f32 %v9315_v21, %v9122_v29  ;;  %v8406_v60 = vpop.xlane.xlu1 %8405  ;;  %v8966_v51 = vmul.f32 %v13953_v62, %v21452_v49  ;;  %v8606_v0 = vmul.f32 0.0625, %v21466_v19  ;;  %v21467_v29 = vld [vmem:[#allocation263_spill] sm:$0xff] }
 0x690   :  { %13966 = vrsqrt.f32 %v8727_v31  ;;  %v8585_v25 = vmul.f32 0.0625, %v8406_v60  ;;  %13132 = vmatprep.mubr.msk.f32.mxu1 %vm21449_vm2, %v8979_v59  ;;  %v21472_v49 = vld [vmem:[#allocation195_spill] sm:$0xff]  ;;  %vm21484_vm2 = vmmov %vm21232_vm0 }
 0x691   :  { %v13955_v63 = vpop.eup %13954  ;;  %13133 = vmatmul.mubr.msk.f32.vlgmr.msra.gmra.mxu1 %vm21450_vm4, %v8980_v40  ;;  %13968 = vrsqrt.f32 %v8714_v8  ;;  %vm21485_vm4 = vmmov %vm21232_vm0 }
 0x692   :  { %v8713_v44 = vadd.f32 1e-05, %v8585_v25  ;;  %v8965_v54 = vmul.f32 %v13955_v63, %v21451_v17  ;;  %v13957_v48 = vpop.eup %13956  ;;  %v21470_v63 = vld [vmem:[#allocation186_spill] sm:$0xff]  ;;  %v8734_v17 = vadd.f32 1e-05, %v8606_v0 }
 0x693   :  { %v8454_v46 = vpop.xlane.xlu1 %8453  ;;  %v8982_v35 = vmul.f32 %v13957_v48, %v21457_v28  ;;  %v8722_v0 = vadd.f32 1e-05, %v8594_v4 }
 0x694   :  { %13970 = vrsqrt.f32 %v8713_v44  ;;  %v8601_v27 = vmul.f32 0.0625, %v8454_v46  ;;  %13107 = vmatprep.mubr.msk.f32.mxu0 %vm21453_vm5, %v8965_v54  ;;  %v12941_v24 = vpop.f32.mrf.mxu0  ;;  %v21471_v54 = vld [vmem:[#allocation134_spill] sm:$0xff]  ;;  %vm21488_vm5 = vmmov %vm21232_vm0 }
 0x695   :  { %v13959_v55 = vpop.eup %13958  ;;  %13108 = vmatmul.mubr.msk.f32.gmra.mxu0 %vm21454_vm12, %v8966_v51  ;;  %13972 = vrsqrt.f32 %v8730_v32  ;;  %v8592_v32 = vmul.f32 0.0625, %v21471_v54  ;;  %vm21489_vm12 = vmmov %vm21232_vm0 }
 0x696   :  { %v8729_v15 = vadd.f32 1e-05, %v8601_v27  ;;  %v8981_v45 = vmul.f32 %v13959_v55, %v21455_v9  ;;  %v13961_v14 = vpop.eup %13960  ;;  %v9132_v7 = vpop.f32.mrf.mxu0 }
 0x697   :  { %v8412_v41 = vpop.xlane.xlu1 %8411  ;;  %v8968_v13 = vmul.f32 %v13961_v14, %v21462_v57  ;;  %v8720_v50 = vadd.f32 1e-05, %v8592_v32  ;;  %v21479_v57 = vld [vmem:[#allocation26_spill] sm:$0xff] }
 0x698   :  { %13974 = vrsqrt.f32 %v8729_v15  ;;  %v8587_v18 = vmul.f32 0.0625, %v8412_v41  ;;  %13135 = vmatprep.mubr.msk.f32.mxu1 %vm21458_vm11, %v8981_v45  ;;  %v21475_v45 = vld [vmem:[#allocation185_spill] sm:$0xff]  ;;  %v21487_v32 = vld [vmem:[#allocation194_spill] sm:$0xff]  ;;  %vm21492_vm11 = vmmov %vm21232_vm0 }
 0x699   :  { %v13963_v12 = vpop.eup %13962  ;;  %v12969_v3 = vpop.f32.mrf.mxu1  ;;  %13136 = vmatmul.mubr.msk.f32.gmra.mxu1 %vm21459_vm6, %v8982_v35  ;;  %13976 = vrsqrt.f32 %v8716_v30  ;;  %v21476_v35 = vld [vmem:[#allocation208_spill] sm:$0xff]  ;;  %vm21493_vm6 = vmmov %vm21232_vm0 }
 0x69a   :  { %v8715_v37 = vadd.f32 1e-05, %v8587_v18  ;;  %v19657_v10 = vadd.f32 %v12969_v3, %v12941_v24  ;;  %v8967_v5 = vmul.f32 %v13963_v12, %v21460_v20  ;;  %v13965_v56 = vpop.eup %13964 }
 0x69b   :  { %v9325_v33 = vpop.f32.mrf.mxu1  ;;  %v8460_v11 = vpop.xlane.xlu1 %8459  ;;  %v8984_v31 = vmul.f32 %v13965_v56, %v21467_v29 }
 0x69c   :  { %13978 = vrsqrt.f32 %v8715_v37  ;;  %v19662_v39 = vadd.f32 %v9325_v33, %v9132_v7  ;;  %v8603_v47 = vmul.f32 0.0625, %v8460_v11  ;;  %13110 = vmatprep.mubr.msk.f32.mxu0 %vm21463_vm7, %v8967_v5  ;;  %vm21497_vm7 = vmmov %vm21232_vm0 }
 0x69d   :  { %v13967_v43 = vpop.eup %13966  ;;  %13111 = vmatmul.mubr.msk.f32.gmra.mxu0 %vm21464_vm8, %v8968_v13  ;;  %v12944_v16 = vpop.f32.mrf.mxu0  ;;  %13980 = vrsqrt.f32 %v8732_v53  ;;  %v21478_v53 = vld [vmem:[#allocation191_spill] sm:$0xff]  ;;  %vm21498_vm8 = vmmov %vm21232_vm0 }
 0x69e   :  { %v8731_v1 = vadd.f32 1e-05, %v8603_v47  ;;  %v8983_v58 = vmul.f32 %v13967_v43, %v21465_v22  ;;  %v13969_v21 = vpop.eup %13968 }
 0x69f   :  { %v8418_v40 = vpop.xlane.xlu1 %8417  ;;  %v9142_v62 = vpop.f32.mrf.mxu0  ;;  %v8970_v51 = vmul.f32 %v13969_v21, %v21472_v49  ;;  %v21483_v21 = vld [vmem:[#allocation66_spill] sm:$0xff] }
 0x6a0   :  { %13982 = vrsqrt.f32 %v8731_v1  ;;  %v8589_v59 = vmul.f32 0.0625, %v8418_v40  ;;  %13138 = vmatprep.mubr.msk.f32.mxu1 %vm21468_vm14, %v8983_v58  ;;  %v8610_v40 = vmul.f32 0.0625, %v19499_v23  ;;  %vm21499_vm14 = vmmov %vm21232_vm0 }
 0x6a1   :  { %v13971_v8 = vpop.eup %13970  ;;  %v12972_v26 = vpop.f32.mrf.mxu1  ;;  %13139 = vmatmul.mubr.msk.f32.gmra.mxu1 %vm21469_vm10, %v8984_v31  ;;  %13984 = vrsqrt.f32 %v8718_v34  ;;  %vm21503_vm10 = vmmov %vm21232_vm0 }
 0x6a2   :  { %v8717_v60 = vadd.f32 1e-05, %v8589_v59  ;;  %v19671_v25 = vadd.f32 %v12972_v26, %v12944_v16  ;;  %v8969_v44 = vmul.f32 %v13971_v8, %v21470_v63  ;;  %v13973_v48 = vpop.eup %13972  ;;  %v8738_v54 = vadd.f32 1e-05, %v8610_v40  ;;  %v14255_v40 = vld [vmem:[#allocation2 + $0x18] sm:$0xff] }
 0x6a3   :  { %v9335_v38 = vpop.f32.mrf.mxu1  ;;  %v8466_v46 = vpop.xlane.xlu1 %8465  ;;  %v8986_v14 = vmul.f32 %v13973_v48, %v21476_v35 }
 0x6a4   :  { %13986 = vrsqrt.f32 %v8717_v60  ;;  %v19676_v27 = vadd.f32 %v9335_v38, %v9142_v62  ;;  %v8605_v55 = vmul.f32 0.0625, %v8466_v46  ;;  %13113 = vmatprep.mubr.msk.f32.mxu0 %vm21473_vm13, %v8969_v44  ;;  %v21486_v44 = vld [vmem:[#allocation188_spill] sm:$0xff]  ;;  %vm21504_vm13 = vmmov %vm21232_vm0 }
 0x6a5   :  { %v13975_v15 = vpop.eup %13974  ;;  %v12947_v24 = vpop.f32.mrf.mxu0  ;;  %13114 = vmatmul.mubr.msk.f32.gmra.mxu0 %vm21474_vm15, %v8970_v51  ;;  %13988 = vrsqrt.f32 %v8734_v17  ;;  %vm21505_vm15 = vmmov %vm21232_vm0 }
 0x6a6   :  { %v8733_v9 = vadd.f32 1e-05, %v8605_v55  ;;  %v8985_v30 = vmul.f32 %v13975_v15, %v21475_v45  ;;  %v13977_v18 = vpop.eup %13976  ;;  %v21490_v15 = vld [vmem:[#allocation193_spill] sm:$0xff] }
 0x6a7   :  { %v8424_v41 = vpop.xlane.xlu1 %8423  ;;  %v9152_v28 = vpop.f32.mrf.mxu0  ;;  %v8972_v13 = vmul.f32 %v13977_v18, %v21479_v57  ;;  %v21491_v45 = vld [vmem:[#allocation201_spill] sm:$0xff] }
 0x6a8   :  { %13990 = vrsqrt.f32 %v8733_v9  ;;  %v8591_v12 = vmul.f32 0.0625, %v8424_v41  ;;  %13141 = vmatprep.mubr.msk.f32.mxu1 %vm21477_vm1, %v8985_v30  ;;  %v21494_v18 = vld [vmem:[#allocation217_spill] sm:$0xff]  ;;  %vm21509_vm1 = vmmov %vm21232_vm0 }
 0x6a9   :  { %v13979_v3 = vpop.eup %13978  ;;  %v12975_v7 = vpop.f32.mrf.mxu1  ;;  %13142 = vmatmul.mubr.msk.f32.gmra.mxu1 %vm21232_vm0, %v8986_v14  ;;  %13992 = vrsqrt.f32 %v8720_v50 }
 0x6aa   :  { %v8719_v37 = vadd.f32 1e-05, %v8591_v12  ;;  %v12950_v20 = vpop.f32.mrf.mxu0  ;;  %v19685_v5 = vadd.f32 %v12975_v7, %v12947_v24  ;;  %v8971_v2 = vmul.f32 %v13979_v3, %v21478_v53  ;;  %v13981_v56 = vpop.eup %13980  ;;  %v21495_v7 = vld [vmem:[#allocation200_spill] sm:$0xff] }
 0x6ab   :  { %v9345_v33 = vpop.f32.mrf.mxu1  ;;  %v8472_v11 = vpop.xlane.xlu1 %8471  ;;  %v8988_v59 = vmul.f32 %v13981_v56, %v21483_v21  ;;  %v21500_v56 = vld [vmem:[#allocation218_spill] sm:$0xff] }
 0x6ac   :  { %13994 = vrsqrt.f32 %v8719_v37  ;;  %v19690_v47 = vadd.f32 %v9345_v33, %v9152_v28  ;;  %v8607_v43 = vmul.f32 0.0625, %v8472_v11  ;;  %13116 = vmatprep.mubr.msk.f32.mxu0 %vm21480_vm9, %v8971_v2  ;;  %v9162_v58 = vpop.f32.mrf.mxu0  ;;  %v21496_v2 = vld [vmem:[#allocation61_spill] sm:$0xff]  ;;  %vm21510_vm9 = vmmov %vm21232_vm0 }
 0x6ad   :  { %v13983_v1 = vpop.eup %13982  ;;  %v12978_v16 = vpop.f32.mrf.mxu1  ;;  %13117 = vmatmul.mubr.msk.f32.gmra.mxu0 %vm21481_vm3, %v8972_v13  ;;  %13996 = vrsqrt.f32 %v8736_v61  ;;  %v14254_v11 = vld [vmem:[#allocation2 + $0x10] sm:$0xff]  ;;  %vm21514_vm3 = vmmov %vm21232_vm0 }
 0x6ae   :  { %v8735_v22 = vadd.f32 1e-05, %v8607_v43  ;;  %v19694_v34 = vadd.f32 %v12978_v16, %v12950_v20  ;;  %v8987_v19 = vmul.f32 %v13983_v1, %v21482_v6  ;;  %v13985_v8 = vpop.eup %13984  ;;  %v21501_v16 = vld [vmem:[#allocation219_spill] sm:$0xff]  ;;  %v21502_v6 = vld [vmem:[#allocation62_spill] sm:$0xff] }
 0x6af   :  { %v9355_v29 = vpop.f32.mrf.mxu1  ;;  %v8430_v31 = vpop.xlane.xlu1 %8429  ;;  %v8974_v38 = vmul.f32 %v13985_v8, %v21487_v32 }
 0x6b0   :  { %13998 = vrsqrt.f32 %v8735_v22  ;;  %v19699_v26 = vadd.f32 %v9355_v29, %v9162_v58  ;;  %v8593_v60 = vmul.f32 0.0625, %v8430_v31  ;;  %13144 = vmatprep.mubr.msk.f32.mxu1 %vm21484_vm2, %v8987_v19  ;;  %vm21515_vm2 = vmmov %vm21232_vm0 }
 0x6b1   :  { %v13987_v62 = vpop.eup %13986  ;;  %13145 = vmatmul.mubr.msk.f32.gmra.mxu1 %vm21485_vm4, %v8988_v59  ;;  %14000 = vrsqrt.f32 %v8722_v0  ;;  %v21506_v59 = vld [vmem:[#allocation254_spill] sm:$0xff]  ;;  %vm21516_vm4 = vmmov %vm21232_vm0 }
 0x6b2   :  { %v8721_v63 = vadd.f32 1e-05, %v8593_v60  ;;  %v8973_v17 = vmul.f32 %v13987_v62, %v21486_v44  ;;  %v13989_v46 = vpop.eup %13988 }
 0x6b3   :  { %v8478_v23 = vpop.xlane.xlu1 %8477  ;;  %v8990_v30 = vmul.f32 %v13989_v46, %v21491_v45 }
 0x6b4   :  { %14002 = vrsqrt.f32 %v8721_v63  ;;  %v8609_v49 = vmul.f32 0.0625, %v8478_v23  ;;  %13119 = vmatprep.mubr.msk.f32.mxu0 %vm21488_vm5, %v8973_v17  ;;  %v12953_v55 = vpop.f32.mrf.mxu0  ;;  %v21507_v63 = vld [vmem:[#allocation203_spill] sm:$0xff]  ;;  %v21508_v23 = vld [vmem:[#allocation204_spill] sm:$0xff]  ;;  %vm21518_vm5 = vmmov %vm21232_vm0 }
 0x6b5   :  { %v13991_v51 = vpop.eup %13990  ;;  %13120 = vmatmul.mubr.msk.f32.gmra.mxu0 %vm21489_vm12, %v8974_v38  ;;  %14004 = vrsqrt.f32 %v8738_v54 }
 0x6b6   :  { %v8737_v48 = vadd.f32 1e-05, %v8609_v49  ;;  %v8989_v24 = vmul.f32 %v13991_v51, %v21490_v15  ;;  %v13993_v50 = vpop.eup %13992  ;;  %v9172_v14 = vpop.f32.mrf.mxu0  ;;  %v14256_v49 = vld [vmem:[#allocation2 + $0x28] sm:$0xff] }
 0x6b7   :  { %v7915_v9 = vpop.permute.xlu1 %7914  ;;  %v8976_v61 = vmul.f32 %v13993_v50, %v21496_v2  ;;  %v21513_v50 = vld [vmem:[#allocation209_spill] sm:$0xff] }
 0x6b8   :  { %14006 = vrsqrt.f32 %v8737_v48  ;;  %v7945_v41 = vmul.f32 %v14253_v52, %v7915_v9  ;;  %13147 = vmatprep.mubr.msk.f32.mxu1 %vm21492_vm11, %v8989_v24  ;;  %v21512_v24 = vld [vmem:[#allocation216_spill] sm:$0xff] }
 0x6b9   :  { %v13995_v28 = vpop.eup %13994  ;;  %v12981_v35 = vpop.f32.mrf.mxu1  ;;  %13148 = vmatmul.mubr.msk.f32.gmra.mxu1 %vm21493_vm6, %v8990_v30 }
 0x6ba   :  { %v7953_v12 = vadd.f32 %v7945_v41, %v21494_v18  ;;  %v19712_v3 = vadd.f32 %v12981_v35, %v12953_v55  ;;  %v8975_v37 = vmul.f32 %v13995_v28, %v21495_v7  ;;  %v13997_v4 = vpop.eup %13996  ;;  %v21511_v55 = vld [vmem:[#allocation228_spill] sm:$0xff]  ;;  %v14257_v41 = vld [vmem:[#allocation2 + $0x38] sm:$0xff] }
 0x6bb   :  { %v9365_v20 = vpop.f32.mrf.mxu1  ;;  %v7923_v53 = vpop.permute.xlu1 %7922  ;;  %v8992_v19 = vmul.f32 %v13997_v4, %v21502_v6 }
 0x6bc   :  { %7962 = vst.msk [vmem:[#allocation2] sm:$0xff] %vm21497_vm7, %v7953_v12  ;;  %v19717_v33 = vadd.f32 %v9365_v20, %v9172_v14  ;;  %v7947_v57 = vmul.f32 %v14254_v11, %v7923_v53  ;;  %13122 = vmatprep.mubr.msk.f32.mxu0 %vm21498_vm8, %v8975_v37  ;;  %v21517_v14 = vld [vmem:[#allocation73_spill] sm:$0xff] }
 0x6bd   :  { %v13999_v13 = vpop.eup %13998  ;;  %13123 = vmatmul.mubr.msk.f32.gmra.mxu0 %vm21499_vm14, %v8976_v61  ;;  %v12956_v1 = vpop.f32.mrf.mxu0 }
 0x6be   :  { %v7955_v43 = vadd.f32 %v7947_v57, %v21500_v56  ;;  %v8991_v22 = vmul.f32 %v13999_v13, %v21501_v16  ;;  %v14001_v0 = vpop.eup %14000 }
 0x6bf   :  { %v7927_v58 = vpop.permute.xlu1 %7926  ;;  %v9182_v60 = vpop.f32.mrf.mxu0  ;;  %v8978_v32 = vmul.f32 %v14001_v0, %v21508_v23 }
 0x6c0   :  { %7964 = vst.msk [vmem:[#allocation2 + $0x10] sm:$0xff] %vm21503_vm10, %v7955_v43  ;;  %v7948_v29 = vmul.f32 %v14255_v40, %v7927_v58  ;;  %13150 = vmatprep.mubr.msk.f32.mxu1 %vm21504_vm13, %v8991_v22 }
 0x6c1   :  { %v14003_v31 = vpop.eup %14002  ;;  %v12984_v21 = vpop.f32.mrf.mxu1  ;;  %13151 = vmatmul.mubr.msk.f32.gmra.mxu1 %vm21505_vm15, %v8992_v19 }
 0x6c2   :  { %v7956_v8 = vadd.f32 %v7948_v29, %v21506_v59  ;;  %v19728_v62 = vadd.f32 %v12984_v21, %v12956_v1  ;;  %v8977_v44 = vmul.f32 %v14003_v31, %v21507_v63  ;;  %v14005_v38 = vpop.eup %14004 }
 0x6c3   :  { %v9375_v17 = vpop.f32.mrf.mxu1  ;;  %v7935_v54 = vpop.permute.xlu1 %7934  ;;  %v8994_v52 = vmul.f32 %v14005_v38, %v21513_v50 }
 0x6c4   :  { %7965 = vst.msk [vmem:[#allocation2 + $0x18] sm:$0xff] %vm21509_vm1, %v7956_v8  ;;  %v19733_v46 = vadd.f32 %v9375_v17, %v9182_v60  ;;  %v7950_v51 = vmul.f32 %v14256_v49, %v7935_v54  ;;  %13125 = vmatprep.mubr.msk.f32.mxu0 %vm21232_vm0, %v8977_v44 }
 0x6c5   :  { %v14007_v48 = vpop.eup %14006  ;;  %13126 = vmatmul.mubr.msk.f32.gmra.mxu0 %vm21510_vm9, %v8978_v32  ;;  %v12959_v45 = vpop.f32.mrf.mxu0 }
 0x6c6   :  { %v7958_v15 = vadd.f32 %v7950_v51, %v21511_v55  ;;  %v8993_v9 = vmul.f32 %v14007_v48, %v21512_v24 }
 0x6c7   :  { %v7943_v30 = vpop.permute.xlu1 %7942  ;;  %v9192_v7 = vpop.f32.mrf.mxu0 }
 0x6c8   :  { %7967 = vst.msk [vmem:[#allocation2 + $0x28] sm:$0xff] %vm21514_vm3, %v7958_v15  ;;  %v7952_v28 = vmul.f32 %v14257_v41, %v7943_v30  ;;  %13153 = vmatprep.mubr.msk.f32.mxu1 %vm21515_vm2, %v8993_v9 }
 0x6c9   :  { %v12987_v35 = vpop.f32.mrf.mxu1  ;;  %13154 = vmatmul.mubr.msk.f32.gmra.mxu1 %vm21516_vm4, %v8994_v52 }
 0x6ca   :  { %v7960_v18 = vadd.f32 %v7952_v28, %v21517_v14  ;;  %v9391_v12 = vadd.f32 %v12987_v35, %v12959_v45 }
 0x6cb   :  { %v9385_v37 = vpop.f32.mrf.mxu1 }
 0x6cc   :  { %7969 = vst.msk [vmem:[#allocation2 + $0x38] sm:$0xff] %vm21518_vm5, %v7960_v18  ;;  %v9386_v20 = vadd.f32 %v9385_v37, %v9192_v7 }
 0x6cd   :  { %v19745_v53 = vpop.f32.mrf.mxu0 }
 0x6cf   :  { %v19747_v2 = vpop.f32.mrf.mxu0 }
 0x6d1   :  { %v19749_v61 = vpop.f32.mrf.mxu1 }
 0x6d3   :  { %v19753_v11 = vpop.f32.mrf.mxu1 }
 0x6d5   :  { %v19751_v4 = vpop.f32.mrf.mxu0 }
 0x6d7   :  { %v19755_v57 = vpop.f32.mrf.mxu0 }
 0x6d9   :  { %v19757_v13 = vpop.f32.mrf.mxu1 }
 0x6db   :  { %v19760_v1 = vpop.f32.mrf.mxu1 }
 0x6dd   :  { %v13000_v56 = vpop.f32.mrf.mxu0 }
 0x6de   :  { %v9599_v43 = vadd.f32 %v13000_v56, %v19671_v25 }
 0x6df   :  { %v9535_v16 = vpop.f32.mrf.mxu0 }
 0x6e0   :  { %v9598_v22 = vadd.f32 %v9535_v16, %v19676_v27 }
 0x6e1   :  { %v13028_v58 = vpop.f32.mrf.mxu1 }
 0x6e2   :  { %v19763_v6 = vadd.f32 %v13028_v58, %v9599_v43  ;;  %v19814_v58 = vld [vmem:[%s20084_s4] sm:$0xff]  }
 0x6e3   :  { %v9751_v19 = vpop.f32.mrf.mxu1 }
 0x6e4   :  { %v19765_v0 = vadd.f32 %v9751_v19, %v9598_v22 }
 0x6e5   :  { %v13003_v40 = vpop.f32.mrf.mxu0 }
 0x6e6   :  { %v9601_v29 = vadd.f32 %v13003_v40, %v19685_v5 }
 0x6e7   :  { %v9545_v31 = vpop.f32.mrf.mxu0 }
 0x6e8   :  { %v9600_v21 = vadd.f32 %v9545_v31, %v19690_v47  ;;  %v20245_v31 = vunpack.c.h.bf16 %v19814_v58 }
 0x6ec   :  { %v13031_v59 = vpop.f32.mrf.mxu1 }
 0x6ed   :  { %v19769_v8 = vadd.f32 %v13031_v59, %v9601_v29 }
 0x6ee   :  { %v9761_v25 = vpop.f32.mrf.mxu1 }
 0x6ef   :  { %v19771_v60 = vadd.f32 %v9761_v25, %v9600_v21  ;;  %v20244_v21 = vunpack.c.l.bf16 %v19814_v58 }
 0x6f1   :  { %v13006_v63 = vpop.f32.mrf.mxu0 }
 0x6f2   :  { %v9603_v27 = vadd.f32 %v13006_v63, %v19694_v34  ;;  %v11439_v63 = vmul.f32 -1.442695, %v20245_v31 }
 0x6f3   :  { %v9555_v44 = vpop.f32.mrf.mxu0 }
 0x6f4   :  { %v9602_v17 = vadd.f32 %v9555_v44, %v19699_v26  ;;  %v19835_v44 = vld [vmem:[%s20084_s4 + $0x8] sm:$0xff]   ;;  %14008 = vpow2.f32 %v11439_v63 }
 0x6f5   :  { %v13009_v54 = vpop.f32.mrf.mxu0  ;;  %v13034_v23 = vpop.f32.mrf.mxu1 }
 0x6f6   :  { %v9605_v32 = vadd.f32 %v13009_v54, %v19712_v3  ;;  %v19776_v5 = vadd.f32 %v13034_v23, %v9603_v27  ;;  %v11438_v27 = vmul.f32 -1.442695, %v20244_v21 }
 0x6f7   :  { %v9565_v38 = vpop.f32.mrf.mxu0  ;;  %v9771_v47 = vpop.f32.mrf.mxu1 }
 0x6f8   :  { %v9604_v49 = vadd.f32 %v9565_v38, %v19717_v33  ;;  %v19779_v51 = vadd.f32 %v9771_v47, %v9602_v17  ;;  %14010 = vpow2.f32 %v11438_v27  ;;  %v20241_v38 = vunpack.c.l.bf16 %v19835_v44 }
 0x6f9   :  { %v13037_v48 = vpop.f32.mrf.mxu1 }
 0x6fa   :  { %v19781_v55 = vadd.f32 %v13037_v48, %v9605_v32  ;;  %v20243_v32 = vunpack.c.h.bf16 %v19835_v44 }
 0x6fb   :  { %v9781_v15 = vpop.f32.mrf.mxu1 }
 0x6fc   :  { %v19783_v34 = vadd.f32 %v9781_v15, %v9604_v49  ;;  %v11441_v15 = vmul.f32 -1.442695, %v20243_v32 }
 0x6fd   :  { %v13012_v24 = vpop.f32.mrf.mxu0 }
 0x6fe   :  { %v9607_v26 = vadd.f32 %v13012_v24, %v19728_v62  ;;  %v19856_v24 = vld [vmem:[%s20084_s4 + $0x10] sm:$0xff]   ;;  %14012 = vpow2.f32 %v11441_v15 }
 0x6ff   :  { %v9575_v9 = vpop.f32.mrf.mxu0 }
 0x700   :  { %v9606_v3 = vadd.f32 %v9575_v9, %v19733_v46 }
 0x701   :  { %v13040_v45 = vpop.f32.mrf.mxu1  ;;  %v14009_v63 = vpop.eup %14008 }
 0x702   :  { %v19787_v30 = vadd.f32 %v13040_v45, %v9607_v26  ;;  %v11440_v26 = vmul.f32 -1.442695, %v20241_v38  ;;  %v10810_v32 = vadd.f32 1.0, %v14009_v63 }
 0x703   :  { %v9791_v50 = vpop.f32.mrf.mxu1 }
 0x704   :  { %v19789_v52 = vadd.f32 %v9791_v50, %v9606_v3  ;;  %v20242_v3 = vunpack.c.h.bf16 %v19856_v24  ;;  %v20246_v50 = vunpack.c.l.bf16 %v19856_v24  ;;  %14014 = vpow2.f32 %v11440_v26 }
 0x705   :  { %v13015_v33 = vpop.f32.mrf.mxu0  ;;  %v14011_v27 = vpop.eup %14010 }
 0x706   :  { %21519 = vst [vmem:[#allocation89_spill] sm:$0xff] %v19789_v52  ;;  %v9609_v41 = vadd.f32 %v13015_v33, %v9391_v12  ;;  %v10809_v31 = vadd.f32 1.0, %v14011_v27  ;;  %v9594_v27 = vadd.f32 %v19747_v2, %v19643_v42 }
 0x707   :  { %v9585_v28 = vpop.f32.mrf.mxu0 }
 0x708   :  { %v9608_v35 = vadd.f32 %v9585_v28, %v9386_v20  ;;  %v11443_v28 = vmul.f32 -1.442695, %v20242_v3 }
 0x709   :  { %v13043_v14 = vpop.f32.mrf.mxu1 }
 0x70a   :  { %v19791_v18 = vadd.f32 %v13043_v14, %v9609_v41  ;;  %14016 = vpow2.f32 %v11443_v28  ;;  %v19898_v28 = vld [vmem:[%s20084_s4 + $0x20] sm:$0xff]  }
 0x70b   :  { %v9801_v7 = vpop.f32.mrf.mxu1  ;;  %v14013_v63 = vpop.eup %14012  ;;  %v20250_v42 = vunpack.c.l.bf16 %v19898_v28 }
 0x70c   :  { %21520 = vst [vmem:[#allocation21_spill] sm:$0xff] %v19791_v18  ;;  %v19793_v37 = vadd.f32 %v9801_v7, %v9608_v35  ;;  %v19875_v35 = vld [vmem:[%s20084_s4 + $0x18] sm:$0xff]   ;;  %v11442_v7 = vmul.f32 -1.442695, %v20246_v50  ;;  %v9595_v18 = vadd.f32 %v19745_v53, %v19637_v36  ;;  %v10812_v52 = vadd.f32 1.0, %v14013_v63 }
 0x70d   :  { %v19795_v62 = vpop.f32.mrf.mxu0  ;;  %v20247_v26 = vunpack.c.h.bf16 %v19875_v35  ;;  %v20248_v21 = vunpack.c.l.bf16 %v19875_v35 }
 0x70e   :  { %21521 = vst [vmem:[#allocation80_spill] sm:$0xff] %v19793_v37  ;;  %14018 = vpow2.f32 %v11442_v7 }
 0x70f   :  { %v19797_v56 = vpop.f32.mrf.mxu0  ;;  %v11445_v50 = vmul.f32 -1.442695, %v20247_v26  ;;  %14020 = vrcp.f32 %v10810_v32  ;;  %v11444_v7 = vmul.f32 -1.442695, %v20248_v21  ;;  %v9811_v26 = vadd.f32 %v19749_v61, %v9595_v18 }
 0x710   :  { %14022 = vrcp.f32 %v10809_v31  ;;  %v9810_v32 = vadd.f32 %v19753_v11, %v9594_v27  ;;  %v9597_v11 = vadd.f32 %v19751_v4, %v19657_v10  ;;  %v11446_v10 = vmul.f32 -1.442695, %v20250_v42 }
 0x711   :  { %v19799_v46 = vpop.f32.mrf.mxu1  ;;  %14024 = vpow2.f32 %v11445_v50 }
 0x712   :  { %14026 = vpow2.f32 %v11444_v7  ;;  %v10026_v2 = vadd.f32 %v19797_v56, %v9810_v32  ;;  %v19927_v7 = vld [vmem:[%s20084_s4 + $0x28] sm:$0xff]  }
 0x713   :  { %v19803_v16 = vpop.f32.mrf.mxu1  ;;  %14028 = vrcp.f32 %v10812_v52 }
 0x715   :  { %v19801_v43 = vpop.f32.mrf.mxu0 }
 0x717   :  { %v19805_v22 = vpop.f32.mrf.mxu0 }
 0x719   :  { %v19807_v12 = vpop.f32.mrf.mxu1 }
 0x71b   :  { %v19816_v19 = vpop.f32.mrf.mxu1 }
 0x71d   :  { %v19809_v20 = vpop.f32.mrf.mxu0 }
 0x71f   :  { %v19818_v40 = vpop.f32.mrf.mxu0 }
 0x721   :  { %v19820_v29 = vpop.f32.mrf.mxu1 }
 0x723   :  { %v19826_v25 = vpop.f32.mrf.mxu1 }
 0x725   :  { %v19824_v59 = vpop.f32.mrf.mxu0 }
 0x727   :  { %v19837_v17 = vpop.f32.mrf.mxu0 }
 0x729   :  { %v19839_v54 = vpop.f32.mrf.mxu1 }
 0x72b   :  { %v19845_v47 = vpop.f32.mrf.mxu1 }
 0x72d   :  { %v19841_v23 = vpop.f32.mrf.mxu0 }
 0x72f   :  { %v19847_v49 = vpop.f32.mrf.mxu0 }
 0x731   :  { %v19849_v48 = vpop.f32.mrf.mxu1 }
 0x733   :  { %v19863_v45 = vpop.f32.mrf.mxu1 }
 0x735   :  { %v19860_v9 = vpop.f32.mrf.mxu0 }
 0x737   :  { %v19866_v33 = vpop.f32.mrf.mxu0 }
 0x739   :  { %v19868_v41 = vpop.f32.mrf.mxu1 }
 0x73b   :  { %v19881_v15 = vpop.f32.mrf.mxu1 }
 0x73d   :  { %v19877_v14 = vpop.f32.mrf.mxu0 }
 0x73f   :  { %v19884_v38 = vpop.f32.mrf.mxu0 }
 0x740   :  { %21522 = vst [vmem:[#allocation39_spill] sm:$0xff] %v19884_v38 }
 0x741   :  { %v19886_v3 = vpop.f32.mrf.mxu1 }
 0x742   :  { %21523 = vst [vmem:[#allocation86_spill] sm:$0xff] %v19886_v3  ;;  %v20249_v3 = vunpack.c.h.bf16 %v19898_v28 }
 0x743   :  { %v19900_v38 = vpop.f32.mrf.mxu1 }
 0x744   :  { %21525 = vst [vmem:[#allocation102_spill] sm:$0xff] %v19900_v38  ;;  %v10027_v38 = vadd.f32 %v19795_v62, %v9811_v26  ;;  %v11447_v50 = vmul.f32 -1.442695, %v20249_v3  ;;  %v10242_v62 = vadd.f32 %v19803_v16, %v10026_v2  ;;  %v9813_v16 = vadd.f32 %v19757_v13, %v9597_v11 }
 0x745   :  { %v19889_v37 = vpop.f32.mrf.mxu0  ;;  %v11508_v13 = vunpack.c.l.bf16 %v19927_v7 }
 0x746   :  { %21524 = vst [vmem:[#allocation128_spill] sm:$0xff] %v19889_v37  ;;  %v14015_v37 = vpop.eup %14014  ;;  %v10243_v61 = vadd.f32 %v19799_v46, %v10027_v38  ;;  %v19934_v38 = vld [vmem:[%s20085_s5] ss:$0 sm:$0xff] }
 0x747   :  { %v19907_v36 = vpop.f32.mrf.mxu0  ;;  %v10811_v18 = vadd.f32 1.0, %v14015_v37  ;;  %v14017_v56 = vpop.eup %14016  ;;  %v9596_v37 = vadd.f32 %v19755_v57, %v19662_v39  ;;  %v11509_v39 = vunpack.c.h.bf16 %v19927_v7  ;;  %v10029_v57 = vadd.f32 %v19801_v43, %v9813_v16 }
 0x748   :  { %v14019_v4 = vpop.eup %14018 }
 0x749   :  { %v19909_v53 = vpop.f32.mrf.mxu1  ;;  %14030 = vrcp.f32 %v10811_v18  ;;  %v9812_v27 = vadd.f32 %v19760_v1, %v9596_v37  ;;  %v10813_v42 = vadd.f32 1.0, %v14019_v4  ;;  %v10245_v1 = vadd.f32 %v19807_v12, %v10029_v57 }
 0x74a   :  { %21526 = vst [vmem:[#allocation41_spill] sm:$0xff] %v19909_v53  ;;  %14032 = vpow2.f32 %v11447_v50  ;;  %v21527_v50 = vunpack.c.h.bf16 %v19814_v58 }
 0x74b   :  { %v19917_v31 = vpop.f32.mrf.mxu1  ;;  %14034 = vpow2.f32 %v11446_v10  ;;  %v10028_v18 = vadd.f32 %v19805_v22, %v9812_v27  ;;  %v21528_v10 = vunpack.c.l.bf16 %v19814_v58  ;;  %v19957_v22 = vld [vmem:[%s20084_s4 + $0x30] sm:$0xff]  }
 0x74d   :  { %v13106_v21 = vpop.f32.mrf.mxu0 }
 0x74e   :  { %v10459_v26 = vadd.f32 %v13106_v21, %v10243_v61  ;;  %v10814_v61 = vadd.f32 1.0, %v14017_v56  ;;  %v11449_v56 = vmul.f32 -1.442695, %v11509_v39 }
 0x74f   :  { %v10379_v53 = vpop.f32.mrf.mxu0 }
 0x750   :  { %v10458_v21 = vadd.f32 %v10379_v53, %v10242_v62  ;;  %v14021_v53 = vpop.eup %14020  ;;  %14036 = vrcp.f32 %v10814_v61 }
 0x751   :  { %v13134_v46 = vpop.f32.mrf.mxu1  ;;  %v14023_v43 = vpop.eup %14022  ;;  %14038 = vrcp.f32 %v10813_v42 }
 0x752   :  { %v10675_v63 = vadd.f32 %v13134_v46, %v10459_v26  ;;  %v14025_v37 = vpop.eup %14024  ;;  %v10244_v46 = vadd.f32 %v19816_v19, %v10028_v18  ;;  %14040 = vpow2.f32 %v11449_v56 }
 0x753   :  { %v10595_v32 = vpop.f32.mrf.mxu1  ;;  %v10816_v58 = vadd.f32 1.0, %v14025_v37 }
 0x754   :  { %v10730_v2 = vmul.f32 %v19934_v38, %v10675_v63  ;;  %v10674_v52 = vadd.f32 %v10595_v32, %v10458_v21  ;;  %v11448_v21 = vmul.f32 -1.442695, %v11508_v13  ;;  %v14027_v63 = vpop.eup %14026 }
 0x755   :  { %v13109_v3 = vpop.f32.mrf.mxu0 }
 0x756   :  { %v10746_v11 = vmul.f32 %v21527_v50, %v10730_v2  ;;  %v10729_v62 = vmul.f32 %v19934_v38, %v10674_v52  ;;  %v10461_v16 = vadd.f32 %v13109_v3, %v10245_v1  ;;  %v11513_v3 = vunpack.c.h.bf16 %v19957_v22 }
 0x757   :  { %v10389_v26 = vpop.f32.mrf.mxu0  ;;  %v10031_v52 = vadd.f32 %v19809_v20, %v19763_v6  ;;  %v10815_v50 = vadd.f32 1.0, %v14027_v63  ;;  %14042 = vpow2.f32 %v11448_v21  ;;  %v21529_v6 = vunpack.c.h.bf16 %v19835_v44 }
 0x758   :  { %v10745_v4 = vmul.f32 %v21528_v10, %v10729_v62  ;;  %v10858_v27 = vmul.f32 %v14021_v53, %v10746_v11  ;;  %v10460_v57 = vadd.f32 %v10389_v26, %v10244_v46  ;;  %v11512_v53 = vunpack.c.l.bf16 %v19957_v22  ;;  %v14029_v11 = vpop.eup %14028 }
 0x759   :  { %v13137_v12 = vpop.f32.mrf.mxu1  ;;  %v10030_v62 = vadd.f32 %v19818_v40, %v19765_v0  ;;  %v14031_v56 = vpop.eup %14030  ;;  %v11451_v46 = vmul.f32 -1.442695, %v11513_v3  ;;  %v21530_v0 = vunpack.c.l.bf16 %v19835_v44  ;;  %14044 = vrcp.f32 %v10816_v58 }
 0x75a   :  { %v10857_v32 = vmul.f32 %v14023_v43, %v10745_v4  ;;  %v10677_v19 = vadd.f32 %v13137_v12, %v10461_v16  ;;  %v10247_v43 = vadd.f32 %v19820_v29, %v10031_v52  ;;  %v14033_v10 = vpop.eup %14032  ;;  %v19983_v16 = vld [vmem:[%s20084_s4 + $0x38] sm:$0xff]   ;;  %14046 = vrcp.f32 %v10815_v50 }
 0x75b   :  { %v10605_v2 = vpop.f32.mrf.mxu1  ;;  %v10246_v4 = vadd.f32 %v19826_v25, %v10030_v62  ;;  %v11450_v21 = vmul.f32 -1.442695, %v11512_v53  ;;  %v14035_v63 = vpop.eup %14034  ;;  %v10818_v44 = vadd.f32 1.0, %v14033_v10  ;;  %14048 = vpow2.f32 %v11451_v46 }
 0x75c   :  { %v11521_v61 = vpack.c.bf16 %v10858_v27, %v10857_v32  ;;  %v10732_v18 = vmul.f32 %v19934_v38, %v10677_v19  ;;  %v10676_v42 = vadd.f32 %v10605_v2, %v10460_v57  ;;  %v11517_v2 = vunpack.c.h.bf16 %v19983_v16 }
 0x75d   :  { %v13112_v1 = vpop.f32.mrf.mxu0  ;;  %v10033_v58 = vadd.f32 %v19824_v59, %v19769_v8  ;;  %v10817_v50 = vadd.f32 1.0, %v14035_v63  ;;  %14050 = vpow2.f32 %v11450_v21  ;;  %v21531_v8 = vunpack.c.h.bf16 %v19856_v24 }
 0x75e   :  { %11522 = vst [vmem:[%s20086_s6] sm:$0xff] %v11521_v61   ;;  %v10748_v20 = vmul.f32 %v21529_v6, %v10732_v18  ;;  %v10731_v26 = vmul.f32 %v19934_v38, %v10676_v42  ;;  %v10463_v29 = vadd.f32 %v13112_v1, %v10247_v43  ;;  %v14037_v42 = vpop.eup %14036  ;;  %v10032_v43 = vadd.f32 %v19837_v17, %v19771_v60 }
 0x75f   :  { %v10399_v37 = vpop.f32.mrf.mxu0  ;;  %v14039_v62 = vpop.eup %14038  ;;  %v10249_v6 = vadd.f32 %v19839_v54, %v10033_v58  ;;  %v21532_v60 = vunpack.c.l.bf16 %v19856_v24  ;;  %14052 = vrcp.f32 %v10818_v44 }
 0x760   :  { %v10747_v40 = vmul.f32 %v21530_v0, %v10731_v26  ;;  %v10860_v27 = vmul.f32 %v14029_v11, %v10748_v20  ;;  %v10462_v57 = vadd.f32 %v10399_v37, %v10246_v4  ;;  %v11516_v11 = vunpack.c.l.bf16 %v19983_v16  ;;  %v14041_v37 = vpop.eup %14040 }
 0x761   :  { %v13140_v12 = vpop.f32.mrf.mxu1  ;;  %v10248_v46 = vadd.f32 %v19845_v47, %v10032_v43  ;;  %14054 = vrcp.f32 %v10817_v50  ;;  %v10035_v47 = vadd.f32 %v19841_v23, %v19776_v5  ;;  %v21533_v5 = vunpack.c.h.bf16 %v19875_v35 }
 0x762   :  { %v10859_v32 = vmul.f32 %v14031_v56, %v10747_v40  ;;  %v10679_v25 = vadd.f32 %v13140_v12, %v10463_v29  ;;  %v11453_v56 = vmul.f32 -1.442695, %v11517_v2  ;;  %v11452_v4 = vmul.f32 -1.442695, %v11516_v11 }
 0x763   :  { %v10615_v19 = vpop.f32.mrf.mxu1 }
 0x764   :  { %v11526_v52 = vpack.c.bf16 %v10860_v27, %v10859_v32  ;;  %v10734_v61 = vmul.f32 %v19934_v38, %v10679_v25  ;;  %v10678_v18 = vadd.f32 %v10615_v19, %v10462_v57  ;;  %v14043_v0 = vpop.eup %14042  ;;  %v10820_v27 = vadd.f32 1.0, %v14041_v37 }
 0x765   :  { %v13115_v1 = vpop.f32.mrf.mxu0  ;;  %14056 = vpow2.f32 %v11453_v56  ;;  %v10819_v44 = vadd.f32 1.0, %v14043_v0  ;;  %v10037_v37 = vadd.f32 %v19860_v9, %v19781_v55 }
 0x766   :  { %11565 = vst [vmem:[%s20086_s6 + $0x8] sm:$0xff] %v11526_v52   ;;  %v10750_v59 = vmul.f32 %v21531_v8, %v10734_v61  ;;  %v10733_v20 = vmul.f32 %v19934_v38, %v10678_v18  ;;  %v10465_v54 = vadd.f32 %v13115_v1, %v10249_v6  ;;  %v14045_v25 = vpop.eup %14044  ;;  %14058 = vpow2.f32 %v11452_v4 }
 0x767   :  { %v10409_v26 = vpop.f32.mrf.mxu0  ;;  %v14047_v58 = vpop.eup %14046  ;;  %v10034_v52 = vadd.f32 %v19847_v49, %v19779_v51  ;;  %v10251_v61 = vadd.f32 %v19849_v48, %v10035_v47  ;;  %14060 = vrcp.f32 %v10820_v27  ;;  %v10036_v4 = vadd.f32 %v19866_v33, %v19783_v34 }
 0x768   :  { %v10749_v17 = vmul.f32 %v21532_v60, %v10733_v20  ;;  %v10862_v40 = vmul.f32 %v14037_v42, %v10750_v59  ;;  %v10464_v12 = vadd.f32 %v10409_v26, %v10248_v46  ;;  %v14049_v1 = vpop.eup %14048  ;;  %14062 = vrcp.f32 %v10819_v44 }
 0x769   :  { %v13143_v10 = vpop.f32.mrf.mxu1  ;;  %v10250_v50 = vadd.f32 %v19863_v45, %v10034_v52  ;;  %v10822_v56 = vadd.f32 1.0, %v14049_v1  ;;  %v10253_v0 = vadd.f32 %v19868_v41, %v10037_v37  ;;  %v10039_v44 = vadd.f32 %v19877_v14, %v19787_v30 }
 0x76a   :  { %v10861_v29 = vmul.f32 %v14039_v62, %v10749_v17  ;;  %v10681_v21 = vadd.f32 %v13143_v10, %v10465_v54  ;;  %v21534_v62 = vunpack.c.l.bf16 %v19875_v35  ;;  %v14051_v49 = vpop.eup %14050 }
 0x76b   :  { %v10625_v63 = vpop.f32.mrf.mxu1  ;;  %v10821_v54 = vadd.f32 1.0, %v14051_v49  ;;  %14064 = vrcp.f32 %v10822_v56 }
 0x76c   :  { %v11531_v24 = vpack.c.bf16 %v10862_v40, %v10861_v29  ;;  %v10736_v32 = vmul.f32 %v19934_v38, %v10681_v21  ;;  %v10680_v57 = vadd.f32 %v10625_v63, %v10464_v12  ;;  %v14053_v35 = vpop.eup %14052  ;;  %v21535_v40 = vunpack.c.h.bf16 %v19898_v28 }
 0x76d   :  { %v13118_v19 = vpop.f32.mrf.mxu0  ;;  %v10252_v21 = vadd.f32 %v19881_v15, %v10036_v4  ;;  %v21536_v63 = vunpack.c.l.bf16 %v19898_v28  ;;  %14066 = vrcp.f32 %v10821_v54 }
 0x76e   :  { %11566 = vst [vmem:[%s20086_s6 + $0x10] sm:$0xff] %v11531_v24   ;;  %v10752_v23 = vmul.f32 %v21533_v5, %v10736_v32  ;;  %v10735_v18 = vmul.f32 %v19934_v38, %v10680_v57  ;;  %v10467_v6 = vadd.f32 %v13118_v19, %v10251_v61  ;;  %v14055_v10 = vpop.eup %14054 }
 0x76f   :  { %v10419_v42 = vpop.f32.mrf.mxu0 }
 0x770   :  { %v10751_v43 = vmul.f32 %v21534_v62, %v10735_v18  ;;  %v10864_v48 = vmul.f32 %v14045_v25, %v10752_v23  ;;  %v10466_v59 = vadd.f32 %v10419_v42, %v10250_v50  ;;  %v21537_v18 = vld [vmem:[#allocation89_spill] sm:$0xff]  ;;  %v21538_v42 = vld [vmem:[#allocation39_spill] sm:$0xff]  ;;  %v21539_v50 = vld [vmem:[#allocation86_spill] sm:$0xff] }
 0x771   :  { %v13146_v51 = vpop.f32.mrf.mxu1  ;;  %v10038_v1 = vadd.f32 %v21538_v42, %v21537_v18  ;;  %v10255_v62 = vadd.f32 %v21539_v50, %v10039_v44 }
 0x772   :  { %v10863_v8 = vmul.f32 %v14047_v58, %v10751_v43  ;;  %v10683_v20 = vadd.f32 %v13146_v51, %v10467_v6  ;;  %v14057_v12 = vpop.eup %14056  ;;  %v21540_v6 = vld [vmem:[#allocation102_spill] sm:$0xff] }
 0x773   :  { %v10635_v26 = vpop.f32.mrf.mxu1  ;;  %v14059_v33 = vpop.eup %14058  ;;  %v10824_v19 = vadd.f32 1.0, %v14057_v12  ;;  %v10254_v51 = vadd.f32 %v21540_v6, %v10038_v1 }
 0x774   :  { %v11536_v46 = vpack.c.bf16 %v10864_v48, %v10863_v8  ;;  %v10738_v45 = vmul.f32 %v19934_v38, %v10683_v20  ;;  %v10682_v60 = vadd.f32 %v10635_v26, %v10466_v59  ;;  %v14061_v28 = vpop.eup %14060  ;;  %v10823_v5 = vadd.f32 1.0, %v14059_v33 }
 0x775   :  { %v13121_v17 = vpop.f32.mrf.mxu0  ;;  %v14063_v23 = vpop.eup %14062  ;;  %14068 = vrcp.f32 %v10824_v19 }
 0x776   :  { %11567 = vst [vmem:[%s20086_s6 + $0x18] sm:$0xff] %v11536_v46   ;;  %v10754_v55 = vmul.f32 %v21535_v40, %v10738_v45  ;;  %v10737_v9 = vmul.f32 %v19934_v38, %v10682_v60  ;;  %v10469_v47 = vadd.f32 %v13121_v17, %v10253_v0  ;;  %14070 = vrcp.f32 %v10823_v5  ;;  %v21541_v46 = vld [vmem:[#allocation21_spill] sm:$0xff]  ;;  %v21542_v45 = vld [vmem:[#allocation128_spill] sm:$0xff] }
 0x777   :  { %v10429_v29 = vpop.f32.mrf.mxu0  ;;  %v21544_v0 = vld [vmem:[#allocation41_spill] sm:$0xff] }
 0x778   :  { %v10753_v27 = vmul.f32 %v21536_v63, %v10737_v9  ;;  %v10866_v41 = vmul.f32 %v14053_v35, %v10754_v55  ;;  %v10468_v32 = vadd.f32 %v10429_v29, %v10252_v21  ;;  %v14065_v54 = vpop.eup %14064 }
 0x779   :  { %v13149_v34 = vpop.f32.mrf.mxu1 }
 0x77a   :  { %v10865_v24 = vmul.f32 %v14055_v10, %v10753_v27  ;;  %v10685_v57 = vadd.f32 %v13149_v34, %v10469_v47  ;;  %v14067_v7 = vpop.eup %14066 }
 0x77b   :  { %v10645_v25 = vpop.f32.mrf.mxu1 }
 0x77c   :  { %v11541_v58 = vpack.c.bf16 %v10866_v41, %v10865_v24  ;;  %v10740_v15 = vmul.f32 %v19934_v38, %v10685_v57  ;;  %v10684_v52 = vadd.f32 %v10645_v25, %v10468_v32 }
 0x77d   :  { %v13124_v61 = vpop.f32.mrf.mxu0 }
 0x77e   :  { %11568 = vst [vmem:[%s20086_s6 + $0x20] sm:$0xff] %v11541_v58   ;;  %v10756_v30 = vmul.f32 %v11509_v39, %v10740_v15  ;;  %v10739_v14 = vmul.f32 %v19934_v38, %v10684_v52  ;;  %v10471_v48 = vadd.f32 %v13124_v61, %v10255_v62  ;;  %v10041_v39 = vadd.f32 %v21542_v45, %v21541_v46 }
 0x77f   :  { %v10439_v43 = vpop.f32.mrf.mxu0 }
 0x780   :  { %v10755_v49 = vmul.f32 %v11508_v13, %v10739_v14  ;;  %v10868_v59 = vmul.f32 %v14061_v28, %v10756_v30  ;;  %v10470_v26 = vadd.f32 %v10439_v43, %v10254_v51  ;;  %v21543_v13 = vld [vmem:[#allocation80_spill] sm:$0xff]  ;;  %v10257_v40 = vadd.f32 %v21544_v0, %v10041_v39 }
 0x781   :  { %v13152_v8 = vpop.f32.mrf.mxu1  ;;  %v10040_v4 = vadd.f32 %v19907_v36, %v21543_v13 }
 0x782   :  { %v10867_v20 = vmul.f32 %v14063_v23, %v10755_v49  ;;  %v10687_v56 = vadd.f32 %v13152_v8, %v10471_v48 }
 0x783   :  { %v10655_v37 = vpop.f32.mrf.mxu1  ;;  %v10256_v12 = vadd.f32 %v19917_v31, %v10040_v4 }
 0x784   :  { %v11546_v60 = vpack.c.bf16 %v10868_v59, %v10867_v20  ;;  %v10742_v35 = vmul.f32 %v19934_v38, %v10687_v56  ;;  %v10686_v17 = vadd.f32 %v10655_v37, %v10470_v26 }
 0x785   :  { %v13127_v10 = vpop.f32.mrf.mxu0 }
 0x786   :  { %11569 = vst [vmem:[%s20086_s6 + $0x28] sm:$0xff] %v11546_v60   ;;  %v10758_v55 = vmul.f32 %v11513_v3, %v10742_v35  ;;  %v10741_v9 = vmul.f32 %v19934_v38, %v10686_v17  ;;  %v10473_v63 = vadd.f32 %v13127_v10, %v10257_v40  ;;  %v14069_v3 = vpop.eup %14068 }
 0x787   :  { %v10449_v29 = vpop.f32.mrf.mxu0  ;;  %v14071_v25 = vpop.eup %14070 }
 0x788   :  { %v10757_v21 = vmul.f32 %v11512_v53, %v10741_v9  ;;  %v10870_v36 = vmul.f32 %v14065_v54, %v10758_v55  ;;  %v10472_v34 = vadd.f32 %v10449_v29, %v10256_v12 }
 0x789   :  { %v13155_v27 = vpop.f32.mrf.mxu1 }
 0x78a   :  { %v10869_v47 = vmul.f32 %v14067_v7, %v10757_v21  ;;  %v10689_v33 = vadd.f32 %v13155_v27, %v10473_v63 }
 0x78b   :  { %v10665_v41 = vpop.f32.mrf.mxu1 }
 0x78c   :  { %v11551_v24 = vpack.c.bf16 %v10870_v36, %v10869_v47  ;;  %v10744_v32 = vmul.f32 %v19934_v38, %v10689_v33  ;;  %v10688_v57 = vadd.f32 %v10665_v41, %v10472_v34 }
 0x78e   :  { %11570 = vst [vmem:[%s20086_s6 + $0x30] sm:$0xff] %v11551_v24   ;;  %v10760_v31 = vmul.f32 %v11517_v2, %v10744_v32  ;;  %v10743_v22 = vmul.f32 %v19934_v38, %v10688_v57 }
 0x790   :  { %v10759_v53 = vmul.f32 %v11516_v11, %v10743_v22  ;;  %v10872_v19 = vmul.f32 %v14069_v3, %v10760_v31 }
 0x792   :  { %v10871_v44 = vmul.f32 %v14071_v25, %v10759_v53 }
 0x794   :  { %v11556_v58 = vpack.c.bf16 %v10872_v19, %v10871_v44 }
 0x796   :  { %11571 = vst [vmem:[%s20086_s6 + $0x38] sm:$0xff] %v11556_v58  }

</bundles_post_ra>
